<compile_context>
chip_gen: v7x
topology: tpu7x:2x2x1
jax: 0.10.0
libtpu: 0.0.40
codegen_flags: <defaults>
</compile_context>

<pallas_src>
import functools

import jax
import jax.numpy as jnp
from jax.experimental import pallas as pl
from jax.experimental.pallas import tpu as pltpu

EPS = 1e-5                  # GroupNorm eps (PyTorch default)
LEAKY_SLOPE = 0.01          # nn.LeakyReLU default negative_slope
USE_BF16_MXU = False        # flip for production on v6e/v7x


def _mxu_dot(a, b):
    if USE_BF16_MXU:
        a = a.astype(jnp.bfloat16)
        b = b.astype(jnp.bfloat16)
    return jnp.dot(a, b, preferred_element_type=jnp.float32)


def _dot_f32(a, b):
    # Always-f32 dot (tiny GroupNorm statistics matmuls).
    return jnp.dot(a, b, preferred_element_type=jnp.float32)


def _group_norm(y, gamma, beta, groups):
    """GroupNorm on a (P, C) tile holding ONE sample (biased var, eps=1e-5).

    Single pass: per-channel sum / sum-of-squares, reduced to per-group stats
    (via a tiny one-hot matmul when channels-per-group > 1) and folded into a
    per-channel scale+shift, so the epilogue is one FMA per element.
    """
    P, C = y.shape
    cg = C // groups
    cnt = jnp.float32(P * cg)

    s1 = jnp.sum(y, axis=0, keepdims=True)          # (1, C)
    s2 = jnp.sum(y * y, axis=0, keepdims=True)      # (1, C)

    if cg == 1:
        mean_c = s1 / cnt
        var_c = jnp.maximum(s2 / cnt - mean_c * mean_c, 0.0)
        inv_c = jax.lax.rsqrt(var_c + EPS)
    else:
        # one-hot channel<->group matrices built from 2-D iota (constants).
        ch = jax.lax.broadcasted_iota(jnp.int32, (C, groups), 0) // cg
        gr = jax.lax.broadcasted_iota(jnp.int32, (C, groups), 1)
        m_cg = (ch == gr).astype(jnp.float32)        # (C, G)
        ch_t = jax.lax.broadcasted_iota(jnp.int32, (groups, C), 1) // cg
        gr_t = jax.lax.broadcasted_iota(jnp.int32, (groups, C), 0)
        m_gc = (ch_t == gr_t).astype(jnp.float32)    # (G, C)

        mean_g = _dot_f32(s1, m_cg) / cnt            # (1, G)
        ex2_g = _dot_f32(s2, m_cg) / cnt
        var_g = jnp.maximum(ex2_g - mean_g * mean_g, 0.0)
        inv_g = jax.lax.rsqrt(var_g + EPS)
        mean_c = _dot_f32(mean_g, m_gc)              # (1, C)
        inv_c = _dot_f32(inv_g, m_gc)

    scale = inv_c * gamma
    shift = beta - mean_c * scale
    return y * scale + shift


def _conv3x3_taps(h, H, W, C):
    """Stride-1, pad=1 im2col: (H, W, C) -> (H*W, 9*C).  Zero pad in VMEM."""
    zrow = jnp.zeros((1, W + 2, C), jnp.float32)
    zcol = jnp.zeros((H, 1, C), jnp.float32)
    hp = jnp.concatenate(
        [zrow, jnp.concatenate([zcol, h, zcol], axis=1), zrow], axis=0)
    taps = [hp[dy:dy + H, dx:dx + W, :] for dy in range(3) for dx in range(3)]
    return jnp.concatenate(taps, axis=-1).reshape(H * W, 9 * C)


def _conv3x3_taps_stride2(h_e, h_o, H, Wo, C):
    """Stride-2, pad=1 im2col built directly at OUTPUT resolution.

    h_e / h_o: (H, Wo, C) even-/odd-column planes of the full-resolution
    conv2 input.  Output (Ho*Wo, 9*C).  The stride-2 selection reduces to
    picking row/column parity planes (static leading-dim reshape + static
    slices) and +/-1 block shifts with zero padding (concats) -- no gathers,
    no selection matmuls.
    """
    Ho = H // 2
    he4 = h_e.reshape(Ho, 2, Wo, C)          # split rows by parity (leading dims)
    ho4 = h_o.reshape(Ho, 2, Wo, C)
    ee, oe = he4[:, 0], he4[:, 1]            # (even|odd) row, even col
    eo, oo = ho4[:, 0], ho4[:, 1]            # (even|odd) row, odd col

    zrow = jnp.zeros((1, Wo, C), jnp.float32)
    zcol = jnp.zeros((Ho, 1, C), jnp.float32)
    rsh = lambda t: jnp.concatenate([zrow, t[:Ho - 1]], axis=0)    # row 2oy-1
    csh = lambda t: jnp.concatenate([zcol, t[:, :Wo - 1]], axis=1)  # col 2ox-1

    # tap(dy, dx)[oy, ox] == padded_input[2*oy + dy, 2*ox + dx]
    taps = [rsh(csh(oo)), rsh(oe), rsh(oo),
            csh(eo),      ee,      eo,
            csh(oo),      oe,      oo]
    return jnp.concatenate(taps, axis=-1).reshape(Ho * Wo, 9 * C)


def _bottleneck_kernel(*refs, groups_mid, groups_out, has_proj, has_stride):
    """Fused BottleneckBlock for one batch sample (grid axis = batch)."""
    x_ref = refs[0]
    w1_ref, g1_ref, b1_ref = refs[1], refs[2], refs[3]
    w2_ref, g2_ref, b2_ref = refs[4], refs[5], refs[6]
    w3_ref, g3_ref, b3_ref = refs[7], refs[8], refs[9]
    i = 10
    if has_proj:
        ws_ref, gs_ref, bs_ref = refs[i], refs[i + 1], refs[i + 2]
        i += 3
    out_ref = refs[i]

    cmid = w1_ref.shape[1]

    if has_stride:
        # Input arrives width space-to-depth'd: (1, H, Wo, 2*Cin); lanes
        # [0:Cin] = even columns, [Cin:2Cin] = odd columns (free HBM reshape
        # in the wrapper).
        _, H, Wo, cin2 = x_ref.shape
        Ho = H // 2
        xs = x_ref[0]                                  # (H, Wo, 2*Cin)
        xs2 = xs.reshape(H * Wo, cin2)

        # conv1 (1x1, stride 1, full resolution) on both column phases via
        # zero-padded weights (avoids in-kernel lane slicing).
        w1 = w1_ref[...]
        zw1 = jnp.zeros_like(w1)
        a_e = _mxu_dot(xs2, jnp.concatenate([w1, zw1], axis=0))   # even cols
        a_o = _mxu_dot(xs2, jnp.concatenate([zw1, w1], axis=0))   # odd cols
        a = jnp.concatenate([a_e, a_o], axis=0)                   # (H*W, Cmid)
        a = jnp.maximum(_group_norm(a, g1_ref[...], b1_ref[...], groups_mid),
                        0.0)
        P = H * Wo
        h_e = a[:P].reshape(H, Wo, cmid)
        h_o = a[P:].reshape(H, Wo, cmid)

        # conv2 (3x3, stride 2): ONE matmul on output-resolution patches.
        patches = _conv3x3_taps_stride2(h_e, h_o, H, Wo, cmid)
        h2 = _mxu_dot(patches, w2_ref[...])
        h2 = jnp.maximum(_group_norm(h2, g2_ref[...], b2_ref[...], groups_mid),
                         0.0)

        # conv3 (1x1) -> GroupNorm.
        h3 = _group_norm(_mxu_dot(h2, w3_ref[...]), g3_ref[...], b3_ref[...],
                         groups_out)

        # projected skip: stride-2 subsample of x (static slicing), then 1x1.
        x_ee = xs.reshape(Ho, 2, Wo, cin2)[:, 0].reshape(Ho * Wo, cin2)
        ws = ws_ref[...]
        idn = _mxu_dot(x_ee, jnp.concatenate([ws, jnp.zeros_like(ws)], axis=0))
        idn = _group_norm(idn, gs_ref[...], bs_ref[...], groups_out)
    else:
        _, H, W, cin = x_ref.shape
        x2 = x_ref[0].reshape(H * W, cin)

        # conv1 (1x1) -> GroupNorm -> ReLU
        h1 = _mxu_dot(x2, w1_ref[...])
        h1 = jnp.maximum(_group_norm(h1, g1_ref[...], b1_ref[...], groups_mid),
                         0.0)

        # conv2 (3x3, pad=1): zero pad in VMEM, 9 taps fused into ONE matmul.
        patches = _conv3x3_taps(h1.reshape(H, W, cmid), H, W, cmid)
        h2 = _mxu_dot(patches, w2_ref[...])
        h2 = jnp.maximum(_group_norm(h2, g2_ref[...], b2_ref[...], groups_mid),
                         0.0)

        # conv3 (1x1) -> GroupNorm.
        h3 = _group_norm(_mxu_dot(h2, w3_ref[...]), g3_ref[...], b3_ref[...],
                         groups_out)

        if has_proj:
            idn = _group_norm(_mxu_dot(x2, ws_ref[...]), gs_ref[...],
                              bs_ref[...], groups_out)
        else:
            idn = x2                                   # stride==1, Cin==Cout

    out_ref[0] = jnp.maximum(h3 + idn, 0.0)            # (Ho*Wo, Cout)


def _head_kernel(*refs, n_layers):
    """Global average pool + regression MLP + final linear, per sample."""
    feat_ref, theta_ref = refs[0], refs[1]
    layer_refs = refs[2:2 + 2 * n_layers]
    wf_ref, bf_ref, out_ref = refs[2 + 2 * n_layers:]

    feat = feat_ref[0]                                   # (P, C)
    gap = jnp.mean(feat, axis=0, keepdims=True)          # AdaptiveAvgPool2d(1)
    x = jnp.concatenate([gap, theta_ref[0] - 0.5], axis=1)
    for i in range(n_layers):
        x = _mxu_dot(x, layer_refs[2 * i][...]) + layer_refs[2 * i + 1][...]
        x = jnp.where(x > 0.0, x, jnp.float32(LEAKY_SLOPE) * x)   # LeakyReLU
        # TODO(synk): nn.Dropout(0.3) would randomly mask here in training
        # mode; inference (identity) semantics are implemented.
    out_ref[0] = _mxu_dot(x, wf_ref[...]) + bf_ref[...]   # (1, 5)


def _full_spec(a):
    return pl.BlockSpec(a.shape, lambda n, nd=a.ndim: (0,) * nd)


def _bottleneck_block(x_nhwc, p):
    """x_nhwc: (N, H, W, Cin) f32.  Returns ((N, Ho*Wo, Cout), Ho, Wo)."""
    N, H, W, cin = x_nhwc.shape
    stride = p['stride']
    has_stride = stride != 1
    Ho, Wo = H // stride, W // stride
    cout = p['cout']

    if has_stride:
        assert stride == 2 and H % 2 == 0 and W % 2 == 0 and p['has_proj']
        # width space-to-depth: pure metadata reshape on the contiguous NHWC
        # HBM array (even columns on lanes [0:Cin], odd on [Cin:2Cin]).
        x_in = x_nhwc.reshape(N, H, W // 2, 2 * cin)
    else:
        x_in = x_nhwc

    args = [x_in, p['w1'], p['g1'], p['b1'], p['w2'], p['g2'], p['b2'],
            p['w3'], p['g3'], p['b3']]
    if p['has_proj']:
        args += [p['ws'], p['gs'], p['bs']]

    in_specs = [pl.BlockSpec((1,) + x_in.shape[1:], lambda n: (n, 0, 0, 0))]
    in_specs += [_full_spec(a) for a in args[1:]]

    kern = functools.partial(
        _bottleneck_kernel, groups_mid=p['gmid'], groups_out=p['gout'],
        has_proj=p['has_proj'], has_stride=has_stride)

    out = pl.pallas_call(
        kern,
        out_shape=jax.ShapeDtypeStruct((N, Ho * Wo, cout), jnp.float32),
        grid=(N,),
        in_specs=in_specs,
        out_specs=pl.BlockSpec((1, Ho * Wo, cout), lambda n: (n, 0, 0)),
        compiler_params=pltpu.CompilerParams(
            dimension_semantics=("parallel",)),
    )(*args)
    return out, Ho, Wo


def _head(feat, edge_theta, params):
    """feat: (N, P, C).  Returns raw line parameters (N, 5)."""
    N, P, C = feat.shape
    n_layers = len(params['mlp'])
    theta = edge_theta.reshape(N, 1, 1).astype(jnp.float32)

    args = [feat, theta]
    for wl, bl in params['mlp']:
        args += [wl, bl]
    args += [params['wf'], params['bf']]

    in_specs = [pl.BlockSpec((1, P, C), lambda n: (n, 0, 0)),
                pl.BlockSpec((1, 1, 1), lambda n: (n, 0, 0))]
    in_specs += [_full_spec(a) for a in args[2:]]

    out = pl.pallas_call(
        functools.partial(_head_kernel, n_layers=n_layers),
        out_shape=jax.ShapeDtypeStruct((N, 1, 5), jnp.float32),
        grid=(N,),
        in_specs=in_specs,
        out_specs=pl.BlockSpec((1, 1, 5), lambda n: (n, 0, 0)),
        compiler_params=pltpu.CompilerParams(
            dimension_semantics=("parallel",)),
    )(*args)
    return out.reshape(N, 5)


def _geometry(coords, edge_len, src_shape):
    """Corner-coordinate epilogue (O(batch*8) scalars), faithful to PyTorch.

    TODO(synk): fold into the head kernel once in-kernel sin/cos lowering is
    confirmed on all target TPU generations; kept as plain JAX for robustness.
    """
    scale = jnp.array([[float(src_shape[0]), float(src_shape[1])]], jnp.float32)
    sig = jax.nn.sigmoid(coords[:, :4])
    left_xy = sig[:, 0:2] * scale
    right_xy = sig[:, 2:4] * scale
    theta = (0.5 + jnp.tanh(coords[:, 4:5]) / 5.0) * jnp.pi
    direction = jnp.concatenate([jnp.cos(theta), jnp.sin(theta)], axis=1)
    disp = edge_len[:, None] * direction
    corners = jnp.stack(
        [left_xy, left_xy + disp, right_xy, right_xy + disp], axis=1)  # (N,4,2)
    return corners / scale[:, None, :]


def line_approx_forward(src_nchw, edge_len, edge_theta, params, src_shape):
    """Forward pass of LineApproxBlock.  src is NCHW like PyTorch."""
    N, cin, H, W = src_nchw.shape
    # single NCHW -> NHWC transpose for the whole backbone.
    x = jnp.transpose(src_nchw, (0, 2, 3, 1)).astype(jnp.float32)
    h, w = H, W
    for p in params['blocks']:
        out, ho, wo = _bottleneck_block(x, p)
        x = out.reshape(N, ho, wo, p['cout'])     # free metadata reshape
        h, w = ho, wo
    coords = _head(x.reshape(N, h * w, x.shape[-1]), edge_theta, params)
    return _geometry(coords, edge_len, src_shape)


# ----------------------------- parameters --------------------------------

def _winit(key, shape, fan_in):
    return jax.random.normal(key, shape, jnp.float32) / jnp.sqrt(jnp.float32(fan_in))


def init_line_approx_params(key, in_channels, stage_channels, blocks_per_stage,
                            reg_embed_channels):
    keys = iter(jax.random.split(key, 128))
    nk = lambda: next(keys)

    def gn_affine(c):
        g = 1.0 + 0.1 * jax.random.normal(nk(), (1, c), jnp.float32)
        b = 0.1 * jax.random.normal(nk(), (1, c), jnp.float32)
        return g, b

    blocks = []
    in_ch = in_channels
    num_downsample = 3
    for si, (nblk, out_ch) in enumerate(zip(blocks_per_stage, stage_channels)):
        for bi in range(nblk):
            stride = 2 if (bi == 0 and si < num_downsample) else 1
            mid = max(1, out_ch // 4)
            has_proj = (stride != 1) or (in_ch != out_ch)
            g1, b1 = gn_affine(mid)
            g2, b2 = gn_affine(mid)
            g3, b3 = gn_affine(out_ch)
            blk = dict(
                stride=stride, has_proj=has_proj,
                gmid=32 if mid >= 32 else mid,
                gout=32 if out_ch >= 32 else out_ch,
                cin=in_ch, cmid=mid, cout=out_ch,
                w1=_winit(nk(), (in_ch, mid), in_ch), g1=g1, b1=b1,
                w2=_winit(nk(), (9 * mid, mid), 9 * mid), g2=g2, b2=b2,
                w3=_winit(nk(), (mid, out_ch), mid), g3=g3, b3=b3,
            )
            if has_proj:
                gs, bs = gn_affine(out_ch)
                blk.update(ws=_winit(nk(), (in_ch, out_ch), in_ch), gs=gs, bs=bs)
            blocks.append(blk)
            in_ch = out_ch

    dims = [stage_channels[-1] + 1] + list(reg_embed_channels)
    mlp = []
    for d_in, d_out in zip(dims[:-1], dims[1:]):
        mlp.append((_winit(nk(), (d_in, d_out), d_in),
                    0.1 * jax.random.normal(nk(), (1, d_out), jnp.float32)))
    wf = _winit(nk(), (dims[-1], 5), dims[-1])
    bf = 0.1 * jax.random.normal(nk(), (1, 5), jnp.float32)
    return dict(blocks=blocks, mlp=mlp, wf=wf, bf=bf)


# ----------------------------- pure-JAX reference ------------------------

def _ref_gn(x, gamma, beta, groups):
    N, H, W, C = x.shape
    xg = x.reshape(N, H * W, groups, C // groups)
    mean = jnp.mean(xg, axis=(1, 3), keepdims=True)
    var = jnp.mean((xg - mean) ** 2, axis=(1, 3), keepdims=True)
    xn = ((xg - mean) / jnp.sqrt(var + EPS)).reshape(N, H, W, C)
    return xn * gamma.reshape(1, 1, 1, C) + beta.reshape(1, 1, 1, C)


def _ref_conv1x1(x, w, stride):
    if stride > 1:
        x = x[:, ::stride, ::stride, :]
    return jnp.einsum('nhwc,cd->nhwd', x, w,
                      precision=jax.lax.Precision.HIGHEST)


def _ref_conv3x3(x, w, stride):
    cin = x.shape[-1]
    wk = w.reshape(3, 3, cin, -1)
    return jax.lax.conv_general_dilated(
        x, wk, (stride, stride), ((1, 1), (1, 1)),
        dimension_numbers=('NHWC', 'HWIO', 'NHWC'),
        precision=jax.lax.Precision.HIGHEST)


def _ref_block(x, p):
    s = p['stride']
    h = jax.nn.relu(_ref_gn(_ref_conv1x1(x, p['w1'], 1), p['g1'], p['b1'], p['gmid']))
    h = jax.nn.relu(_ref_gn(_ref_conv3x3(h, p['w2'], s), p['g2'], p['b2'], p['gmid']))
    h = _ref_gn(_ref_conv1x1(h, p['w3'], 1), p['g3'], p['b3'], p['gout'])
    if p['has_proj']:
        idn = _ref_gn(_ref_conv1x1(x, p['ws'], s), p['gs'], p['bs'], p['gout'])
    else:
        idn = x
    return jax.nn.relu(h + idn)


def _reference(src_nchw, edge_len, edge_theta, params, src_shape):
    x = jnp.transpose(src_nchw, (0, 2, 3, 1)).astype(jnp.float32)
    for p in params['blocks']:
        x = _ref_block(x, p)
    gap = jnp.mean(x, axis=(1, 2))
    h = jnp.concatenate([gap, edge_theta[:, None] - 0.5], axis=1)
    for wl, bl in params['mlp']:
        h = jnp.dot(h, wl, precision=jax.lax.Precision.HIGHEST) + bl
        h = jnp.where(h > 0, h, LEAKY_SLOPE * h)
    coords = jnp.dot(h, params['wf'], precision=jax.lax.Precision.HIGHEST) + params['bf']
    return _geometry(coords, edge_len, src_shape)


# ----------------------------- demo ---------------------------------------

if __name__ == "__main__":
    key = jax.random.PRNGKey(0)
    k_src, k_len, k_theta, k_par = jax.random.split(key, 4)

    batch, in_channels, H, W = 2, 4, 32, 32
    stage_channels = [16, 32, 32, 64]
    blocks_per_stage = [1, 1, 1, 2]
    reg_embed_channels = [32, 16]
    src_shape = (W, H)   # (width, height) -> the registered scale buffer

    src = jax.random.normal(k_src, (batch, in_channels, H, W), jnp.float32)
    edge_len = jax.random.uniform(k_len, (batch,), jnp.float32, 16.0, 48.0)
    edge_theta = jax.random.uniform(k_theta, (batch,), jnp.float32, 1.2, 1.9)

    params = init_line_approx_params(k_par, in_channels, stage_channels,
                                     blocks_per_stage, reg_embed_channels)

    out = line_approx_forward(src, edge_len, edge_theta, params, src_shape)
    out = jax.block_until_ready(out)

    ref = _reference(src, edge_len, edge_theta, params, src_shape)
    assert out.shape == (batch, 4, 2), out.shape
    max_err = float(jnp.max(jnp.abs(out - ref)))
    assert jnp.allclose(out, ref, atol=5e-3, rtol=5e-3), max_err
    print("KERNEL_OK")
</pallas_src>

<mosaic_0001>
module attributes {stable_mosaic.version = 11 : i64} {
  func.func @_bottleneck_kernel(%arg0: i32, %arg1: memref<1x32x16x8xf32, #tpu.memory_space<vmem>>, %arg2: memref<4x4xf32, #tpu.memory_space<vmem>>, %arg3: memref<1x4xf32, #tpu.memory_space<vmem>>, %arg4: memref<1x4xf32, #tpu.memory_space<vmem>>, %arg5: memref<36x4xf32, #tpu.memory_space<vmem>>, %arg6: memref<1x4xf32, #tpu.memory_space<vmem>>, %arg7: memref<1x4xf32, #tpu.memory_space<vmem>>, %arg8: memref<4x16xf32, #tpu.memory_space<vmem>>, %arg9: memref<1x16xf32, #tpu.memory_space<vmem>>, %arg10: memref<1x16xf32, #tpu.memory_space<vmem>>, %arg11: memref<4x16xf32, #tpu.memory_space<vmem>>, %arg12: memref<1x16xf32, #tpu.memory_space<vmem>>, %arg13: memref<1x16xf32, #tpu.memory_space<vmem>>, %arg14: memref<1x256x16xf32, #tpu.memory_space<vmem>>) attributes {dimension_semantics = [#tpu.dimension_semantics<parallel>], iteration_bounds = array<i64: 2>, scalar_prefetch = 0 : i64, scratch_operands = 0 : i64, tpu.core_type = #tpu.core_type<tc>, window_params = [{transform_indices = @transform_0, window_bounds = array<i64: 1, 32, 16, 8>}, {pipeline_mode = #tpu.pipeline_mode<synchronous>, transform_indices = @transform_1, window_bounds = array<i64: 4, 4>}, {pipeline_mode = #tpu.pipeline_mode<synchronous>, transform_indices = @transform_2, window_bounds = array<i64: 1, 4>}, {pipeline_mode = #tpu.pipeline_mode<synchronous>, transform_indices = @transform_3, window_bounds = array<i64: 1, 4>}, {pipeline_mode = #tpu.pipeline_mode<synchronous>, transform_indices = @transform_4, window_bounds = array<i64: 36, 4>}, {pipeline_mode = #tpu.pipeline_mode<synchronous>, transform_indices = @transform_5, window_bounds = array<i64: 1, 4>}, {pipeline_mode = #tpu.pipeline_mode<synchronous>, transform_indices = @transform_6, window_bounds = array<i64: 1, 4>}, {pipeline_mode = #tpu.pipeline_mode<synchronous>, transform_indices = @transform_7, window_bounds = array<i64: 4, 16>}, {pipeline_mode = #tpu.pipeline_mode<synchronous>, transform_indices = @transform_8, window_bounds = array<i64: 1, 16>}, {pipeline_mode = #tpu.pipeline_mode<synchronous>, transform_indices = @transform_9, window_bounds = array<i64: 1, 16>}, {pipeline_mode = #tpu.pipeline_mode<synchronous>, transform_indices = @transform_10, window_bounds = array<i64: 4, 16>}, {pipeline_mode = #tpu.pipeline_mode<synchronous>, transform_indices = @transform_11, window_bounds = array<i64: 1, 16>}, {pipeline_mode = #tpu.pipeline_mode<synchronous>, transform_indices = @transform_12, window_bounds = array<i64: 1, 16>}, {transform_indices = @transform_13, window_bounds = array<i64: 1, 256, 16>}]} {
    %c0 = arith.constant 0 : index
    %c0_0 = arith.constant 0 : index
    %c0_1 = arith.constant 0 : index
    %c0_2 = arith.constant 0 : index
    %0 = vector.load %arg1[%c0, %c0_0, %c0_1, %c0_2] : memref<1x32x16x8xf32, #tpu.memory_space<vmem>>, vector<1x32x16x8xf32>
    %1 = vector.shape_cast %0 : vector<1x32x16x8xf32> to vector<32x16x8xf32>
    %2 = vector.shape_cast %1 : vector<32x16x8xf32> to vector<512x8xf32>
    %c0_3 = arith.constant 0 : index
    %c0_4 = arith.constant 0 : index
    %3 = vector.load %arg2[%c0_3, %c0_4] : memref<4x4xf32, #tpu.memory_space<vmem>>, vector<4x4xf32>
    %cst = arith.constant 0.000000e+00 : f32
    %4 = vector.broadcast %cst : f32 to vector<4x4xf32>
    %5 = tpu.concatenate %3, %4 in 0 : vector<4x4xf32>, vector<4x4xf32> -> vector<8x4xf32>
    %cst_5 = arith.constant dense<0.000000e+00> : vector<512x4xf32>
    %6 = tpu.matmul %2, %5, %cst_5 {dimension_numbers = #tpu.dot_dimension_numbers<[1], [0], [0], [1], [0, 0, 1, 1], [], []>} : vector<512x8xf32>, vector<8x4xf32>, vector<512x4xf32> -> vector<512x4xf32>
    %7 = tpu.concatenate %4, %3 in 0 : vector<4x4xf32>, vector<4x4xf32> -> vector<8x4xf32>
    %cst_6 = arith.constant dense<0.000000e+00> : vector<512x4xf32>
    %8 = tpu.matmul %2, %7, %cst_6 {dimension_numbers = #tpu.dot_dimension_numbers<[1], [0], [0], [1], [0, 0, 1, 1], [], []>} : vector<512x8xf32>, vector<8x4xf32>, vector<512x4xf32> -> vector<512x4xf32>
    %9 = tpu.concatenate %6, %8 in 0 : vector<512x4xf32>, vector<512x4xf32> -> vector<1024x4xf32>
    %c0_7 = arith.constant 0 : index
    %c0_8 = arith.constant 0 : index
    %10 = vector.load %arg3[%c0_7, %c0_8] : memref<1x4xf32, #tpu.memory_space<vmem>>, vector<1x4xf32>
    %c0_9 = arith.constant 0 : index
    %c0_10 = arith.constant 0 : index
    %11 = vector.load %arg4[%c0_9, %c0_10] : memref<1x4xf32, #tpu.memory_space<vmem>>, vector<1x4xf32>
    %cst_11 = arith.constant dense<0.000000e+00> : vector<4xf32>
    %12 = vector.multi_reduction <add>, %9, %cst_11 [0] : vector<1024x4xf32> to vector<4xf32>
    %13 = vector.shape_cast %12 : vector<4xf32> to vector<1x4xf32>
    %14 = arith.mulf %9, %9 : vector<1024x4xf32>
    %cst_12 = arith.constant dense<0.000000e+00> : vector<4xf32>
    %15 = vector.multi_reduction <add>, %14, %cst_12 [0] : vector<1024x4xf32> to vector<4xf32>
    %16 = vector.shape_cast %15 : vector<4xf32> to vector<1x4xf32>
    %cst_13 = arith.constant 1.024000e+03 : f32
    %17 = vector.broadcast %cst_13 : f32 to vector<1x4xf32>
    %18 = arith.divf %13, %17 : vector<1x4xf32>
    %cst_14 = arith.constant 1.024000e+03 : f32
    %19 = vector.broadcast %cst_14 : f32 to vector<1x4xf32>
    %20 = arith.divf %16, %19 : vector<1x4xf32>
    %21 = arith.mulf %18, %18 : vector<1x4xf32>
    %22 = arith.subf %20, %21 : vector<1x4xf32>
    %cst_15 = arith.constant 0.000000e+00 : f32
    %23 = vector.broadcast %cst_15 : f32 to vector<1x4xf32>
    %24 = arith.maximumf %22, %23 : vector<1x4xf32>
    %cst_16 = arith.constant 9.99999974E-6 : f32
    %25 = vector.broadcast %cst_16 : f32 to vector<1x4xf32>
    %26 = arith.addf %24, %25 : vector<1x4xf32>
    %27 = math.rsqrt %26 : vector<1x4xf32>
    %28 = arith.mulf %27, %10 : vector<1x4xf32>
    %29 = arith.mulf %18, %28 : vector<1x4xf32>
    %30 = arith.subf %11, %29 : vector<1x4xf32>
    %31 = vector.broadcast %28 : vector<1x4xf32> to vector<1024x4xf32>
    %32 = arith.mulf %9, %31 : vector<1024x4xf32>
    %33 = vector.broadcast %30 : vector<1x4xf32> to vector<1024x4xf32>
    %34 = arith.addf %32, %33 : vector<1024x4xf32>
    %cst_17 = arith.constant 0.000000e+00 : f32
    %35 = vector.broadcast %cst_17 : f32 to vector<1024x4xf32>
    %36 = arith.maximumf %34, %35 : vector<1024x4xf32>
    %37 = vector.extract_strided_slice %36 {offsets = [0, 0], sizes = [512, 4], strides = [1, 1]} : vector<1024x4xf32> to vector<512x4xf32>
    %38 = vector.shape_cast %37 : vector<512x4xf32> to vector<32x16x4xf32>
    %39 = vector.extract_strided_slice %36 {offsets = [512, 0], sizes = [512, 4], strides = [1, 1]} : vector<1024x4xf32> to vector<512x4xf32>
    %40 = vector.shape_cast %39 : vector<512x4xf32> to vector<32x16x4xf32>
    %41 = vector.shape_cast %38 : vector<32x16x4xf32> to vector<16x2x16x4xf32>
    %42 = vector.shape_cast %40 : vector<32x16x4xf32> to vector<16x2x16x4xf32>
    %43 = vector.extract_strided_slice %41 {offsets = [0, 0, 0, 0], sizes = [16, 1, 16, 4], strides = [1, 1, 1, 1]} : vector<16x2x16x4xf32> to vector<16x1x16x4xf32>
    %44 = vector.shape_cast %43 : vector<16x1x16x4xf32> to vector<16x16x4xf32>
    %45 = vector.extract_strided_slice %41 {offsets = [0, 1, 0, 0], sizes = [16, 1, 16, 4], strides = [1, 1, 1, 1]} : vector<16x2x16x4xf32> to vector<16x1x16x4xf32>
    %46 = vector.shape_cast %45 : vector<16x1x16x4xf32> to vector<16x16x4xf32>
    %47 = vector.extract_strided_slice %42 {offsets = [0, 0, 0, 0], sizes = [16, 1, 16, 4], strides = [1, 1, 1, 1]} : vector<16x2x16x4xf32> to vector<16x1x16x4xf32>
    %48 = vector.shape_cast %47 : vector<16x1x16x4xf32> to vector<16x16x4xf32>
    %49 = vector.extract_strided_slice %42 {offsets = [0, 1, 0, 0], sizes = [16, 1, 16, 4], strides = [1, 1, 1, 1]} : vector<16x2x16x4xf32> to vector<16x1x16x4xf32>
    %50 = vector.shape_cast %49 : vector<16x1x16x4xf32> to vector<16x16x4xf32>
    %cst_18 = arith.constant 0.000000e+00 : f32
    %51 = vector.broadcast %cst_18 : f32 to vector<1x16x4xf32>
    %cst_19 = arith.constant 0.000000e+00 : f32
    %52 = vector.broadcast %cst_19 : f32 to vector<16x1x4xf32>
    %53 = vector.extract_strided_slice %50 {offsets = [0, 0, 0], sizes = [16, 15, 4], strides = [1, 1, 1]} : vector<16x16x4xf32> to vector<16x15x4xf32>
    %54 = tpu.concatenate %52, %53 in 1 : vector<16x1x4xf32>, vector<16x15x4xf32> -> vector<16x16x4xf32>
    %55 = vector.extract_strided_slice %54 {offsets = [0, 0, 0], sizes = [15, 16, 4], strides = [1, 1, 1]} : vector<16x16x4xf32> to vector<15x16x4xf32>
    %56 = tpu.concatenate %51, %55 in 0 : vector<1x16x4xf32>, vector<15x16x4xf32> -> vector<16x16x4xf32>
    %57 = vector.extract_strided_slice %46 {offsets = [0, 0, 0], sizes = [15, 16, 4], strides = [1, 1, 1]} : vector<16x16x4xf32> to vector<15x16x4xf32>
    %58 = tpu.concatenate %51, %57 in 0 : vector<1x16x4xf32>, vector<15x16x4xf32> -> vector<16x16x4xf32>
    %59 = vector.extract_strided_slice %50 {offsets = [0, 0, 0], sizes = [15, 16, 4], strides = [1, 1, 1]} : vector<16x16x4xf32> to vector<15x16x4xf32>
    %60 = tpu.concatenate %51, %59 in 0 : vector<1x16x4xf32>, vector<15x16x4xf32> -> vector<16x16x4xf32>
    %61 = vector.extract_strided_slice %48 {offsets = [0, 0, 0], sizes = [16, 15, 4], strides = [1, 1, 1]} : vector<16x16x4xf32> to vector<16x15x4xf32>
    %62 = tpu.concatenate %52, %61 in 1 : vector<16x1x4xf32>, vector<16x15x4xf32> -> vector<16x16x4xf32>
    %63 = vector.extract_strided_slice %50 {offsets = [0, 0, 0], sizes = [16, 15, 4], strides = [1, 1, 1]} : vector<16x16x4xf32> to vector<16x15x4xf32>
    %64 = tpu.concatenate %52, %63 in 1 : vector<16x1x4xf32>, vector<16x15x4xf32> -> vector<16x16x4xf32>
    %65 = tpu.concatenate %56, %58, %60, %62, %44, %48, %64, %46, %50 in 2 : vector<16x16x4xf32>, vector<16x16x4xf32>, vector<16x16x4xf32>, vector<16x16x4xf32>, vector<16x16x4xf32>, vector<16x16x4xf32>, vector<16x16x4xf32>, vector<16x16x4xf32>, vector<16x16x4xf32> -> vector<16x16x36xf32>
    %66 = vector.shape_cast %65 : vector<16x16x36xf32> to vector<256x36xf32>
    %c0_20 = arith.constant 0 : index
    %c0_21 = arith.constant 0 : index
    %67 = vector.load %arg5[%c0_20, %c0_21] : memref<36x4xf32, #tpu.memory_space<vmem>>, vector<36x4xf32>
    %cst_22 = arith.constant dense<0.000000e+00> : vector<256x4xf32>
    %68 = tpu.matmul %66, %67, %cst_22 {dimension_numbers = #tpu.dot_dimension_numbers<[1], [0], [0], [1], [0, 0, 1, 1], [], []>} : vector<256x36xf32>, vector<36x4xf32>, vector<256x4xf32> -> vector<256x4xf32>
    %c0_23 = arith.constant 0 : index
    %c0_24 = arith.constant 0 : index
    %69 = vector.load %arg6[%c0_23, %c0_24] : memref<1x4xf32, #tpu.memory_space<vmem>>, vector<1x4xf32>
    %c0_25 = arith.constant 0 : index
    %c0_26 = arith.constant 0 : index
    %70 = vector.load %arg7[%c0_25, %c0_26] : memref<1x4xf32, #tpu.memory_space<vmem>>, vector<1x4xf32>
    %cst_27 = arith.constant dense<0.000000e+00> : vector<4xf32>
    %71 = vector.multi_reduction <add>, %68, %cst_27 [0] : vector<256x4xf32> to vector<4xf32>
    %72 = vector.shape_cast %71 : vector<4xf32> to vector<1x4xf32>
    %73 = arith.mulf %68, %68 : vector<256x4xf32>
    %cst_28 = arith.constant dense<0.000000e+00> : vector<4xf32>
    %74 = vector.multi_reduction <add>, %73, %cst_28 [0] : vector<256x4xf32> to vector<4xf32>
    %75 = vector.shape_cast %74 : vector<4xf32> to vector<1x4xf32>
    %cst_29 = arith.constant 2.560000e+02 : f32
    %76 = vector.broadcast %cst_29 : f32 to vector<1x4xf32>
    %77 = arith.divf %72, %76 : vector<1x4xf32>
    %cst_30 = arith.constant 2.560000e+02 : f32
    %78 = vector.broadcast %cst_30 : f32 to vector<1x4xf32>
    %79 = arith.divf %75, %78 : vector<1x4xf32>
    %80 = arith.mulf %77, %77 : vector<1x4xf32>
    %81 = arith.subf %79, %80 : vector<1x4xf32>
    %cst_31 = arith.constant 0.000000e+00 : f32
    %82 = vector.broadcast %cst_31 : f32 to vector<1x4xf32>
    %83 = arith.maximumf %81, %82 : vector<1x4xf32>
    %cst_32 = arith.constant 9.99999974E-6 : f32
    %84 = vector.broadcast %cst_32 : f32 to vector<1x4xf32>
    %85 = arith.addf %83, %84 : vector<1x4xf32>
    %86 = math.rsqrt %85 : vector<1x4xf32>
    %87 = arith.mulf %86, %69 : vector<1x4xf32>
    %88 = arith.mulf %77, %87 : vector<1x4xf32>
    %89 = arith.subf %70, %88 : vector<1x4xf32>
    %90 = vector.broadcast %87 : vector<1x4xf32> to vector<256x4xf32>
    %91 = arith.mulf %68, %90 : vector<256x4xf32>
    %92 = vector.broadcast %89 : vector<1x4xf32> to vector<256x4xf32>
    %93 = arith.addf %91, %92 : vector<256x4xf32>
    %cst_33 = arith.constant 0.000000e+00 : f32
    %94 = vector.broadcast %cst_33 : f32 to vector<256x4xf32>
    %95 = arith.maximumf %93, %94 : vector<256x4xf32>
    %c0_34 = arith.constant 0 : index
    %c0_35 = arith.constant 0 : index
    %96 = vector.load %arg8[%c0_34, %c0_35] : memref<4x16xf32, #tpu.memory_space<vmem>>, vector<4x16xf32>
    %cst_36 = arith.constant dense<0.000000e+00> : vector<256x16xf32>
    %97 = tpu.matmul %95, %96, %cst_36 {dimension_numbers = #tpu.dot_dimension_numbers<[1], [0], [0], [1], [0, 0, 1, 1], [], []>} : vector<256x4xf32>, vector<4x16xf32>, vector<256x16xf32> -> vector<256x16xf32>
    %c0_37 = arith.constant 0 : index
    %c0_38 = arith.constant 0 : index
    %98 = vector.load %arg9[%c0_37, %c0_38] : memref<1x16xf32, #tpu.memory_space<vmem>>, vector<1x16xf32>
    %c0_39 = arith.constant 0 : index
    %c0_40 = arith.constant 0 : index
    %99 = vector.load %arg10[%c0_39, %c0_40] : memref<1x16xf32, #tpu.memory_space<vmem>>, vector<1x16xf32>
    %cst_41 = arith.constant dense<0.000000e+00> : vector<16xf32>
    %100 = vector.multi_reduction <add>, %97, %cst_41 [0] : vector<256x16xf32> to vector<16xf32>
    %101 = vector.shape_cast %100 : vector<16xf32> to vector<1x16xf32>
    %102 = arith.mulf %97, %97 : vector<256x16xf32>
    %cst_42 = arith.constant dense<0.000000e+00> : vector<16xf32>
    %103 = vector.multi_reduction <add>, %102, %cst_42 [0] : vector<256x16xf32> to vector<16xf32>
    %104 = vector.shape_cast %103 : vector<16xf32> to vector<1x16xf32>
    %cst_43 = arith.constant 2.560000e+02 : f32
    %105 = vector.broadcast %cst_43 : f32 to vector<1x16xf32>
    %106 = arith.divf %101, %105 : vector<1x16xf32>
    %cst_44 = arith.constant 2.560000e+02 : f32
    %107 = vector.broadcast %cst_44 : f32 to vector<1x16xf32>
    %108 = arith.divf %104, %107 : vector<1x16xf32>
    %109 = arith.mulf %106, %106 : vector<1x16xf32>
    %110 = arith.subf %108, %109 : vector<1x16xf32>
    %cst_45 = arith.constant 0.000000e+00 : f32
    %111 = vector.broadcast %cst_45 : f32 to vector<1x16xf32>
    %112 = arith.maximumf %110, %111 : vector<1x16xf32>
    %cst_46 = arith.constant 9.99999974E-6 : f32
    %113 = vector.broadcast %cst_46 : f32 to vector<1x16xf32>
    %114 = arith.addf %112, %113 : vector<1x16xf32>
    %115 = math.rsqrt %114 : vector<1x16xf32>
    %116 = arith.mulf %115, %98 : vector<1x16xf32>
    %117 = arith.mulf %106, %116 : vector<1x16xf32>
    %118 = arith.subf %99, %117 : vector<1x16xf32>
    %119 = vector.broadcast %116 : vector<1x16xf32> to vector<256x16xf32>
    %120 = arith.mulf %97, %119 : vector<256x16xf32>
    %121 = vector.broadcast %118 : vector<1x16xf32> to vector<256x16xf32>
    %122 = arith.addf %120, %121 : vector<256x16xf32>
    %123 = vector.shape_cast %1 : vector<32x16x8xf32> to vector<16x2x16x8xf32>
    %124 = vector.extract_strided_slice %123 {offsets = [0, 0, 0, 0], sizes = [16, 1, 16, 8], strides = [1, 1, 1, 1]} : vector<16x2x16x8xf32> to vector<16x1x16x8xf32>
    %125 = vector.shape_cast %124 : vector<16x1x16x8xf32> to vector<16x16x8xf32>
    %126 = vector.shape_cast %125 : vector<16x16x8xf32> to vector<256x8xf32>
    %c0_47 = arith.constant 0 : index
    %c0_48 = arith.constant 0 : index
    %127 = vector.load %arg11[%c0_47, %c0_48] : memref<4x16xf32, #tpu.memory_space<vmem>>, vector<4x16xf32>
    %cst_49 = arith.constant 0.000000e+00 : f32
    %128 = vector.broadcast %cst_49 : f32 to vector<4x16xf32>
    %129 = tpu.concatenate %127, %128 in 0 : vector<4x16xf32>, vector<4x16xf32> -> vector<8x16xf32>
    %cst_50 = arith.constant dense<0.000000e+00> : vector<256x16xf32>
    %130 = tpu.matmul %126, %129, %cst_50 {dimension_numbers = #tpu.dot_dimension_numbers<[1], [0], [0], [1], [0, 0, 1, 1], [], []>} : vector<256x8xf32>, vector<8x16xf32>, vector<256x16xf32> -> vector<256x16xf32>
    %c0_51 = arith.constant 0 : index
    %c0_52 = arith.constant 0 : index
    %131 = vector.load %arg12[%c0_51, %c0_52] : memref<1x16xf32, #tpu.memory_space<vmem>>, vector<1x16xf32>
    %c0_53 = arith.constant 0 : index
    %c0_54 = arith.constant 0 : index
    %132 = vector.load %arg13[%c0_53, %c0_54] : memref<1x16xf32, #tpu.memory_space<vmem>>, vector<1x16xf32>
    %cst_55 = arith.constant dense<0.000000e+00> : vector<16xf32>
    %133 = vector.multi_reduction <add>, %130, %cst_55 [0] : vector<256x16xf32> to vector<16xf32>
    %134 = vector.shape_cast %133 : vector<16xf32> to vector<1x16xf32>
    %135 = arith.mulf %130, %130 : vector<256x16xf32>
    %cst_56 = arith.constant dense<0.000000e+00> : vector<16xf32>
    %136 = vector.multi_reduction <add>, %135, %cst_56 [0] : vector<256x16xf32> to vector<16xf32>
    %137 = vector.shape_cast %136 : vector<16xf32> to vector<1x16xf32>
    %cst_57 = arith.constant 2.560000e+02 : f32
    %138 = vector.broadcast %cst_57 : f32 to vector<1x16xf32>
    %139 = arith.divf %134, %138 : vector<1x16xf32>
    %cst_58 = arith.constant 2.560000e+02 : f32
    %140 = vector.broadcast %cst_58 : f32 to vector<1x16xf32>
    %141 = arith.divf %137, %140 : vector<1x16xf32>
    %142 = arith.mulf %139, %139 : vector<1x16xf32>
    %143 = arith.subf %141, %142 : vector<1x16xf32>
    %cst_59 = arith.constant 0.000000e+00 : f32
    %144 = vector.broadcast %cst_59 : f32 to vector<1x16xf32>
    %145 = arith.maximumf %143, %144 : vector<1x16xf32>
    %cst_60 = arith.constant 9.99999974E-6 : f32
    %146 = vector.broadcast %cst_60 : f32 to vector<1x16xf32>
    %147 = arith.addf %145, %146 : vector<1x16xf32>
    %148 = math.rsqrt %147 : vector<1x16xf32>
    %149 = arith.mulf %148, %131 : vector<1x16xf32>
    %150 = arith.mulf %139, %149 : vector<1x16xf32>
    %151 = arith.subf %132, %150 : vector<1x16xf32>
    %152 = vector.broadcast %149 : vector<1x16xf32> to vector<256x16xf32>
    %153 = arith.mulf %130, %152 : vector<256x16xf32>
    %154 = vector.broadcast %151 : vector<1x16xf32> to vector<256x16xf32>
    %155 = arith.addf %153, %154 : vector<256x16xf32>
    %156 = arith.addf %122, %155 : vector<256x16xf32>
    %cst_61 = arith.constant 0.000000e+00 : f32
    %157 = vector.broadcast %cst_61 : f32 to vector<256x16xf32>
    %158 = arith.maximumf %156, %157 : vector<256x16xf32>
    %c0_62 = arith.constant 0 : index
    %c0_63 = arith.constant 0 : index
    %c0_64 = arith.constant 0 : index
    %159 = vector.load %arg14[%c0_62, %c0_63, %c0_64] : memref<1x256x16xf32, #tpu.memory_space<vmem>>, vector<1x256x16xf32>
    %160 = vector.shape_cast %159 : vector<1x256x16xf32> to vector<256x16xf32>
    %161 = vector.shape_cast %158 : vector<256x16xf32> to vector<1x256x16xf32>
    tpu.vector_store %arg14[%c0_62, %c0_63, %c0_64], %161 {strides = array<i32>} : memref<1x256x16xf32, #tpu.memory_space<vmem>>, vector<1x256x16xf32>,
    return
  }
  func.func @transform_0(%arg0: i32) -> (i32, i32, i32, i32) {
    %c0_i32 = arith.constant 0 : i32
    %c0_i32_0 = arith.constant 0 : i32
    %c0_i32_1 = arith.constant 0 : i32
    %c0_i32_2 = arith.constant 0 : i32
    return %arg0, %c0_i32, %c0_i32_0, %c0_i32_1 : i32, i32, i32, i32
  }
  func.func @transform_1(%arg0: i32) -> (i32, i32) {
    %c0_i32 = arith.constant 0 : i32
    %c0_i32_0 = arith.constant 0 : i32
    %c0_i32_1 = arith.constant 0 : i32
    return %c0_i32, %c0_i32_0 : i32, i32
  }
  func.func @transform_2(%arg0: i32) -> (i32, i32) {
    %c0_i32 = arith.constant 0 : i32
    %c0_i32_0 = arith.constant 0 : i32
    %c0_i32_1 = arith.constant 0 : i32
    return %c0_i32, %c0_i32_0 : i32, i32
  }
  func.func @transform_3(%arg0: i32) -> (i32, i32) {
    %c0_i32 = arith.constant 0 : i32
    %c0_i32_0 = arith.constant 0 : i32
    %c0_i32_1 = arith.constant 0 : i32
    return %c0_i32, %c0_i32_0 : i32, i32
  }
  func.func @transform_4(%arg0: i32) -> (i32, i32) {
    %c0_i32 = arith.constant 0 : i32
    %c0_i32_0 = arith.constant 0 : i32
    %c0_i32_1 = arith.constant 0 : i32
    return %c0_i32, %c0_i32_0 : i32, i32
  }
  func.func @transform_5(%arg0: i32) -> (i32, i32) {
    %c0_i32 = arith.constant 0 : i32
    %c0_i32_0 = arith.constant 0 : i32
    %c0_i32_1 = arith.constant 0 : i32
    return %c0_i32, %c0_i32_0 : i32, i32
  }
  func.func @transform_6(%arg0: i32) -> (i32, i32) {
    %c0_i32 = arith.constant 0 : i32
    %c0_i32_0 = arith.constant 0 : i32
    %c0_i32_1 = arith.constant 0 : i32
    return %c0_i32, %c0_i32_0 : i32, i32
  }
  func.func @transform_7(%arg0: i32) -> (i32, i32) {
    %c0_i32 = arith.constant 0 : i32
    %c0_i32_0 = arith.constant 0 : i32
    %c0_i32_1 = arith.constant 0 : i32
    return %c0_i32, %c0_i32_0 : i32, i32
  }
  func.func @transform_8(%arg0: i32) -> (i32, i32) {
    %c0_i32 = arith.constant 0 : i32
    %c0_i32_0 = arith.constant 0 : i32
    %c0_i32_1 = arith.constant 0 : i32
    return %c0_i32, %c0_i32_0 : i32, i32
  }
  func.func @transform_9(%arg0: i32) -> (i32, i32) {
    %c0_i32 = arith.constant 0 : i32
    %c0_i32_0 = arith.constant 0 : i32
    %c0_i32_1 = arith.constant 0 : i32
    return %c0_i32, %c0_i32_0 : i32, i32
  }
  func.func @transform_10(%arg0: i32) -> (i32, i32) {
    %c0_i32 = arith.constant 0 : i32
    %c0_i32_0 = arith.constant 0 : i32
    %c0_i32_1 = arith.constant 0 : i32
    return %c0_i32, %c0_i32_0 : i32, i32
  }
  func.func @transform_11(%arg0: i32) -> (i32, i32) {
    %c0_i32 = arith.constant 0 : i32
    %c0_i32_0 = arith.constant 0 : i32
    %c0_i32_1 = arith.constant 0 : i32
    return %c0_i32, %c0_i32_0 : i32, i32
  }
  func.func @transform_12(%arg0: i32) -> (i32, i32) {
    %c0_i32 = arith.constant 0 : i32
    %c0_i32_0 = arith.constant 0 : i32
    %c0_i32_1 = arith.constant 0 : i32
    return %c0_i32, %c0_i32_0 : i32, i32
  }
  func.func @transform_13(%arg0: i32) -> (i32, i32, i32) {
    %c0_i32 = arith.constant 0 : i32
    %c0_i32_0 = arith.constant 0 : i32
    %c0_i32_1 = arith.constant 0 : i32
    return %arg0, %c0_i32, %c0_i32_0 : i32, i32, i32
  }
}

</mosaic_0001>

<bundles_post_ra>
// kernel: tpu_custom_call.1
= control target key start
LH: loop header
LB: loop body
LE: loop exit
PB: predicated region body
PF: predicated region fallthrough
CT: control target
= control target key end

     0   :  { %s6710_s25 = smov 0   ;;  %s11697_s0 = inlined_call_operand.vmem [shape: f32[2,32,16,8], index: 0, kind: input, shape index: {}]   ;;  %s11698_s1 = inlined_call_operand.vmem [shape: f32[4,4], index: 1, kind: input, shape index: {}]   ;;  %s11699_s2 = inlined_call_operand.vmem [shape: f32[1,4], index: 2, kind: input, shape index: {}]   ;;  %s11700_s3 = inlined_call_operand.vmem [shape: f32[1,4], index: 3, kind: input, shape index: {}]   ;;  %s11701_s4 = inlined_call_operand.vmem [shape: f32[36,4], index: 4, kind: input, shape index: {}]   ;;  %s11702_s5 = inlined_call_operand.vmem [shape: f32[1,4], index: 5, kind: input, shape index: {}]   ;;  %s11703_s6 = inlined_call_operand.vmem [shape: f32[1,4], index: 6, kind: input, shape index: {}]   ;;  %s11704_s7 = inlined_call_operand.vmem [shape: f32[4,16], index: 7, kind: input, shape index: {}]   ;;  %s11705_s8 = inlined_call_operand.vmem [shape: f32[1,16], index: 8, kind: input, shape index: {}]   ;;  %s11706_s9 = inlined_call_operand.vmem [shape: f32[1,16], index: 9, kind: input, shape index: {}]   ;;  %s11707_s10 = inlined_call_operand.vmem [shape: f32[4,16], index: 10, kind: input, shape index: {}]   ;;  %s11708_s11 = inlined_call_operand.vmem [shape: f32[1,16], index: 11, kind: input, shape index: {}]   ;;  %s11709_s12 = inlined_call_operand.vmem [shape: f32[1,16], index: 12, kind: input, shape index: {}]   ;;  %s11710_s13 = inlined_call_operand.vmem [shape: f32[2,256,16], index: 13, kind: output, shape index: {}]  }
   0x1 LB: > { %s5726_s26 = sadd.s32 4294967295, %s6629_s25   ;;  %p5730_p0 = scmp.ge.s32.totalorder %s6629_s25, 1  ;;  %s6629_s25 = sphi %s6710_s25, %s23_s25  }
   0x2   : > { %p387_p1 = scmp.lt.s32.totalorder %s6629_s25, 3 }
   0x4   : > { %p388_p2 = pnand %p5730_p0, %p387_p1 }
   0x6   : > { %391 = sbr.rel (%p388_p2) target bundleno = 1838 (0x72e), region = 72 }
   0xd   : > { %v505_v0 = vld [vmem:[%s11698_s1] sm:$0xf]  ;;  %vm506_vm0 = vcmask 1043456   ;;  %p431_p3 = scmp.lt.s32.totalorder %s5726_s26, 1  ;;  %vm508_vm2 = vcmask 64512   ;;  %vm1477_vm3 = vcmask 31744  }
   0xe   : > { %6202 = vmatprep.subr.msk.mxu0 %vm506_vm0, %v505_v0  ;;  %6564 = vmatprep.subr.msk.mxu1 %vm506_vm0, %v505_v0  ;;  %v1087_v1 = vrot.slane %v505_v0, 4  ;;  %vm6724_vm1 = vmneg %vm506_vm0  ;;  %s6632_s16 = smov 4   ;;  %s6633_s17 = smov 8   ;;  %vm2565_vm4 = vcmask 1040384   ;;  %vm3694_vm5 = vcmask 97280   ;;  %vm3727_vm6 = vcmask 130048  }
   0xf   : > { %6203 = vmatpush3.msk.msra.mxu0 %vm506_vm0, %v505_v0  ;;  %s12614_s26 = smov (!%p431_p3, %s5726_s26), 1  ;;  %6565 = vmatpush3.msk.msra.mxu1 %vm506_vm0, %v505_v0  ;;  %s6634_s22 = smov 16   ;;  %vm3760_vm7 = vcmask 162816   ;;  %vm3793_vm8 = vcmask 195584   ;;  %vm3826_vm9 = vcmask 228352   ;;  %vm3859_vm10 = vcmask 261120  }
  0x10   : > { %6300 = vmatprep.subr.msk.mxu1 %vm6724_vm1, %v1087_v1  ;;  %s5967_s29 = sshll.u32 %s12614_s26, 9  ;;  %s6635_s23 = smov 20   ;;  %vm3897_vm11 = vcmask 293888  }
  0x11   : > { %s6738_s15 = scalar_lea.vmem %s11697_s0, %s5967_s29  ;;  %s6636_s24 = smov 28  }
  0x12   : > { %v6741_v3 = vld [vmem:[%s6738_s15] sm:$0xff]  ;;  %v6744_v4 = vld [vmem:[%s6738_s15 + $0x8] sm:$0xff]  ;;  %v6747_v5 = vld [vmem:[%s6738_s15 + $0x10] sm:$0xff]  ;;  %s6637_s27 = smov 32  }
  0x13   : > { %6204 = vmatprep.mubr.msk.f32.mxu0 %vm508_vm2, %v6741_v3  ;;  %v6756_v6 = vld [vmem:[%s6738_s15 + $0x18] sm:$0xff]  ;;  %v6759_v7 = vld [vmem:[%s6738_s15 + $0x20] sm:$0xff]  ;;  %v6766_v8 = vld [vmem:[%s6738_s15 + $0x28] sm:$0xff] }
  0x14   : > { %6205 = vmatmul.mubr.msk.f32.vlgmr.msra.gmra.mrb[0].mxu0 %vm508_vm2, %v6744_v4  ;;  %v6769_v9 = vld [vmem:[%s6738_s15 + $0x30] sm:$0xff]  ;;  %v6776_v10 = vld [vmem:[%s6738_s15 + $0x38] sm:$0xff]  ;;  %v6779_v11 = vld [vmem:[%s6738_s15 + $0x40] sm:$0xff] }
  0x15   : > { %6207 = vmatprep.mubr.msk.f32.mxu0 %vm508_vm2, %v6747_v5  ;;  %v6786_v12 = vld [vmem:[%s6738_s15 + $0x48] sm:$0xff]  ;;  %v6789_v13 = vld [vmem:[%s6738_s15 + $0x50] sm:$0xff]  ;;  %v6792_v14 = vld [vmem:[%s6738_s15 + $0x180] sm:$0xff] }
  0x16   : > { %v6795_v15 = vld [vmem:[%s6738_s15 + $0x188] sm:$0xff]  ;;  %6276 = vmatprep.mubr.msk.f32.mxu1 %vm508_vm2, %v6792_v14  ;;  %v6800_v16 = vld [vmem:[%s6738_s15 + $0x190] sm:$0xff]  ;;  %v6809_v17 = vld [vmem:[%s6738_s15 + $0x58] sm:$0xff] }
  0x17   : > { %6277 = vmatmul.mubr.msk.f32.vlgmr.msra.gmra.mrb[0].mxu1 %vm508_vm2, %v6795_v15  ;;  %v6814_v18 = vld [vmem:[%s6738_s15 + $0x198] sm:$0xff]  ;;  %v6817_v19 = vld [vmem:[%s6738_s15 + $0x60] sm:$0xff]  ;;  %v6831_v21 = vld [vmem:[%s6738_s15 + $0x68] sm:$0xff] }
  0x18   : > { %6208 = vmatmul.mubr.msk.f32.gmra.mrb[2].mxu0 %vm508_vm2, %v6756_v6  ;;  %6301 = vmatpush3.msk.msra.mxu1 %vm6724_vm1, %v1087_v1  ;;  %v6822_v20 = vld [vmem:[%s6738_s15 + $0x1a0] sm:$0xff]  ;;  %v6836_v22 = vld [vmem:[%s6738_s15 + $0x1a8] sm:$0xff]  ;;  %v6839_v23 = vld [vmem:[%s6738_s15 + $0x70] sm:$0xff] }
  0x19   : > { %6210 = vmatprep.mubr.msk.f32.mxu0 %vm508_vm2, %v6759_v7  ;;  %6279 = vmatprep.mubr.msk.f32.mxu1 %vm508_vm2, %v6800_v16  ;;  %v6842_v24 = vld [vmem:[%s6738_s15 + $0x1b0] sm:$0xff]  ;;  %v6851_v25 = vld [vmem:[%s6738_s15 + $0x78] sm:$0xff]  ;;  %v6859_v27 = vld [vmem:[%s6738_s15 + $0x80] sm:$0xff] }
  0x1a   : > { %v6856_v26 = vld [vmem:[%s6738_s15 + $0x1b8] sm:$0xff]  ;;  %v6862_v28 = vld [vmem:[%s6738_s15 + $0x1c0] sm:$0xff]  ;;  %v6871_v29 = vld [vmem:[%s6738_s15 + $0x88] sm:$0xff] }
  0x1b   : > { %6280 = vmatmul.mubr.msk.f32.gmra.mrb[2].mxu1 %vm508_vm2, %v6814_v18  ;;  %v6876_v30 = vld [vmem:[%s6738_s15 + $0x1c8] sm:$0xff]  ;;  %v6879_v31 = vld [vmem:[%s6738_s15 + $0x90] sm:$0xff]  ;;  %v6891_v33 = vld [vmem:[%s6738_s15 + $0x98] sm:$0xff] }
  0x1c   : > { %6211 = vmatmul.mubr.msk.f32.gmra.mrb[4].mxu0 %vm508_vm2, %v6766_v8  ;;  %6282 = vmatprep.mubr.msk.f32.mxu1 %vm508_vm2, %v6822_v20  ;;  %v6882_v32 = vld [vmem:[%s6738_s15 + $0x1d0] sm:$0xff]  ;;  %v6896_v34 = vld [vmem:[%s6738_s15 + $0x1d8] sm:$0xff]  ;;  %v6899_v35 = vld [vmem:[%s6738_s15 + $0xa0] sm:$0xff] }
  0x1d   : > { %6213 = vmatprep.mubr.msk.f32.mxu0 %vm508_vm2, %v6769_v9  ;;  %v6902_v36 = vld [vmem:[%s6738_s15 + $0x1e0] sm:$0xff]  ;;  %v6911_v37 = vld [vmem:[%s6738_s15 + $0xa8] sm:$0xff]  ;;  %v6919_v39 = vld [vmem:[%s6738_s15 + $0xb0] sm:$0xff] }
  0x1e   : > { %v6916_v38 = vld [vmem:[%s6738_s15 + $0x1e8] sm:$0xff]  ;;  %v6922_v40 = vld [vmem:[%s6738_s15 + $0x1f0] sm:$0xff]  ;;  %v6931_v41 = vld [vmem:[%s6738_s15 + $0xb8] sm:$0xff] }
  0x1f   : > { %6283 = vmatmul.mubr.msk.f32.gmra.mrb[4].mxu1 %vm508_vm2, %v6836_v22  ;;  %v6936_v42 = vld [vmem:[%s6738_s15 + $0x1f8] sm:$0xff]  ;;  %v6939_v43 = vld [vmem:[%s6738_s15 + $0xc0] sm:$0xff]  ;;  %v6948_v44 = vld [vmem:[%s6738_s15 + $0xc8] sm:$0xff] }
  0x20   : > { %6214 = vmatmul.mubr.msk.f32.gmra.mrb[6].mxu0 %vm508_vm2, %v6776_v10  ;;  %6285 = vmatprep.mubr.msk.f32.mxu1 %vm508_vm2, %v6842_v24  ;;  %v6953_v45 = vld [vmem:[%s6738_s15 + $0xd0] sm:$0xff]  ;;  %v6962_v46 = vld [vmem:[%s6738_s15 + $0xd8] sm:$0xff]  ;;  %v6967_v47 = vld [vmem:[%s6738_s15 + $0xe0] sm:$0xff] }
  0x21   : > { %6216 = vmatprep.mubr.msk.f32.mxu0 %vm508_vm2, %v6779_v11  ;;  %v6976_v48 = vld [vmem:[%s6738_s15 + $0xe8] sm:$0xff]  ;;  %v471_v49 = vld [vmem:[%s6738_s15 + $0xf0] sm:$0xff]  ;;  %v472_v50 = vld [vmem:[%s6738_s15 + $0xf8] sm:$0xff] }
  0x22   : > { %v473_v51 = vld [vmem:[%s6738_s15 + $0x100] sm:$0xff]  ;;  %v474_v52 = vld [vmem:[%s6738_s15 + $0x108] sm:$0xff]  ;;  %v475_v53 = vld [vmem:[%s6738_s15 + $0x110] sm:$0xff] }
  0x23   : > { %6286 = vmatmul.mubr.msk.f32.gmra.mrb[6].mxu1 %vm508_vm2, %v6856_v26  ;;  %v476_v54 = vld [vmem:[%s6738_s15 + $0x118] sm:$0xff]  ;;  %v477_v55 = vld [vmem:[%s6738_s15 + $0x120] sm:$0xff]  ;;  %v478_v56 = vld [vmem:[%s6738_s15 + $0x128] sm:$0xff] }
  0x24   : > { %6217 = vmatmul.mubr.msk.f32.gmra.mrb[8].mxu0 %vm508_vm2, %v6786_v12  ;;  %6288 = vmatprep.mubr.msk.f32.mxu1 %vm508_vm2, %v6862_v28  ;;  %v479_v57 = vld [vmem:[%s6738_s15 + $0x130] sm:$0xff]  ;;  %v480_v58 = vld [vmem:[%s6738_s15 + $0x138] sm:$0xff]  ;;  %v481_v59 = vld [vmem:[%s6738_s15 + $0x140] sm:$0xff] }
  0x25   : > { %6219 = vmatprep.mubr.msk.f32.mxu0 %vm508_vm2, %v6789_v13  ;;  %v482_v60 = vld [vmem:[%s6738_s15 + $0x148] sm:$0xff]  ;;  %v483_v61 = vld [vmem:[%s6738_s15 + $0x150] sm:$0xff]  ;;  %v484_v62 = vld [vmem:[%s6738_s15 + $0x158] sm:$0xff] }
  0x26   : > { %v485_v63 = vld [vmem:[%s6738_s15 + $0x160] sm:$0xff]  ;;  %v486_v0 = vld [vmem:[%s6738_s15 + $0x168] sm:$0xff]  ;;  %v487_v1 = vld [vmem:[%s6738_s15 + $0x170] sm:$0xff] }
  0x27   : > { %6289 = vmatmul.mubr.msk.f32.gmra.mrb[8].mxu1 %vm508_vm2, %v6876_v30  ;;  %v488_v2 = vld [vmem:[%s6738_s15 + $0x178] sm:$0xff] }
  0x28   : > { %6220 = vmatmul.mubr.msk.f32.gmra.mrb[10].mxu0 %vm508_vm2, %v6809_v17  ;;  %6291 = vmatprep.mubr.msk.f32.mxu1 %vm508_vm2, %v6882_v32 }
  0x29   : > { %6222 = vmatprep.mubr.msk.f32.mxu0 %vm508_vm2, %v6817_v19 }
  0x2b   : > { %6292 = vmatmul.mubr.msk.f32.gmra.mrb[10].mxu1 %vm508_vm2, %v6896_v34 }
  0x2c   : > { %6223 = vmatmul.mubr.msk.f32.gmra.mrb[12].mxu0 %vm508_vm2, %v6831_v21  ;;  %6294 = vmatprep.mubr.msk.f32.mxu1 %vm508_vm2, %v6902_v36 }
  0x2d   : > { %6225 = vmatprep.mubr.msk.f32.mxu0 %vm508_vm2, %v6839_v23 }
  0x2f   : > { %6295 = vmatmul.mubr.msk.f32.gmra.mrb[12].mxu1 %vm508_vm2, %v6916_v38 }
  0x30   : > { %6226 = vmatmul.mubr.msk.f32.gmra.mrb[14].mxu0 %vm508_vm2, %v6851_v25  ;;  %6297 = vmatprep.mubr.msk.f32.mxu1 %vm508_vm2, %v6922_v40 }
  0x31   : > { %6228 = vmatprep.mubr.msk.f32.mxu0 %vm508_vm2, %v6859_v27 }
  0x33   : > { %6298 = vmatmul.mubr.msk.f32.gmra.mrb[14].mxu1 %vm508_vm2, %v6936_v42 }
  0x34   : > { %6229 = vmatmul.mubr.msk.f32.gmra.mrb[16].mxu0 %vm508_vm2, %v6871_v29  ;;  %6302 = vmatprep.mubr.msk.f32.mxu1 %vm508_vm2, %v6741_v3 }
  0x35   : > { %6231 = vmatprep.mubr.msk.f32.mxu0 %vm508_vm2, %v6879_v31 }
  0x37   : > { %6303 = vmatmul.mubr.msk.f32.vlgmr.msra.gmra.mrb[16].mxu1 %vm508_vm2, %v6744_v4 }
  0x38   : > { %6232 = vmatmul.mubr.msk.f32.gmra.mrb[18].mxu0 %vm508_vm2, %v6891_v33  ;;  %6305 = vmatprep.mubr.msk.f32.mxu1 %vm508_vm2, %v6747_v5 }
  0x39   : > { %6234 = vmatprep.mubr.msk.f32.mxu0 %vm508_vm2, %v6899_v35 }
  0x3b   : > { %6306 = vmatmul.mubr.msk.f32.gmra.mrb[18].mxu1 %vm508_vm2, %v6756_v6 }
  0x3c   : > { %6235 = vmatmul.mubr.msk.f32.gmra.mrb[20].mxu0 %vm508_vm2, %v6911_v37  ;;  %6308 = vmatprep.mubr.msk.f32.mxu1 %vm508_vm2, %v6759_v7 }
  0x3d   : > { %6237 = vmatprep.mubr.msk.f32.mxu0 %vm508_vm2, %v6919_v39 }
  0x3f   : > { %6309 = vmatmul.mubr.msk.f32.gmra.mrb[20].mxu1 %vm508_vm2, %v6766_v8 }
  0x40   : > { %6238 = vmatmul.mubr.msk.f32.gmra.mrb[22].mxu0 %vm508_vm2, %v6931_v41  ;;  %6311 = vmatprep.mubr.msk.f32.mxu1 %vm508_vm2, %v6769_v9 }
  0x41   : > { %6240 = vmatprep.mubr.msk.f32.mxu0 %vm508_vm2, %v6939_v43 }
  0x43   : > { %6312 = vmatmul.mubr.msk.f32.gmra.mrb[22].mxu1 %vm508_vm2, %v6776_v10 }
  0x44   : > { %6241 = vmatmul.mubr.msk.f32.gmra.mrb[24].mxu0 %vm508_vm2, %v6948_v44  ;;  %6314 = vmatprep.mubr.msk.f32.mxu1 %vm508_vm2, %v6779_v11 }
  0x45   : > { %6243 = vmatprep.mubr.msk.f32.mxu0 %vm508_vm2, %v6953_v45 }
  0x47   : > { %6315 = vmatmul.mubr.msk.f32.gmra.mrb[24].mxu1 %vm508_vm2, %v6786_v12 }
  0x48   : > { %6244 = vmatmul.mubr.msk.f32.gmra.mrb[26].mxu0 %vm508_vm2, %v6962_v46  ;;  %6317 = vmatprep.mubr.msk.f32.mxu1 %vm508_vm2, %v6789_v13 }
  0x49   : > { %6246 = vmatprep.mubr.msk.f32.mxu0 %vm508_vm2, %v6967_v47 }
  0x4b   : > { %6318 = vmatmul.mubr.msk.f32.gmra.mrb[26].mxu1 %vm508_vm2, %v6809_v17 }
  0x4c   : > { %6247 = vmatmul.mubr.msk.f32.gmra.mrb[28].mxu0 %vm508_vm2, %v6976_v48  ;;  %6320 = vmatprep.mubr.msk.f32.mxu1 %vm508_vm2, %v6817_v19 }
  0x4d   : > { %6249 = vmatprep.mubr.msk.f32.mxu0 %vm508_vm2, %v471_v49 }
  0x4f   : > { %6321 = vmatmul.mubr.msk.f32.gmra.mrb[28].mxu1 %vm508_vm2, %v6831_v21 }
  0x50   : > { %6250 = vmatmul.mubr.msk.f32.gmra.mrb[30].mxu0 %vm508_vm2, %v472_v50  ;;  %6323 = vmatprep.mubr.msk.f32.mxu1 %vm508_vm2, %v6839_v23 }
  0x51   : > { %6252 = vmatprep.mubr.msk.f32.mxu0 %vm508_vm2, %v473_v51 }
  0x53   : > { %6324 = vmatmul.mubr.msk.f32.gmra.mrb[30].mxu1 %vm508_vm2, %v6851_v25 }
  0x54   : > { %6253 = vmatmul.mubr.msk.f32.gmra.mrb[32].mxu0 %vm508_vm2, %v474_v52  ;;  %6326 = vmatprep.mubr.msk.f32.mxu1 %vm508_vm2, %v6859_v27 }
  0x55   : > { %6255 = vmatprep.mubr.msk.f32.mxu0 %vm508_vm2, %v475_v53 }
  0x57   : > { %6327 = vmatmul.mubr.msk.f32.gmra.mrb[32].mxu1 %vm508_vm2, %v6871_v29 }
  0x58   : > { %6256 = vmatmul.mubr.msk.f32.gmra.mrb[34].mxu0 %vm508_vm2, %v476_v54  ;;  %6329 = vmatprep.mubr.msk.f32.mxu1 %vm508_vm2, %v6879_v31 }
  0x59   : > { %6258 = vmatprep.mubr.msk.f32.mxu0 %vm508_vm2, %v477_v55 }
  0x5b   : > { %6330 = vmatmul.mubr.msk.f32.gmra.mrb[34].mxu1 %vm508_vm2, %v6891_v33 }
  0x5c   : > { %6259 = vmatmul.mubr.msk.f32.gmra.mrb[36].mxu0 %vm508_vm2, %v478_v56  ;;  %6332 = vmatprep.mubr.msk.f32.mxu1 %vm508_vm2, %v6899_v35 }
  0x5d   : > { %6261 = vmatprep.mubr.msk.f32.mxu0 %vm508_vm2, %v479_v57 }
  0x5f   : > { %6333 = vmatmul.mubr.msk.f32.gmra.mrb[36].mxu1 %vm508_vm2, %v6911_v37 }
  0x60   : > { %6262 = vmatmul.mubr.msk.f32.gmra.mrb[38].mxu0 %vm508_vm2, %v480_v58  ;;  %6335 = vmatprep.mubr.msk.f32.mxu1 %vm508_vm2, %v6919_v39 }
  0x61   : > { %6264 = vmatprep.mubr.msk.f32.mxu0 %vm508_vm2, %v481_v59 }
  0x63   : > { %6336 = vmatmul.mubr.msk.f32.gmra.mrb[38].mxu1 %vm508_vm2, %v6931_v41 }
  0x64   : > { %6265 = vmatmul.mubr.msk.f32.gmra.mrb[40].mxu0 %vm508_vm2, %v482_v60  ;;  %6338 = vmatprep.mubr.msk.f32.mxu1 %vm508_vm2, %v6939_v43 }
  0x65   : > { %6267 = vmatprep.mubr.msk.f32.mxu0 %vm508_vm2, %v483_v61 }
  0x67   : > { %6339 = vmatmul.mubr.msk.f32.gmra.mrb[40].mxu1 %vm508_vm2, %v6948_v44 }
  0x68   : > { %6268 = vmatmul.mubr.msk.f32.gmra.mrb[42].mxu0 %vm508_vm2, %v484_v62  ;;  %6341 = vmatprep.mubr.msk.f32.mxu1 %vm508_vm2, %v6953_v45 }
  0x69   : > { %6270 = vmatprep.mubr.msk.f32.mxu0 %vm508_vm2, %v485_v63 }
  0x6b   : > { %6342 = vmatmul.mubr.msk.f32.gmra.mrb[42].mxu1 %vm508_vm2, %v6962_v46 }
  0x6c   : > { %6271 = vmatmul.mubr.msk.f32.gmra.mrb[44].mxu0 %vm508_vm2, %v486_v0  ;;  %6344 = vmatprep.mubr.msk.f32.mxu1 %vm508_vm2, %v6967_v47 }
  0x6d   : > { %6273 = vmatprep.mubr.msk.f32.mxu0 %vm508_vm2, %v487_v1 }
  0x6f   : > { %6345 = vmatmul.mubr.msk.f32.gmra.mrb[44].mxu1 %vm508_vm2, %v6976_v48 }
  0x70   : > { %6274 = vmatmul.mubr.msk.f32.gmra.mrb[46].mxu0 %vm508_vm2, %v488_v2  ;;  %6347 = vmatprep.mubr.msk.f32.mxu1 %vm508_vm2, %v471_v49 }
  0x73   : > { %6348 = vmatmul.mubr.msk.f32.gmra.mrb[46].mxu1 %vm508_vm2, %v472_v50 }
  0x74   : > { %6350 = vmatprep.mubr.msk.f32.mxu1 %vm508_vm2, %v473_v51 }
  0x77   : > { %6351 = vmatmul.mubr.msk.f32.gmra.mrb[48].mxu1 %vm508_vm2, %v474_v52 }
  0x78   : > { %6353 = vmatprep.mubr.msk.f32.mxu1 %vm508_vm2, %v475_v53 }
  0x7b   : > { %6354 = vmatmul.mubr.msk.f32.gmra.mrb[50].mxu1 %vm508_vm2, %v476_v54 }
  0x7c   : > { %6356 = vmatprep.mubr.msk.f32.mxu1 %vm508_vm2, %v477_v55 }
  0x7f   : > { %6357 = vmatmul.mubr.msk.f32.gmra.mrb[52].mxu1 %vm508_vm2, %v478_v56 }
  0x80   : > { %6359 = vmatprep.mubr.msk.f32.mxu1 %vm508_vm2, %v479_v57 }
  0x83   : > { %6360 = vmatmul.mubr.msk.f32.gmra.mrb[54].mxu1 %vm508_vm2, %v480_v58 }
  0x84   : > { %6362 = vmatprep.mubr.msk.f32.mxu1 %vm508_vm2, %v481_v59 }
  0x87   : > { %6363 = vmatmul.mubr.msk.f32.gmra.mrb[56].mxu1 %vm508_vm2, %v482_v60 }
  0x88   : > { %6365 = vmatprep.mubr.msk.f32.mxu1 %vm508_vm2, %v483_v61 }
  0x8b   : > { %6366 = vmatmul.mubr.msk.f32.gmra.mrb[58].mxu1 %vm508_vm2, %v484_v62 }
  0x8c   : > { %6368 = vmatprep.mubr.msk.f32.mxu1 %vm508_vm2, %v485_v63 }
  0x8f   : > { %6369 = vmatmul.mubr.msk.f32.gmra.mrb[60].mxu1 %vm508_vm2, %v486_v0 }
  0x90   : > { %6371 = vmatprep.mubr.msk.f32.mxu1 %vm508_vm2, %v487_v1 }
  0x93   : > { %6372 = vmatmul.mubr.msk.f32.gmra.mrb[62].mxu1 %vm508_vm2, %v488_v2 }
  0x94   : > { %6374 = vmatprep.mubr.msk.f32.mxu1 %vm508_vm2, %v6792_v14 }
  0x97   : > { %6375 = vmatmul.mubr.msk.f32.gmra.mrb[64].mxu1 %vm508_vm2, %v6795_v15 }
  0x98   : > { %6377 = vmatprep.mubr.msk.f32.mxu1 %vm508_vm2, %v6800_v16 }
  0x9b   : > { %6378 = vmatmul.mubr.msk.f32.gmra.mrb[66].mxu1 %vm508_vm2, %v6814_v18 }
  0x9c   : > { %6380 = vmatprep.mubr.msk.f32.mxu1 %vm508_vm2, %v6822_v20 }
  0x9f   : > { %6381 = vmatmul.mubr.msk.f32.gmra.mrb[68].mxu1 %vm508_vm2, %v6836_v22 }
  0xa0   : > { %6383 = vmatprep.mubr.msk.f32.mxu1 %vm508_vm2, %v6842_v24 }
  0xa3   : > { %6384 = vmatmul.mubr.msk.f32.gmra.mrb[70].mxu1 %vm508_vm2, %v6856_v26 }
  0xa4   : > { %6386 = vmatprep.mubr.msk.f32.mxu1 %vm508_vm2, %v6862_v28 }
  0xa7   : > { %6387 = vmatmul.mubr.msk.f32.gmra.mrb[72].mxu1 %vm508_vm2, %v6876_v30 }
  0xa8   : > { %6389 = vmatprep.mubr.msk.f32.mxu1 %vm508_vm2, %v6882_v32 }
  0xab   : > { %6390 = vmatmul.mubr.msk.f32.gmra.mrb[74].mxu1 %vm508_vm2, %v6896_v34 }
  0xac   : > { %6392 = vmatprep.mubr.msk.f32.mxu1 %vm508_vm2, %v6902_v36 }
  0xaf   : > { %6393 = vmatmul.mubr.msk.f32.gmra.mrb[76].mxu1 %vm508_vm2, %v6916_v38 }
  0xb0   : > { %6395 = vmatprep.mubr.msk.f32.mxu1 %vm508_vm2, %v6922_v40 }
  0xb3   : > { %6396 = vmatmul.mubr.msk.f32.gmra.mrb[78].mxu1 %vm508_vm2, %v6936_v42 }
  0xe7   : > { %v7118_v3 = vpop.f32.mrb[0].mxu0 }
  0xe8   : > { %v1479_v4 = vsel %vm1477_vm3, %v7118_v3, 0.0  ;;  %v1740_v5 = vmul.f32 %v7118_v3, %v7118_v3  ;;  %v7124_v6 = vpop.f32.mrb[1].mxu0 }
  0xe9   : > { %v1478_v7 = vsel %vm1477_vm3, %v7124_v6, 0.0  ;;  %v1739_v8 = vmul.f32 %v7124_v6, %v7124_v6 }
  0xea   : > { %v1868_v9 = vsel %vm1477_vm3, %v1740_v5, 0.0  ;;  %v1480_v10 = vadd.f32 %v1479_v4, %v1478_v7  ;;  %v7175_v46 = vpop.f32.mrb[0].mxu1 }
  0xeb   : > { %v1867_v11 = vsel %vm1477_vm3, %v1739_v8, 0.0  ;;  %v7132_v12 = vpop.f32.mrb[2].mxu0  ;;  %11854 = vst [vmem:[#allocation6_spill] sm:$0xff] %v7175_v46  ;;  %v7179_v50 = vpop.f32.mrb[1].mxu1 }
  0xec   : > { %v1869_v13 = vadd.f32 %v1868_v9, %v1867_v11  ;;  %v7134_v14 = vpop.f32.mrb[3].mxu0  ;;  %v1742_v15 = vmul.f32 %v7132_v12, %v7132_v12  ;;  %v1483_v19 = vsel %vm1477_vm3, %v7132_v12, 0.0  ;;  %11856 = vst [vmem:[#allocation8_spill] sm:$0xff] %v7179_v50 }
  0xed   : > { %v1481_v16 = vsel %vm1477_vm3, %v7134_v14, 0.0  ;;  %v1741_v17 = vmul.f32 %v7134_v14, %v7134_v14 }
  0xee   : > { %v1482_v18 = vadd.f32 %v1481_v16, %v1480_v10  ;;  %v1872_v25 = vsel %vm1477_vm3, %v1742_v15, 0.0  ;;  %v7193_v60 = vpop.f32.mrb[2].mxu1 }
  0xef   : > { %v1870_v20 = vsel %vm1477_vm3, %v1741_v17, 0.0  ;;  %v7145_v21 = vpop.f32.mrb[4].mxu0  ;;  %11858 = vst [vmem:[#allocation10_spill] sm:$0xff] %v7193_v60  ;;  %v7197_v0 = vpop.f32.mrb[3].mxu1 }
  0xf0   : > { %11850 = vst [vmem:[#allocation2_spill] sm:$0xff] %v7145_v21  ;;  %v1484_v22 = vadd.f32 %v1483_v19, %v1482_v18  ;;  %v1871_v23 = vadd.f32 %v1870_v20, %v1869_v13  ;;  %v7147_v24 = vpop.f32.mrb[5].mxu0  ;;  %v1744_v26 = vmul.f32 %v7145_v21, %v7145_v21  ;;  %v1487_v31 = vsel %vm1477_vm3, %v7145_v21, 0.0  ;;  %11860 = vst [vmem:[#allocation12_spill] sm:$0xff] %v7197_v0 }
  0xf1   : > { %v1485_v27 = vsel %vm1477_vm3, %v7147_v24, 0.0  ;;  %v1743_v28 = vmul.f32 %v7147_v24, %v7147_v24 }
  0xf2   : > { %v1873_v29 = vadd.f32 %v1872_v25, %v1871_v23  ;;  %v1486_v30 = vadd.f32 %v1485_v27, %v1484_v22  ;;  %v1876_v37 = vsel %vm1477_vm3, %v1744_v26, 0.0  ;;  %v7211_v13 = vpop.f32.mrb[4].mxu1 }
  0xf3   : > { %v1874_v32 = vsel %vm1477_vm3, %v1743_v28, 0.0  ;;  %v7159_v33 = vpop.f32.mrb[6].mxu0  ;;  %11862 = vst [vmem:[#allocation14_spill] sm:$0xff] %v7211_v13  ;;  %v7215_v18 = vpop.f32.mrb[5].mxu1 }
  0xf4   : > { %11851 = vst [vmem:[#allocation3_spill] sm:$0xff] %v7159_v33  ;;  %v1488_v34 = vadd.f32 %v1487_v31, %v1486_v30  ;;  %v1875_v35 = vadd.f32 %v1874_v32, %v1873_v29  ;;  %v7161_v36 = vpop.f32.mrb[7].mxu0  ;;  %v1746_v38 = vmul.f32 %v7159_v33, %v7159_v33  ;;  %v1491_v43 = vsel %vm1477_vm3, %v7159_v33, 0.0  ;;  %11864 = vst [vmem:[#allocation16_spill] sm:$0xff] %v7215_v18 }
  0xf5   : > { %11852 = vst [vmem:[#allocation4_spill] sm:$0xff] %v7161_v36  ;;  %v1489_v39 = vsel %vm1477_vm3, %v7161_v36, 0.0  ;;  %v1745_v40 = vmul.f32 %v7161_v36, %v7161_v36 }
  0xf6   : > { %v1877_v41 = vadd.f32 %v1876_v37, %v1875_v35  ;;  %v1490_v42 = vadd.f32 %v1489_v39, %v1488_v34  ;;  %v1880_v51 = vsel %vm1477_vm3, %v1746_v38, 0.0  ;;  %v7229_v30 = vpop.f32.mrb[6].mxu1 }
  0xf7   : > { %v1878_v44 = vsel %vm1477_vm3, %v1745_v40, 0.0  ;;  %v7173_v45 = vpop.f32.mrb[8].mxu0  ;;  %11866 = vst [vmem:[#allocation18_spill] sm:$0xff] %v7229_v30  ;;  %v7233_v35 = vpop.f32.mrb[7].mxu1 }
  0xf8   : > { %11853 = vst [vmem:[#allocation5_spill] sm:$0xff] %v7173_v45  ;;  %v1492_v47 = vadd.f32 %v1491_v43, %v1490_v42  ;;  %v1879_v48 = vadd.f32 %v1878_v44, %v1877_v41  ;;  %v7177_v49 = vpop.f32.mrb[9].mxu0  ;;  %v1748_v52 = vmul.f32 %v7173_v45, %v7173_v45  ;;  %v1495_v57 = vsel %vm1477_vm3, %v7173_v45, 0.0  ;;  %11868 = vst [vmem:[#allocation20_spill] sm:$0xff] %v7233_v35 }
  0xf9   : > { %11855 = vst [vmem:[#allocation7_spill] sm:$0xff] %v7177_v49  ;;  %v1493_v53 = vsel %vm1477_vm3, %v7177_v49, 0.0  ;;  %v1747_v54 = vmul.f32 %v7177_v49, %v7177_v49  ;;  %v1787_v49 = vmul.f32 %v7179_v50, %v7179_v50 }
  0xfa   : > { %v1881_v55 = vadd.f32 %v1880_v51, %v1879_v48  ;;  %v1494_v56 = vadd.f32 %v1493_v53, %v1492_v47  ;;  %v1884_v1 = vsel %vm1477_vm3, %v1748_v52, 0.0  ;;  %v7247_v48 = vpop.f32.mrb[8].mxu1 }
  0xfb   : > { %v1882_v58 = vsel %vm1477_vm3, %v1747_v54, 0.0  ;;  %v7191_v59 = vpop.f32.mrb[10].mxu0  ;;  %11870 = vst [vmem:[#allocation22_spill] sm:$0xff] %v7247_v48  ;;  %v7251_v54 = vpop.f32.mrb[9].mxu1 }
  0xfc   : > { %11857 = vst [vmem:[#allocation9_spill] sm:$0xff] %v7191_v59  ;;  %v1496_v61 = vadd.f32 %v1495_v57, %v1494_v56  ;;  %v1883_v62 = vadd.f32 %v1882_v58, %v1881_v55  ;;  %v7195_v63 = vpop.f32.mrb[11].mxu0  ;;  %v1750_v2 = vmul.f32 %v7191_v59, %v7191_v59  ;;  %v1499_v9 = vsel %vm1477_vm3, %v7191_v59, 0.0  ;;  %11872 = vst [vmem:[#allocation24_spill] sm:$0xff] %v7251_v54 }
  0xfd   : > { %11859 = vst [vmem:[#allocation11_spill] sm:$0xff] %v7195_v63  ;;  %v1497_v4 = vsel %vm1477_vm3, %v7195_v63, 0.0  ;;  %v1749_v5 = vmul.f32 %v7195_v63, %v7195_v63 }
  0xfe   : > { %v1885_v7 = vadd.f32 %v1884_v1, %v1883_v62  ;;  %v1498_v8 = vadd.f32 %v1497_v4, %v1496_v61  ;;  %v1888_v19 = vsel %vm1477_vm3, %v1750_v2, 0.0 }
  0xff   : > { %v1886_v10 = vsel %vm1477_vm3, %v1749_v5, 0.0  ;;  %v7209_v11 = vpop.f32.mrb[12].mxu0  ;;  %v7265_v5 = vpop.f32.mrb[10].mxu1 }
 0x100   : > { %11861 = vst [vmem:[#allocation13_spill] sm:$0xff] %v7209_v11  ;;  %v1500_v15 = vadd.f32 %v1499_v9, %v1498_v8  ;;  %v1887_v16 = vadd.f32 %v1886_v10, %v1885_v7  ;;  %v7213_v17 = vpop.f32.mrb[13].mxu0  ;;  %v1752_v20 = vmul.f32 %v7209_v11, %v7209_v11  ;;  %v1503_v27 = vsel %vm1477_vm3, %v7209_v11, 0.0  ;;  %11874 = vst [vmem:[#allocation26_spill] sm:$0xff] %v7265_v5  ;;  %v7269_v10 = vpop.f32.mrb[11].mxu1 }
 0x101   : > { %11863 = vst [vmem:[#allocation15_spill] sm:$0xff] %v7213_v17  ;;  %v1501_v22 = vsel %vm1477_vm3, %v7213_v17, 0.0  ;;  %v1751_v23 = vmul.f32 %v7213_v17, %v7213_v17  ;;  %11876 = vst [vmem:[#allocation28_spill] sm:$0xff] %v7269_v10 }
 0x102   : > { %v1889_v25 = vadd.f32 %v1888_v19, %v1887_v16  ;;  %v1502_v26 = vadd.f32 %v1501_v22, %v1500_v15  ;;  %v1892_v37 = vsel %vm1477_vm3, %v1752_v20, 0.0 }
 0x103   : > { %v1890_v28 = vsel %vm1477_vm3, %v1751_v23, 0.0  ;;  %v7227_v29 = vpop.f32.mrb[14].mxu0 }
 0x104   : > { %11865 = vst [vmem:[#allocation17_spill] sm:$0xff] %v7227_v29  ;;  %v1504_v31 = vadd.f32 %v1503_v27, %v1502_v26  ;;  %v1891_v32 = vadd.f32 %v1890_v28, %v1889_v25  ;;  %v7231_v34 = vpop.f32.mrb[15].mxu0  ;;  %v1754_v38 = vmul.f32 %v7227_v29, %v7227_v29  ;;  %v1507_v43 = vsel %vm1477_vm3, %v7227_v29, 0.0  ;;  %v7283_v28 = vpop.f32.mrb[12].mxu1 }
 0x105   : > { %11867 = vst [vmem:[#allocation19_spill] sm:$0xff] %v7231_v34  ;;  %v1505_v39 = vsel %vm1477_vm3, %v7231_v34, 0.0  ;;  %v1753_v40 = vmul.f32 %v7231_v34, %v7231_v34  ;;  %11878 = vst [vmem:[#allocation30_spill] sm:$0xff] %v7283_v28 }
 0x106   : > { %v1893_v41 = vadd.f32 %v1892_v37, %v1891_v32  ;;  %v1506_v42 = vadd.f32 %v1505_v39, %v1504_v31  ;;  %v1896_v55 = vsel %vm1477_vm3, %v1754_v38, 0.0  ;;  %v7287_v38 = vpop.f32.mrb[13].mxu1 }
 0x107   : > { %v1894_v44 = vsel %vm1477_vm3, %v1753_v40, 0.0  ;;  %v7245_v47 = vpop.f32.mrb[16].mxu0  ;;  %11880 = vst [vmem:[#allocation32_spill] sm:$0xff] %v7287_v38 }
 0x108   : > { %11869 = vst [vmem:[#allocation21_spill] sm:$0xff] %v7245_v47  ;;  %v1508_v51 = vadd.f32 %v1507_v43, %v1506_v42  ;;  %v1895_v52 = vadd.f32 %v1894_v44, %v1893_v41  ;;  %v7249_v53 = vpop.f32.mrb[17].mxu0  ;;  %v1756_v56 = vmul.f32 %v7245_v47, %v7245_v47  ;;  %v1511_v1 = vsel %vm1477_vm3, %v7245_v47, 0.0 }
 0x109   : > { %11871 = vst [vmem:[#allocation23_spill] sm:$0xff] %v7249_v53  ;;  %v1509_v57 = vsel %vm1477_vm3, %v7249_v53, 0.0  ;;  %v1755_v58 = vmul.f32 %v7249_v53, %v7249_v53 }
 0x10a   : > { %v1897_v61 = vadd.f32 %v1896_v55, %v1895_v52  ;;  %v1510_v62 = vadd.f32 %v1509_v57, %v1508_v51  ;;  %v1900_v15 = vsel %vm1477_vm3, %v1756_v56, 0.0  ;;  %v7301_v56 = vpop.f32.mrb[14].mxu1 }
 0x10b   : > { %v1898_v2 = vsel %vm1477_vm3, %v1755_v58, 0.0  ;;  %v7263_v4 = vpop.f32.mrb[18].mxu0  ;;  %11882 = vst [vmem:[#allocation34_spill] sm:$0xff] %v7301_v56 }
 0x10c   : > { %11873 = vst [vmem:[#allocation25_spill] sm:$0xff] %v7263_v4  ;;  %v1512_v7 = vadd.f32 %v1511_v1, %v1510_v62  ;;  %v1899_v8 = vadd.f32 %v1898_v2, %v1897_v61  ;;  %v7267_v9 = vpop.f32.mrb[19].mxu0  ;;  %v1758_v16 = vmul.f32 %v7263_v4, %v7263_v4  ;;  %v1515_v25 = vsel %vm1477_vm3, %v7263_v4, 0.0  ;;  %v7305_v62 = vpop.f32.mrb[15].mxu1 }
 0x10d   : > { %11875 = vst [vmem:[#allocation27_spill] sm:$0xff] %v7267_v9  ;;  %v1513_v19 = vsel %vm1477_vm3, %v7267_v9, 0.0  ;;  %v1757_v20 = vmul.f32 %v7267_v9, %v7267_v9  ;;  %11884 = vst [vmem:[#allocation36_spill] sm:$0xff] %v7305_v62 }
 0x10e   : > { %v1901_v22 = vadd.f32 %v1900_v15, %v1899_v8  ;;  %v1514_v23 = vadd.f32 %v1513_v19, %v1512_v7  ;;  %v1904_v39 = vsel %vm1477_vm3, %v1758_v16, 0.0 }
 0x10f   : > { %v1902_v26 = vsel %vm1477_vm3, %v1757_v20, 0.0  ;;  %v7281_v27 = vpop.f32.mrb[20].mxu0 }
 0x110   : > { %11877 = vst [vmem:[#allocation29_spill] sm:$0xff] %v7281_v27  ;;  %v1516_v31 = vadd.f32 %v1515_v25, %v1514_v23  ;;  %v1903_v32 = vadd.f32 %v1902_v26, %v1901_v22  ;;  %v7285_v37 = vpop.f32.mrb[21].mxu0  ;;  %v1760_v40 = vmul.f32 %v7281_v27, %v7281_v27  ;;  %v1519_v51 = vsel %vm1477_vm3, %v7281_v27, 0.0  ;;  %v7319_v23 = vpop.f32.mrb[16].mxu1 }
 0x111   : > { %11879 = vst [vmem:[#allocation31_spill] sm:$0xff] %v7285_v37  ;;  %v1517_v41 = vsel %vm1477_vm3, %v7285_v37, 0.0  ;;  %v1759_v42 = vmul.f32 %v7285_v37, %v7285_v37  ;;  %11886 = vst [vmem:[#allocation38_spill] sm:$0xff] %v7319_v23 }
 0x112   : > { %v1905_v43 = vadd.f32 %v1904_v39, %v1903_v32  ;;  %v1518_v44 = vadd.f32 %v1517_v41, %v1516_v31  ;;  %v1908_v1 = vsel %vm1477_vm3, %v1760_v40, 0.0  ;;  %v7323_v32 = vpop.f32.mrb[17].mxu1 }
 0x113   : > { %v1906_v52 = vsel %vm1477_vm3, %v1759_v42, 0.0  ;;  %v7299_v55 = vpop.f32.mrb[22].mxu0  ;;  %11888 = vst [vmem:[#allocation40_spill] sm:$0xff] %v7323_v32 }
 0x114   : > { %11881 = vst [vmem:[#allocation33_spill] sm:$0xff] %v7299_v55  ;;  %v1520_v57 = vadd.f32 %v1519_v51, %v1518_v44  ;;  %v1907_v58 = vadd.f32 %v1906_v52, %v1905_v43  ;;  %v7303_v61 = vpop.f32.mrb[23].mxu0  ;;  %v1762_v2 = vmul.f32 %v7299_v55, %v7299_v55  ;;  %v1523_v19 = vsel %vm1477_vm3, %v7299_v55, 0.0 }
 0x115   : > { %11883 = vst [vmem:[#allocation35_spill] sm:$0xff] %v7303_v61  ;;  %v1521_v7 = vsel %vm1477_vm3, %v7303_v61, 0.0  ;;  %v1761_v8 = vmul.f32 %v7303_v61, %v7303_v61 }
 0x116   : > { %v1909_v15 = vadd.f32 %v1908_v1, %v1907_v58  ;;  %v1522_v16 = vadd.f32 %v1521_v7, %v1520_v57  ;;  %v1912_v39 = vsel %vm1477_vm3, %v1762_v2, 0.0  ;;  %v7337_v58 = vpop.f32.mrb[18].mxu1 }
 0x117   : > { %v1910_v20 = vsel %vm1477_vm3, %v1761_v8, 0.0  ;;  %v7317_v22 = vpop.f32.mrb[24].mxu0  ;;  %11890 = vst [vmem:[#allocation42_spill] sm:$0xff] %v7337_v58  ;;  %v7341_v8 = vpop.f32.mrb[19].mxu1 }
 0x118   : > { %11885 = vst [vmem:[#allocation37_spill] sm:$0xff] %v7317_v22  ;;  %v1524_v25 = vadd.f32 %v1523_v19, %v1522_v16  ;;  %v1911_v26 = vadd.f32 %v1910_v20, %v1909_v15  ;;  %v7321_v31 = vpop.f32.mrb[25].mxu0  ;;  %v1764_v40 = vmul.f32 %v7317_v22, %v7317_v22  ;;  %v1527_v51 = vsel %vm1477_vm3, %v7317_v22, 0.0  ;;  %11892 = vst [vmem:[#allocation44_spill] sm:$0xff] %v7341_v8 }
 0x119   : > { %11887 = vst [vmem:[#allocation39_spill] sm:$0xff] %v7321_v31  ;;  %v1525_v41 = vsel %vm1477_vm3, %v7321_v31, 0.0  ;;  %v1763_v42 = vmul.f32 %v7321_v31, %v7321_v31 }
 0x11a   : > { %v1913_v43 = vadd.f32 %v1912_v39, %v1911_v26  ;;  %v1526_v44 = vadd.f32 %v1525_v41, %v1524_v25  ;;  %v1916_v15 = vsel %vm1477_vm3, %v1764_v40, 0.0 }
 0x11b   : > { %v1914_v52 = vsel %vm1477_vm3, %v1763_v42, 0.0  ;;  %v7335_v57 = vpop.f32.mrb[26].mxu0 }
 0x11c   : > { %11889 = vst [vmem:[#allocation41_spill] sm:$0xff] %v7335_v57  ;;  %v1528_v1 = vadd.f32 %v1527_v51, %v1526_v44  ;;  %v1915_v2 = vadd.f32 %v1914_v52, %v1913_v43  ;;  %v7339_v7 = vpop.f32.mrb[27].mxu0  ;;  %v1766_v16 = vmul.f32 %v7335_v57, %v7335_v57  ;;  %v1531_v39 = vsel %vm1477_vm3, %v7335_v57, 0.0  ;;  %v7355_v43 = vpop.f32.mrb[20].mxu1 }
 0x11d   : > { %11891 = vst [vmem:[#allocation43_spill] sm:$0xff] %v7339_v7  ;;  %v1529_v19 = vsel %vm1477_vm3, %v7339_v7, 0.0  ;;  %v1765_v20 = vmul.f32 %v7339_v7, %v7339_v7  ;;  %11894 = vst [vmem:[#allocation46_spill] sm:$0xff] %v7355_v43  ;;  %v7359_v52 = vpop.f32.mrb[21].mxu1 }
 0x11e   : > { %v1917_v25 = vadd.f32 %v1916_v15, %v1915_v2  ;;  %v1530_v26 = vadd.f32 %v1529_v19, %v1528_v1  ;;  %11896 = vst [vmem:[#allocation48_spill] sm:$0xff] %v7359_v52  ;;  %v1920_v22 = vsel %vm1477_vm3, %v1766_v16, 0.0 }
 0x11f   : > { %v1918_v41 = vsel %vm1477_vm3, %v1765_v20, 0.0  ;;  %v7353_v42 = vpop.f32.mrb[28].mxu0 }
 0x120   : > { %11893 = vst [vmem:[#allocation45_spill] sm:$0xff] %v7353_v42  ;;  %v1532_v40 = vadd.f32 %v1531_v39, %v1530_v26  ;;  %v1919_v44 = vadd.f32 %v1918_v41, %v1917_v25  ;;  %v7357_v51 = vpop.f32.mrb[29].mxu0  ;;  %v1768_v1 = vmul.f32 %v7353_v42, %v7353_v42  ;;  %v1535_v25 = vsel %vm1477_vm3, %v7353_v42, 0.0  ;;  %v7373_v41 = vpop.f32.mrb[22].mxu1 }
 0x121   : > { %11895 = vst [vmem:[#allocation47_spill] sm:$0xff] %v7357_v51  ;;  %v1533_v2 = vsel %vm1477_vm3, %v7357_v51, 0.0  ;;  %v1767_v15 = vmul.f32 %v7357_v51, %v7357_v51  ;;  %11898 = vst [vmem:[#allocation50_spill] sm:$0xff] %v7373_v41  ;;  %v7377_v31 = vpop.f32.mrb[23].mxu1 }
 0x122   : > { %v1921_v19 = vadd.f32 %v1920_v22, %v1919_v44  ;;  %v1534_v20 = vadd.f32 %v1533_v2, %v1532_v40  ;;  %11900 = vst [vmem:[#allocation52_spill] sm:$0xff] %v7377_v31  ;;  %v1924_v55 = vsel %vm1477_vm3, %v1768_v1, 0.0 }
 0x123   : > { %v1922_v26 = vsel %vm1477_vm3, %v1767_v15, 0.0  ;;  %v7371_v39 = vpop.f32.mrb[30].mxu0 }
 0x124   : > { %11897 = vst [vmem:[#allocation49_spill] sm:$0xff] %v7371_v39  ;;  %v1536_v16 = vadd.f32 %v1535_v25, %v1534_v20  ;;  %v1923_v57 = vadd.f32 %v1922_v26, %v1921_v19  ;;  %v7375_v7 = vpop.f32.mrb[31].mxu0  ;;  %v1770_v22 = vmul.f32 %v7371_v39, %v7371_v39  ;;  %v1539_v19 = vsel %vm1477_vm3, %v7371_v39, 0.0  ;;  %v7391_v26 = vpop.f32.mrb[24].mxu1 }
 0x125   : > { %11899 = vst [vmem:[#allocation51_spill] sm:$0xff] %v7375_v7  ;;  %v1537_v40 = vsel %vm1477_vm3, %v7375_v7, 0.0  ;;  %v1769_v44 = vmul.f32 %v7375_v7, %v7375_v7  ;;  %11902 = vst [vmem:[#allocation54_spill] sm:$0xff] %v7391_v26  ;;  %v7395_v61 = vpop.f32.mrb[25].mxu1 }
 0x126   : > { %v1925_v2 = vadd.f32 %v1924_v55, %v1923_v57  ;;  %v1538_v15 = vadd.f32 %v1537_v40, %v1536_v16  ;;  %11904 = vst [vmem:[#allocation56_spill] sm:$0xff] %v7395_v61  ;;  %v1928_v27 = vsel %vm1477_vm3, %v1770_v22, 0.0 }
 0x127   : > { %v1926_v20 = vsel %vm1477_vm3, %v1769_v44, 0.0  ;;  %v7389_v25 = vpop.f32.mrb[32].mxu0 }
 0x128   : > { %11901 = vst [vmem:[#allocation53_spill] sm:$0xff] %v7389_v25  ;;  %v1540_v1 = vadd.f32 %v1539_v19, %v1538_v15  ;;  %v1927_v42 = vadd.f32 %v1926_v20, %v1925_v2  ;;  %v7393_v51 = vpop.f32.mrb[33].mxu0  ;;  %v1772_v55 = vmul.f32 %v7389_v25, %v7389_v25  ;;  %v1543_v2 = vsel %vm1477_vm3, %v7389_v25, 0.0  ;;  %v7409_v20 = vpop.f32.mrb[26].mxu1 }
 0x129   : > { %11903 = vst [vmem:[#allocation55_spill] sm:$0xff] %v7393_v51  ;;  %v1541_v57 = vsel %vm1477_vm3, %v7393_v51, 0.0  ;;  %v1771_v16 = vmul.f32 %v7393_v51, %v7393_v51  ;;  %11906 = vst [vmem:[#allocation58_spill] sm:$0xff] %v7409_v20  ;;  %v7413_v37 = vpop.f32.mrb[27].mxu1 }
 0x12a   : > { %v1929_v40 = vadd.f32 %v1928_v27, %v1927_v42  ;;  %v1542_v44 = vadd.f32 %v1541_v57, %v1540_v1  ;;  %11908 = vst [vmem:[#allocation60_spill] sm:$0xff] %v7413_v37  ;;  %v1932_v4 = vsel %vm1477_vm3, %v1772_v55, 0.0 }
 0x12b   : > { %v1930_v15 = vsel %vm1477_vm3, %v1771_v16, 0.0  ;;  %v7407_v19 = vpop.f32.mrb[34].mxu0 }
 0x12c   : > { %11905 = vst [vmem:[#allocation57_spill] sm:$0xff] %v7407_v19  ;;  %v1544_v22 = vadd.f32 %v1543_v2, %v1542_v44  ;;  %v1931_v39 = vadd.f32 %v1930_v15, %v1929_v40  ;;  %v7411_v7 = vpop.f32.mrb[35].mxu0  ;;  %v1774_v27 = vmul.f32 %v7407_v19, %v7407_v19  ;;  %v1547_v40 = vsel %vm1477_vm3, %v7407_v19, 0.0  ;;  %v7427_v15 = vpop.f32.mrb[28].mxu1 }
 0x12d   : > { %11907 = vst [vmem:[#allocation59_spill] sm:$0xff] %v7411_v7  ;;  %v1545_v42 = vsel %vm1477_vm3, %v7411_v7, 0.0  ;;  %v1773_v1 = vmul.f32 %v7411_v7, %v7411_v7  ;;  %11910 = vst [vmem:[#allocation62_spill] sm:$0xff] %v7427_v15  ;;  %v7431_v9 = vpop.f32.mrb[29].mxu1 }
 0x12e   : > { %v1933_v57 = vadd.f32 %v1932_v4, %v1931_v39  ;;  %v1546_v16 = vadd.f32 %v1545_v42, %v1544_v22  ;;  %11912 = vst [vmem:[#allocation64_spill] sm:$0xff] %v7431_v9  ;;  %v1936_v47 = vsel %vm1477_vm3, %v1774_v27, 0.0 }
 0x12f   : > { %v1934_v44 = vsel %vm1477_vm3, %v1773_v1, 0.0  ;;  %v7425_v2 = vpop.f32.mrb[36].mxu0 }
 0x130   : > { %11909 = vst [vmem:[#allocation61_spill] sm:$0xff] %v7425_v2  ;;  %v1548_v55 = vadd.f32 %v1547_v40, %v1546_v16  ;;  %v1935_v25 = vadd.f32 %v1934_v44, %v1933_v57  ;;  %v7429_v51 = vpop.f32.mrb[37].mxu0  ;;  %v1776_v4 = vmul.f32 %v7425_v2, %v7425_v2  ;;  %v1551_v57 = vsel %vm1477_vm3, %v7425_v2, 0.0  ;;  %v7445_v44 = vpop.f32.mrb[30].mxu1 }
 0x131   : > { %11911 = vst [vmem:[#allocation63_spill] sm:$0xff] %v7429_v51  ;;  %v1549_v39 = vsel %vm1477_vm3, %v7429_v51, 0.0  ;;  %v1775_v22 = vmul.f32 %v7429_v51, %v7429_v51  ;;  %11914 = vst [vmem:[#allocation66_spill] sm:$0xff] %v7445_v44  ;;  %v7449_v53 = vpop.f32.mrb[31].mxu1 }
 0x132   : > { %v1937_v42 = vadd.f32 %v1936_v47, %v1935_v25  ;;  %v1550_v1 = vadd.f32 %v1549_v39, %v1548_v55  ;;  %11916 = vst [vmem:[#allocation68_spill] sm:$0xff] %v7449_v53  ;;  %v1940_v29 = vsel %vm1477_vm3, %v1776_v4, 0.0 }
 0x133   : > { %v1938_v16 = vsel %vm1477_vm3, %v1775_v22, 0.0  ;;  %v7443_v40 = vpop.f32.mrb[38].mxu0 }
 0x134   : > { %11913 = vst [vmem:[#allocation65_spill] sm:$0xff] %v7443_v40  ;;  %v1552_v27 = vadd.f32 %v1551_v57, %v1550_v1  ;;  %v1939_v19 = vadd.f32 %v1938_v16, %v1937_v42  ;;  %v7447_v7 = vpop.f32.mrb[39].mxu0  ;;  %v1778_v47 = vmul.f32 %v7443_v40, %v7443_v40  ;;  %v1555_v42 = vsel %vm1477_vm3, %v7443_v40, 0.0  ;;  %v7463_v16 = vpop.f32.mrb[32].mxu1 }
 0x135   : > { %11915 = vst [vmem:[#allocation67_spill] sm:$0xff] %v7447_v7  ;;  %v1553_v25 = vsel %vm1477_vm3, %v7447_v7, 0.0  ;;  %v1777_v55 = vmul.f32 %v7447_v7, %v7447_v7  ;;  %11918 = vst [vmem:[#allocation70_spill] sm:$0xff] %v7463_v16  ;;  %v7467_v34 = vpop.f32.mrb[33].mxu1 }
 0x136   : > { %v1941_v39 = vadd.f32 %v1940_v29, %v1939_v19  ;;  %v1554_v22 = vadd.f32 %v1553_v25, %v1552_v27  ;;  %11920 = vst [vmem:[#allocation72_spill] sm:$0xff] %v7467_v34  ;;  %v1944_v11 = vsel %vm1477_vm3, %v1778_v47, 0.0 }
 0x137   : > { %v1942_v1 = vsel %vm1477_vm3, %v1777_v55, 0.0  ;;  %v7461_v57 = vpop.f32.mrb[40].mxu0 }
 0x138   : > { %11917 = vst [vmem:[#allocation69_spill] sm:$0xff] %v7461_v57  ;;  %v1556_v4 = vadd.f32 %v1555_v42, %v1554_v22  ;;  %v1943_v2 = vadd.f32 %v1942_v1, %v1941_v39  ;;  %v7465_v51 = vpop.f32.mrb[41].mxu0  ;;  %v1780_v29 = vmul.f32 %v7461_v57, %v7461_v57  ;;  %v1559_v39 = vsel %vm1477_vm3, %v7461_v57, 0.0  ;;  %v7481_v1 = vpop.f32.mrb[34].mxu1 }
 0x139   : > { %11919 = vst [vmem:[#allocation71_spill] sm:$0xff] %v7465_v51  ;;  %v1557_v19 = vsel %vm1477_vm3, %v7465_v51, 0.0  ;;  %v1779_v27 = vmul.f32 %v7465_v51, %v7465_v51  ;;  %11922 = vst [vmem:[#allocation74_spill] sm:$0xff] %v7481_v1  ;;  %v7485_v17 = vpop.f32.mrb[35].mxu1 }
 0x13a   : > { %v1945_v25 = vadd.f32 %v1944_v11, %v1943_v2  ;;  %v1558_v55 = vadd.f32 %v1557_v19, %v1556_v4  ;;  %11924 = vst [vmem:[#allocation76_spill] sm:$0xff] %v7485_v17  ;;  %v1948_v59 = vsel %vm1477_vm3, %v1780_v29, 0.0 }
 0x13b   : > { %v1946_v22 = vsel %vm1477_vm3, %v1779_v27, 0.0  ;;  %v7479_v42 = vpop.f32.mrb[42].mxu0 }
 0x13c   : > { %11921 = vst [vmem:[#allocation73_spill] sm:$0xff] %v7479_v42  ;;  %v1560_v47 = vadd.f32 %v1559_v39, %v1558_v55  ;;  %v1947_v40 = vadd.f32 %v1946_v22, %v1945_v25  ;;  %v7483_v7 = vpop.f32.mrb[43].mxu0  ;;  %v1782_v11 = vmul.f32 %v7479_v42, %v7479_v42  ;;  %v1563_v25 = vsel %vm1477_vm3, %v7479_v42, 0.0  ;;  %v7499_v22 = vpop.f32.mrb[36].mxu1 }
 0x13d   : > { %11923 = vst [vmem:[#allocation75_spill] sm:$0xff] %v7483_v7  ;;  %v1561_v2 = vsel %vm1477_vm3, %v7483_v7, 0.0  ;;  %v1781_v4 = vmul.f32 %v7483_v7, %v7483_v7  ;;  %11926 = vst [vmem:[#allocation78_spill] sm:$0xff] %v7499_v22  ;;  %v7503_v63 = vpop.f32.mrb[37].mxu1 }
 0x13e   : > { %v1949_v19 = vadd.f32 %v1948_v59, %v1947_v40  ;;  %v1562_v27 = vadd.f32 %v1561_v2, %v1560_v47  ;;  %11928 = vst [vmem:[#allocation80_spill] sm:$0xff] %v7503_v63  ;;  %v1952_v45 = vsel %vm1477_vm3, %v1782_v11, 0.0 }
 0x13f   : > { %v1950_v55 = vsel %vm1477_vm3, %v1781_v4, 0.0  ;;  %v7497_v39 = vpop.f32.mrb[44].mxu0 }
 0x140   : > { %11925 = vst [vmem:[#allocation77_spill] sm:$0xff] %v7497_v39  ;;  %v1564_v29 = vadd.f32 %v1563_v25, %v1562_v27  ;;  %v1951_v57 = vadd.f32 %v1950_v55, %v1949_v19  ;;  %v7501_v51 = vpop.f32.mrb[45].mxu0  ;;  %v1784_v59 = vmul.f32 %v7497_v39, %v7497_v39  ;;  %v1567_v19 = vsel %vm1477_vm3, %v7497_v39, 0.0  ;;  %v7517_v55 = vpop.f32.mrb[38].mxu1 }
 0x141   : > { %11927 = vst [vmem:[#allocation79_spill] sm:$0xff] %v7501_v51  ;;  %v1565_v40 = vsel %vm1477_vm3, %v7501_v51, 0.0  ;;  %v1783_v47 = vmul.f32 %v7501_v51, %v7501_v51  ;;  %v7523_v33 = vpop.f32.mrb[39].mxu1 }
 0x142   : > { %v1953_v2 = vadd.f32 %v1952_v45, %v1951_v57  ;;  %v1566_v4 = vadd.f32 %v1565_v40, %v1564_v29  ;;  %11930 = vst [vmem:[#allocation82_spill] sm:$0xff] %v7523_v33  ;;  %v1956_v45 = vsel %vm1477_vm3, %v1784_v59, 0.0  ;;  %v7537_v59 = vpop.f32.mrb[40].mxu1 }
 0x143   : > { %v1954_v27 = vsel %vm1477_vm3, %v1783_v47, 0.0  ;;  %v7515_v25 = vpop.f32.mrb[46].mxu0  ;;  %v7539_v36 = vpop.f32.mrb[41].mxu1 }
 0x144   : > { %11929 = vst [vmem:[#allocation81_spill] sm:$0xff] %v7515_v25  ;;  %v1568_v11 = vadd.f32 %v1567_v19, %v1566_v4  ;;  %v1955_v42 = vadd.f32 %v1954_v27, %v1953_v2  ;;  %v7519_v7 = vpop.f32.mrb[47].mxu0  ;;  %v1786_v57 = vmul.f32 %v7515_v25, %v7515_v25  ;;  %v1571_v4 = vsel %vm1477_vm3, %v7515_v25, 0.0 }
 0x145   : > { %v1569_v29 = vsel %vm1477_vm3, %v7519_v7, 0.0  ;;  %v1785_v40 = vmul.f32 %v7519_v7, %v7519_v7  ;;  %v1573_v27 = vsel %vm1477_vm3, %v7179_v50, 0.0  ;;  %v1575_v50 = vsel %vm1477_vm3, %v7175_v46, 0.0 }
 0x146   : > { %v1957_v47 = vadd.f32 %v1956_v45, %v1955_v42  ;;  %v1570_v2 = vadd.f32 %v1569_v29, %v1568_v11  ;;  %v1960_v21 = vsel %vm1477_vm3, %v1786_v57, 0.0  ;;  %v1788_v42 = vmul.f32 %v7175_v46, %v7175_v46 }
 0x147   : > { %v1958_v19 = vsel %vm1477_vm3, %v1785_v40, 0.0  ;;  %v1962_v11 = vsel %vm1477_vm3, %v1787_v49, 0.0  ;;  %v1789_v45 = vmul.f32 %v7197_v0, %v7197_v0  ;;  %v1790_v49 = vmul.f32 %v7193_v60, %v7193_v60 }
 0x148   : > { %v1572_v39 = vadd.f32 %v1571_v4, %v1570_v2  ;;  %v1959_v51 = vadd.f32 %v1958_v19, %v1957_v47  ;;  %v1577_v47 = vsel %vm1477_vm3, %v7197_v0, 0.0  ;;  %v7551_v2 = vpop.f32.mrb[42].mxu1  ;;  %v1964_v25 = vsel %vm1477_vm3, %v1788_v42, 0.0 }
 0x149   : > { %v7553_v19 = vpop.f32.mrb[43].mxu1  ;;  %v1579_v0 = vsel %vm1477_vm3, %v7193_v60, 0.0  ;;  %v1968_v46 = vsel %vm1477_vm3, %v1790_v49, 0.0 }
 0x14a   : > { %v1961_v29 = vadd.f32 %v1960_v21, %v1959_v51  ;;  %v1574_v40 = vadd.f32 %v1573_v27, %v1572_v39  ;;  %v1966_v21 = vsel %vm1477_vm3, %v1789_v45, 0.0  ;;  %v1791_v51 = vmul.f32 %v7215_v18, %v7215_v18 }
 0x14b   : > { %v1792_v45 = vmul.f32 %v7211_v13, %v7211_v13 }
 0x14c   : > { %v1576_v4 = vadd.f32 %v1575_v50, %v1574_v40  ;;  %v1963_v57 = vadd.f32 %v1962_v11, %v1961_v29  ;;  %v1581_v50 = vsel %vm1477_vm3, %v7215_v18, 0.0  ;;  %v7565_v11 = vpop.f32.mrb[44].mxu1  ;;  %v1583_v18 = vsel %vm1477_vm3, %v7211_v13, 0.0 }
 0x14d   : > { %v7567_v40 = vpop.f32.mrb[45].mxu1  ;;  %v1972_v60 = vsel %vm1477_vm3, %v1792_v45, 0.0 }
 0x14e   : > { %v1965_v39 = vadd.f32 %v1964_v25, %v1963_v57  ;;  %v1578_v27 = vadd.f32 %v1577_v47, %v1576_v4  ;;  %v1970_v25 = vsel %vm1477_vm3, %v1791_v51, 0.0  ;;  %v1793_v47 = vmul.f32 %v7233_v35, %v7233_v35 }
 0x14f   : > { %v1794_v51 = vmul.f32 %v7229_v30, %v7229_v30 }
 0x150   : > { %v1580_v29 = vadd.f32 %v1579_v0, %v1578_v27  ;;  %v1967_v42 = vadd.f32 %v1966_v21, %v1965_v39  ;;  %v1585_v0 = vsel %vm1477_vm3, %v7233_v35, 0.0  ;;  %v7579_v21 = vpop.f32.mrb[46].mxu1  ;;  %v1587_v35 = vsel %vm1477_vm3, %v7229_v30, 0.0 }
 0x151   : > { %v7581_v27 = vpop.f32.mrb[47].mxu1  ;;  %v1976_v13 = vsel %vm1477_vm3, %v1794_v51, 0.0 }
 0x152   : > { %v1969_v4 = vadd.f32 %v1968_v46, %v1967_v42  ;;  %v1582_v57 = vadd.f32 %v1581_v50, %v1580_v29  ;;  %v1974_v46 = vsel %vm1477_vm3, %v1793_v47, 0.0  ;;  %v1795_v50 = vmul.f32 %v7251_v54, %v7251_v54 }
 0x153   : > { %v1796_v47 = vmul.f32 %v7247_v48, %v7247_v48 }
 0x154   : > { %v1584_v39 = vadd.f32 %v1583_v18, %v1582_v57  ;;  %v1971_v49 = vadd.f32 %v1970_v25, %v1969_v4  ;;  %v1589_v18 = vsel %vm1477_vm3, %v7251_v54, 0.0  ;;  %v7593_v25 = vpop.f32.mrb[48].mxu1  ;;  %v1591_v54 = vsel %vm1477_vm3, %v7247_v48, 0.0 }
 0x155   : > { %v7595_v57 = vpop.f32.mrb[49].mxu1  ;;  %v1980_v30 = vsel %vm1477_vm3, %v1796_v47, 0.0 }
 0x156   : > { %v1973_v29 = vadd.f32 %v1972_v60, %v1971_v49  ;;  %v1586_v42 = vadd.f32 %v1585_v0, %v1584_v39  ;;  %v1978_v60 = vsel %vm1477_vm3, %v1795_v50, 0.0  ;;  %v1797_v0 = vmul.f32 %v7269_v10, %v7269_v10 }
 0x157   : > { %v1798_v50 = vmul.f32 %v7265_v5, %v7265_v5 }
 0x158   : > { %v1588_v4 = vadd.f32 %v1587_v35, %v1586_v42  ;;  %v1975_v45 = vadd.f32 %v1974_v46, %v1973_v29  ;;  %v1593_v35 = vsel %vm1477_vm3, %v7269_v10, 0.0  ;;  %v7607_v46 = vpop.f32.mrb[50].mxu1  ;;  %v1595_v10 = vsel %vm1477_vm3, %v7265_v5, 0.0 }
 0x159   : > { %v7609_v42 = vpop.f32.mrb[51].mxu1  ;;  %v1984_v48 = vsel %vm1477_vm3, %v1798_v50, 0.0 }
 0x15a   : > { %v1977_v39 = vadd.f32 %v1976_v13, %v1975_v45  ;;  %v1590_v49 = vadd.f32 %v1589_v18, %v1588_v4  ;;  %v1982_v13 = vsel %vm1477_vm3, %v1797_v0, 0.0  ;;  %v1799_v18 = vmul.f32 %v7287_v38, %v7287_v38 }
 0x15b   : > { %v1800_v0 = vmul.f32 %v7283_v28, %v7283_v28 }
 0x15c   : > { %v1592_v29 = vadd.f32 %v1591_v54, %v1590_v49  ;;  %v1979_v51 = vadd.f32 %v1978_v60, %v1977_v39  ;;  %v1597_v54 = vsel %vm1477_vm3, %v7287_v38, 0.0  ;;  %v7621_v60 = vpop.f32.mrb[52].mxu1  ;;  %v1599_v38 = vsel %vm1477_vm3, %v7283_v28, 0.0 }
 0x15d   : > { %v7623_v49 = vpop.f32.mrb[53].mxu1  ;;  %v1988_v5 = vsel %vm1477_vm3, %v1800_v0, 0.0 }
 0x15e   : > { %v1981_v4 = vadd.f32 %v1980_v30, %v1979_v51  ;;  %v1594_v45 = vadd.f32 %v1593_v35, %v1592_v29  ;;  %11931 = vst [vmem:[#allocation83_spill] sm:$0xff] %v7623_v49  ;;  %v1986_v30 = vsel %vm1477_vm3, %v1799_v18, 0.0  ;;  %v1801_v35 = vmul.f32 %v7305_v62, %v7305_v62 }
 0x15f   : > { %v1802_v18 = vmul.f32 %v7301_v56, %v7301_v56 }
 0x160   : > { %v1596_v39 = vadd.f32 %v1595_v10, %v1594_v45  ;;  %v1983_v47 = vadd.f32 %v1982_v13, %v1981_v4  ;;  %v1601_v10 = vsel %vm1477_vm3, %v7305_v62, 0.0  ;;  %v7635_v13 = vpop.f32.mrb[54].mxu1  ;;  %v1603_v62 = vsel %vm1477_vm3, %v7301_v56, 0.0 }
 0x161   : > { %v7637_v45 = vpop.f32.mrb[55].mxu1  ;;  %v1992_v28 = vsel %vm1477_vm3, %v1802_v18, 0.0 }
 0x162   : > { %v1985_v29 = vadd.f32 %v1984_v48, %v1983_v47  ;;  %v1598_v51 = vadd.f32 %v1597_v54, %v1596_v39  ;;  %v1990_v48 = vsel %vm1477_vm3, %v1801_v35, 0.0  ;;  %v1803_v54 = vmul.f32 %v7323_v32, %v7323_v32 }
 0x163   : > { %v1804_v35 = vmul.f32 %v7319_v23, %v7319_v23 }
 0x164   : > { %v1600_v4 = vadd.f32 %v1599_v38, %v1598_v51  ;;  %v1987_v50 = vadd.f32 %v1986_v30, %v1985_v29  ;;  %v1605_v38 = vsel %vm1477_vm3, %v7323_v32, 0.0  ;;  %v7649_v30 = vpop.f32.mrb[56].mxu1  ;;  %v1607_v32 = vsel %vm1477_vm3, %v7319_v23, 0.0 }
 0x165   : > { %v7651_v51 = vpop.f32.mrb[57].mxu1  ;;  %v1996_v56 = vsel %vm1477_vm3, %v1804_v35, 0.0 }
 0x166   : > { %v1989_v39 = vadd.f32 %v1988_v5, %v1987_v50  ;;  %v1602_v47 = vadd.f32 %v1601_v10, %v1600_v4  ;;  %v1994_v5 = vsel %vm1477_vm3, %v1803_v54, 0.0  ;;  %v1805_v10 = vmul.f32 %v7341_v8, %v7341_v8 }
 0x167   : > { %v1806_v54 = vmul.f32 %v7337_v58, %v7337_v58 }
 0x168   : > { %v1604_v29 = vadd.f32 %v1603_v62, %v1602_v47  ;;  %v1991_v0 = vadd.f32 %v1990_v48, %v1989_v39  ;;  %v1609_v62 = vsel %vm1477_vm3, %v7341_v8, 0.0  ;;  %v7663_v48 = vpop.f32.mrb[58].mxu1  ;;  %v1611_v8 = vsel %vm1477_vm3, %v7337_v58, 0.0 }
 0x169   : > { %v7665_v47 = vpop.f32.mrb[59].mxu1  ;;  %v2000_v23 = vsel %vm1477_vm3, %v1806_v54, 0.0 }
 0x16a   : > { %v1993_v4 = vadd.f32 %v1992_v28, %v1991_v0  ;;  %v1606_v50 = vadd.f32 %v1605_v38, %v1604_v29  ;;  %v1998_v28 = vsel %vm1477_vm3, %v1805_v10, 0.0  ;;  %v1807_v38 = vmul.f32 %v7359_v52, %v7359_v52 }
 0x16b   : > { %v1808_v10 = vmul.f32 %v7355_v43, %v7355_v43 }
 0x16c   : > { %v1608_v39 = vadd.f32 %v1607_v32, %v1606_v50  ;;  %v1995_v18 = vadd.f32 %v1994_v5, %v1993_v4  ;;  %v1613_v32 = vsel %vm1477_vm3, %v7359_v52, 0.0  ;;  %v7677_v5 = vpop.f32.mrb[60].mxu1  ;;  %v1615_v52 = vsel %vm1477_vm3, %v7355_v43, 0.0 }
 0x16d   : > { %v7679_v50 = vpop.f32.mrb[61].mxu1  ;;  %v2004_v58 = vsel %vm1477_vm3, %v1808_v10, 0.0 }
 0x16e   : > { %v1997_v29 = vadd.f32 %v1996_v56, %v1995_v18  ;;  %v1610_v0 = vadd.f32 %v1609_v62, %v1608_v39  ;;  %v2002_v56 = vsel %vm1477_vm3, %v1807_v38, 0.0  ;;  %v1809_v62 = vmul.f32 %v7377_v31, %v7377_v31 }
 0x16f   : > { %v1810_v38 = vmul.f32 %v7373_v41, %v7373_v41 }
 0x170   : > { %v1612_v4 = vadd.f32 %v1611_v8, %v1610_v0  ;;  %v1999_v35 = vadd.f32 %v1998_v28, %v1997_v29  ;;  %v1617_v8 = vsel %vm1477_vm3, %v7377_v31, 0.0  ;;  %v7691_v28 = vpop.f32.mrb[62].mxu1  ;;  %v1619_v31 = vsel %vm1477_vm3, %v7373_v41, 0.0 }
 0x171   : > { %v7693_v0 = vpop.f32.mrb[63].mxu1  ;;  %v2008_v43 = vsel %vm1477_vm3, %v1810_v38, 0.0 }
 0x172   : > { %v2001_v39 = vadd.f32 %v2000_v23, %v1999_v35  ;;  %v1614_v18 = vadd.f32 %v1613_v32, %v1612_v4  ;;  %v2006_v23 = vsel %vm1477_vm3, %v1809_v62, 0.0  ;;  %v1811_v32 = vmul.f32 %v7395_v61, %v7395_v61 }
 0x173   : > { %v1812_v62 = vmul.f32 %v7391_v26, %v7391_v26 }
 0x174   : > { %v2003_v29 = vadd.f32 %v2002_v56, %v2001_v39  ;;  %v1616_v54 = vadd.f32 %v1615_v52, %v1614_v18  ;;  %v1621_v52 = vsel %vm1477_vm3, %v7395_v61, 0.0  ;;  %v7705_v56 = vpop.f32.mrb[64].mxu1  ;;  %v1623_v61 = vsel %vm1477_vm3, %v7391_v26, 0.0 }
 0x175   : > { %v7707_v18 = vpop.f32.mrb[65].mxu1  ;;  %v2012_v41 = vsel %vm1477_vm3, %v1812_v62, 0.0 }
 0x176   : > { %v1618_v4 = vadd.f32 %v1617_v8, %v1616_v54  ;;  %v2005_v35 = vadd.f32 %v2004_v58, %v2003_v29  ;;  %v2010_v8 = vsel %vm1477_vm3, %v1811_v32, 0.0  ;;  %v1813_v58 = vmul.f32 %v7413_v37, %v7413_v37 }
 0x177   : > { %v1814_v32 = vmul.f32 %v7409_v20, %v7409_v20 }
 0x178   : > { %v2007_v39 = vadd.f32 %v2006_v23, %v2005_v35  ;;  %v1620_v10 = vadd.f32 %v1619_v31, %v1618_v4  ;;  %v1625_v31 = vsel %vm1477_vm3, %v7413_v37, 0.0  ;;  %v7719_v23 = vpop.f32.mrb[66].mxu1  ;;  %v1627_v37 = vsel %vm1477_vm3, %v7409_v20, 0.0 }
 0x179   : > { %v7721_v35 = vpop.f32.mrb[67].mxu1  ;;  %v2016_v26 = vsel %vm1477_vm3, %v1814_v32, 0.0 }
 0x17a   : > { %v1622_v29 = vadd.f32 %v1621_v52, %v1620_v10  ;;  %v2009_v54 = vadd.f32 %v2008_v43, %v2007_v39  ;;  %v2014_v52 = vsel %vm1477_vm3, %v1813_v58, 0.0  ;;  %v1815_v43 = vmul.f32 %v7431_v9, %v7431_v9 }
 0x17b   : > { %v1816_v58 = vmul.f32 %v7427_v15, %v7427_v15 }
 0x17c   : > { %v2011_v4 = vadd.f32 %v2010_v8, %v2009_v54  ;;  %v1624_v38 = vadd.f32 %v1623_v61, %v1622_v29  ;;  %v1629_v61 = vsel %vm1477_vm3, %v7431_v9, 0.0  ;;  %v7733_v8 = vpop.f32.mrb[68].mxu1  ;;  %v1631_v9 = vsel %vm1477_vm3, %v7427_v15, 0.0 }
 0x17d   : > { %v7735_v54 = vpop.f32.mrb[69].mxu1  ;;  %v2020_v20 = vsel %vm1477_vm3, %v1816_v58, 0.0 }
 0x17e   : > { %v1626_v39 = vadd.f32 %v1625_v31, %v1624_v38  ;;  %v2013_v10 = vadd.f32 %v2012_v41, %v2011_v4  ;;  %v2018_v31 = vsel %vm1477_vm3, %v1815_v43, 0.0  ;;  %v1817_v41 = vmul.f32 %v7449_v53, %v7449_v53 }
 0x17f   : > { %v1818_v43 = vmul.f32 %v7445_v44, %v7445_v44 }
 0x180   : > { %v2015_v29 = vadd.f32 %v2014_v52, %v2013_v10  ;;  %v1628_v62 = vadd.f32 %v1627_v37, %v1626_v39  ;;  %v1633_v37 = vsel %vm1477_vm3, %v7449_v53, 0.0  ;;  %v7747_v52 = vpop.f32.mrb[70].mxu1  ;;  %v1635_v53 = vsel %vm1477_vm3, %v7445_v44, 0.0 }
 0x181   : > { %v7749_v10 = vpop.f32.mrb[71].mxu1  ;;  %v2024_v15 = vsel %vm1477_vm3, %v1818_v43, 0.0 }
 0x182   : > { %v1630_v4 = vadd.f32 %v1629_v61, %v1628_v62  ;;  %v2017_v38 = vadd.f32 %v2016_v26, %v2015_v29  ;;  %v2022_v61 = vsel %vm1477_vm3, %v1817_v41, 0.0  ;;  %v1819_v26 = vmul.f32 %v7467_v34, %v7467_v34 }
 0x183   : > { %v1820_v41 = vmul.f32 %v7463_v16, %v7463_v16 }
 0x184   : > { %v2019_v39 = vadd.f32 %v2018_v31, %v2017_v38  ;;  %v1632_v32 = vadd.f32 %v1631_v9, %v1630_v4  ;;  %v1637_v9 = vsel %vm1477_vm3, %v7467_v34, 0.0  ;;  %v7761_v31 = vpop.f32.mrb[72].mxu1  ;;  %v1639_v34 = vsel %vm1477_vm3, %v7463_v16, 0.0 }
 0x185   : > { %11932 = vst [vmem:[#allocation84_spill] sm:$0xff] %v7761_v31  ;;  %v7763_v38 = vpop.f32.mrb[73].mxu1  ;;  %v2028_v44 = vsel %vm1477_vm3, %v1820_v41, 0.0 }
 0x186   : > { %v1634_v29 = vadd.f32 %v1633_v37, %v1632_v32  ;;  %v2021_v62 = vadd.f32 %v2020_v20, %v2019_v39  ;;  %v2026_v37 = vsel %vm1477_vm3, %v1819_v26, 0.0  ;;  %v1821_v20 = vmul.f32 %v7485_v17, %v7485_v17 }
 0x187   : > { %v1822_v26 = vmul.f32 %v7481_v1, %v7481_v1 }
 0x188   : > { %v2023_v4 = vadd.f32 %v2022_v61, %v2021_v62  ;;  %v1636_v58 = vadd.f32 %v1635_v53, %v1634_v29  ;;  %v1641_v53 = vsel %vm1477_vm3, %v7485_v17, 0.0  ;;  %v7775_v61 = vpop.f32.mrb[74].mxu1  ;;  %v1643_v17 = vsel %vm1477_vm3, %v7481_v1, 0.0 }
 0x189   : > { %11933 = vst [vmem:[#allocation85_spill] sm:$0xff] %v7775_v61  ;;  %v7777_v62 = vpop.f32.mrb[75].mxu1  ;;  %v2032_v16 = vsel %vm1477_vm3, %v1822_v26, 0.0 }
 0x18a   : > { %v1638_v39 = vadd.f32 %v1637_v9, %v1636_v58  ;;  %v2025_v32 = vadd.f32 %v2024_v15, %v2023_v4  ;;  %11934 = vst [vmem:[#allocation86_spill] sm:$0xff] %v7777_v62  ;;  %v2030_v9 = vsel %vm1477_vm3, %v1821_v20, 0.0  ;;  %v1823_v15 = vmul.f32 %v7503_v63, %v7503_v63 }
 0x18b   : > { %v1824_v20 = vmul.f32 %v7499_v22, %v7499_v22 }
 0x18c   : > { %v2027_v29 = vadd.f32 %v2026_v37, %v2025_v32  ;;  %v1640_v43 = vadd.f32 %v1639_v34, %v1638_v39  ;;  %v1645_v34 = vsel %vm1477_vm3, %v7503_v63, 0.0  ;;  %v7789_v37 = vpop.f32.mrb[76].mxu1  ;;  %v1647_v63 = vsel %vm1477_vm3, %v7499_v22, 0.0 }
 0x18d   : > { %11935 = vst [vmem:[#allocation87_spill] sm:$0xff] %v7789_v37  ;;  %v7791_v32 = vpop.f32.mrb[77].mxu1  ;;  %v2036_v1 = vsel %vm1477_vm3, %v1824_v20, 0.0  ;;  %v1829_v22 = vmul.f32 %v7553_v19, %v7553_v19 }
 0x18e   : > { %v1642_v4 = vadd.f32 %v1641_v53, %v1640_v43  ;;  %v2029_v58 = vadd.f32 %v2028_v44, %v2027_v29  ;;  %11936 = vst [vmem:[#allocation88_spill] sm:$0xff] %v7791_v32  ;;  %v2034_v53 = vsel %vm1477_vm3, %v1823_v15, 0.0  ;;  %v1825_v44 = vmul.f32 %v7523_v33, %v7523_v33 }
 0x18f   : > { %v1826_v15 = vmul.f32 %v7517_v55, %v7517_v55 }
 0x190   : > { %v2031_v39 = vadd.f32 %v2030_v9, %v2029_v58  ;;  %v1644_v41 = vadd.f32 %v1643_v17, %v1642_v4  ;;  %v1649_v17 = vsel %vm1477_vm3, %v7523_v33, 0.0  ;;  %v7803_v9 = vpop.f32.mrb[78].mxu1  ;;  %v1651_v33 = vsel %vm1477_vm3, %v7517_v55, 0.0 }
 0x191   : > { %11937 = vst [vmem:[#allocation89_spill] sm:$0xff] %v7803_v9  ;;  %v7805_v58 = vpop.f32.mrb[79].mxu1  ;;  %v2040_v20 = vsel %vm1477_vm3, %v1826_v15, 0.0 }
 0x192   : > { %v1646_v29 = vadd.f32 %v1645_v34, %v1644_v41  ;;  %v2033_v43 = vadd.f32 %v2032_v16, %v2031_v39  ;;  %v2038_v34 = vsel %vm1477_vm3, %v1825_v44, 0.0  ;;  %v1827_v16 = vmul.f32 %v7539_v36, %v7539_v36 }
 0x194   : > { %v2035_v4 = vadd.f32 %v2034_v53, %v2033_v43  ;;  %v1648_v26 = vadd.f32 %v1647_v63, %v1646_v29  ;;  %v1653_v63 = vsel %vm1477_vm3, %v7539_v36, 0.0  ;;  %v1828_v43 = vmul.f32 %v7537_v59, %v7537_v59 }
 0x195   : > { %v2042_v44 = vsel %vm1477_vm3, %v1827_v16, 0.0  ;;  %v2046_v16 = vsel %vm1477_vm3, %v1829_v22, 0.0 }
 0x196   : > { %v1650_v39 = vadd.f32 %v1649_v17, %v1648_v26  ;;  %v2037_v41 = vadd.f32 %v2036_v1, %v2035_v4  ;;  %v1655_v4 = vsel %vm1477_vm3, %v7537_v59, 0.0  ;;  %v1657_v26 = vsel %vm1477_vm3, %v7553_v19, 0.0 }
 0x197   : > { %v2044_v15 = vsel %vm1477_vm3, %v1828_v43, 0.0 }
 0x198   : > { %v2039_v53 = vadd.f32 %v2038_v34, %v2037_v41  ;;  %v1652_v29 = vadd.f32 %v1651_v33, %v1650_v39  ;;  %v1830_v39 = vmul.f32 %v7551_v2, %v7551_v2  ;;  %v1831_v41 = vmul.f32 %v7567_v40, %v7567_v40 }
 0x19a   : > { %v1654_v17 = vadd.f32 %v1653_v63, %v1652_v29  ;;  %v2041_v1 = vadd.f32 %v2040_v20, %v2039_v53  ;;  %v1659_v29 = vsel %vm1477_vm3, %v7551_v2, 0.0  ;;  %v1661_v20 = vsel %vm1477_vm3, %v7567_v40, 0.0 }
 0x19b   : > { %v2048_v43 = vsel %vm1477_vm3, %v1830_v39, 0.0  ;;  %v2050_v22 = vsel %vm1477_vm3, %v1831_v41, 0.0 }
 0x19c   : > { %v2043_v34 = vadd.f32 %v2042_v44, %v2041_v1  ;;  %v1656_v33 = vadd.f32 %v1655_v4, %v1654_v17  ;;  %v1832_v1 = vmul.f32 %v7565_v11, %v7565_v11  ;;  %v1833_v4 = vmul.f32 %v7581_v27, %v7581_v27 }
 0x19e   : > { %v1658_v63 = vadd.f32 %v1657_v26, %v1656_v33  ;;  %v2045_v53 = vadd.f32 %v2044_v15, %v2043_v34  ;;  %v1663_v33 = vsel %vm1477_vm3, %v7565_v11, 0.0  ;;  %v1665_v15 = vsel %vm1477_vm3, %v7581_v27, 0.0 }
 0x19f   : > { %v2052_v39 = vsel %vm1477_vm3, %v1832_v1, 0.0  ;;  %v2054_v41 = vsel %vm1477_vm3, %v1833_v4, 0.0 }
 0x1a0   : > { %v2047_v44 = vadd.f32 %v2046_v16, %v2045_v53  ;;  %v1660_v17 = vadd.f32 %v1659_v29, %v1658_v63  ;;  %v1834_v53 = vmul.f32 %v7579_v21, %v7579_v21  ;;  %v1835_v29 = vmul.f32 %v7595_v57, %v7595_v57 }
 0x1a2   : > { %v1662_v26 = vadd.f32 %v1661_v20, %v1660_v17  ;;  %v2049_v34 = vadd.f32 %v2048_v43, %v2047_v44  ;;  %v1667_v17 = vsel %vm1477_vm3, %v7579_v21, 0.0  ;;  %v1669_v43 = vsel %vm1477_vm3, %v7595_v57, 0.0 }
 0x1a3   : > { %v2056_v1 = vsel %vm1477_vm3, %v1834_v53, 0.0  ;;  %v2058_v4 = vsel %vm1477_vm3, %v1835_v29, 0.0 }
 0x1a4   : > { %v2051_v16 = vadd.f32 %v2050_v22, %v2049_v34  ;;  %v1664_v63 = vadd.f32 %v1663_v33, %v1662_v26  ;;  %v1836_v34 = vmul.f32 %v7593_v25, %v7593_v25  ;;  %v1837_v33 = vmul.f32 %v7609_v42, %v7609_v42 }
 0x1a6   : > { %v1666_v20 = vadd.f32 %v1665_v15, %v1664_v63  ;;  %v2053_v44 = vadd.f32 %v2052_v39, %v2051_v16  ;;  %v1671_v63 = vsel %vm1477_vm3, %v7593_v25, 0.0  ;;  %v1673_v39 = vsel %vm1477_vm3, %v7609_v42, 0.0 }
 0x1a7   : > { %v2060_v53 = vsel %vm1477_vm3, %v1836_v34, 0.0  ;;  %v2062_v29 = vsel %vm1477_vm3, %v1837_v33, 0.0  ;;  %v1840_v33 = vmul.f32 %v7621_v60, %v7621_v60 }
 0x1a8   : > { %v2055_v22 = vadd.f32 %v2054_v41, %v2053_v44  ;;  %v1668_v26 = vadd.f32 %v1667_v17, %v1666_v20  ;;  %v1838_v44 = vmul.f32 %v7607_v46, %v7607_v46  ;;  %v1839_v17 = vmul.f32 %v7623_v49, %v7623_v49 }
 0x1aa   : > { %v1670_v15 = vadd.f32 %v1669_v43, %v1668_v26  ;;  %v2057_v16 = vadd.f32 %v2056_v1, %v2055_v22  ;;  %v1675_v26 = vsel %vm1477_vm3, %v7607_v46, 0.0  ;;  %v1677_v1 = vsel %vm1477_vm3, %v7623_v49, 0.0 }
 0x1ab   : > { %v1681_v49 = vsel %vm1477_vm3, %v7637_v45, 0.0 }
 0x1ac   : > { %v2059_v41 = vadd.f32 %v2058_v4, %v2057_v16  ;;  %v1672_v20 = vadd.f32 %v1671_v63, %v1670_v15  ;;  %v6631_v4 = vmov 0.0   ;;  %v2064_v16 = vsel %vm1477_vm3, %v1838_v44, 0.0 }
 0x1ad   : > { %2804 = vrot.lane.b32.xlu0 %v6631_v4, %s6632_s16  ;;  %v2066_v63 = vsel %vm1477_vm3, %v1839_v17, 0.0  ;;  %v2068_v44 = vsel %vm1477_vm3, %v1840_v33, 0.0 }
 0x1ae   : > { %v1674_v43 = vadd.f32 %v1673_v39, %v1672_v20  ;;  %v2061_v22 = vadd.f32 %v2060_v53, %v2059_v41  ;;  %v1841_v39 = vmul.f32 %v7637_v45, %v7637_v45  ;;  %v1679_v53 = vsel %vm1477_vm3, %v7621_v60, 0.0 }
 0x1b0   : > { %v2063_v34 = vadd.f32 %v2062_v29, %v2061_v22  ;;  %v1676_v15 = vadd.f32 %v1675_v26, %v1674_v43  ;;  %v1842_v22 = vmul.f32 %v7635_v13, %v7635_v13  ;;  %v2070_v17 = vsel %vm1477_vm3, %v1841_v39, 0.0 }
 0x1b1   : > { %v1843_v26 = vmul.f32 %v7651_v51, %v7651_v51  ;;  %2897 = vrot.lane.b32.xlu0 %v6631_v4, %s6633_s17  ;;  %v1697_v4 = vsel %vm1477_vm3, %v7693_v0, 0.0 }
 0x1b2   : > { %v1678_v41 = vadd.f32 %v1677_v1, %v1676_v15  ;;  %v2065_v20 = vadd.f32 %v2064_v16, %v2063_v34  ;;  %v1683_v15 = vsel %vm1477_vm3, %v7635_v13, 0.0  ;;  %v1685_v16 = vsel %vm1477_vm3, %v7651_v51, 0.0 }
 0x1b3   : > { %v2072_v33 = vsel %vm1477_vm3, %v1842_v22, 0.0  ;;  %v2074_v39 = vsel %vm1477_vm3, %v1843_v26, 0.0 }
 0x1b4   : > { %v2067_v29 = vadd.f32 %v2066_v63, %v2065_v20  ;;  %v1680_v43 = vadd.f32 %v1679_v53, %v1678_v41  ;;  %v1844_v20 = vmul.f32 %v7649_v30, %v7649_v30  ;;  %v1845_v53 = vmul.f32 %v7665_v47, %v7665_v47 }
 0x1b6   : > { %v1682_v1 = vadd.f32 %v1681_v49, %v1680_v43  ;;  %v2069_v34 = vadd.f32 %v2068_v44, %v2067_v29  ;;  %v1687_v43 = vsel %vm1477_vm3, %v7649_v30, 0.0  ;;  %v1689_v44 = vsel %vm1477_vm3, %v7665_v47, 0.0 }
 0x1b7   : > { %v2076_v22 = vsel %vm1477_vm3, %v1844_v20, 0.0  ;;  %v2078_v26 = vsel %vm1477_vm3, %v1845_v53, 0.0  ;;  %v1848_v53 = vmul.f32 %v7677_v5, %v7677_v5 }
 0x1b8   : > { %v2071_v63 = vadd.f32 %v2070_v17, %v2069_v34  ;;  %v1684_v41 = vadd.f32 %v1683_v15, %v1682_v1  ;;  %v1846_v34 = vmul.f32 %v7663_v48, %v7663_v48  ;;  %v1847_v15 = vmul.f32 %v7679_v50, %v7679_v50 }
 0x1ba   : > { %v1686_v49 = vadd.f32 %v1685_v16, %v1684_v41  ;;  %v2073_v29 = vadd.f32 %v2072_v33, %v2071_v63  ;;  %v1691_v41 = vsel %vm1477_vm3, %v7663_v48, 0.0  ;;  %v1693_v33 = vsel %vm1477_vm3, %v7679_v50, 0.0 }
 0x1bc   : > { %v2075_v17 = vadd.f32 %v2074_v39, %v2073_v29  ;;  %v1688_v1 = vadd.f32 %v1687_v43, %v1686_v49  ;;  %v2080_v49 = vsel %vm1477_vm3, %v1846_v34, 0.0  ;;  %v2082_v29 = vsel %vm1477_vm3, %v1847_v15, 0.0 }
 0x1bd   : > { %v1849_v43 = vmul.f32 %v7693_v0, %v7693_v0  ;;  %v2084_v34 = vsel %vm1477_vm3, %v1848_v53, 0.0 }
 0x1be   : > { %v1690_v16 = vadd.f32 %v1689_v44, %v1688_v1  ;;  %v2077_v63 = vadd.f32 %v2076_v22, %v2075_v17  ;;  %v1695_v1 = vsel %vm1477_vm3, %v7677_v5, 0.0 }
 0x1bf   : > { %v2086_v15 = vsel %vm1477_vm3, %v1849_v43, 0.0 }
 0x1c0   : > { %v2079_v20 = vadd.f32 %v2078_v26, %v2077_v63  ;;  %v1692_v39 = vadd.f32 %v1691_v41, %v1690_v16  ;;  %v1850_v16 = vmul.f32 %v7691_v28, %v7691_v28  ;;  %v1851_v63 = vmul.f32 %v7707_v18, %v7707_v18 }
 0x1c2   : > { %v1694_v44 = vadd.f32 %v1693_v33, %v1692_v39  ;;  %v2081_v17 = vadd.f32 %v2080_v49, %v2079_v20  ;;  %v1699_v20 = vsel %vm1477_vm3, %v7691_v28, 0.0  ;;  %v1701_v39 = vsel %vm1477_vm3, %v7707_v18, 0.0 }
 0x1c3   : > { %v2088_v53 = vsel %vm1477_vm3, %v1850_v16, 0.0  ;;  %v2090_v43 = vsel %vm1477_vm3, %v1851_v63, 0.0 }
 0x1c4   : > { %v2083_v22 = vadd.f32 %v2082_v29, %v2081_v17  ;;  %v1696_v26 = vadd.f32 %v1695_v1, %v1694_v44  ;;  %v1852_v44 = vmul.f32 %v7705_v56, %v7705_v56  ;;  %v1853_v17 = vmul.f32 %v7721_v35, %v7721_v35 }
 0x1c6   : > { %v1698_v41 = vadd.f32 %v1697_v4, %v1696_v26  ;;  %v2085_v33 = vadd.f32 %v2084_v34, %v2083_v22  ;;  %v1703_v22 = vsel %vm1477_vm3, %v7705_v56, 0.0  ;;  %v1705_v26 = vsel %vm1477_vm3, %v7721_v35, 0.0 }
 0x1c7   : > { %v2092_v16 = vsel %vm1477_vm3, %v1852_v44, 0.0  ;;  %v2094_v63 = vsel %vm1477_vm3, %v1853_v17, 0.0 }
 0x1c8   : > { %v2087_v49 = vadd.f32 %v2086_v15, %v2085_v33  ;;  %v1700_v29 = vadd.f32 %v1699_v20, %v1698_v41  ;;  %v1854_v41 = vmul.f32 %v7719_v23, %v7719_v23  ;;  %v1855_v33 = vmul.f32 %v7735_v54, %v7735_v54 }
 0x1ca   : > { %v1702_v1 = vadd.f32 %v1701_v39, %v1700_v29  ;;  %v2089_v4 = vadd.f32 %v2088_v53, %v2087_v49  ;;  %v1707_v49 = vsel %vm1477_vm3, %v7719_v23, 0.0  ;;  %v1709_v29 = vsel %vm1477_vm3, %v7735_v54, 0.0 }
 0x1cb   : > { %v2096_v44 = vsel %vm1477_vm3, %v1854_v41, 0.0  ;;  %v2098_v17 = vsel %vm1477_vm3, %v1855_v33, 0.0 }
 0x1cc   : > { %v2091_v34 = vadd.f32 %v2090_v43, %v2089_v4  ;;  %v1704_v15 = vadd.f32 %v1703_v22, %v1702_v1  ;;  %v1856_v1 = vmul.f32 %v7733_v8, %v7733_v8  ;;  %v1857_v4 = vmul.f32 %v7749_v10, %v7749_v10 }
 0x1ce   : > { %v1706_v20 = vadd.f32 %v1705_v26, %v1704_v15  ;;  %v2093_v39 = vadd.f32 %v2092_v16, %v2091_v34  ;;  %v1711_v34 = vsel %vm1477_vm3, %v7733_v8, 0.0  ;;  %v1713_v15 = vsel %vm1477_vm3, %v7749_v10, 0.0 }
 0x1cf   : > { %v2100_v41 = vsel %vm1477_vm3, %v1856_v1, 0.0  ;;  %v2102_v33 = vsel %vm1477_vm3, %v1857_v4, 0.0 }
 0x1d0   : > { %v2095_v53 = vadd.f32 %v2094_v63, %v2093_v39  ;;  %v1708_v43 = vadd.f32 %v1707_v49, %v1706_v20  ;;  %v1858_v20 = vmul.f32 %v7747_v52, %v7747_v52  ;;  %v1859_v39 = vmul.f32 %v7763_v38, %v7763_v38 }
 0x1d2   : > { %v1710_v22 = vadd.f32 %v1709_v29, %v1708_v43  ;;  %v2097_v26 = vadd.f32 %v2096_v44, %v2095_v53  ;;  %v1715_v53 = vsel %vm1477_vm3, %v7747_v52, 0.0  ;;  %v1717_v43 = vsel %vm1477_vm3, %v7763_v38, 0.0 }
 0x1d3   : > { %v2104_v1 = vsel %vm1477_vm3, %v1858_v20, 0.0  ;;  %v2106_v4 = vsel %vm1477_vm3, %v1859_v39, 0.0 }
 0x1d4   : > { %v2099_v16 = vadd.f32 %v2098_v17, %v2097_v26  ;;  %v1712_v63 = vadd.f32 %v1711_v34, %v1710_v22  ;;  %v1860_v22 = vmul.f32 %v7761_v31, %v7761_v31  ;;  %v1861_v26 = vmul.f32 %v7777_v62, %v7777_v62 }
 0x1d6   : > { %v1714_v49 = vadd.f32 %v1713_v15, %v1712_v63  ;;  %v2101_v29 = vadd.f32 %v2100_v41, %v2099_v16  ;;  %v1719_v16 = vsel %vm1477_vm3, %v7761_v31, 0.0  ;;  %v1721_v63 = vsel %vm1477_vm3, %v7777_v62, 0.0 }
 0x1d7   : > { %v2108_v20 = vsel %vm1477_vm3, %v1860_v22, 0.0  ;;  %v2110_v39 = vsel %vm1477_vm3, %v1861_v26, 0.0 }
 0x1d8   : > { %v2103_v44 = vadd.f32 %v2102_v33, %v2101_v29  ;;  %v1716_v17 = vadd.f32 %v1715_v53, %v1714_v49  ;;  %v1862_v49 = vmul.f32 %v7775_v61, %v7775_v61  ;;  %v1863_v29 = vmul.f32 %v7791_v32, %v7791_v32 }
 0x1da   : > { %v1718_v34 = vadd.f32 %v1717_v43, %v1716_v17  ;;  %v2105_v15 = vadd.f32 %v2104_v1, %v2103_v44  ;;  %v1723_v44 = vsel %vm1477_vm3, %v7775_v61, 0.0  ;;  %v1725_v17 = vsel %vm1477_vm3, %v7791_v32, 0.0 }
 0x1db   : > { %v2112_v22 = vsel %vm1477_vm3, %v1862_v49, 0.0  ;;  %v2114_v26 = vsel %vm1477_vm3, %v1863_v29, 0.0 }
 0x1dc   : > { %v2107_v41 = vadd.f32 %v2106_v4, %v2105_v15  ;;  %v1720_v33 = vadd.f32 %v1719_v16, %v1718_v34  ;;  %v1864_v34 = vmul.f32 %v7789_v37, %v7789_v37  ;;  %v1865_v15 = vmul.f32 %v7805_v58, %v7805_v58 }
 0x1de   : > { %v1722_v53 = vadd.f32 %v1721_v63, %v1720_v33  ;;  %v2109_v43 = vadd.f32 %v2108_v20, %v2107_v41  ;;  %v1727_v41 = vsel %vm1477_vm3, %v7789_v37, 0.0  ;;  %v1729_v33 = vsel %vm1477_vm3, %v7805_v58, 0.0 }
 0x1df   : > { %v2116_v49 = vsel %vm1477_vm3, %v1864_v34, 0.0  ;;  %v2118_v29 = vsel %vm1477_vm3, %v1865_v15, 0.0 }
 0x1e0   : > { %v2111_v1 = vadd.f32 %v2110_v39, %v2109_v43  ;;  %v1724_v4 = vadd.f32 %v1723_v44, %v1722_v53  ;;  %v1866_v53 = vmul.f32 %v7803_v9, %v7803_v9 }
 0x1e2   : > { %v1726_v16 = vadd.f32 %v1725_v17, %v1724_v4  ;;  %v2113_v63 = vadd.f32 %v2112_v22, %v2111_v1  ;;  %v1731_v17 = vsel %vm1477_vm3, %v7803_v9, 0.0  ;;  %v2120_v22 = vsel %vm1477_vm3, %v1866_v53, 0.0 }
 0x1e3   : > { %v2139_v53 = vlaneseq }
 0x1e4   : > { %v2115_v20 = vadd.f32 %v2114_v26, %v2113_v63  ;;  %v1728_v39 = vadd.f32 %v1727_v41, %v1726_v16 }
 0x1e6   : > { %v1730_v43 = vadd.f32 %v1729_v33, %v1728_v39  ;;  %v2117_v44 = vadd.f32 %v2116_v49, %v2115_v20 }
 0x1e8   : > { %v1732_v1 = vadd.f32 %v1731_v17, %v1730_v43  ;;  %v2119_v4 = vadd.f32 %v2118_v29, %v2117_v44  ;;  %v2140_v17 = vshrl.u32 %v2139_v53, 7  ;;  %v11953_v53 = vld [vmem:[#allocation13_spill] sm:$0xff] }
 0x1ea   : > { %v1733_v37 = vrot.slane %v1732_v1, 4  ;;  %v2121_v32 = vadd.f32 %v2120_v22, %v2119_v4 }
 0x1ec   : > { %v1734_v26 = vadd.f32 %v1733_v37, %v1732_v1  ;;  %v2122_v16 = vrot.slane %v2121_v32, 4  ;;  %v1475_v37 = vld [vmem:[%s11699_s2] sm:$0x1] }
 0x1ee   : > { %v1735_v63 = vrot.slane %v1734_v26, 2  ;;  %v2123_v34 = vadd.f32 %v2122_v16, %v2121_v32  ;;  %v8019_v32 = vsub.s32 0, %v2140_v17 }
 0x1f0   : > { %v1736_v41 = vadd.f32 %v1735_v63, %v1734_v26  ;;  %v2124_v61 = vrot.slane %v2123_v34, 2  ;;  %11938 = vst [vmem:[#allocation90_spill] sm:$0xff] %v8019_v32  ;;  %v11940_v63 = vld [vmem:[#allocation2_spill] sm:$0xff] }
 0x1f2   : > { %v1737_v62 = vrot.slane %v1736_v41, 1  ;;  %v2125_v31 = vadd.f32 %v2124_v61, %v2123_v34  ;;  %v11941_v34 = vld [vmem:[#allocation4_spill] sm:$0xff] }
 0x1f4   : > { %v1738_v15 = vadd.f32 %v1737_v62, %v1736_v41  ;;  %v2126_v33 = vrot.slane %v2125_v31, 1  ;;  %v11942_v41 = vld [vmem:[#allocation3_spill] sm:$0xff] }
 0x1f6   : > { %v2127_v20 = vadd.f32 %v2126_v33, %v2125_v31  ;;  %v2129_v39 = vmul.f32 0.0009765625, %v1738_v15  ;;  %v11943_v15 = vld [vmem:[#allocation7_spill] sm:$0xff]  ;;  %v11945_v33 = vld [vmem:[#allocation5_spill] sm:$0xff] }
 0x1f8   : > { %v2130_v49 = vmul.f32 0.0009765625, %v2127_v20  ;;  %v2131_v9 = vmul.f32 %v2129_v39, %v2129_v39  ;;  %v11947_v20 = vld [vmem:[#allocation11_spill] sm:$0xff] }
 0x1fa   : > { %v2132_v43 = vsub.f32 %v2130_v49, %v2131_v9  ;;  %v11949_v49 = vld [vmem:[#allocation9_spill] sm:$0xff] }
 0x1fc   : > { %v2133_v29 = vmax.f32 %v2132_v43, 0.0 }
 0x1fe   : > { %v2134_v44 = vadd.f32 1e-05, %v2133_v29  ;;  %v11951_v29 = vld [vmem:[#allocation15_spill] sm:$0xff] }
 0x200   : > { %6583 = vrsqrt.f32 %v2134_v44 }
 0x20a   : > { %v6584_v1 = vpop.eup %6583 }
 0x20b   : > { %v2136_v61 = vmul.f32 %v6584_v1, %v1475_v37  ;;  %v11955_v37 = vld [vmem:[#allocation19_spill] sm:$0xff] }
 0x20d   : > { %v8021_v62 = vmul.f32 %v2136_v61, %v2129_v39  ;;  %v8024_v31 = vrot.slane %v2136_v61, %v8019_v32  ;;  %v11957_v61 = vld [vmem:[#allocation17_spill] sm:$0xff] }
 0x20f   : > { %v8028_v9 = vmul.f32 %v8024_v31, %v7805_v58  ;;  %v8032_v4 = vmul.f32 %v8024_v31, %v7124_v6  ;;  %v8036_v22 = vmul.f32 %v7118_v3, %v8024_v31  ;;  %v8040_v26 = vmul.f32 %v8024_v31, %v7134_v14 }
 0x210   : > { %v8044_v16 = vmul.f32 %v7132_v12, %v8024_v31  ;;  %v8048_v58 = vmul.f32 %v8024_v31, %v7147_v24  ;;  %v8052_v6 = vmul.f32 %v11940_v63, %v8024_v31  ;;  %v8056_v3 = vmul.f32 %v8024_v31, %v11941_v34  ;;  %v11959_v34 = vld [vmem:[#allocation23_spill] sm:$0xff] }
 0x211   : > { %11939 = vst [vmem:[#allocation91_spill] sm:$0xff] %v8028_v9  ;;  %v8060_v14 = vmul.f32 %v11942_v41, %v8024_v31  ;;  %v8064_v12 = vmul.f32 %v8024_v31, %v11943_v15  ;;  %v8068_v24 = vmul.f32 %v11945_v33, %v8024_v31  ;;  %v8072_v39 = vmul.f32 %v8024_v31, %v11947_v20  ;;  %v11961_v15 = vld [vmem:[#allocation21_spill] sm:$0xff]  ;;  %v11963_v20 = vld [vmem:[#allocation27_spill] sm:$0xff]  ;;  %v12067_v9 = vld [vmem:[#allocation60_spill] sm:$0xff] }
 0x212   : > { %v8076_v43 = vmul.f32 %v11949_v49, %v8024_v31  ;;  %v8080_v44 = vmul.f32 %v8024_v31, %v11951_v29  ;;  %v8084_v17 = vmul.f32 %v11953_v53, %v8024_v31  ;;  %v8088_v1 = vmul.f32 %v8024_v31, %v11955_v37  ;;  %v11965_v29 = vld [vmem:[#allocation25_spill] sm:$0xff]  ;;  %v11967_v37 = vld [vmem:[#allocation31_spill] sm:$0xff] }
 0x213   : > { %11944 = vst [vmem:[#allocation2_spill] sm:$0xff] %v8064_v12  ;;  %11946 = vst [vmem:[#allocation4_spill] sm:$0xff] %v8068_v24  ;;  %v8092_v63 = vmul.f32 %v11957_v61, %v8024_v31  ;;  %v8096_v41 = vmul.f32 %v8024_v31, %v11959_v34  ;;  %v8100_v33 = vmul.f32 %v11961_v15, %v8024_v31  ;;  %v12071_v24 = vld [vmem:[#allocation62_spill] sm:$0xff]  ;;  %v12077_v12 = vld [vmem:[#allocation72_spill] sm:$0xff] }
 0x214   : > { %11948 = vst [vmem:[#allocation3_spill] sm:$0xff] %v8072_v39  ;;  %11950 = vst [vmem:[#allocation7_spill] sm:$0xff] %v8076_v43  ;;  %v8104_v49 = vmul.f32 %v8024_v31, %v11963_v20  ;;  %v8108_v53 = vmul.f32 %v11965_v29, %v8024_v31  ;;  %v8112_v61 = vmul.f32 %v8024_v31, %v11967_v37  ;;  %v12068_v43 = vld [vmem:[#allocation58_spill] sm:$0xff]  ;;  %v12069_v39 = vld [vmem:[#allocation64_spill] sm:$0xff] }
 0x215   : > { %11952 = vst [vmem:[#allocation5_spill] sm:$0xff] %v8080_v44  ;;  %11954 = vst [vmem:[#allocation11_spill] sm:$0xff] %v8084_v17  ;;  %v12063_v17 = vld [vmem:[#allocation56_spill] sm:$0xff]  ;;  %v12065_v44 = vld [vmem:[#allocation54_spill] sm:$0xff] }
 0x216   : > { %11956 = vst [vmem:[#allocation9_spill] sm:$0xff] %v8088_v1  ;;  %11958 = vst [vmem:[#allocation15_spill] sm:$0xff] %v8092_v63  ;;  %v11969_v63 = vld [vmem:[#allocation29_spill] sm:$0xff]  ;;  %v12062_v1 = vld [vmem:[#allocation50_spill] sm:$0xff] }
 0x217   : > { %11960 = vst [vmem:[#allocation13_spill] sm:$0xff] %v8096_v41  ;;  %11962 = vst [vmem:[#allocation19_spill] sm:$0xff] %v8100_v33  ;;  %v8116_v34 = vmul.f32 %v11969_v63, %v8024_v31  ;;  %v11971_v41 = vld [vmem:[#allocation35_spill] sm:$0xff]  ;;  %v11973_v33 = vld [vmem:[#allocation33_spill] sm:$0xff] }
 0x218   : > { %11964 = vst [vmem:[#allocation17_spill] sm:$0xff] %v8104_v49  ;;  %11966 = vst [vmem:[#allocation23_spill] sm:$0xff] %v8108_v53  ;;  %v8120_v15 = vmul.f32 %v8024_v31, %v11971_v41  ;;  %v8124_v20 = vmul.f32 %v11973_v33, %v8024_v31  ;;  %v11975_v49 = vld [vmem:[#allocation39_spill] sm:$0xff]  ;;  %v11977_v53 = vld [vmem:[#allocation37_spill] sm:$0xff] }
 0x219   : > { %11968 = vst [vmem:[#allocation21_spill] sm:$0xff] %v8112_v61  ;;  %11970 = vst [vmem:[#allocation27_spill] sm:$0xff] %v8116_v34  ;;  %v8128_v29 = vmul.f32 %v8024_v31, %v11975_v49  ;;  %v8132_v37 = vmul.f32 %v11977_v53, %v8024_v31  ;;  %v11979_v61 = vld [vmem:[#allocation43_spill] sm:$0xff]  ;;  %v11981_v34 = vld [vmem:[#allocation41_spill] sm:$0xff] }
 0x21a   : > { %11972 = vst [vmem:[#allocation25_spill] sm:$0xff] %v8120_v15  ;;  %11974 = vst [vmem:[#allocation31_spill] sm:$0xff] %v8124_v20  ;;  %v8136_v63 = vmul.f32 %v8024_v31, %v11979_v61  ;;  %v8140_v41 = vmul.f32 %v11981_v34, %v8024_v31  ;;  %v11983_v15 = vld [vmem:[#allocation47_spill] sm:$0xff]  ;;  %v11985_v20 = vld [vmem:[#allocation45_spill] sm:$0xff] }
 0x21b   : > { %11976 = vst [vmem:[#allocation29_spill] sm:$0xff] %v8128_v29  ;;  %11978 = vst [vmem:[#allocation35_spill] sm:$0xff] %v8132_v37  ;;  %v8144_v33 = vmul.f32 %v8024_v31, %v11983_v15  ;;  %v8148_v49 = vmul.f32 %v11985_v20, %v8024_v31  ;;  %v11987_v29 = vld [vmem:[#allocation51_spill] sm:$0xff]  ;;  %v11989_v37 = vld [vmem:[#allocation49_spill] sm:$0xff] }
 0x21c   : > { %11980 = vst [vmem:[#allocation33_spill] sm:$0xff] %v8136_v63  ;;  %11982 = vst [vmem:[#allocation39_spill] sm:$0xff] %v8140_v41  ;;  %v8152_v53 = vmul.f32 %v8024_v31, %v11987_v29  ;;  %v8156_v61 = vmul.f32 %v11989_v37, %v8024_v31  ;;  %v11991_v63 = vld [vmem:[#allocation55_spill] sm:$0xff]  ;;  %v11993_v41 = vld [vmem:[#allocation53_spill] sm:$0xff] }
 0x21d   : > { %11984 = vst [vmem:[#allocation37_spill] sm:$0xff] %v8144_v33  ;;  %11986 = vst [vmem:[#allocation43_spill] sm:$0xff] %v8148_v49  ;;  %v8160_v34 = vmul.f32 %v8024_v31, %v11991_v63  ;;  %v8164_v15 = vmul.f32 %v11993_v41, %v8024_v31  ;;  %v11995_v33 = vld [vmem:[#allocation59_spill] sm:$0xff]  ;;  %v11997_v49 = vld [vmem:[#allocation57_spill] sm:$0xff] }
 0x21e   : > { %11988 = vst [vmem:[#allocation41_spill] sm:$0xff] %v8152_v53  ;;  %11990 = vst [vmem:[#allocation47_spill] sm:$0xff] %v8156_v61  ;;  %v8168_v20 = vmul.f32 %v8024_v31, %v11995_v33  ;;  %v8172_v29 = vmul.f32 %v11997_v49, %v8024_v31  ;;  %v11999_v53 = vld [vmem:[#allocation63_spill] sm:$0xff]  ;;  %v12001_v61 = vld [vmem:[#allocation61_spill] sm:$0xff] }
 0x21f   : > { %11992 = vst [vmem:[#allocation45_spill] sm:$0xff] %v8160_v34  ;;  %11994 = vst [vmem:[#allocation51_spill] sm:$0xff] %v8164_v15  ;;  %v8176_v37 = vmul.f32 %v8024_v31, %v11999_v53  ;;  %v8180_v63 = vmul.f32 %v12001_v61, %v8024_v31  ;;  %v12003_v34 = vld [vmem:[#allocation67_spill] sm:$0xff]  ;;  %v12005_v15 = vld [vmem:[#allocation65_spill] sm:$0xff] }
 0x220   : > { %11996 = vst [vmem:[#allocation49_spill] sm:$0xff] %v8168_v20  ;;  %11998 = vst [vmem:[#allocation55_spill] sm:$0xff] %v8172_v29  ;;  %v8184_v41 = vmul.f32 %v8024_v31, %v12003_v34  ;;  %v8188_v33 = vmul.f32 %v12005_v15, %v8024_v31  ;;  %v12007_v20 = vld [vmem:[#allocation71_spill] sm:$0xff]  ;;  %v12009_v29 = vld [vmem:[#allocation69_spill] sm:$0xff] }
 0x221   : > { %12000 = vst [vmem:[#allocation53_spill] sm:$0xff] %v8176_v37  ;;  %12002 = vst [vmem:[#allocation59_spill] sm:$0xff] %v8180_v63  ;;  %v8192_v49 = vmul.f32 %v8024_v31, %v12007_v20  ;;  %v8196_v53 = vmul.f32 %v12009_v29, %v8024_v31  ;;  %v12011_v37 = vld [vmem:[#allocation75_spill] sm:$0xff]  ;;  %v12013_v63 = vld [vmem:[#allocation73_spill] sm:$0xff]  ;;  %v8216_v29 = vmul.f32 %v8024_v31, %v7519_v7 }
 0x222   : > { %12004 = vst [vmem:[#allocation57_spill] sm:$0xff] %v8184_v41  ;;  %12006 = vst [vmem:[#allocation63_spill] sm:$0xff] %v8188_v33  ;;  %v8200_v61 = vmul.f32 %v8024_v31, %v12011_v37  ;;  %v8204_v34 = vmul.f32 %v12013_v63, %v8024_v31  ;;  %v12015_v41 = vld [vmem:[#allocation79_spill] sm:$0xff]  ;;  %v12017_v33 = vld [vmem:[#allocation77_spill] sm:$0xff] }
 0x223   : > { %12008 = vst [vmem:[#allocation61_spill] sm:$0xff] %v8192_v49  ;;  %12010 = vst [vmem:[#allocation67_spill] sm:$0xff] %v8196_v53  ;;  %v8208_v15 = vmul.f32 %v8024_v31, %v12015_v41  ;;  %v8212_v20 = vmul.f32 %v12017_v33, %v8024_v31  ;;  %v12020_v53 = vld [vmem:[#allocation81_spill] sm:$0xff]  ;;  %v12061_v49 = vld [vmem:[#allocation52_spill] sm:$0xff] }
 0x224   : > { %12012 = vst [vmem:[#allocation65_spill] sm:$0xff] %v8200_v61  ;;  %12014 = vst [vmem:[#allocation71_spill] sm:$0xff] %v8204_v34  ;;  %v8220_v37 = vmul.f32 %v12020_v53, %v8024_v31  ;;  %v12022_v61 = vld [vmem:[#allocation8_spill] sm:$0xff]  ;;  %v12024_v34 = vld [vmem:[#allocation6_spill] sm:$0xff] }
 0x225   : > { %12016 = vst [vmem:[#allocation69_spill] sm:$0xff] %v8208_v15  ;;  %12018 = vst [vmem:[#allocation75_spill] sm:$0xff] %v8212_v20  ;;  %v8224_v63 = vmul.f32 %v8024_v31, %v12022_v61  ;;  %v8228_v41 = vmul.f32 %v12024_v34, %v8024_v31  ;;  %v12026_v15 = vld [vmem:[#allocation12_spill] sm:$0xff]  ;;  %v12028_v20 = vld [vmem:[#allocation10_spill] sm:$0xff] }
 0x226   : > { %12019 = vst [vmem:[#allocation73_spill] sm:$0xff] %v8216_v29  ;;  %12021 = vst [vmem:[#allocation79_spill] sm:$0xff] %v8220_v37  ;;  %v8232_v33 = vmul.f32 %v8024_v31, %v12026_v15  ;;  %v8236_v7 = vmul.f32 %v12028_v20, %v8024_v31  ;;  %v12030_v29 = vld [vmem:[#allocation16_spill] sm:$0xff]  ;;  %v12032_v37 = vld [vmem:[#allocation14_spill] sm:$0xff] }
 0x227   : > { %12023 = vst [vmem:[#allocation77_spill] sm:$0xff] %v8224_v63  ;;  %12025 = vst [vmem:[#allocation81_spill] sm:$0xff] %v8228_v41  ;;  %v8240_v53 = vmul.f32 %v8024_v31, %v12030_v29  ;;  %v8244_v61 = vmul.f32 %v12032_v37, %v8024_v31  ;;  %v12034_v63 = vld [vmem:[#allocation20_spill] sm:$0xff]  ;;  %v12036_v41 = vld [vmem:[#allocation18_spill] sm:$0xff] }
 0x228   : > { %12027 = vst [vmem:[#allocation8_spill] sm:$0xff] %v8232_v33  ;;  %12029 = vst [vmem:[#allocation6_spill] sm:$0xff] %v8236_v7  ;;  %v8248_v34 = vmul.f32 %v8024_v31, %v12034_v63  ;;  %v8252_v15 = vmul.f32 %v12036_v41, %v8024_v31  ;;  %v12038_v33 = vld [vmem:[#allocation24_spill] sm:$0xff]  ;;  %v12040_v7 = vld [vmem:[#allocation22_spill] sm:$0xff] }
 0x229   : > { %12031 = vst [vmem:[#allocation12_spill] sm:$0xff] %v8240_v53  ;;  %12033 = vst [vmem:[#allocation10_spill] sm:$0xff] %v8244_v61  ;;  %v8256_v20 = vmul.f32 %v8024_v31, %v12038_v33  ;;  %v8260_v29 = vmul.f32 %v12040_v7, %v8024_v31  ;;  %v12042_v53 = vld [vmem:[#allocation28_spill] sm:$0xff]  ;;  %v12044_v61 = vld [vmem:[#allocation26_spill] sm:$0xff] }
 0x22a   : > { %12035 = vst [vmem:[#allocation16_spill] sm:$0xff] %v8248_v34  ;;  %12037 = vst [vmem:[#allocation14_spill] sm:$0xff] %v8252_v15  ;;  %v8264_v37 = vmul.f32 %v8024_v31, %v12042_v53  ;;  %v8268_v63 = vmul.f32 %v12044_v61, %v8024_v31  ;;  %v12046_v34 = vld [vmem:[#allocation32_spill] sm:$0xff]  ;;  %v12048_v15 = vld [vmem:[#allocation30_spill] sm:$0xff] }
 0x22b   : > { %12039 = vst [vmem:[#allocation20_spill] sm:$0xff] %v8256_v20  ;;  %12041 = vst [vmem:[#allocation18_spill] sm:$0xff] %v8260_v29  ;;  %v8272_v41 = vmul.f32 %v8024_v31, %v12046_v34  ;;  %v8276_v33 = vmul.f32 %v12048_v15, %v8024_v31  ;;  %v12050_v20 = vld [vmem:[#allocation36_spill] sm:$0xff]  ;;  %v12052_v29 = vld [vmem:[#allocation34_spill] sm:$0xff] }
 0x22c   : > { %12043 = vst [vmem:[#allocation24_spill] sm:$0xff] %v8264_v37  ;;  %12045 = vst [vmem:[#allocation22_spill] sm:$0xff] %v8268_v63  ;;  %v8280_v7 = vmul.f32 %v8024_v31, %v12050_v20  ;;  %v8284_v53 = vmul.f32 %v12052_v29, %v8024_v31  ;;  %v12054_v37 = vld [vmem:[#allocation40_spill] sm:$0xff]  ;;  %v12055_v63 = vld [vmem:[#allocation38_spill] sm:$0xff] }
 0x22d   : > { %12047 = vst [vmem:[#allocation28_spill] sm:$0xff] %v8272_v41  ;;  %12049 = vst [vmem:[#allocation26_spill] sm:$0xff] %v8276_v33  ;;  %v8288_v61 = vmul.f32 %v8024_v31, %v12054_v37  ;;  %v8292_v34 = vmul.f32 %v12055_v63, %v8024_v31  ;;  %v12056_v41 = vld [vmem:[#allocation44_spill] sm:$0xff]  ;;  %v12057_v33 = vld [vmem:[#allocation42_spill] sm:$0xff]  ;;  %v8312_v63 = vmul.f32 %v8024_v31, %v12061_v49 }
 0x22e   : > { %12051 = vst [vmem:[#allocation32_spill] sm:$0xff] %v8280_v7  ;;  %12053 = vst [vmem:[#allocation30_spill] sm:$0xff] %v8284_v53  ;;  %v8296_v15 = vmul.f32 %v8024_v31, %v12056_v41  ;;  %v8300_v20 = vmul.f32 %v12057_v33, %v8024_v31  ;;  %v12058_v7 = vld [vmem:[#allocation48_spill] sm:$0xff]  ;;  %v12059_v53 = vld [vmem:[#allocation46_spill] sm:$0xff]  ;;  %v8316_v41 = vmul.f32 %v12062_v1, %v8024_v31 }
 0x22f   : > { %v8304_v29 = vmul.f32 %v8024_v31, %v12058_v7  ;;  %v8308_v37 = vmul.f32 %v12059_v53, %v8024_v31  ;;  %v8320_v33 = vmul.f32 %v8024_v31, %v12063_v17  ;;  %v8324_v7 = vmul.f32 %v12065_v44, %v8024_v31 }
 0x230   : > { %v8328_v53 = vmul.f32 %v8024_v31, %v12067_v9  ;;  %v8332_v49 = vmul.f32 %v12068_v43, %v8024_v31  ;;  %v8336_v1 = vmul.f32 %v8024_v31, %v12069_v39  ;;  %v8340_v17 = vmul.f32 %v12071_v24, %v8024_v31 }
 0x231   : > { %12060 = vst [vmem:[#allocation36_spill] sm:$0xff] %v8308_v37  ;;  %12064 = vst [vmem:[#allocation34_spill] sm:$0xff] %v8320_v33  ;;  %v12073_v33 = vld [vmem:[#allocation68_spill] sm:$0xff]  ;;  %v8352_v43 = vmul.f32 %v8024_v31, %v12077_v12  ;;  %v12079_v37 = vld [vmem:[#allocation70_spill] sm:$0xff] }
 0x232   : > { %12066 = vst [vmem:[#allocation40_spill] sm:$0xff] %v8324_v7  ;;  %12070 = vst [vmem:[#allocation38_spill] sm:$0xff] %v8336_v1  ;;  %v8344_v44 = vmul.f32 %v8024_v31, %v12073_v33  ;;  %v12075_v7 = vld [vmem:[#allocation66_spill] sm:$0xff]  ;;  %v8356_v39 = vmul.f32 %v12079_v37, %v8024_v31  ;;  %v12080_v1 = vld [vmem:[#allocation76_spill] sm:$0xff] }
 0x233   : > { %12072 = vst [vmem:[#allocation44_spill] sm:$0xff] %v8340_v17  ;;  %v8348_v9 = vmul.f32 %v12075_v7, %v8024_v31  ;;  %12078 = vst [vmem:[#allocation46_spill] sm:$0xff] %v8352_v43  ;;  %v8360_v24 = vmul.f32 %v8024_v31, %v12080_v1  ;;  %v12081_v17 = vld [vmem:[#allocation74_spill] sm:$0xff]  ;;  %v8380_v1 = vmul.f32 %v7517_v55, %v8024_v31 }
 0x234   : > { %12074 = vst [vmem:[#allocation42_spill] sm:$0xff] %v8344_v44  ;;  %v8364_v33 = vmul.f32 %v12081_v17, %v8024_v31  ;;  %v12082_v44 = vld [vmem:[#allocation80_spill] sm:$0xff]  ;;  %v12084_v43 = vld [vmem:[#allocation82_spill] sm:$0xff]  ;;  %v8384_v17 = vmul.f32 %v8024_v31, %v7539_v36  ;;  %v8400_v55 = vmul.f32 %v8024_v31, %v7567_v40  ;;  %v8404_v36 = vmul.f32 %v7565_v11, %v8024_v31 }
 0x235   : > { %12076 = vst [vmem:[#allocation48_spill] sm:$0xff] %v8348_v9  ;;  %v8368_v7 = vmul.f32 %v8024_v31, %v12082_v44  ;;  %v12083_v9 = vld [vmem:[#allocation78_spill] sm:$0xff]  ;;  %v8376_v37 = vmul.f32 %v8024_v31, %v12084_v43  ;;  %v8388_v44 = vmul.f32 %v7537_v59, %v8024_v31  ;;  %v8396_v43 = vmul.f32 %v7551_v2, %v8024_v31 }
 0x236   : > { %v8372_v12 = vmul.f32 %v12083_v9, %v8024_v31  ;;  %v8392_v9 = vmul.f32 %v8024_v31, %v7553_v19  ;;  %12085 = vst [vmem:[#allocation52_spill] sm:$0xff] %v8404_v36  ;;  %v8408_v59 = vmul.f32 %v8024_v31, %v7581_v27  ;;  %v8412_v19 = vmul.f32 %v7579_v21, %v8024_v31  ;;  %v12086_v36 = vld [vmem:[#allocation83_spill] sm:$0xff] }
 0x237   : > { %v8416_v2 = vmul.f32 %v8024_v31, %v7595_v57  ;;  %v8420_v40 = vmul.f32 %v7593_v25, %v8024_v31  ;;  %v8424_v11 = vmul.f32 %v8024_v31, %v7609_v42  ;;  %v8428_v27 = vmul.f32 %v7607_v46, %v8024_v31 }
 0x238   : > { %v8432_v21 = vmul.f32 %v8024_v31, %v12086_v36  ;;  %v8436_v57 = vmul.f32 %v7621_v60, %v8024_v31  ;;  %v8440_v25 = vmul.f32 %v8024_v31, %v7637_v45  ;;  %v8444_v42 = vmul.f32 %v7635_v13, %v8024_v31 }
 0x239   : > { %v8448_v46 = vmul.f32 %v8024_v31, %v7651_v51  ;;  %v8452_v36 = vmul.f32 %v7649_v30, %v8024_v31  ;;  %v8456_v60 = vmul.f32 %v8024_v31, %v7665_v47  ;;  %v8460_v45 = vmul.f32 %v7663_v48, %v8024_v31 }
 0x23a   : > { %v8464_v13 = vmul.f32 %v8024_v31, %v7679_v50  ;;  %v8468_v51 = vmul.f32 %v7677_v5, %v8024_v31  ;;  %v8472_v30 = vmul.f32 %v8024_v31, %v7693_v0  ;;  %v8476_v47 = vmul.f32 %v7691_v28, %v8024_v31 }
 0x23b   : > { %v8480_v48 = vmul.f32 %v8024_v31, %v7707_v18  ;;  %v8484_v50 = vmul.f32 %v7705_v56, %v8024_v31  ;;  %v8488_v5 = vmul.f32 %v8024_v31, %v7721_v35  ;;  %v8492_v0 = vmul.f32 %v7719_v23, %v8024_v31 }
 0x23c   : > { %v8496_v28 = vmul.f32 %v8024_v31, %v7735_v54  ;;  %v8500_v18 = vmul.f32 %v7733_v8, %v8024_v31  ;;  %v8504_v56 = vmul.f32 %v8024_v31, %v7749_v10  ;;  %v8508_v35 = vmul.f32 %v7747_v52, %v8024_v31 }
 0x23d   : > { %12087 = vst [vmem:[#allocation50_spill] sm:$0xff] %v8492_v0  ;;  %v8512_v23 = vmul.f32 %v8024_v31, %v7763_v38  ;;  %v12093_v0 = vld [vmem:[#allocation84_spill] sm:$0xff] }
 0x23e   : > { %12088 = vst [vmem:[#allocation56_spill] sm:$0xff] %v8496_v28  ;;  %12089 = vst [vmem:[#allocation54_spill] sm:$0xff] %v8500_v18  ;;  %v8516_v54 = vmul.f32 %v12093_v0, %v8024_v31  ;;  %v12095_v28 = vld [vmem:[#allocation86_spill] sm:$0xff]  ;;  %v12096_v18 = vld [vmem:[#allocation85_spill] sm:$0xff] }
 0x23f   : > { %12090 = vst [vmem:[#allocation60_spill] sm:$0xff] %v8504_v56  ;;  %12091 = vst [vmem:[#allocation58_spill] sm:$0xff] %v8508_v35  ;;  %v8520_v8 = vmul.f32 %v8024_v31, %v12095_v28  ;;  %v8524_v10 = vmul.f32 %v12096_v18, %v8024_v31  ;;  %v12097_v56 = vld [vmem:[#allocation88_spill] sm:$0xff]  ;;  %v12099_v35 = vld [vmem:[#allocation87_spill] sm:$0xff] }
 0x240   : > { %12092 = vst [vmem:[#allocation64_spill] sm:$0xff] %v8512_v23  ;;  %12094 = vst [vmem:[#allocation62_spill] sm:$0xff] %v8516_v54  ;;  %v8528_v52 = vmul.f32 %v8024_v31, %v12097_v56  ;;  %v8532_v38 = vmul.f32 %v12099_v35, %v8024_v31  ;;  %v12101_v23 = vld [vmem:[#allocation89_spill] sm:$0xff]  ;;  %v1476_v28 = vld [vmem:[%s11700_s3] sm:$0x1] }
 0x241   : > { %v8536_v0 = vmul.f32 %v12101_v23, %v8024_v31  ;;  %v2138_v54 = vsub.f32 %v1476_v28, %v8021_v62 }
 0x242   : > { %12098 = vst [vmem:[#allocation68_spill] sm:$0xff] %v8528_v52  ;;  %12100 = vst [vmem:[#allocation66_spill] sm:$0xff] %v8532_v38 }
 0x243   : > { %v8543_v18 = vrot.slane %v2138_v54, %v8019_v32 }
 0x245   : > { %v2279_v56 = vadd.f32 %v8543_v18, %v8040_v26  ;;  %v2277_v35 = vadd.f32 %v8543_v18, %v8032_v4  ;;  %v8551_v31 = vadd.f32 %v8543_v18, %v8288_v61  ;;  %v2278_v23 = vadd.f32 %v8543_v18, %v8036_v22 }
 0x246   : > { %v2343_v4 = vadd.f32 %v8543_v18, %v8296_v15  ;;  %v2280_v54 = vadd.f32 %v8543_v18, %v8044_v16  ;;  %v2281_v15 = vadd.f32 %v8543_v18, %v8048_v58  ;;  %v2344_v28 = vadd.f32 %v8543_v18, %v8300_v20 }
 0x247   : > { %v2407_v38 = vmax.f32 %v2279_v56, 0.0  ;;  %v2405_v52 = vmax.f32 %v2277_v35, 0.0  ;;  %v11801_v62 = vmax.f32 %v8551_v31, 0.0  ;;  %v2406_v26 = vmax.f32 %v2278_v23, 0.0 }
 0x248   : > { %v8566_v22 = vmax.f32 %v2343_v4, 0.0  ;;  %v2408_v61 = vmax.f32 %v2280_v54, 0.0  ;;  %v2472_v56 = vmax.f32 %v2344_v28, 0.0  ;;  %v2347_v35 = vadd.f32 %v8543_v18, %v8312_v63 }
 0x249   : > { %2806 = vrot.lane.b32.xlu1 %v2407_v38, %s6632_s16  ;;  %3134 = vrot.lane.b32.xlu0 %v2405_v52, %s6634_s22  ;;  %v8570_v52 = vadd.f32 %v8543_v18, %v8292_v34  ;;  %v2409_v34 = vmax.f32 %v2281_v15, 0.0  ;;  %v2282_v58 = vadd.f32 %v8543_v18, %v8052_v6  ;;  %v2283_v20 = vadd.f32 %v8543_v18, %v8056_v3 }
 0x24a   : > { %12102 = vst [vmem:[#allocation72_spill] sm:$0xff] %v8566_v22  ;;  %v11799_v23 = vrot.slane %v8566_v22, 7  ;;  %v2567_v63 = vrot.slane %v2472_v56, 7  ;;  %v2345_v6 = vadd.f32 %v8543_v18, %v8304_v29  ;;  %v2351_v3 = vadd.f32 %v8543_v18, %v8328_v53 }
 0x24b   : > { %v11802_v16 = vmax.f32 %v8570_v52, 0.0  ;;  %v2410_v4 = vmax.f32 %v2282_v58, 0.0 }
 0x24c   : > { %v8607_v15 = vsel %vm2565_vm4, %v11799_v23, %v2567_v63  ;;  %v8614_v28 = vmax.f32 %v2351_v3, 0.0  ;;  %v2473_v53 = vmax.f32 %v2345_v6, 0.0 }
 0x24d   : > { %3230 = vrot.lane.b32.xlu1 %v11801_v62, %s6635_s23  ;;  %3136 = vrot.lane.b32.xlu0 %v2406_v26, %s6634_s22  ;;  %v8598_v26 = vmax.f32 %v2347_v35, 0.0  ;;  %v12110_v62 = vld [vmem:[#allocation40_spill] sm:$0xff] }
 0x24f   : > { %v11800_v29 = vrot.slane %v8598_v26, 7 }
 0x251   : > { %2899 = vrot.lane.b32.xlu1 %v8566_v22, %s6633_s17  ;;  %2808 = vrot.lane.b32.xlu0 %v2408_v61, %s6632_s16 }
 0x255   : > { %3440 = vrot.lane.b32.xlu1 %v2407_v38, %s6636_s24  ;;  %3232 = vrot.lane.b32.xlu0 %v11802_v16, %s6635_s23  ;;  %v2348_v38 = vadd.f32 %v8543_v18, %v8316_v41  ;;  %v2411_v41 = vmax.f32 %v2283_v20, 0.0  ;;  %v12103_v20 = vld [vmem:[#allocation42_spill] sm:$0xff]  ;;  %v2350_v16 = vadd.f32 %v8543_v18, %v12110_v62  ;;  %v12111_v62 = vmax.f32 %v8570_v52, 0.0 }
 0x257   : > { %v2476_v54 = vmax.f32 %v2348_v38, 0.0  ;;  %v2355_v38 = vadd.f32 %v8543_v18, %v12103_v20 }
 0x259   : > { %3138 = vrot.lane.b32.xlu1 %v2409_v34, %s6634_s22  ;;  %2901 = vrot.lane.b32.xlu0 %v2472_v56, %s6633_s17  ;;  %v2284_v34 = vadd.f32 %v8543_v18, %v8060_v14  ;;  %v2570_v35 = vrot.slane %v2476_v54, 7  ;;  %v11805_v14 = vrot.slane %v8614_v28, 7  ;;  %v8634_v23 = vmax.f32 %v2355_v38, 0.0  ;;  %v12109_v38 = vld [vmem:[#allocation34_spill] sm:$0xff] }
 0x25b   : > { %v8629_v6 = vsel %vm2565_vm4, %v11800_v29, %v2570_v35  ;;  %v2412_v3 = vmax.f32 %v2284_v34, 0.0  ;;  %v2349_v29 = vadd.f32 %v8543_v18, %v12109_v38  ;;  %v11809_v32 = vrot.slane %v8634_v23, 7 }
 0x25c   : > { %12105 = vst [vmem:[#allocation70_spill] sm:$0xff] %v8629_v6  ;;  %v8662_v38 = vrot.slane %v2473_v53, 7  ;;  %v12112_v6 = vld [vmem:[#allocation4_spill] sm:$0xff] }
 0x25d   : > { %3536 = vrot.lane.b32.xlu1 %v8566_v22, %s6637_s27  ;;  %3442 = vrot.lane.b32.xlu0 %v2408_v61, %s6636_s24  ;;  %v2352_v61 = vadd.f32 %v8543_v18, %v8332_v49  ;;  %v12104_v49 = vld [vmem:[#allocation48_spill] sm:$0xff] }
 0x25e   : > { %v2356_v63 = vadd.f32 %v8543_v18, %v12104_v49  ;;  %v12108_v49 = vld [vmem:[#allocation2_spill] sm:$0xff] }
 0x25f   : > { %v8618_v58 = vmax.f32 %v2352_v61, 0.0 }
 0x260   : > { %v8640_v20 = vmax.f32 %v2356_v63, 0.0 }
 0x261   : > { %3140 = vrot.lane.b32.xlu1 %v2410_v4, %s6634_s22  ;;  %2810 = vrot.lane.b32.xlu0 %v2411_v41, %s6632_s16  ;;  %v12106_v4 = vld [vmem:[#allocation36_spill] sm:$0xff] }
 0x262   : > { %v2346_v61 = vadd.f32 %v8543_v18, %v12106_v4  ;;  %v2285_v4 = vadd.f32 %v8543_v18, %v12108_v49  ;;  %v2576_v63 = vrot.slane %v8640_v20, 7 }
 0x264   : > { %v2474_v34 = vmax.f32 %v2346_v61, 0.0  ;;  %v2478_v61 = vmax.f32 %v2350_v16, 0.0  ;;  %v8660_v49 = vsel %vm2565_vm4, %v11809_v32, %v2576_v63 }
 0x265   : > { %3538 = vrot.lane.b32.xlu1 %v2472_v56, %s6637_s27  ;;  %3234 = vrot.lane.b32.xlu0 %v2473_v53, %s6635_s23  ;;  %v2573_v56 = vrot.slane %v8618_v58, 7  ;;  %v12114_v53 = vmax.f32 %v8551_v31, 0.0 }
 0x266   : > { %v2700_v63 = vrot.slane %v2478_v61, 7 }
 0x267   : > { %v8645_v35 = vsel %vm2565_vm4, %v11805_v14, %v2573_v56  ;;  %v2413_v56 = vmax.f32 %v2285_v4, 0.0  ;;  %v2477_v14 = vmax.f32 %v2349_v29, 0.0  ;;  %v2286_v4 = vadd.f32 %v8543_v18, %v12112_v6  ;;  %v12113_v29 = vld [vmem:[#allocation3_spill] sm:$0xff] }
 0x268   : > { %12107 = vst [vmem:[#allocation76_spill] sm:$0xff] %v8645_v35  ;;  %v2697_v35 = vrot.slane %v2474_v34, 7  ;;  %v2287_v16 = vadd.f32 %v8543_v18, %v12113_v29  ;;  %v8676_v32 = vrot.slane %v12114_v53, 7  ;;  %v12116_v29 = vld [vmem:[#allocation91_spill] sm:$0xff]  ;;  %v12119_v53 = vld [vmem:[#allocation5_spill] sm:$0xff] }
 0x269   : > { %2903 = vrot.lane.b32.xlu1 %v8598_v26, %s6633_s17  ;;  %2812 = vrot.lane.b32.xlu0 %v2412_v3, %s6632_s16  ;;  %v8672_v22 = vrot.slane %v2477_v14, 7 }
 0x26a   : > { %v8683_v52 = vsel %vm2565_vm4, %v8662_v38, %v2697_v35  ;;  %v8699_v35 = vadd.f32 %v8543_v18, %v12116_v29  ;;  %v12123_v29 = vld [vmem:[#allocation9_spill] sm:$0xff] }
 0x26b   : > { %v8691_v31 = vsel %vm2565_vm4, %v8672_v22, %v2700_v63 }
 0x26c   : > { %12117 = vst [vmem:[#allocation74_spill] sm:$0xff] %v8699_v35 }
 0x26d   : > { %3444 = vrot.lane.b32.xlu1 %v2411_v41, %s6636_s24  ;;  %3236 = vrot.lane.b32.xlu0 %v2474_v34, %s6635_s23  ;;  %v2694_v41 = vrot.slane %v12111_v62, 7  ;;  %v2414_v34 = vmax.f32 %v2286_v4, 0.0  ;;  %v12115_v62 = vld [vmem:[#allocation7_spill] sm:$0xff] }
 0x26f   : > { %v8687_v6 = vsel %vm2565_vm4, %v8676_v32, %v2694_v41  ;;  %v8703_v41 = vadd.f32 %v8543_v18, %v8536_v0 }
 0x271   : > { %3142 = vrot.lane.b32.xlu1 %v2413_v56, %s6634_s22  ;;  %2905 = vrot.lane.b32.xlu0 %v2476_v54, %s6633_s17  ;;  %v2415_v56 = vmax.f32 %v2287_v16, 0.0  ;;  %12118 = vst [vmem:[#allocation80_spill] sm:$0xff] %v8703_v41  ;;  %v11811_v16 = vmax.f32 %v8699_v35, 0.0  ;;  %v11810_v63 = vmax.f32 %v8703_v41, 0.0 }
 0x273   : > { %v2611_v0 = vrot.slane %v11811_v16, 7  ;;  %v12129_v16 = vld [vmem:[#allocation17_spill] sm:$0xff] }
 0x275   : > { %3540 = vrot.lane.b32.xlu1 %v8598_v26, %s6637_s27  ;;  %3446 = vrot.lane.b32.xlu0 %v2412_v3, %s6636_s24  ;;  %v2288_v3 = vadd.f32 %v8543_v18, %v12115_v62  ;;  %v8721_v62 = vsel %vm2565_vm4, 0.0, %v2611_v0 }
 0x276   : > { %12120 = vst [vmem:[#allocation78_spill] sm:$0xff] %v8721_v62  ;;  %v12143_v62 = vld [vmem:[#allocation31_spill] sm:$0xff] }
 0x277   : > { %v2416_v4 = vmax.f32 %v2288_v3, 0.0 }
 0x279   : > { %3144 = vrot.lane.b32.xlu1 %v2414_v34, %s6634_s22  ;;  %2814 = vrot.lane.b32.xlu0 %v2415_v56, %s6632_s16  ;;  %v2289_v34 = vadd.f32 %v8543_v18, %v12119_v53  ;;  %v2291_v53 = vadd.f32 %v8543_v18, %v12123_v29 }
 0x27d   : > { %3542 = vrot.lane.b32.xlu1 %v2476_v54, %s6637_s27  ;;  %3238 = vrot.lane.b32.xlu0 %v2477_v14, %s6635_s23  ;;  %v2612_v54 = vrot.slane %v11810_v63, 7  ;;  %v2417_v14 = vmax.f32 %v2289_v34, 0.0  ;;  %v2419_v63 = vmax.f32 %v2291_v53, 0.0 }
 0x27f   : > { %v8724_v3 = vsel %vm2565_vm4, %v2611_v0, %v2612_v54  ;;  %v12124_v0 = vld [vmem:[#allocation38_spill] sm:$0xff] }
 0x280   : > { %12121 = vst [vmem:[#allocation82_spill] sm:$0xff] %v8724_v3  ;;  %v8738_v54 = vadd.f32 %v8543_v18, %v12124_v0  ;;  %v12127_v0 = vld [vmem:[#allocation13_spill] sm:$0xff] }
 0x281   : > { %2907 = vrot.lane.b32.xlu1 %v8614_v28, %s6633_s17  ;;  %2816 = vrot.lane.b32.xlu0 %v2416_v4, %s6632_s16  ;;  %v12138_v3 = vld [vmem:[#allocation25_spill] sm:$0xff] }
 0x285   : > { %3448 = vrot.lane.b32.xlu1 %v2415_v56, %s6636_s24  ;;  %3240 = vrot.lane.b32.xlu0 %v2478_v61, %s6635_s23  ;;  %v12122_v56 = vld [vmem:[#allocation11_spill] sm:$0xff] }
 0x286   : > { %v2290_v61 = vadd.f32 %v8543_v18, %v12122_v56  ;;  %v12125_v56 = vld [vmem:[#allocation15_spill] sm:$0xff] }
 0x287   : > { %v2292_v29 = vadd.f32 %v8543_v18, %v12125_v56  ;;  %v2293_v56 = vadd.f32 %v8543_v18, %v12127_v0 }
 0x288   : > { %v2418_v34 = vmax.f32 %v2290_v61, 0.0  ;;  %v12126_v61 = vld [vmem:[#allocation44_spill] sm:$0xff] }
 0x289   : > { %3146 = vrot.lane.b32.xlu1 %v2417_v14, %s6634_s22  ;;  %2909 = vrot.lane.b32.xlu0 %v8618_v58, %s6633_s17  ;;  %v11812_v14 = vmax.f32 %v8738_v54, 0.0  ;;  %v8752_v53 = vadd.f32 %v8543_v18, %v12126_v61 }
 0x28d   : > { %3544 = vrot.lane.b32.xlu1 %v8614_v28, %s6637_s27  ;;  %3450 = vrot.lane.b32.xlu0 %v2416_v4, %s6636_s24  ;;  %v2420_v4 = vmax.f32 %v2292_v29, 0.0  ;;  %v12128_v29 = vld [vmem:[#allocation19_spill] sm:$0xff] }
 0x28e   : > { %v2294_v61 = vadd.f32 %v8543_v18, %v12128_v29  ;;  %v12131_v29 = vld [vmem:[#allocation23_spill] sm:$0xff] }
 0x28f   : > { %v2296_v41 = vadd.f32 %v8543_v18, %v12131_v29 }
 0x291   : > { %3148 = vrot.lane.b32.xlu1 %v2418_v34, %s6634_s22  ;;  %2818 = vrot.lane.b32.xlu0 %v2419_v63, %s6632_s16  ;;  %v11813_v34 = vmax.f32 %v8752_v53, 0.0 }
 0x295   : > { %3546 = vrot.lane.b32.xlu1 %v8618_v58, %s6637_s27  ;;  %3242 = vrot.lane.b32.xlu0 %v11812_v14, %s6635_s23  ;;  %v2421_v58 = vmax.f32 %v2293_v56, 0.0  ;;  %v2295_v14 = vadd.f32 %v8543_v18, %v12129_v16  ;;  %v2359_v16 = vadd.f32 %v8543_v18, %v8360_v24 }
 0x297   : > { %v2423_v0 = vmax.f32 %v2295_v14, 0.0  ;;  %v8790_v14 = vmax.f32 %v2359_v16, 0.0  ;;  %v2360_v16 = vadd.f32 %v8543_v18, %v8364_v33  ;;  %v12137_v33 = vld [vmem:[#allocation27_spill] sm:$0xff] }
 0x299   : > { %2911 = vrot.lane.b32.xlu1 %v8634_v23, %s6633_s17  ;;  %2820 = vrot.lane.b32.xlu0 %v2420_v4, %s6632_s16  ;;  %v8812_v29 = vmax.f32 %v2360_v16, 0.0 }
 0x29d   : > { %3452 = vrot.lane.b32.xlu1 %v2419_v63, %s6636_s24  ;;  %3244 = vrot.lane.b32.xlu0 %v11813_v34, %s6635_s23  ;;  %v2422_v63 = vmax.f32 %v2294_v61, 0.0  ;;  %v12130_v34 = vld [vmem:[#allocation46_spill] sm:$0xff]  ;;  %v8796_v61 = vadd.f32 %v8543_v18, %v8356_v39 }
 0x29e   : > { %v8776_v56 = vadd.f32 %v8543_v18, %v12130_v34  ;;  %v8792_v34 = vpop.permute.xlu0 %2804 }
 0x29f   : > { %12132 = vst [vmem:[#allocation83_spill] sm:$0xff] %v8792_v34  ;;  %v11816_v24 = vmax.f32 %v8796_v61, 0.0 }
 0x2a1   : > { %3150 = vrot.lane.b32.xlu1 %v2421_v58, %s6634_s22  ;;  %2913 = vrot.lane.b32.xlu0 %v8640_v20, %s6633_s17  ;;  %v11815_v58 = vmax.f32 %v8776_v56, 0.0 }
 0x2a2   : > { %v8810_v39 = vpop.permute.xlu0 %2897 }
 0x2a3   : > { %12134 = vst [vmem:[#allocation84_spill] sm:$0xff] %v8810_v39 }
 0x2a5   : > { %3548 = vrot.lane.b32.xlu1 %v8634_v23, %s6637_s27  ;;  %3454 = vrot.lane.b32.xlu0 %v2420_v4, %s6636_s24  ;;  %v2424_v4 = vmax.f32 %v2296_v41, 0.0 }
 0x2a9   : > { %3152 = vrot.lane.b32.xlu1 %v2422_v63, %s6634_s22  ;;  %2822 = vrot.lane.b32.xlu0 %v2423_v0, %s6632_s16 }
 0x2ad   : > { %3550 = vrot.lane.b32.xlu1 %v8640_v20, %s6637_s27  ;;  %3246 = vrot.lane.b32.xlu0 %v11815_v58, %s6635_s23  ;;  %v12133_v20 = vld [vmem:[#allocation21_spill] sm:$0xff] }
 0x2ae   : > { %v2297_v63 = vadd.f32 %v8543_v18, %v12133_v20 }
 0x2b0   : > { %v2425_v41 = vmax.f32 %v2297_v63, 0.0 }
 0x2b1   : > { %2915 = vrot.lane.b32.xlu1 %v8790_v14, %s6633_s17  ;;  %2824 = vrot.lane.b32.xlu0 %v2424_v4, %s6632_s16 }
 0x2b5   : > { %3456 = vrot.lane.b32.xlu1 %v2423_v0, %s6636_s24  ;;  %3248 = vrot.lane.b32.xlu0 %v11816_v24, %s6635_s23  ;;  %v2298_v0 = vadd.f32 %v8543_v18, %v12137_v33  ;;  %v2299_v24 = vadd.f32 %v8543_v18, %v12138_v3 }
 0x2b7   : > { %v2427_v35 = vmax.f32 %v2299_v24, 0.0  ;;  %v2300_v24 = vadd.f32 %v8543_v18, %v12143_v62 }
 0x2b9   : > { %3154 = vrot.lane.b32.xlu1 %v2425_v41, %s6634_s22  ;;  %2917 = vrot.lane.b32.xlu0 %v8812_v29, %s6633_s17  ;;  %v2426_v41 = vmax.f32 %v2298_v0, 0.0 }
 0x2bb   : > { %v8817_v20 = vpop.permute.xlu1 %2806  ;;  %v8819_v58 = vpop.permute.xlu0 %3134 }
 0x2bc   : > { %12135 = vst [vmem:[#allocation86_spill] sm:$0xff] %v8817_v20  ;;  %12136 = vst [vmem:[#allocation85_spill] sm:$0xff] %v8819_v58  ;;  %v8834_v20 = vadd.f32 %v8543_v18, %v8368_v7 }
 0x2bd   : > { %3552 = vrot.lane.b32.xlu1 %v8790_v14, %s6637_s27  ;;  %3458 = vrot.lane.b32.xlu0 %v2424_v4, %s6636_s24 }
 0x2be   : > { %v11818_v4 = vmax.f32 %v8834_v20, 0.0 }
 0x2bf   : > { %v8828_v63 = vpop.permute.xlu1 %3230  ;;  %v8830_v16 = vpop.permute.xlu0 %3136 }
 0x2c0   : > { %12139 = vst [vmem:[#allocation88_spill] sm:$0xff] %v8828_v63  ;;  %12140 = vst [vmem:[#allocation87_spill] sm:$0xff] %v8830_v16  ;;  %v2363_v63 = vadd.f32 %v8543_v18, %v8376_v37  ;;  %v8860_v37 = vadd.f32 %v8543_v18, %v8372_v12 }
 0x2c1   : > { %3156 = vrot.lane.b32.xlu1 %v2426_v41, %s6634_s22  ;;  %2826 = vrot.lane.b32.xlu0 %v2427_v35, %s6632_s16 }
 0x2c2   : > { %v8856_v41 = vmax.f32 %v2363_v63, 0.0 }
 0x2c3   : > { %v8838_v3 = vpop.permute.xlu1 %2899  ;;  %v8840_v33 = vpop.permute.xlu0 %2808 }
 0x2c4   : > { %12141 = vst [vmem:[#allocation89_spill] sm:$0xff] %v8838_v3  ;;  %12142 = vst [vmem:[#allocation42_spill] sm:$0xff] %v8840_v33  ;;  %v2428_v3 = vmax.f32 %v2300_v24, 0.0  ;;  %v2364_v24 = vadd.f32 %v8543_v18, %v8380_v1 }
 0x2c5   : > { %3554 = vrot.lane.b32.xlu1 %v8812_v29, %s6637_s27  ;;  %3250 = vrot.lane.b32.xlu0 %v11818_v4, %s6635_s23  ;;  %v11819_v4 = vmax.f32 %v8860_v37, 0.0 }
 0x2c6   : > { %v8882_v58 = vmax.f32 %v2364_v24, 0.0 }
 0x2c7   : > { %v8852_v7 = vpop.permute.xlu1 %3440  ;;  %v8854_v0 = vpop.permute.xlu0 %3232 }
 0x2c8   : > { %12144 = vst [vmem:[#allocation48_spill] sm:$0xff] %v8852_v7  ;;  %12145 = vst [vmem:[#allocation36_spill] sm:$0xff] %v8854_v0  ;;  %v12148_v7 = vld [vmem:[#allocation29_spill] sm:$0xff] }
 0x2c9   : > { %2919 = vrot.lane.b32.xlu1 %v8856_v41, %s6633_s17  ;;  %2828 = vrot.lane.b32.xlu0 %v2428_v3, %s6632_s16  ;;  %v2301_v63 = vadd.f32 %v8543_v18, %v12148_v7 }
 0x2cb   : > { %v8865_v62 = vpop.permute.xlu1 %3138  ;;  %v8867_v16 = vpop.permute.xlu0 %2901 }
 0x2cc   : > { %12146 = vst [vmem:[#allocation2_spill] sm:$0xff] %v8865_v62  ;;  %12147 = vst [vmem:[#allocation34_spill] sm:$0xff] %v8867_v16  ;;  %v2429_v62 = vmax.f32 %v2301_v63, 0.0 }
 0x2cd   : > { %3460 = vrot.lane.b32.xlu1 %v2427_v35, %s6636_s24  ;;  %3252 = vrot.lane.b32.xlu0 %v11819_v4, %s6635_s23  ;;  %v12153_v35 = vld [vmem:[#allocation35_spill] sm:$0xff]  ;;  %v12154_v4 = vld [vmem:[#allocation33_spill] sm:$0xff] }
 0x2ce   : > { %v2302_v16 = vadd.f32 %v8543_v18, %v12153_v35 }
 0x2cf   : > { %v8878_v12 = vpop.permute.xlu1 %3536  ;;  %v8880_v0 = vpop.permute.xlu0 %3442 }
 0x2d0   : > { %12149 = vst [vmem:[#allocation40_spill] sm:$0xff] %v8878_v12  ;;  %12150 = vst [vmem:[#allocation4_spill] sm:$0xff] %v8880_v0  ;;  %v2303_v12 = vadd.f32 %v8543_v18, %v12154_v4  ;;  %v2430_v24 = vmax.f32 %v2302_v16, 0.0 }
 0x2d1   : > { %3158 = vrot.lane.b32.xlu1 %v2429_v62, %s6634_s22  ;;  %2921 = vrot.lane.b32.xlu0 %v8882_v58, %s6633_s17 }
 0x2d2   : > { %v2431_v0 = vmax.f32 %v2303_v12, 0.0 }
 0x2d3   : > { %v8887_v7 = vpop.permute.xlu1 %3140  ;;  %v8889_v1 = vpop.permute.xlu0 %2810 }
 0x2d4   : > { %12151 = vst [vmem:[#allocation3_spill] sm:$0xff] %v8887_v7  ;;  %12152 = vst [vmem:[#allocation7_spill] sm:$0xff] %v8889_v1  ;;  %v8904_v1 = vadd.f32 %v8543_v18, %v8384_v17 }
 0x2d5   : > { %3556 = vrot.lane.b32.xlu1 %v8856_v41, %s6637_s27  ;;  %3462 = vrot.lane.b32.xlu0 %v2428_v3, %s6636_s24 }
 0x2d6   : > { %v11820_v3 = vmax.f32 %v8904_v1, 0.0 }
 0x2d7   : > { %v8898_v63 = vpop.permute.xlu1 %3538  ;;  %v8900_v62 = vpop.permute.xlu0 %3234 }
 0x2d8   : > { %12155 = vst [vmem:[#allocation91_spill] sm:$0xff] %v8898_v63  ;;  %12156 = vst [vmem:[#allocation5_spill] sm:$0xff] %v8900_v62  ;;  %v2367_v63 = vadd.f32 %v8543_v18, %v8392_v9  ;;  %v12159_v62 = vld [vmem:[#allocation39_spill] sm:$0xff]  ;;  %v8930_v9 = vadd.f32 %v8543_v18, %v8388_v44 }
 0x2d9   : > { %3160 = vrot.lane.b32.xlu1 %v2430_v24, %s6634_s22  ;;  %2830 = vrot.lane.b32.xlu0 %v2431_v0, %s6632_s16  ;;  %v2304_v16 = vadd.f32 %v8543_v18, %v12159_v62 }
 0x2da   : > { %v8926_v24 = vmax.f32 %v2367_v63, 0.0 }
 0x2db   : > { %v8908_v4 = vpop.permute.xlu1 %2903  ;;  %v8910_v35 = vpop.permute.xlu0 %2812 }
 0x2dc   : > { %12157 = vst [vmem:[#allocation11_spill] sm:$0xff] %v8908_v4  ;;  %12158 = vst [vmem:[#allocation9_spill] sm:$0xff] %v8910_v35  ;;  %v2432_v4 = vmax.f32 %v2304_v16, 0.0  ;;  %v2368_v16 = vadd.f32 %v8543_v18, %v8396_v43 }
 0x2dd   : > { %3558 = vrot.lane.b32.xlu1 %v8882_v58, %s6637_s27  ;;  %3254 = vrot.lane.b32.xlu0 %v11820_v3, %s6635_s23  ;;  %v11821_v3 = vmax.f32 %v8930_v9, 0.0 }
 0x2df   : > { %v8922_v17 = vpop.permute.xlu1 %3444  ;;  %v8924_v12 = vpop.permute.xlu0 %3236 }
 0x2e0   : > { %12160 = vst [vmem:[#allocation38_spill] sm:$0xff] %v8922_v17  ;;  %12161 = vst [vmem:[#allocation15_spill] sm:$0xff] %v8924_v12  ;;  %v12164_v17 = vld [vmem:[#allocation37_spill] sm:$0xff] }
 0x2e1   : > { %2923 = vrot.lane.b32.xlu1 %v8926_v24, %s6633_s17  ;;  %2832 = vrot.lane.b32.xlu0 %v2432_v4, %s6632_s16  ;;  %v2305_v63 = vadd.f32 %v8543_v18, %v12164_v17 }
 0x2e3   : > { %v8935_v62 = vpop.permute.xlu1 %3142  ;;  %v8937_v35 = vpop.permute.xlu0 %2905 }
 0x2e4   : > { %12162 = vst [vmem:[#allocation44_spill] sm:$0xff] %v8935_v62  ;;  %12163 = vst [vmem:[#allocation13_spill] sm:$0xff] %v8937_v35  ;;  %v2433_v62 = vmax.f32 %v2305_v63, 0.0  ;;  %v8952_v35 = vmax.f32 %v2368_v16, 0.0 }
 0x2e5   : > { %3464 = vrot.lane.b32.xlu1 %v2431_v0, %s6636_s24  ;;  %3256 = vrot.lane.b32.xlu0 %v11821_v3, %s6635_s23  ;;  %v12169_v0 = vld [vmem:[#allocation43_spill] sm:$0xff]  ;;  %v12170_v3 = vld [vmem:[#allocation41_spill] sm:$0xff] }
 0x2e6   : > { %v2306_v7 = vadd.f32 %v8543_v18, %v12169_v0 }
 0x2e7   : > { %v8948_v44 = vpop.permute.xlu1 %3540  ;;  %v8950_v12 = vpop.permute.xlu0 %3446 }
 0x2e8   : > { %12165 = vst [vmem:[#allocation19_spill] sm:$0xff] %v8948_v44  ;;  %12166 = vst [vmem:[#allocation17_spill] sm:$0xff] %v8950_v12  ;;  %v2307_v44 = vadd.f32 %v8543_v18, %v12170_v3  ;;  %v2434_v16 = vmax.f32 %v2306_v7, 0.0 }
 0x2e9   : > { %3162 = vrot.lane.b32.xlu1 %v2433_v62, %s6634_s22  ;;  %2925 = vrot.lane.b32.xlu0 %v8952_v35, %s6633_s17 }
 0x2ea   : > { %v2435_v12 = vmax.f32 %v2307_v44, 0.0 }
 0x2eb   : > { %v8957_v17 = vpop.permute.xlu1 %3144  ;;  %v8959_v43 = vpop.permute.xlu0 %2814 }
 0x2ec   : > { %12167 = vst [vmem:[#allocation46_spill] sm:$0xff] %v8957_v17  ;;  %12168 = vst [vmem:[#allocation23_spill] sm:$0xff] %v8959_v43  ;;  %v8974_v43 = vadd.f32 %v8543_v18, %v8400_v55 }
 0x2ed   : > { %3560 = vrot.lane.b32.xlu1 %v8926_v24, %s6637_s27  ;;  %3466 = vrot.lane.b32.xlu0 %v2432_v4, %s6636_s24 }
 0x2ee   : > { %v11822_v4 = vmax.f32 %v8974_v43, 0.0 }
 0x2ef   : > { %v8968_v63 = vpop.permute.xlu1 %3542  ;;  %v8970_v62 = vpop.permute.xlu0 %3238 }
 0x2f0   : > { %12171 = vst [vmem:[#allocation21_spill] sm:$0xff] %v8968_v63  ;;  %12172 = vst [vmem:[#allocation27_spill] sm:$0xff] %v8970_v62  ;;  %v2371_v63 = vadd.f32 %v8543_v18, %v8408_v59  ;;  %v12175_v62 = vld [vmem:[#allocation47_spill] sm:$0xff] }
 0x2f1   : > { %3164 = vrot.lane.b32.xlu1 %v2434_v16, %s6634_s22  ;;  %2834 = vrot.lane.b32.xlu0 %v2435_v12, %s6632_s16  ;;  %v2308_v7 = vadd.f32 %v8543_v18, %v12175_v62 }
 0x2f2   : > { %v8996_v16 = vmax.f32 %v2371_v63, 0.0 }
 0x2f3   : > { %v8978_v3 = vpop.permute.xlu1 %2907  ;;  %v8980_v0 = vpop.permute.xlu0 %2816 }
 0x2f4   : > { %12173 = vst [vmem:[#allocation25_spill] sm:$0xff] %v8978_v3  ;;  %12174 = vst [vmem:[#allocation31_spill] sm:$0xff] %v8980_v0  ;;  %v2436_v3 = vmax.f32 %v2308_v7, 0.0  ;;  %v12178_v0 = vld [vmem:[#allocation52_spill] sm:$0xff]  ;;  %v2372_v7 = vadd.f32 %v8543_v18, %v8412_v19 }
 0x2f5   : > { %3562 = vrot.lane.b32.xlu1 %v8952_v35, %s6637_s27  ;;  %3258 = vrot.lane.b32.xlu0 %v11822_v4, %s6635_s23  ;;  %v9000_v59 = vadd.f32 %v8543_v18, %v12178_v0 }
 0x2f7   : > { %v8992_v55 = vpop.permute.xlu1 %3448  ;;  %v8994_v44 = vpop.permute.xlu0 %3240  ;;  %v11823_v4 = vmax.f32 %v9000_v59, 0.0 }
 0x2f8   : > { %12176 = vst [vmem:[#allocation29_spill] sm:$0xff] %v8992_v55  ;;  %12177 = vst [vmem:[#allocation35_spill] sm:$0xff] %v8994_v44  ;;  %v12181_v55 = vld [vmem:[#allocation45_spill] sm:$0xff] }
 0x2f9   : > { %2927 = vrot.lane.b32.xlu1 %v8996_v16, %s6633_s17  ;;  %2836 = vrot.lane.b32.xlu0 %v2436_v3, %s6632_s16  ;;  %v2309_v63 = vadd.f32 %v8543_v18, %v12181_v55  ;;  %v12184_v55 = vld [vmem:[#allocation49_spill] sm:$0xff] }
 0x2fa   : > { %v2311_v19 = vadd.f32 %v8543_v18, %v12184_v55 }
 0x2fb   : > { %v9005_v62 = vpop.permute.xlu1 %3146  ;;  %v9007_v17 = vpop.permute.xlu0 %2909 }
 0x2fc   : > { %12179 = vst [vmem:[#allocation33_spill] sm:$0xff] %v9005_v62  ;;  %12180 = vst [vmem:[#allocation39_spill] sm:$0xff] %v9007_v17  ;;  %v2437_v62 = vmax.f32 %v2309_v63, 0.0  ;;  %v9022_v17 = vmax.f32 %v2372_v7, 0.0  ;;  %v2439_v63 = vmax.f32 %v2311_v19, 0.0 }
 0x2fd   : > { %3468 = vrot.lane.b32.xlu1 %v2435_v12, %s6636_s24  ;;  %3260 = vrot.lane.b32.xlu0 %v11823_v4, %s6635_s23  ;;  %v12187_v4 = vld [vmem:[#allocation51_spill] sm:$0xff] }
 0x2ff   : > { %v9018_v0 = vpop.permute.xlu1 %3544  ;;  %v9020_v44 = vpop.permute.xlu0 %3450 }
 0x300   : > { %12182 = vst [vmem:[#allocation37_spill] sm:$0xff] %v9018_v0  ;;  %12183 = vst [vmem:[#allocation43_spill] sm:$0xff] %v9020_v44  ;;  %v2310_v0 = vadd.f32 %v8543_v18, %v12187_v4  ;;  %v12190_v4 = vld [vmem:[#allocation55_spill] sm:$0xff] }
 0x301   : > { %3166 = vrot.lane.b32.xlu1 %v2437_v62, %s6634_s22  ;;  %2929 = vrot.lane.b32.xlu0 %v9022_v17, %s6633_s17  ;;  %v9040_v62 = vadd.f32 %v8543_v18, %v8416_v2 }
 0x302   : > { %v2438_v44 = vmax.f32 %v2310_v0, 0.0 }
 0x303   : > { %v9029_v12 = vpop.permute.xlu1 %3148  ;;  %v9031_v33 = vpop.permute.xlu0 %2818 }
 0x304   : > { %12185 = vst [vmem:[#allocation41_spill] sm:$0xff] %v9029_v12  ;;  %12186 = vst [vmem:[#allocation47_spill] sm:$0xff] %v9031_v33  ;;  %v2312_v33 = vadd.f32 %v8543_v18, %v12190_v4  ;;  %v11824_v12 = vmax.f32 %v9040_v62, 0.0 }
 0x305   : > { %3564 = vrot.lane.b32.xlu1 %v8996_v16, %s6637_s27  ;;  %3470 = vrot.lane.b32.xlu0 %v2436_v3, %s6636_s24  ;;  %v2375_v3 = vadd.f32 %v8543_v18, %v8424_v11 }
 0x306   : > { %v2440_v0 = vmax.f32 %v2312_v33, 0.0 }
 0x307   : > { %v9042_v7 = vpop.permute.xlu1 %3546  ;;  %v9044_v55 = vpop.permute.xlu0 %3242  ;;  %v9066_v4 = vmax.f32 %v2375_v3, 0.0 }
 0x308   : > { %12188 = vst [vmem:[#allocation52_spill] sm:$0xff] %v9042_v7  ;;  %12189 = vst [vmem:[#allocation45_spill] sm:$0xff] %v9044_v55 }
 0x309   : > { %3168 = vrot.lane.b32.xlu1 %v2438_v44, %s6634_s22  ;;  %2838 = vrot.lane.b32.xlu0 %v2439_v63, %s6632_s16  ;;  %v9064_v44 = vadd.f32 %v8543_v18, %v8420_v40 }
 0x30b   : > { %v9053_v2 = vpop.permute.xlu1 %2911  ;;  %v9055_v19 = vpop.permute.xlu0 %2820  ;;  %v11825_v40 = vmax.f32 %v9064_v44, 0.0 }
 0x30c   : > { %12191 = vst [vmem:[#allocation49_spill] sm:$0xff] %v9053_v2  ;;  %12192 = vst [vmem:[#allocation51_spill] sm:$0xff] %v9055_v19  ;;  %v12195_v2 = vld [vmem:[#allocation53_spill] sm:$0xff] }
 0x30d   : > { %3566 = vrot.lane.b32.xlu1 %v9022_v17, %s6637_s27  ;;  %3262 = vrot.lane.b32.xlu0 %v11824_v12, %s6635_s23  ;;  %v2313_v7 = vadd.f32 %v8543_v18, %v12195_v2  ;;  %v2376_v12 = vadd.f32 %v8543_v18, %v8428_v27  ;;  %v12200_v27 = vld [vmem:[#allocation59_spill] sm:$0xff] }
 0x30f   : > { %v9068_v11 = vpop.permute.xlu1 %3452  ;;  %v9070_v55 = vpop.permute.xlu0 %3244 }
 0x310   : > { %12193 = vst [vmem:[#allocation55_spill] sm:$0xff] %v9068_v11  ;;  %12194 = vst [vmem:[#allocation92_spill] sm:$0xff] %v9070_v55  ;;  %v2441_v11 = vmax.f32 %v2313_v7, 0.0  ;;  %v9088_v55 = vmax.f32 %v2376_v12, 0.0  ;;  %v9110_v12 = vadd.f32 %v8543_v18, %v8432_v21 }
 0x311   : > { %2931 = vrot.lane.b32.xlu1 %v9066_v4, %s6633_s17  ;;  %2840 = vrot.lane.b32.xlu0 %v2440_v0, %s6632_s16 }
 0x313   : > { %v9080_v33 = vpop.permute.xlu1 %3150  ;;  %v9082_v3 = vpop.permute.xlu0 %2913 }
 0x314   : > { %12196 = vst [vmem:[#allocation53_spill] sm:$0xff] %v9080_v33  ;;  %12197 = vst [vmem:[#allocation93_spill] sm:$0xff] %v9082_v3  ;;  %v2314_v33 = vadd.f32 %v8543_v18, %v12200_v27 }
 0x315   : > { %3472 = vrot.lane.b32.xlu1 %v2439_v63, %s6636_s24  ;;  %3264 = vrot.lane.b32.xlu0 %v11825_v40, %s6635_s23  ;;  %v12201_v63 = vld [vmem:[#allocation57_spill] sm:$0xff] }
 0x316   : > { %v2315_v3 = vadd.f32 %v8543_v18, %v12201_v63  ;;  %v12206_v63 = vld [vmem:[#allocation63_spill] sm:$0xff] }
 0x317   : > { %v9090_v19 = vpop.permute.xlu1 %3548  ;;  %v9092_v2 = vpop.permute.xlu0 %3454 }
 0x318   : > { %12198 = vst [vmem:[#allocation94_spill] sm:$0xff] %v9090_v19  ;;  %12199 = vst [vmem:[#allocation95_spill] sm:$0xff] %v9092_v2  ;;  %v2443_v40 = vmax.f32 %v2315_v3, 0.0  ;;  %v11826_v2 = vmax.f32 %v9110_v12, 0.0  ;;  %v9134_v3 = vadd.f32 %v8543_v18, %v8436_v57 }
 0x319   : > { %3170 = vrot.lane.b32.xlu1 %v2441_v11, %s6634_s22  ;;  %2933 = vrot.lane.b32.xlu0 %v9088_v55, %s6633_s17  ;;  %v2442_v11 = vmax.f32 %v2314_v33, 0.0 }
 0x31a   : > { %v11827_v57 = vmax.f32 %v9134_v3, 0.0 }
 0x31b   : > { %v9101_v39 = vpop.permute.xlu1 %3152  ;;  %v9103_v7 = vpop.permute.xlu0 %2822 }
 0x31c   : > { %12202 = vst [vmem:[#allocation59_spill] sm:$0xff] %v9101_v39  ;;  %12203 = vst [vmem:[#allocation57_spill] sm:$0xff] %v9103_v7  ;;  %v2316_v7 = vadd.f32 %v8543_v18, %v12206_v63 }
 0x31d   : > { %3568 = vrot.lane.b32.xlu1 %v9066_v4, %s6637_s27  ;;  %3474 = vrot.lane.b32.xlu0 %v2440_v0, %s6636_s24  ;;  %v2379_v0 = vadd.f32 %v8543_v18, %v8440_v25 }
 0x31f   : > { %v9112_v19 = vpop.permute.xlu1 %3550  ;;  %v9114_v27 = vpop.permute.xlu0 %3246  ;;  %v9136_v63 = vmax.f32 %v2379_v0, 0.0 }
 0x320   : > { %12204 = vst [vmem:[#allocation96_spill] sm:$0xff] %v9112_v19  ;;  %12205 = vst [vmem:[#allocation97_spill] sm:$0xff] %v9114_v27 }
 0x321   : > { %3172 = vrot.lane.b32.xlu1 %v2442_v11, %s6634_s22  ;;  %2842 = vrot.lane.b32.xlu0 %v2443_v40, %s6632_s16  ;;  %v2444_v11 = vmax.f32 %v2316_v7, 0.0 }
 0x323   : > { %v9123_v21 = vpop.permute.xlu1 %2915  ;;  %v9125_v33 = vpop.permute.xlu0 %2824 }
 0x324   : > { %12207 = vst [vmem:[#allocation63_spill] sm:$0xff] %v9123_v21  ;;  %12208 = vst [vmem:[#allocation98_spill] sm:$0xff] %v9125_v33  ;;  %v12211_v21 = vld [vmem:[#allocation61_spill] sm:$0xff] }
 0x325   : > { %3570 = vrot.lane.b32.xlu1 %v9088_v55, %s6637_s27  ;;  %3266 = vrot.lane.b32.xlu0 %v11826_v2, %s6635_s23  ;;  %v2317_v19 = vadd.f32 %v8543_v18, %v12211_v21  ;;  %v2380_v2 = vadd.f32 %v8543_v18, %v8444_v42  ;;  %v12216_v42 = vld [vmem:[#allocation67_spill] sm:$0xff] }
 0x327   : > { %v9138_v25 = vpop.permute.xlu1 %3456  ;;  %v9140_v27 = vpop.permute.xlu0 %3248 }
 0x328   : > { %12209 = vst [vmem:[#allocation99_spill] sm:$0xff] %v9138_v25  ;;  %12210 = vst [vmem:[#allocation100_spill] sm:$0xff] %v9140_v27  ;;  %v2445_v25 = vmax.f32 %v2317_v19, 0.0  ;;  %v9158_v27 = vmax.f32 %v2380_v2, 0.0  ;;  %v9180_v2 = vadd.f32 %v8543_v18, %v8448_v46 }
 0x329   : > { %2935 = vrot.lane.b32.xlu1 %v9136_v63, %s6633_s17  ;;  %2844 = vrot.lane.b32.xlu0 %v2444_v11, %s6632_s16 }
 0x32b   : > { %v9150_v7 = vpop.permute.xlu1 %3154  ;;  %v9152_v0 = vpop.permute.xlu0 %2917 }
 0x32c   : > { %12212 = vst [vmem:[#allocation61_spill] sm:$0xff] %v9150_v7  ;;  %12213 = vst [vmem:[#allocation101_spill] sm:$0xff] %v9152_v0  ;;  %v2318_v7 = vadd.f32 %v8543_v18, %v12216_v42 }
 0x32d   : > { %3476 = vrot.lane.b32.xlu1 %v2443_v40, %s6636_s24  ;;  %3268 = vrot.lane.b32.xlu0 %v11827_v57, %s6635_s23  ;;  %v12217_v40 = vld [vmem:[#allocation65_spill] sm:$0xff] }
 0x32e   : > { %v2319_v0 = vadd.f32 %v8543_v18, %v12217_v40  ;;  %v12222_v40 = vld [vmem:[#allocation71_spill] sm:$0xff] }
 0x32f   : > { %v9160_v33 = vpop.permute.xlu1 %3552  ;;  %v9162_v21 = vpop.permute.xlu0 %3458 }
 0x330   : > { %12214 = vst [vmem:[#allocation102_spill] sm:$0xff] %v9160_v33  ;;  %12215 = vst [vmem:[#allocation103_spill] sm:$0xff] %v9162_v21  ;;  %v2447_v57 = vmax.f32 %v2319_v0, 0.0  ;;  %v11828_v21 = vmax.f32 %v9180_v2, 0.0  ;;  %v9204_v0 = vadd.f32 %v8543_v18, %v8452_v36 }
 0x331   : > { %3174 = vrot.lane.b32.xlu1 %v2445_v25, %s6634_s22  ;;  %2937 = vrot.lane.b32.xlu0 %v9158_v27, %s6633_s17  ;;  %v2446_v25 = vmax.f32 %v2318_v7, 0.0 }
 0x332   : > { %v11829_v36 = vmax.f32 %v9204_v0, 0.0 }
 0x333   : > { %v9171_v39 = vpop.permute.xlu1 %3156  ;;  %v9173_v19 = vpop.permute.xlu0 %2826 }
 0x334   : > { %12218 = vst [vmem:[#allocation67_spill] sm:$0xff] %v9171_v39  ;;  %12219 = vst [vmem:[#allocation65_spill] sm:$0xff] %v9173_v19  ;;  %v2320_v19 = vadd.f32 %v8543_v18, %v12222_v40 }
 0x335   : > { %3572 = vrot.lane.b32.xlu1 %v9136_v63, %s6637_s27  ;;  %3478 = vrot.lane.b32.xlu0 %v2444_v11, %s6636_s24  ;;  %v2383_v11 = vadd.f32 %v8543_v18, %v8456_v60 }
 0x337   : > { %v9182_v33 = vpop.permute.xlu1 %3554  ;;  %v9184_v42 = vpop.permute.xlu0 %3250  ;;  %v9206_v40 = vmax.f32 %v2383_v11, 0.0 }
 0x338   : > { %12220 = vst [vmem:[#allocation104_spill] sm:$0xff] %v9182_v33  ;;  %12221 = vst [vmem:[#allocation105_spill] sm:$0xff] %v9184_v42 }
 0x339   : > { %3176 = vrot.lane.b32.xlu1 %v2446_v25, %s6634_s22  ;;  %2846 = vrot.lane.b32.xlu0 %v2447_v57, %s6632_s16  ;;  %v2448_v25 = vmax.f32 %v2320_v19, 0.0 }
 0x33b   : > { %v9193_v46 = vpop.permute.xlu1 %2919  ;;  %v9195_v7 = vpop.permute.xlu0 %2828 }
 0x33c   : > { %12223 = vst [vmem:[#allocation71_spill] sm:$0xff] %v9193_v46  ;;  %12224 = vst [vmem:[#allocation106_spill] sm:$0xff] %v9195_v7  ;;  %v12227_v46 = vld [vmem:[#allocation69_spill] sm:$0xff] }
 0x33d   : > { %3574 = vrot.lane.b32.xlu1 %v9158_v27, %s6637_s27  ;;  %3270 = vrot.lane.b32.xlu0 %v11828_v21, %s6635_s23  ;;  %v2321_v33 = vadd.f32 %v8543_v18, %v12227_v46  ;;  %v2384_v21 = vadd.f32 %v8543_v18, %v8460_v45  ;;  %v12232_v45 = vld [vmem:[#allocation75_spill] sm:$0xff] }
 0x33f   : > { %v9208_v60 = vpop.permute.xlu1 %3460  ;;  %v9210_v42 = vpop.permute.xlu0 %3252 }
 0x340   : > { %12225 = vst [vmem:[#allocation107_spill] sm:$0xff] %v9208_v60  ;;  %12226 = vst [vmem:[#allocation108_spill] sm:$0xff] %v9210_v42  ;;  %v2449_v60 = vmax.f32 %v2321_v33, 0.0  ;;  %v9228_v42 = vmax.f32 %v2384_v21, 0.0  ;;  %v9250_v21 = vadd.f32 %v8543_v18, %v8464_v13 }
 0x341   : > { %2939 = vrot.lane.b32.xlu1 %v9206_v40, %s6633_s17  ;;  %2848 = vrot.lane.b32.xlu0 %v2448_v25, %s6632_s16 }
 0x343   : > { %v9220_v19 = vpop.permute.xlu1 %3158  ;;  %v9222_v11 = vpop.permute.xlu0 %2921 }
 0x344   : > { %12228 = vst [vmem:[#allocation69_spill] sm:$0xff] %v9220_v19  ;;  %12229 = vst [vmem:[#allocation109_spill] sm:$0xff] %v9222_v11  ;;  %v2322_v19 = vadd.f32 %v8543_v18, %v12232_v45 }
 0x345   : > { %3480 = vrot.lane.b32.xlu1 %v2447_v57, %s6636_s24  ;;  %3272 = vrot.lane.b32.xlu0 %v11829_v36, %s6635_s23  ;;  %v12233_v57 = vld [vmem:[#allocation73_spill] sm:$0xff] }
 0x346   : > { %v2323_v11 = vadd.f32 %v8543_v18, %v12233_v57  ;;  %v12238_v57 = vld [vmem:[#allocation79_spill] sm:$0xff] }
 0x347   : > { %v9230_v7 = vpop.permute.xlu1 %3556  ;;  %v9232_v46 = vpop.permute.xlu0 %3462 }
 0x348   : > { %12230 = vst [vmem:[#allocation110_spill] sm:$0xff] %v9230_v7  ;;  %12231 = vst [vmem:[#allocation111_spill] sm:$0xff] %v9232_v46  ;;  %v2451_v36 = vmax.f32 %v2323_v11, 0.0  ;;  %v11830_v46 = vmax.f32 %v9250_v21, 0.0  ;;  %v9274_v11 = vadd.f32 %v8543_v18, %v8468_v51 }
 0x349   : > { %3178 = vrot.lane.b32.xlu1 %v2449_v60, %s6634_s22  ;;  %2941 = vrot.lane.b32.xlu0 %v9228_v42, %s6633_s17  ;;  %v2450_v60 = vmax.f32 %v2322_v19, 0.0 }
 0x34a   : > { %v11831_v51 = vmax.f32 %v9274_v11, 0.0 }
 0x34b   : > { %v9241_v39 = vpop.permute.xlu1 %3160  ;;  %v9243_v33 = vpop.permute.xlu0 %2830 }
 0x34c   : > { %12234 = vst [vmem:[#allocation75_spill] sm:$0xff] %v9241_v39  ;;  %12235 = vst [vmem:[#allocation73_spill] sm:$0xff] %v9243_v33  ;;  %v2324_v33 = vadd.f32 %v8543_v18, %v12238_v57 }
 0x34d   : > { %3576 = vrot.lane.b32.xlu1 %v9206_v40, %s6637_s27  ;;  %3482 = vrot.lane.b32.xlu0 %v2448_v25, %s6636_s24  ;;  %v2387_v25 = vadd.f32 %v8543_v18, %v8472_v30 }
 0x34f   : > { %v9252_v7 = vpop.permute.xlu1 %3558  ;;  %v9254_v45 = vpop.permute.xlu0 %3254  ;;  %v9276_v57 = vmax.f32 %v2387_v25, 0.0 }
 0x350   : > { %12236 = vst [vmem:[#allocation112_spill] sm:$0xff] %v9252_v7  ;;  %12237 = vst [vmem:[#allocation113_spill] sm:$0xff] %v9254_v45 }
 0x351   : > { %3180 = vrot.lane.b32.xlu1 %v2450_v60, %s6634_s22  ;;  %2850 = vrot.lane.b32.xlu0 %v2451_v36, %s6632_s16  ;;  %v2452_v60 = vmax.f32 %v2324_v33, 0.0 }
 0x353   : > { %v9263_v13 = vpop.permute.xlu1 %2923  ;;  %v9265_v19 = vpop.permute.xlu0 %2832 }
 0x354   : > { %12239 = vst [vmem:[#allocation79_spill] sm:$0xff] %v9263_v13  ;;  %12240 = vst [vmem:[#allocation114_spill] sm:$0xff] %v9265_v19  ;;  %v12243_v13 = vld [vmem:[#allocation77_spill] sm:$0xff] }
 0x355   : > { %3578 = vrot.lane.b32.xlu1 %v9228_v42, %s6637_s27  ;;  %3274 = vrot.lane.b32.xlu0 %v11830_v46, %s6635_s23  ;;  %v2325_v7 = vadd.f32 %v8543_v18, %v12243_v13  ;;  %v2388_v46 = vadd.f32 %v8543_v18, %v8476_v47  ;;  %v12249_v47 = vld [vmem:[#allocation81_spill] sm:$0xff] }
 0x357   : > { %v9278_v30 = vpop.permute.xlu1 %3464  ;;  %v9280_v45 = vpop.permute.xlu0 %3256 }
 0x358   : > { %12241 = vst [vmem:[#allocation115_spill] sm:$0xff] %v9278_v30  ;;  %12242 = vst [vmem:[#allocation116_spill] sm:$0xff] %v9280_v45  ;;  %v2453_v30 = vmax.f32 %v2325_v7, 0.0  ;;  %v9298_v45 = vmax.f32 %v2388_v46, 0.0  ;;  %v9320_v46 = vadd.f32 %v8543_v18, %v8480_v48 }
 0x359   : > { %2943 = vrot.lane.b32.xlu1 %v9276_v57, %s6633_s17  ;;  %2852 = vrot.lane.b32.xlu0 %v2452_v60, %s6632_s16 }
 0x35a   : > { %12246 = vst [vmem:[#allocation118_spill] sm:$0xff] %v9298_v45  ;;  %12253 = vst [vmem:[#allocation121_spill] sm:$0xff] %v9320_v46 }
 0x35b   : > { %v9290_v33 = vpop.permute.xlu1 %3162  ;;  %v9292_v25 = vpop.permute.xlu0 %2925 }
 0x35c   : > { %12244 = vst [vmem:[#allocation77_spill] sm:$0xff] %v9290_v33  ;;  %12245 = vst [vmem:[#allocation117_spill] sm:$0xff] %v9292_v25  ;;  %v2326_v33 = vadd.f32 %v8543_v18, %v12249_v47 }
 0x35d   : > { %3484 = vrot.lane.b32.xlu1 %v2451_v36, %s6636_s24  ;;  %3276 = vrot.lane.b32.xlu0 %v11831_v51, %s6635_s23  ;;  %v12250_v36 = vld [vmem:[#allocation8_spill] sm:$0xff] }
 0x35e   : > { %v2327_v25 = vadd.f32 %v8543_v18, %v12250_v36  ;;  %v12256_v36 = vld [vmem:[#allocation6_spill] sm:$0xff] }
 0x35f   : > { %v9300_v19 = vpop.permute.xlu1 %3560  ;;  %v9302_v13 = vpop.permute.xlu0 %3466 }
 0x360   : > { %12247 = vst [vmem:[#allocation119_spill] sm:$0xff] %v9300_v19  ;;  %12248 = vst [vmem:[#allocation120_spill] sm:$0xff] %v9302_v13  ;;  %v2455_v51 = vmax.f32 %v2327_v25, 0.0  ;;  %v11832_v13 = vmax.f32 %v9320_v46, 0.0  ;;  %v9344_v25 = vadd.f32 %v8543_v18, %v8484_v50 }
 0x361   : > { %3182 = vrot.lane.b32.xlu1 %v2453_v30, %s6634_s22  ;;  %2945 = vrot.lane.b32.xlu0 %v9298_v45, %s6633_s17  ;;  %v2454_v30 = vmax.f32 %v2326_v33, 0.0 }
 0x362   : > { %12259 = vst [vmem:[#allocation125_spill] sm:$0xff] %v9344_v25  ;;  %v11833_v50 = vmax.f32 %v9344_v25, 0.0 }
 0x363   : > { %v9311_v39 = vpop.permute.xlu1 %3164  ;;  %v9313_v7 = vpop.permute.xlu0 %2834 }
 0x364   : > { %12251 = vst [vmem:[#allocation81_spill] sm:$0xff] %v9311_v39  ;;  %12252 = vst [vmem:[#allocation8_spill] sm:$0xff] %v9313_v7  ;;  %v2328_v7 = vadd.f32 %v8543_v18, %v12256_v36 }
 0x365   : > { %3580 = vrot.lane.b32.xlu1 %v9276_v57, %s6637_s27  ;;  %3486 = vrot.lane.b32.xlu0 %v2452_v60, %s6636_s24  ;;  %v2391_v60 = vadd.f32 %v8543_v18, %v8488_v5 }
 0x367   : > { %v9322_v19 = vpop.permute.xlu1 %3562  ;;  %v9324_v47 = vpop.permute.xlu0 %3258  ;;  %v9346_v36 = vmax.f32 %v2391_v60, 0.0 }
 0x368   : > { %12254 = vst [vmem:[#allocation122_spill] sm:$0xff] %v9322_v19  ;;  %12255 = vst [vmem:[#allocation123_spill] sm:$0xff] %v9324_v47 }
 0x369   : > { %3184 = vrot.lane.b32.xlu1 %v2454_v30, %s6634_s22  ;;  %2854 = vrot.lane.b32.xlu0 %v2455_v51, %s6632_s16  ;;  %v2456_v30 = vmax.f32 %v2328_v7, 0.0 }
 0x36b   : > { %v9333_v48 = vpop.permute.xlu1 %2927  ;;  %v9335_v33 = vpop.permute.xlu0 %2836 }
 0x36c   : > { %12257 = vst [vmem:[#allocation6_spill] sm:$0xff] %v9333_v48  ;;  %12258 = vst [vmem:[#allocation124_spill] sm:$0xff] %v9335_v33  ;;  %v12262_v48 = vld [vmem:[#allocation12_spill] sm:$0xff] }
 0x36d   : > { %3582 = vrot.lane.b32.xlu1 %v9298_v45, %s6637_s27  ;;  %3278 = vrot.lane.b32.xlu0 %v11832_v13, %s6635_s23  ;;  %v2329_v19 = vadd.f32 %v8543_v18, %v12262_v48  ;;  %v12263_v13 = vld [vmem:[#allocation50_spill] sm:$0xff] }
 0x36e   : > { %v2392_v33 = vadd.f32 %v8543_v18, %v12263_v13  ;;  %v12268_v13 = vld [vmem:[#allocation10_spill] sm:$0xff] }
 0x36f   : > { %v9348_v5 = vpop.permute.xlu1 %3468  ;;  %v9350_v47 = vpop.permute.xlu0 %3260 }
 0x370   : > { %12260 = vst [vmem:[#allocation126_spill] sm:$0xff] %v9348_v5  ;;  %12261 = vst [vmem:[#allocation127_spill] sm:$0xff] %v9350_v47  ;;  %v2457_v5 = vmax.f32 %v2329_v19, 0.0  ;;  %v9368_v47 = vmax.f32 %v2392_v33, 0.0  ;;  %v12272_v33 = vld [vmem:[#allocation56_spill] sm:$0xff] }
 0x371   : > { %2947 = vrot.lane.b32.xlu1 %v9346_v36, %s6633_s17  ;;  %2856 = vrot.lane.b32.xlu0 %v2456_v30, %s6632_s16 }
 0x373   : > { %v9360_v7 = vpop.permute.xlu1 %3166  ;;  %v9362_v60 = vpop.permute.xlu0 %2929 }
 0x374   : > { %12264 = vst [vmem:[#allocation12_spill] sm:$0xff] %v9360_v7  ;;  %12265 = vst [vmem:[#allocation50_spill] sm:$0xff] %v9362_v60  ;;  %v2330_v7 = vadd.f32 %v8543_v18, %v12268_v13 }
 0x375   : > { %3488 = vrot.lane.b32.xlu1 %v2455_v51, %s6636_s24  ;;  %3280 = vrot.lane.b32.xlu0 %v11833_v50, %s6635_s23  ;;  %v12269_v51 = vld [vmem:[#allocation16_spill] sm:$0xff] }
 0x376   : > { %v2331_v60 = vadd.f32 %v8543_v18, %v12269_v51  ;;  %v2458_v50 = vmax.f32 %v2330_v7, 0.0  ;;  %v12276_v51 = vld [vmem:[#allocation14_spill] sm:$0xff] }
 0x377   : > { %v9370_v39 = vpop.permute.xlu1 %3564  ;;  %v9372_v48 = vpop.permute.xlu0 %3470 }
 0x378   : > { %12266 = vst [vmem:[#allocation128_spill] sm:$0xff] %v9370_v39  ;;  %12267 = vst [vmem:[#allocation129_spill] sm:$0xff] %v9372_v48  ;;  %v2459_v39 = vmax.f32 %v2331_v60, 0.0 }
 0x379   : > { %3186 = vrot.lane.b32.xlu1 %v2457_v5, %s6634_s22  ;;  %2949 = vrot.lane.b32.xlu0 %v9368_v47, %s6633_s17  ;;  %v9390_v5 = vadd.f32 %v8543_v18, %v12272_v33 }
 0x37b   : > { %v9381_v34 = vpop.permute.xlu1 %3168  ;;  %v9383_v19 = vpop.permute.xlu0 %2838  ;;  %12273 = vst [vmem:[#allocation56_spill] sm:$0xff] %v9390_v5  ;;  %v11835_v25 = vmax.f32 %v9390_v5, 0.0 }
 0x37c   : > { %12270 = vst [vmem:[#allocation10_spill] sm:$0xff] %v9381_v34  ;;  %12271 = vst [vmem:[#allocation16_spill] sm:$0xff] %v9383_v19  ;;  %v2332_v19 = vadd.f32 %v8543_v18, %v12276_v51  ;;  %v12277_v34 = vld [vmem:[#allocation60_spill] sm:$0xff] }
 0x37d   : > { %3584 = vrot.lane.b32.xlu1 %v9346_v36, %s6637_s27  ;;  %3490 = vrot.lane.b32.xlu0 %v2456_v30, %s6636_s24  ;;  %v2395_v30 = vadd.f32 %v8543_v18, %v12277_v34 }
 0x37e   : > { %v2460_v51 = vmax.f32 %v2332_v19, 0.0 }
 0x37f   : > { %v9392_v48 = vpop.permute.xlu1 %3566  ;;  %v9394_v13 = vpop.permute.xlu0 %3262 }
 0x380   : > { %12274 = vst [vmem:[#allocation130_spill] sm:$0xff] %v9392_v48  ;;  %12275 = vst [vmem:[#allocation131_spill] sm:$0xff] %v9394_v13  ;;  %v9416_v13 = vmax.f32 %v2395_v30, 0.0 }
 0x381   : > { %3188 = vrot.lane.b32.xlu1 %v2458_v50, %s6634_s22  ;;  %2858 = vrot.lane.b32.xlu0 %v2459_v39, %s6632_s16  ;;  %v12280_v50 = vld [vmem:[#allocation54_spill] sm:$0xff] }
 0x382   : > { %v9414_v60 = vadd.f32 %v8543_v18, %v12280_v50 }
 0x383   : > { %v9403_v33 = vpop.permute.xlu1 %2931  ;;  %v9405_v7 = vpop.permute.xlu0 %2840 }
 0x384   : > { %12278 = vst [vmem:[#allocation14_spill] sm:$0xff] %v9403_v33  ;;  %12279 = vst [vmem:[#allocation60_spill] sm:$0xff] %v9405_v7  ;;  %v12284_v33 = vld [vmem:[#allocation20_spill] sm:$0xff]  ;;  %v11839_v50 = vmax.f32 %v9414_v60, 0.0 }
 0x385   : > { %3586 = vrot.lane.b32.xlu1 %v9368_v47, %s6637_s27  ;;  %3282 = vrot.lane.b32.xlu0 %v11835_v25, %s6635_s23  ;;  %12281 = vst [vmem:[#allocation54_spill] sm:$0xff] %v9414_v60  ;;  %v2333_v7 = vadd.f32 %v8543_v18, %v12284_v33  ;;  %v12285_v25 = vld [vmem:[#allocation58_spill] sm:$0xff] }
 0x386   : > { %v2396_v5 = vadd.f32 %v8543_v18, %v12285_v25  ;;  %v12290_v25 = vld [vmem:[#allocation18_spill] sm:$0xff] }
 0x387   : > { %v9418_v34 = vpop.permute.xlu1 %3472  ;;  %v9420_v48 = vpop.permute.xlu0 %3264 }
 0x388   : > { %12282 = vst [vmem:[#allocation132_spill] sm:$0xff] %v9418_v34  ;;  %12283 = vst [vmem:[#allocation133_spill] sm:$0xff] %v9420_v48  ;;  %v2461_v34 = vmax.f32 %v2333_v7, 0.0  ;;  %v9438_v48 = vmax.f32 %v2396_v5, 0.0  ;;  %v12294_v5 = vld [vmem:[#allocation64_spill] sm:$0xff] }
 0x389   : > { %2951 = vrot.lane.b32.xlu1 %v9416_v13, %s6633_s17  ;;  %2860 = vrot.lane.b32.xlu0 %v2460_v51, %s6632_s16 }
 0x38b   : > { %v9430_v19 = vpop.permute.xlu1 %3170  ;;  %v9432_v30 = vpop.permute.xlu0 %2933 }
 0x38c   : > { %12286 = vst [vmem:[#allocation20_spill] sm:$0xff] %v9430_v19  ;;  %12287 = vst [vmem:[#allocation58_spill] sm:$0xff] %v9432_v30  ;;  %v2334_v19 = vadd.f32 %v8543_v18, %v12290_v25 }
 0x38d   : > { %3492 = vrot.lane.b32.xlu1 %v2459_v39, %s6636_s24  ;;  %3284 = vrot.lane.b32.xlu0 %v11839_v50, %s6635_s23  ;;  %v12291_v39 = vld [vmem:[#allocation24_spill] sm:$0xff] }
 0x38e   : > { %v2335_v30 = vadd.f32 %v8543_v18, %v12291_v39  ;;  %v2462_v50 = vmax.f32 %v2334_v19, 0.0  ;;  %v3892_v39 = vld [vmem:[%s11701_s4] sm:$0xff] }
 0x38f   : > { %v9440_v46 = vpop.permute.xlu1 %3568  ;;  %v9442_v33 = vpop.permute.xlu0 %3474 }
 0x390   : > { %12288 = vst [vmem:[#allocation134_spill] sm:$0xff] %v9440_v46  ;;  %12289 = vst [vmem:[#allocation135_spill] sm:$0xff] %v9442_v33  ;;  %v2463_v46 = vmax.f32 %v2335_v30, 0.0  ;;  %v2399_v30 = vadd.f32 %v8543_v18, %v8520_v8 }
 0x391   : > { %3190 = vrot.lane.b32.xlu1 %v2461_v34, %s6634_s22  ;;  %2953 = vrot.lane.b32.xlu0 %v9438_v48, %s6633_s17  ;;  %v9460_v34 = vadd.f32 %v8543_v18, %v12294_v5 }
 0x392   : > { %v9492_v8 = vmax.f32 %v2399_v30, 0.0 }
 0x393   : > { %v9451_v60 = vpop.permute.xlu1 %3172  ;;  %v9453_v7 = vpop.permute.xlu0 %2842  ;;  %12295 = vst [vmem:[#allocation64_spill] sm:$0xff] %v9460_v34  ;;  %v11840_v5 = vmax.f32 %v9460_v34, 0.0 }
 0x394   : > { %12292 = vst [vmem:[#allocation18_spill] sm:$0xff] %v9451_v60  ;;  %12293 = vst [vmem:[#allocation24_spill] sm:$0xff] %v9453_v7  ;;  %v3893_v7 = vld [vmem:[%s11701_s4 + $0x8] sm:$0xff] }
 0x395   : > { %3588 = vrot.lane.b32.xlu1 %v9416_v13, %s6637_s27  ;;  %3494 = vrot.lane.b32.xlu0 %v2460_v51, %s6636_s24  ;;  %v6556_v60 = vpack.c.bf16 %v3893_v7, %v3892_v39  ;;  %v12298_v51 = vld [vmem:[#allocation22_spill] sm:$0xff] }
 0x396   : > { %v2336_v19 = vadd.f32 %v8543_v18, %v12298_v51 }
 0x397   : > { %v9462_v33 = vpop.permute.xlu1 %3570  ;;  %v9464_v25 = vpop.permute.xlu0 %3266  ;;  %6557 = vmatprep.subr.bf16.mxu0 %v6556_v60 }
 0x398   : > { %12296 = vst [vmem:[#allocation136_spill] sm:$0xff] %v9462_v33  ;;  %12297 = vst [vmem:[#allocation137_spill] sm:$0xff] %v9464_v25  ;;  %6559 = vmatpush3.bf16.msra.mxu0 %v6556_v60  ;;  %v2464_v39 = vmax.f32 %v2336_v19, 0.0  ;;  %v12305_v60 = vld [vmem:[#allocation28_spill] sm:$0xff] }
 0x399   : > { %3192 = vrot.lane.b32.xlu1 %v2462_v50, %s6634_s22  ;;  %2862 = vrot.lane.b32.xlu0 %v2463_v46, %s6632_s16  ;;  %v12301_v50 = vld [vmem:[#allocation62_spill] sm:$0xff] }
 0x39a   : > { %v9490_v7 = vadd.f32 %v8543_v18, %v12301_v50 }
 0x39b   : > { %v9479_v25 = vpop.permute.xlu1 %2935  ;;  %v9481_v33 = vpop.permute.xlu0 %2844 }
 0x39c   : > { %12299 = vst [vmem:[#allocation22_spill] sm:$0xff] %v9479_v25  ;;  %12300 = vst [vmem:[#allocation138_spill] sm:$0xff] %v9481_v33  ;;  %v2337_v33 = vadd.f32 %v8543_v18, %v12305_v60  ;;  %v11842_v50 = vmax.f32 %v9490_v7, 0.0 }
 0x39d   : > { %3590 = vrot.lane.b32.xlu1 %v9438_v48, %s6637_s27  ;;  %3286 = vrot.lane.b32.xlu0 %v11840_v5, %s6635_s23  ;;  %12302 = vst [vmem:[#allocation62_spill] sm:$0xff] %v9490_v7  ;;  %v2400_v5 = vadd.f32 %v8543_v18, %v8524_v10  ;;  %v12310_v10 = vld [vmem:[#allocation26_spill] sm:$0xff] }
 0x39f   : > { %v9494_v51 = vpop.permute.xlu1 %3476  ;;  %v9496_v25 = vpop.permute.xlu0 %3268 }
 0x3a0   : > { %12303 = vst [vmem:[#allocation139_spill] sm:$0xff] %v9494_v51  ;;  %12304 = vst [vmem:[#allocation140_spill] sm:$0xff] %v9496_v25  ;;  %v2465_v51 = vmax.f32 %v2337_v33, 0.0  ;;  %v9514_v25 = vmax.f32 %v2400_v5, 0.0  ;;  %v12314_v5 = vld [vmem:[#allocation66_spill] sm:$0xff] }
 0x3a1   : > { %2955 = vrot.lane.b32.xlu1 %v9492_v8, %s6633_s17  ;;  %2864 = vrot.lane.b32.xlu0 %v2464_v39, %s6632_s16 }
 0x3a3   : > { %v9506_v19 = vpop.permute.xlu1 %3174  ;;  %v9508_v30 = vpop.permute.xlu0 %2937 }
 0x3a4   : > { %12306 = vst [vmem:[#allocation28_spill] sm:$0xff] %v9506_v19  ;;  %12307 = vst [vmem:[#allocation141_spill] sm:$0xff] %v9508_v30  ;;  %v2338_v19 = vadd.f32 %v8543_v18, %v12310_v10 }
 0x3a5   : > { %3496 = vrot.lane.b32.xlu1 %v2463_v46, %s6636_s24  ;;  %3288 = vrot.lane.b32.xlu0 %v11842_v50, %s6635_s23  ;;  %v12311_v46 = vld [vmem:[#allocation68_spill] sm:$0xff] }
 0x3a6   : > { %v9527_v30 = vadd.f32 %v8543_v18, %v12311_v46 }
 0x3a7   : > { %v9516_v34 = vpop.permute.xlu1 %3572  ;;  %v9518_v60 = vpop.permute.xlu0 %3478 }
 0x3a8   : > { %12308 = vst [vmem:[#allocation142_spill] sm:$0xff] %v9516_v34  ;;  %12309 = vst [vmem:[#allocation143_spill] sm:$0xff] %v9518_v60  ;;  %v2466_v34 = vmax.f32 %v2338_v19, 0.0  ;;  %v11845_v10 = vmax.f32 %v9527_v30, 0.0 }
 0x3a9   : > { %3194 = vrot.lane.b32.xlu1 %v2465_v51, %s6634_s22  ;;  %2957 = vrot.lane.b32.xlu0 %v9514_v25, %s6633_s17  ;;  %v9538_v51 = vadd.f32 %v8543_v18, %v12314_v5 }
 0x3ab   : > { %v9529_v50 = vpop.permute.xlu1 %3176  ;;  %v9531_v33 = vpop.permute.xlu0 %2846  ;;  %v11846_v19 = vmax.f32 %v9538_v51, 0.0 }
 0x3ac   : > { %12312 = vst [vmem:[#allocation26_spill] sm:$0xff] %v9529_v50  ;;  %12313 = vst [vmem:[#allocation68_spill] sm:$0xff] %v9531_v33  ;;  %v12316_v33 = vld [vmem:[#allocation32_spill] sm:$0xff]  ;;  %v12317_v50 = vld [vmem:[#allocation30_spill] sm:$0xff] }
 0x3ad   : > { %3592 = vrot.lane.b32.xlu1 %v9492_v8, %s6637_s27  ;;  %3498 = vrot.lane.b32.xlu0 %v2464_v39, %s6636_s24  ;;  %v2339_v39 = vadd.f32 %v8543_v18, %v12316_v33  ;;  %v2340_v5 = vadd.f32 %v8543_v18, %v12317_v50  ;;  %v3894_v18 = vld [vmem:[%s11701_s4 + $0x10] sm:$0xff]  ;;  %v3895_v50 = vld [vmem:[%s11701_s4 + $0x18] sm:$0xff] }
 0x3af   : > { %v9541_v60 = vpop.permute.xlu1 %3574  ;;  %v9543_v46 = vpop.permute.xlu0 %3270 }
 0x3b0   : > { %12315 = vst [vmem:[#allocation66_spill] sm:$0xff] %v9543_v46 }
 0x3b1   : > { %3290 = vrot.lane.b32.xlu1 %v11845_v10, %s6635_s23  ;;  %3196 = vrot.lane.b32.xlu0 %v2466_v34, %s6634_s22  ;;  %v2467_v34 = vmax.f32 %v2339_v39, 0.0  ;;  %v2468_v10 = vmax.f32 %v2340_v5, 0.0  ;;  %v3896_v39 = vld [vmem:[%s11701_s4 + $0x20] sm:$0xf]  ;;  %s6638_s22 = smov 12  }
 0x3b3   : > { %v9554_v7 = vpop.permute.xlu1 %2939  ;;  %v9556_v45 = vpop.permute.xlu0 %2848 }
 0x3b4   : > { %12318 = vst [vmem:[#allocation32_spill] sm:$0xff] %v9554_v7  ;;  %v6560_v7 = vpack.c.bf16 %v3895_v50, %v3894_v18 }
 0x3b5   : > { %3292 = vrot.lane.b32.xlu1 %v11846_v19, %s6635_s23  ;;  %3594 = vrot.lane.b32.xlu0 %v9514_v25, %s6637_s27  ;;  %s6639_s23 = smov 24  }
 0x3b6   : > { %6561 = vmatprep.subr.bf16.mxu0 %v6560_v7 }
 0x3b7   : > { %v9563_v46 = vpop.permute.xlu1 %3480  ;;  %v9565_v33 = vpop.permute.xlu0 %3272  ;;  %6563 = vmatpush3.bf16.msra.mxu0 %v6560_v7 }
 0x3b8   : > { %12319 = vst [vmem:[#allocation30_spill] sm:$0xff] %v9563_v46  ;;  %v2757_v46 = vsel %vm2565_vm4, 0.0, %v8676_v32  ;;  %6406 = vmatprep.subr.msk.mxu0 %vm506_vm0, %v3896_v39 }
 0x3b9   : > { %3502 = vrot.lane.b32.xlu1 %v2468_v10, %s6636_s24  ;;  %3500 = vrot.lane.b32.xlu0 %v2467_v34, %s6636_s24 }
 0x3bb   : > { %v9578_v5 = vpop.permute.xlu1 %3178  ;;  %v9580_v19 = vpop.permute.xlu0 %2941  ;;  %6407 = vmatpush3.msk.msra.mxu0 %vm506_vm0, %v3896_v39  ;;  %v12327_v39 = vld [vmem:[#allocation70_spill] sm:$0xff] }
 0x3bc   : > { %12320 = vst [vmem:[#allocation144_spill] sm:$0xff] %v9578_v5 }
 0x3bd   : > { %3006 = vrot.lane.b32.xlu1 %v2757_v46, %s6638_s22  ;;  %3344 = vrot.lane.b32.xlu0 %v8607_v15, %s6639_s23  ;;  %v12325_v46 = vld [vmem:[#allocation72_spill] sm:$0xff] }
 0x3be   : > { %v12326_v18 = vrot.slane %v12325_v46, 7 }
 0x3bf   : > { %v9588_v10 = vpop.permute.xlu1 %3576  ;;  %v9590_v34 = vpop.permute.xlu0 %3482 }
 0x3c0   : > { %12321 = vst [vmem:[#allocation145_spill] sm:$0xff] %v9588_v10  ;;  %12322 = vst [vmem:[#allocation146_spill] sm:$0xff] %v9590_v34  ;;  %v9604_v50 = vsel %vm2565_vm4, 0.0, %v12326_v18  ;;  %v12332_v34 = vmax.f32 %v8752_v53, 0.0 }
 0x3c1   : > { %3008 = vrot.lane.b32.xlu1 %v8687_v6, %s6638_s22  ;;  %3012 = vrot.lane.b32.xlu0 %v8683_v52, %s6638_s22  ;;  %v2758_v52 = vsel %vm2565_vm4, 0.0, %v8662_v38  ;;  %v12334_v38 = vld [vmem:[#allocation76_spill] sm:$0xff] }
 0x3c3   : > { %v9597_v32 = vpop.permute.xlu1 %3180  ;;  %v9599_v7 = vpop.permute.xlu0 %2850 }
 0x3c4   : > { %12323 = vst [vmem:[#allocation147_spill] sm:$0xff] %v9597_v32  ;;  %12324 = vst [vmem:[#allocation148_spill] sm:$0xff] %v9599_v7  ;;  %v12331_v7 = vmax.f32 %v8738_v54, 0.0  ;;  %v2759_v54 = vsel %vm2565_vm4, 0.0, %v8672_v22 }
 0x3c5   : > { %3342 = vrot.lane.b32.xlu1 %v9604_v50, %s6639_s23  ;;  %3348 = vrot.lane.b32.xlu0 %v12327_v39, %s6639_s23 }
 0x3c6   : > { %v2702_v10 = vrot.slane %v12331_v7, 7  ;;  %v12338_v7 = vmax.f32 %v8776_v56, 0.0  ;;  %v2578_v56 = vrot.slane %v8790_v14, 7 }
 0x3c7   : > { %v9610_v5 = vpop.permute.xlu1 %3578  ;;  %v9612_v6 = vpop.permute.xlu0 %3274 }
 0x3c8   : > { %12328 = vst [vmem:[#allocation72_spill] sm:$0xff] %v9610_v5  ;;  %12329 = vst [vmem:[#allocation70_spill] sm:$0xff] %v9612_v6  ;;  %v2703_v5 = vrot.slane %v12332_v34, 7  ;;  %v12333_v6 = vrot.slane %v8598_v26, 7 }
 0x3c9   : > { %3010 = vrot.lane.b32.xlu1 %v2758_v52, %s6638_s22  ;;  %3016 = vrot.lane.b32.xlu0 %v8691_v31, %s6638_s22 }
 0x3ca   : > { %v9630_v32 = vsel %vm2565_vm4, 0.0, %v12333_v6  ;;  %v2704_v53 = vsel %vm2565_vm4, %v2702_v10, %v2703_v5  ;;  %v2705_v6 = vrot.slane %v12338_v7, 7  ;;  %v12343_v7 = vmax.f32 %v8834_v20, 0.0 }
 0x3cb   : > { %v9619_v46 = vpop.permute.xlu1 %2943  ;;  %v9621_v18 = vpop.permute.xlu0 %2852 }
 0x3cc   : > { %12330 = vst [vmem:[#allocation149_spill] sm:$0xff] %v9619_v46  ;;  %v12339_v46 = vmax.f32 %v8796_v61, 0.0  ;;  %v2579_v61 = vrot.slane %v8812_v29, 7  ;;  %v12345_v29 = vrot.slane %v8634_v23, 7  ;;  %v2582_v23 = vrot.slane %v8882_v58, 7 }
 0x3cd   : > { %3346 = vrot.lane.b32.xlu1 %v9630_v32, %s6639_s23  ;;  %3352 = vrot.lane.b32.xlu0 %v12334_v38, %s6639_s23 }
 0x3cf   : > { %v9636_v31 = vpop.permute.xlu1 %3484  ;;  %v9638_v52 = vpop.permute.xlu0 %3276 }
 0x3d0   : > { %12335 = vst [vmem:[#allocation76_spill] sm:$0xff] %v9636_v31  ;;  %12336 = vst [vmem:[#allocation150_spill] sm:$0xff] %v9638_v52  ;;  %v2706_v31 = vrot.slane %v12339_v46, 7  ;;  %v12340_v52 = vrot.slane %v8614_v28, 7  ;;  %v2760_v46 = vsel %vm2565_vm4, 0.0, %v2702_v10  ;;  %v9683_v10 = vsel %vm2565_vm4, 0.0, %v12345_v29 }
 0x3d1   : > { %3014 = vrot.lane.b32.xlu1 %v2759_v54, %s6638_s22  ;;  %3020 = vrot.lane.b32.xlu0 %v2704_v53, %s6638_s22  ;;  %v12349_v29 = vmax.f32 %v8904_v1, 0.0  ;;  %v2603_v1 = vrot.slane %v9368_v47, 7 }
 0x3d2   : > { %v9656_v22 = vsel %vm2565_vm4, 0.0, %v12340_v52  ;;  %v2707_v28 = vsel %vm2565_vm4, %v2705_v6, %v2706_v31  ;;  %v9686_v31 = vsel %vm2565_vm4, %v2578_v56, %v2579_v61 }
 0x3d3   : > { %v9645_v26 = vpop.permute.xlu1 %3182  ;;  %v9647_v34 = vpop.permute.xlu0 %2945 }
 0x3d4   : > { %12337 = vst [vmem:[#allocation151_spill] sm:$0xff] %v9645_v26  ;;  %v2708_v26 = vrot.slane %v12343_v7, 7 }
 0x3d5   : > { %3350 = vrot.lane.b32.xlu1 %v9656_v22, %s6639_s23  ;;  %3356 = vrot.lane.b32.xlu0 %v8660_v49, %s6639_s23 }
 0x3d7   : > { %v9662_v5 = vpop.permute.xlu1 %3580  ;;  %v9664_v54 = vpop.permute.xlu0 %3486 }
 0x3d8   : > { %12341 = vst [vmem:[#allocation152_spill] sm:$0xff] %v9662_v5  ;;  %v12344_v5 = vmax.f32 %v8860_v37, 0.0  ;;  %v2581_v37 = vrot.slane %v8856_v41, 7  ;;  %v9709_v41 = vsel %vm2565_vm4, 0.0, %v2578_v56  ;;  %v2584_v56 = vrot.slane %v8926_v24, 7 }
 0x3d9   : > { %3018 = vrot.lane.b32.xlu1 %v2760_v46, %s6638_s22  ;;  %3024 = vrot.lane.b32.xlu0 %v2707_v28, %s6638_s22 }
 0x3da   : > { %v2709_v14 = vrot.slane %v12344_v5, 7  ;;  %v2761_v5 = vsel %vm2565_vm4, 0.0, %v2705_v6  ;;  %v9712_v58 = vsel %vm2565_vm4, %v2581_v37, %v2582_v23  ;;  %v11847_v6 = vrot.slane %v9346_v36, 7 }
 0x3db   : > { %v9672_v52 = vpop.permute.xlu1 %3184  ;;  %v9674_v53 = vpop.permute.xlu0 %2854  ;;  %v2762_v23 = vsel %vm2565_vm4, 0.0, %v2708_v26 }
 0x3dc   : > { %12342 = vst [vmem:[#allocation153_spill] sm:$0xff] %v9674_v53  ;;  %v2710_v28 = vsel %vm2565_vm4, %v2708_v26, %v2709_v14  ;;  %v2711_v53 = vrot.slane %v12349_v29, 7  ;;  %v9733_v47 = vsel %vm2565_vm4, %v11847_v6, %v2603_v1 }
 0x3dd   : > { %3354 = vrot.lane.b32.xlu1 %v9683_v10, %s6639_s23  ;;  %3360 = vrot.lane.b32.xlu0 %v9686_v31, %s6639_s23 }
 0x3df   : > { %v9692_v46 = vpop.permute.xlu1 %3582  ;;  %v9694_v20 = vpop.permute.xlu0 %3278 }
 0x3e0   : > { %12346 = vst [vmem:[#allocation154_spill] sm:$0xff] %v9692_v46  ;;  %12347 = vst [vmem:[#allocation155_spill] sm:$0xff] %v9694_v20  ;;  %v12350_v20 = vmax.f32 %v8930_v9, 0.0 }
 0x3e1   : > { %3022 = vrot.lane.b32.xlu1 %v2761_v5, %s6638_s22  ;;  %3028 = vrot.lane.b32.xlu0 %v2710_v28, %s6638_s22  ;;  %v12351_v28 = vmax.f32 %v8974_v43, 0.0 }
 0x3e2   : > { %v2712_v46 = vrot.slane %v12350_v20, 7  ;;  %v2585_v20 = vrot.slane %v8952_v35, 7 }
 0x3e3   : > { %v9702_v61 = vpop.permute.xlu1 %2947  ;;  %v2857_v7 = vpop.permute.xlu0 %2856  ;;  %v2714_v29 = vrot.slane %v12351_v28, 7  ;;  %v2763_v28 = vsel %vm2565_vm4, 0.0, %v2711_v53 }
 0x3e4   : > { %12348 = vst [vmem:[#allocation156_spill] sm:$0xff] %v9702_v61  ;;  %v2713_v5 = vsel %vm2565_vm4, %v2711_v53, %v2712_v46  ;;  %v3658_v24 = vsel %vm1477_vm3, %v9733_v47, %v2857_v7  ;;  %v12353_v46 = vmax.f32 %v9000_v59, 0.0  ;;  %v2605_v59 = vrot.slane %v9416_v13, 7 }
 0x3e5   : > { %3358 = vrot.lane.b32.xlu1 %v9709_v41, %s6639_s23  ;;  %3364 = vrot.lane.b32.xlu0 %v9712_v58, %s6639_s23  ;;  %v12355_v53 = vmax.f32 %v9040_v62, 0.0  ;;  %v2606_v62 = vrot.slane %v9438_v48, 7 }
 0x3e6   : > { %v2715_v61 = vrot.slane %v12353_v46, 7  ;;  %v9773_v6 = vsel %vm2565_vm4, 0.0, %v2605_v59 }
 0x3e7   : > { %v9720_v14 = vpop.permute.xlu1 %3488  ;;  %v9722_v9 = vpop.permute.xlu0 %3280 }
 0x3e9   : > { %3026 = vrot.lane.b32.xlu1 %v2762_v23, %s6638_s22  ;;  %3032 = vrot.lane.b32.xlu0 %v2713_v5, %s6638_s22  ;;  %v9744_v23 = vsel %vm2565_vm4, 0.0, %v2581_v37  ;;  %v9747_v5 = vsel %vm2565_vm4, %v2584_v56, %v2585_v20  ;;  %v2587_v37 = vrot.slane %v8996_v16, 7  ;;  %v2588_v20 = vrot.slane %v9022_v17, 7 }
 0x3eb   : > { %v9739_v35 = vpop.permute.xlu1 %3186  ;;  %v2950_v26 = vpop.permute.xlu0 %2949  ;;  %v9776_v16 = vsel %vm2565_vm4, %v2587_v37, %v2588_v20  ;;  %v2591_v20 = vrot.slane %v9088_v55, 7 }
 0x3ec   : > { %12352 = vst [vmem:[#allocation157_spill] sm:$0xff] %v9739_v35  ;;  %v9750_v1 = vsel %vm508_vm2, %v3658_v24, %v2950_v26  ;;  %v2716_v24 = vsel %vm2565_vm4, %v2714_v29, %v2715_v61  ;;  %v9768_v26 = vsel %vm2565_vm4, 0.0, %v2584_v56  ;;  %v2717_v61 = vrot.slane %v12355_v53, 7 }
 0x3ed   : > { %3362 = vrot.lane.b32.xlu1 %v9744_v23, %s6639_s23  ;;  %3368 = vrot.lane.b32.xlu0 %v9747_v5, %s6639_s23  ;;  %v2590_v56 = vrot.slane %v9066_v4, 7  ;;  %v9800_v53 = vsel %vm2565_vm4, 0.0, %v2587_v37  ;;  %v12360_v37 = vmax.f32 %v9134_v3, 0.0 }
 0x3ef   : > { %v9756_v43 = vpop.permute.xlu1 %3584  ;;  %v9758_v7 = vpop.permute.xlu0 %3490  ;;  %v9803_v4 = vsel %vm2565_vm4, %v2590_v56, %v2591_v20  ;;  %v9832_v3 = vsel %vm2565_vm4, 0.0, %v2590_v56 }
 0x3f0   : > { %12354 = vst [vmem:[#allocation158_spill] sm:$0xff] %v9756_v43 }
 0x3f1   : > { %3030 = vrot.lane.b32.xlu1 %v2763_v28, %s6638_s22  ;;  %3036 = vrot.lane.b32.xlu0 %v2716_v24, %s6638_s22  ;;  %v12356_v28 = vmax.f32 %v9064_v44, 0.0 }
 0x3f3   : > { %v9770_v46 = vpop.permute.xlu1 %3188  ;;  %v2859_v13 = vpop.permute.xlu0 %2858  ;;  %v2718_v24 = vrot.slane %v12356_v28, 7  ;;  %v9806_v28 = vsel %vm2565_vm4, %v2605_v59, %v2606_v62 }
 0x3f4   : > { %v3659_v17 = vsel %vm1477_vm3, %v9773_v6, %v2859_v13  ;;  %v2764_v13 = vsel %vm2565_vm4, 0.0, %v2714_v29 }
 0x3f5   : > { %3366 = vrot.lane.b32.xlu1 %v9768_v26, %s6639_s23  ;;  %3372 = vrot.lane.b32.xlu0 %v9776_v16, %s6639_s23  ;;  %v2719_v44 = vsel %vm2565_vm4, %v2717_v61, %v2718_v24  ;;  %v12359_v24 = vmax.f32 %v9110_v12, 0.0  ;;  %v2765_v12 = vsel %vm2565_vm4, 0.0, %v2717_v61 }
 0x3f7   : > { %v9790_v35 = vpop.permute.xlu1 %3586  ;;  %v9792_v43 = vpop.permute.xlu0 %3282 }
 0x3f8   : > { %12357 = vst [vmem:[#allocation159_spill] sm:$0xff] %v9792_v43 }
 0x3f9   : > { %3034 = vrot.lane.b32.xlu1 %v2764_v13, %s6638_s22  ;;  %3040 = vrot.lane.b32.xlu0 %v2719_v44, %s6638_s22  ;;  %v2720_v13 = vrot.slane %v12359_v24, 7  ;;  %v2721_v44 = vrot.slane %v12360_v37, 7 }
 0x3fb   : > { %v2952_v55 = vpop.permute.xlu1 %2951  ;;  %v2861_v43 = vpop.permute.xlu0 %2860  ;;  %v2722_v62 = vsel %vm2565_vm4, %v2720_v13, %v2721_v44  ;;  %v12364_v44 = vmax.f32 %v9204_v0, 0.0 }
 0x3fc   : > { %v9809_v48 = vsel %vm508_vm2, %v3659_v17, %v2952_v55  ;;  %v3660_v29 = vsel %vm1477_vm3, %v9806_v28, %v2861_v43  ;;  %v2593_v17 = vrot.slane %v9136_v63, 7  ;;  %v2594_v43 = vrot.slane %v9158_v27, 7 }
 0x3fd   : > { %12358 = vst [vmem:[#allocation160_spill] sm:$0xff] %v9809_v48  ;;  %3370 = vrot.lane.b32.xlu1 %v9800_v53, %s6639_s23  ;;  %3376 = vrot.lane.b32.xlu0 %v9803_v4, %s6639_s23  ;;  %v12363_v27 = vmax.f32 %v9180_v2, 0.0  ;;  %v2597_v2 = vrot.slane %v9228_v42, 7  ;;  %v12370_v48 = vld [vmem:[#allocation118_spill] sm:$0xff] }
 0x3fe   : > { %v9837_v37 = vsel %vm2565_vm4, %v2593_v17, %v2594_v43  ;;  %v2608_v43 = vrot.slane %v9492_v8, 7 }
 0x3ff   : > { %v9821_v59 = vpop.permute.xlu1 %3492  ;;  %v9823_v20 = vpop.permute.xlu0 %3284  ;;  %v2723_v61 = vrot.slane %v12363_v27, 7  ;;  %v9862_v27 = vsel %vm2565_vm4, 0.0, %v2593_v17  ;;  %v2599_v17 = vrot.slane %v9276_v57, 7 }
 0x400   : > { %12361 = vst [vmem:[#allocation161_spill] sm:$0xff] %v9821_v59 }
 0x401   : > { %3038 = vrot.lane.b32.xlu1 %v2765_v12, %s6638_s22  ;;  %3044 = vrot.lane.b32.xlu0 %v2722_v62, %s6638_s22  ;;  %v2724_v12 = vrot.slane %v12364_v44, 7 }
 0x403   : > { %v9834_v55 = vpop.permute.xlu1 %3190  ;;  %v2954_v24 = vpop.permute.xlu0 %2953  ;;  %v2725_v0 = vsel %vm2565_vm4, %v2723_v61, %v2724_v12 }
 0x404   : > { %12362 = vst [vmem:[#allocation162_spill] sm:$0xff] %v9834_v55  ;;  %v9840_v63 = vsel %vm508_vm2, %v3660_v29, %v2954_v24  ;;  %v2596_v29 = vrot.slane %v9206_v40, 7  ;;  %v2766_v24 = vsel %vm2565_vm4, 0.0, %v2720_v13  ;;  %v9867_v55 = vsel %vm2565_vm4, 0.0, %v2608_v43 }
 0x405   : > { %3374 = vrot.lane.b32.xlu1 %v9832_v3, %s6639_s23  ;;  %3380 = vrot.lane.b32.xlu0 %v9837_v37, %s6639_s23  ;;  %v12368_v13 = vmax.f32 %v9250_v21, 0.0  ;;  %v2609_v21 = vrot.slane %v9514_v25, 7 }
 0x406   : > { %v9870_v40 = vsel %vm2565_vm4, %v2596_v29, %v2597_v2  ;;  %v2600_v2 = vrot.slane %v12370_v48, 7 }
 0x407   : > { %v9850_v56 = vpop.permute.xlu1 %3588  ;;  %v9852_v62 = vpop.permute.xlu0 %3494  ;;  %v2726_v12 = vrot.slane %v12368_v13, 7  ;;  %v9894_v13 = vsel %vm2565_vm4, 0.0, %v2596_v29 }
 0x408   : > { %12365 = vst [vmem:[#allocation163_spill] sm:$0xff] %v9850_v56  ;;  %12366 = vst [vmem:[#allocation164_spill] sm:$0xff] %v9852_v62  ;;  %v9897_v57 = vsel %vm2565_vm4, %v2599_v17, %v2600_v2  ;;  %v12376_v62 = vld [vmem:[#allocation125_spill] sm:$0xff]  ;;  %v9923_v2 = vsel %vm2565_vm4, 0.0, %v2599_v17 }
 0x409   : > { %3042 = vrot.lane.b32.xlu1 %v2766_v24, %s6638_s22  ;;  %3048 = vrot.lane.b32.xlu0 %v2725_v0, %s6638_s22  ;;  %v12369_v24 = vmax.f32 %v9274_v11, 0.0 }
 0x40b   : > { %v9864_v44 = vpop.permute.xlu1 %3192  ;;  %v2863_v8 = vpop.permute.xlu0 %2862  ;;  %v2727_v0 = vrot.slane %v12369_v24, 7  ;;  %v2610_v24 = vsel %vm2565_vm4, %v2608_v43, %v2609_v21 }
 0x40c   : > { %12367 = vst [vmem:[#allocation165_spill] sm:$0xff] %v9864_v44  ;;  %v3661_v42 = vsel %vm1477_vm3, %v9867_v55, %v2863_v8  ;;  %v2767_v8 = vsel %vm2565_vm4, 0.0, %v2723_v61 }
 0x40d   : > { %3378 = vrot.lane.b32.xlu1 %v9862_v27, %s6639_s23  ;;  %3384 = vrot.lane.b32.xlu0 %v9870_v40, %s6639_s23  ;;  %v2728_v11 = vsel %vm2565_vm4, %v2726_v12, %v2727_v0  ;;  %v12374_v0 = vld [vmem:[#allocation121_spill] sm:$0xff] }
 0x40f   : > { %v9884_v56 = vpop.permute.xlu1 %3590  ;;  %v9886_v59 = vpop.permute.xlu0 %3286 }
 0x410   : > { %12371 = vst [vmem:[#allocation118_spill] sm:$0xff] %v9884_v56  ;;  %12372 = vst [vmem:[#allocation166_spill] sm:$0xff] %v9886_v59  ;;  %v12375_v56 = vmax.f32 %v12374_v0, 0.0 }
 0x411   : > { %3046 = vrot.lane.b32.xlu1 %v2767_v8, %s6638_s22  ;;  %3052 = vrot.lane.b32.xlu0 %v2728_v11, %s6638_s22  ;;  %v12377_v11 = vmax.f32 %v12376_v62, 0.0 }
 0x412   : > { %v2729_v8 = vrot.slane %v12375_v56, 7 }
 0x413   : > { %v2956_v48 = vpop.permute.xlu1 %2955  ;;  %v2865_v59 = vpop.permute.xlu0 %2864  ;;  %v2730_v44 = vrot.slane %v12377_v11, 7 }
 0x414   : > { %v9901_v25 = vsel %vm508_vm2, %v3661_v42, %v2956_v48  ;;  %v3662_v61 = vsel %vm1477_vm3, %v2610_v24, %v2865_v59  ;;  %v2768_v42 = vsel %vm2565_vm4, 0.0, %v2726_v12  ;;  %v12380_v48 = vld [vmem:[#allocation56_spill] sm:$0xff]  ;;  %v2769_v17 = vsel %vm2565_vm4, 0.0, %v2729_v8 }
 0x415   : > { %12373 = vst [vmem:[#allocation167_spill] sm:$0xff] %v9901_v25  ;;  %3382 = vrot.lane.b32.xlu1 %v9894_v13, %s6639_s23  ;;  %3388 = vrot.lane.b32.xlu0 %v9897_v57, %s6639_s23  ;;  %v2731_v59 = vsel %vm2565_vm4, %v2729_v8, %v2730_v44  ;;  %v12381_v0 = vmax.f32 %v12380_v48, 0.0  ;;  %v12382_v25 = vld [vmem:[#allocation54_spill] sm:$0xff]  ;;  %v12387_v48 = vld [vmem:[#allocation64_spill] sm:$0xff] }
 0x416   : > { %v12383_v12 = vmax.f32 %v12382_v25, 0.0 }
 0x417   : > { %v9912_v29 = vpop.permute.xlu1 %3496  ;;  %v9914_v43 = vpop.permute.xlu0 %3288  ;;  %v2732_v11 = vrot.slane %v12381_v0, 7  ;;  %v12388_v0 = vmax.f32 %v12387_v48, 0.0  ;;  %v12393_v48 = vmax.f32 %v9527_v30, 0.0 }
 0x418   : > { %12378 = vst [vmem:[#allocation121_spill] sm:$0xff] %v9912_v29  ;;  %v2733_v29 = vrot.slane %v12383_v12, 7 }
 0x419   : > { %3050 = vrot.lane.b32.xlu1 %v2768_v42, %s6638_s22  ;;  %3056 = vrot.lane.b32.xlu0 %v2731_v59, %s6638_s22  ;;  %v2735_v12 = vrot.slane %v12388_v0, 7  ;;  %v2738_v0 = vrot.slane %v12393_v48, 7 }
 0x41b   : > { %v9920_v56 = vpop.permute.xlu1 %3194  ;;  %v2958_v62 = vpop.permute.xlu0 %2957  ;;  %v2771_v30 = vsel %vm2565_vm4, 0.0, %v2735_v12 }
 0x41c   : > { %12379 = vst [vmem:[#allocation125_spill] sm:$0xff] %v9920_v56  ;;  %v9926_v21 = vsel %vm508_vm2, %v3662_v61, %v2958_v62  ;;  %v2734_v61 = vsel %vm2565_vm4, %v2732_v11, %v2733_v29  ;;  %v12386_v62 = vrot.slane %v9346_v36, 7  ;;  %v12389_v56 = vld [vmem:[#allocation62_spill] sm:$0xff]  ;;  %v2770_v36 = vsel %vm2565_vm4, 0.0, %v2732_v11 }
 0x41d   : > { %3386 = vrot.lane.b32.xlu1 %v9923_v2, %s6639_s23  ;;  %3392 = vrot.lane.b32.xlu0 %v9733_v47, %s6639_s23  ;;  %v12390_v8 = vmax.f32 %v12389_v56, 0.0 }
 0x41e   : > { %v9951_v47 = vsel %vm2565_vm4, 0.0, %v12386_v62 }
 0x41f   : > { %v9936_v44 = vpop.permute.xlu1 %3592  ;;  %v9938_v42 = vpop.permute.xlu0 %3498 }
 0x420   : > { %12384 = vst [vmem:[#allocation56_spill] sm:$0xff] %v9936_v44  ;;  %v2736_v44 = vrot.slane %v12390_v8, 7 }
 0x421   : > { %3054 = vrot.lane.b32.xlu1 %v2769_v17, %s6638_s22  ;;  %3060 = vrot.lane.b32.xlu0 %v2734_v61, %s6638_s22 }
 0x422   : > { %v2737_v61 = vsel %vm2565_vm4, %v2735_v12, %v2736_v44  ;;  %v12399_v12 = vld [vmem:[#allocation85_spill] sm:$0xff] }
 0x423   : > { %v9944_v25 = vpop.permute.xlu1 %3290  ;;  %v9946_v59 = vpop.permute.xlu0 %3196 }
 0x424   : > { %12385 = vst [vmem:[#allocation54_spill] sm:$0xff] %v9944_v25 }
 0x425   : > { %3390 = vrot.lane.b32.xlu1 %v9951_v47, %s6639_s23  ;;  %3396 = vrot.lane.b32.xlu0 %v9806_v28, %s6639_s23  ;;  %v12394_v28 = vmax.f32 %v9538_v51, 0.0 }
 0x427   : > { %v9961_v29 = vpop.permute.xlu1 %3292  ;;  %v9963_v17 = vpop.permute.xlu0 %3594  ;;  %v2739_v8 = vrot.slane %v12394_v28, 7 }
 0x428   : > { %12391 = vst [vmem:[#allocation64_spill] sm:$0xff] %v9961_v29  ;;  %v12395_v29 = vld [vmem:[#allocation83_spill] sm:$0xff] }
 0x429   : > { %3058 = vrot.lane.b32.xlu1 %v2770_v36, %s6638_s22  ;;  %3064 = vrot.lane.b32.xlu0 %v2737_v61, %s6638_s22  ;;  %v3632_v25 = vsel %vm1477_vm3, 0.0, %v12395_v29  ;;  %v12396_v36 = vld [vmem:[#allocation84_spill] sm:$0xff]  ;;  %v2740_v48 = vsel %vm2565_vm4, %v2738_v0, %v2739_v8  ;;  %v12398_v29 = vld [vmem:[#allocation34_spill] sm:$0xff] }
 0x42a   : > { %v3663_v61 = vsel %vm508_vm2, %v3632_v25, %v12396_v36 }
 0x42b   : > { %v9969_v56 = vpop.permute.xlu1 %3502  ;;  %v9971_v62 = vpop.permute.xlu0 %3500 }
 0x42c   : > { %12392 = vst [vmem:[#allocation62_spill] sm:$0xff] %v9969_v56  ;;  %v12400_v56 = vld [vmem:[#allocation87_spill] sm:$0xff] }
 0x42d   : > { %3394 = vrot.lane.b32.xlu1 %v9773_v6, %s6639_s23  ;;  %3400 = vrot.lane.b32.xlu0 %v2610_v24, %s6639_s23  ;;  %v12397_v6 = vld [vmem:[#allocation42_spill] sm:$0xff] }
 0x42e   : > { %v3634_v24 = vsel %vm1477_vm3, %v8607_v15, %v12397_v6  ;;  %v12401_v15 = vld [vmem:[#allocation78_spill] sm:$0xff]  ;;  %v12402_v6 = vld [vmem:[#allocation36_spill] sm:$0xff] }
 0x42f   : > { %v3007_v11 = vpop.permute.xlu1 %3006  ;;  %v3345_v44 = vpop.permute.xlu0 %3344  ;;  %v3665_v28 = vsel %vm508_vm2, %v3634_v24, %v12398_v29  ;;  %v12403_v29 = vld [vmem:[#allocation3_spill] sm:$0xff] }
 0x430   : > { %v3695_v51 = vsel %vm3694_vm5, %v3663_v61, %v3007_v11 }
 0x431   : > { %3062 = vrot.lane.b32.xlu1 %v2771_v30, %s6638_s22  ;;  %3068 = vrot.lane.b32.xlu0 %v2740_v48, %s6638_s22  ;;  %v3728_v8 = vsel %vm3727_vm6, %v3695_v51, %v12399_v12  ;;  %v2772_v12 = vsel %vm2565_vm4, 0.0, %v2738_v0 }
 0x433   : > { %v3009_v25 = vpop.permute.xlu1 %3008  ;;  %v3013_v36 = vpop.permute.xlu0 %3012 }
 0x434   : > { %v3696_v11 = vsel %vm3694_vm5, %v3663_v61, %v3009_v25  ;;  %v3698_v30 = vsel %vm3694_vm5, %v3665_v28, %v3013_v36  ;;  %v12404_v28 = vld [vmem:[#allocation88_spill] sm:$0xff] }
 0x435   : > { %v3729_v48 = vsel %vm3727_vm6, %v3696_v11, %v12400_v56  ;;  %3398 = vrot.lane.b32.xlu1 %v9867_v55, %s6639_s23  ;;  %3402 = vrot.lane.b32.xlu0 %v12401_v15, %s6639_s23  ;;  %v3731_v61 = vsel %vm3727_vm6, %v3698_v30, %v12403_v29  ;;  %v3761_v36 = vsel %vm3760_vm7, %v3728_v8, %v12404_v28  ;;  %v12405_v11 = vld [vmem:[#allocation4_spill] sm:$0xff]  ;;  %v12407_v30 = vld [vmem:[#allocation74_spill] sm:$0xff]  ;;  %v12410_v29 = vld [vmem:[#allocation9_spill] sm:$0xff] }
 0x436   : > { %v3762_v24 = vsel %vm3760_vm7, %v3729_v48, %v12402_v6  ;;  %v12406_v48 = vld [vmem:[#allocation48_spill] sm:$0xff]  ;;  %v12408_v6 = vmax.f32 %v12407_v30, 0.0  ;;  %v12409_v8 = vld [vmem:[#allocation86_spill] sm:$0xff]  ;;  %v3636_v0 = vsel %vm1477_vm3, %v12327_v39, %v12410_v29 }
 0x437   : > { %v3795_v51 = vsel %vm3793_vm8, %v3762_v24, %v3345_v44  ;;  %v3343_v25 = vpop.permute.xlu1 %3342  ;;  %v3349_v56 = vpop.permute.xlu0 %3348  ;;  %v3633_v24 = vsel %vm1477_vm3, %v9604_v50, %v12409_v8  ;;  %v12412_v28 = vld [vmem:[#allocation40_spill] sm:$0xff]  ;;  %v12416_v29 = vld [vmem:[#allocation2_spill] sm:$0xff] }
 0x438   : > { %v3794_v55 = vsel %vm3793_vm8, %v3761_v36, %v3343_v25  ;;  %v3828_v15 = vsel %vm3826_vm9, %v3795_v51, %v12405_v11  ;;  %v12411_v25 = vld [vmem:[#allocation15_spill] sm:$0xff]  ;;  %v12414_v11 = vld [vmem:[#allocation13_spill] sm:$0xff] }
 0x439   : > { %v3827_v44 = vsel %vm3826_vm9, %v3794_v55, %v12406_v48  ;;  %3066 = vrot.lane.b32.xlu1 %v2772_v12, %s6638_s22  ;;  %3596 = vrot.lane.b32.xlu0 %v12408_v6, %s6637_s27  ;;  %v3764_v51 = vsel %vm3760_vm7, %v3731_v61, %v12411_v25  ;;  %v12413_v55 = vld [vmem:[#allocation89_spill] sm:$0xff]  ;;  %v3667_v48 = vsel %vm508_vm2, %v3636_v0, %v12414_v11  ;;  %v12415_v6 = vld [vmem:[#allocation91_spill] sm:$0xff]  ;;  %v12417_v0 = vld [vmem:[#allocation82_spill] sm:$0xff] }
 0x43a   : > { %v3860_v36 = vsel %vm3859_vm10, %v3827_v44, %v12412_v28  ;;  %v3664_v12 = vsel %vm508_vm2, %v3633_v24, %v12413_v55  ;;  %v3861_v8 = vsel %vm3859_vm10, %v3828_v15, %v12415_v6  ;;  %v3797_v44 = vsel %vm3793_vm8, %v3764_v51, %v3349_v56  ;;  %v12418_v25 = vld [vmem:[#allocation5_spill] sm:$0xff]  ;;  %v12421_v56 = vld [vmem:[#allocation38_spill] sm:$0xff] }
 0x43b   : > { %v3011_v30 = vpop.permute.xlu1 %3010  ;;  %6408 = vmatprep.mubr.msk.f32.mxu0 %vm3897_vm11, %v3860_v36  ;;  %v3017_v50 = vpop.permute.xlu0 %3016  ;;  %v12419_v36 = vld [vmem:[#allocation46_spill] sm:$0xff]  ;;  %v12420_v11 = vld [vmem:[#allocation17_spill] sm:$0xff] }
 0x43c   : > { %v3697_v39 = vsel %vm3694_vm5, %v3664_v12, %v3011_v30  ;;  %v3700_v61 = vsel %vm3694_vm5, %v3667_v48, %v3017_v50  ;;  %6409 = vmatmul.mubr.msk.f32.vlgmr.msra.gmra.mrb[48].mxu0 %vm3897_vm11, %v3861_v8  ;;  %v3830_v48 = vsel %vm3826_vm9, %v3797_v44, %v12420_v11  ;;  %v12422_v50 = vld [vmem:[#allocation80_spill] sm:$0xff]  ;;  %v12424_v8 = vld [vmem:[#allocation7_spill] sm:$0xff] }
 0x43d   : > { %v3730_v24 = vsel %vm3727_vm6, %v3697_v39, %v12416_v29  ;;  %3404 = vrot.lane.b32.xlu1 %v12417_v0, %s6639_s23  ;;  %v3733_v15 = vsel %vm3727_vm6, %v3700_v61, %v12419_v36  ;;  %v12423_v6 = vmax.f32 %v12422_v50, 0.0  ;;  %v3635_v39 = vsel %vm1477_vm3, %v9630_v32, %v12424_v8  ;;  %v12425_v29 = vld [vmem:[#allocation31_spill] sm:$0xff] }
 0x43e   : > { %v3763_v28 = vsel %vm3760_vm7, %v3730_v24, %v12418_v25  ;;  %v3638_v61 = vsel %vm1477_vm3, %v12334_v38, %v12425_v29  ;;  %v12426_v24 = vld [vmem:[#allocation35_spill] sm:$0xff] }
 0x43f   : > { %v3347_v55 = vpop.permute.xlu1 %3346  ;;  %v3353_v12 = vpop.permute.xlu0 %3352  ;;  %v3766_v44 = vsel %vm3760_vm7, %v3733_v15, %v12426_v24  ;;  %v12427_v0 = vld [vmem:[#allocation19_spill] sm:$0xff] }
 0x440   : > { %v3796_v30 = vsel %vm3793_vm8, %v3763_v28, %v3347_v55  ;;  %v12428_v28 = vld [vmem:[#allocation11_spill] sm:$0xff] }
 0x441   : > { %v3829_v51 = vsel %vm3826_vm9, %v3796_v30, %v12421_v56  ;;  %3598 = vrot.lane.b32.xlu1 %v12423_v6, %s6637_s27  ;;  %v3666_v36 = vsel %vm508_vm2, %v3635_v39, %v12428_v28  ;;  %v12429_v55 = vld [vmem:[#allocation39_spill] sm:$0xff]  ;;  %v12430_v56 = vld [vmem:[#allocation21_spill] sm:$0xff]  ;;  %v12431_v6 = vld [vmem:[#allocation44_spill] sm:$0xff]  ;;  %s5968_s27 = sshll.u32 %s12614_s26, 8 }
 0x442   : > { %v3862_v25 = vsel %vm3859_vm10, %v3829_v51, %v12427_v0  ;;  %v3669_v11 = vsel %vm508_vm2, %v3638_v61, %v12429_v55  ;;  %v3863_v50 = vsel %vm3859_vm10, %v3830_v48, %v12430_v56  ;;  %v3799_v51 = vsel %vm3793_vm8, %v3766_v44, %v3353_v12  ;;  %v12432_v39 = vld [vmem:[#allocation27_spill] sm:$0xff]  ;;  %v12433_v61 = vld [vmem:[#allocation41_spill] sm:$0xff]  ;;  %v12438_v56 = vld [vmem:[#allocation92_spill] sm:$0xff]  ;;  %s11604_s29 = scalar_lea.vmem %s11710_s13, %s5968_s27 }
 0x443   : > { %v3015_v30 = vpop.permute.xlu1 %3014  ;;  %6411 = vmatprep.mubr.msk.f32.mxu0 %vm3897_vm11, %v3862_v25  ;;  %v3021_v32 = vpop.permute.xlu0 %3020  ;;  %v12434_v48 = vld [vmem:[#allocation43_spill] sm:$0xff]  ;;  %v12435_v55 = vld [vmem:[#allocation29_spill] sm:$0xff] }
 0x444   : > { %v3699_v38 = vsel %vm3694_vm5, %v3666_v36, %v3015_v30  ;;  %v3702_v15 = vsel %vm3694_vm5, %v3669_v11, %v3021_v32  ;;  %6412 = vmatmul.mubr.msk.f32.gmra.mrb[50].mxu0 %vm3897_vm11, %v3863_v50  ;;  %v3832_v28 = vsel %vm3826_vm9, %v3799_v51, %v12434_v48  ;;  %v12436_v12 = vld [vmem:[#allocation23_spill] sm:$0xff]  ;;  %v12440_v51 = vld [vmem:[#allocation25_spill] sm:$0xff] }
 0x445   : > { %v3732_v8 = vsel %vm3727_vm6, %v3699_v38, %v12431_v6  ;;  %v3735_v24 = vsel %vm3727_vm6, %v3702_v15, %v12433_v61  ;;  %v3637_v44 = vsel %vm1477_vm3, %v9656_v22, %v12436_v12  ;;  %v12437_v30 = vld [vmem:[#allocation51_spill] sm:$0xff]  ;;  %v12439_v38 = vld [vmem:[#allocation37_spill] sm:$0xff]  ;;  %v12442_v61 = vld [vmem:[#allocation52_spill] sm:$0xff] }
 0x446   : > { %v3765_v29 = vsel %vm3760_vm7, %v3732_v8, %v12432_v39  ;;  %v3640_v32 = vsel %vm1477_vm3, %v8660_v49, %v12437_v30  ;;  %v3768_v50 = vsel %vm3760_vm7, %v3735_v24, %v12438_v56  ;;  %v3668_v6 = vsel %vm508_vm2, %v3637_v44, %v12440_v51  ;;  %v12441_v8 = vld [vmem:[#allocation93_spill] sm:$0xff]  ;;  %v12445_v44 = vld [vmem:[#allocation59_spill] sm:$0xff] }
 0x447   : > { %v3351_v0 = vpop.permute.xlu1 %3350  ;;  %v3357_v25 = vpop.permute.xlu0 %3356  ;;  %v3671_v39 = vsel %vm508_vm2, %v3640_v32, %v12441_v8  ;;  %v12447_v51 = vld [vmem:[#allocation55_spill] sm:$0xff]  ;;  %v12449_v8 = vld [vmem:[#allocation98_spill] sm:$0xff] }
 0x448   : > { %v3798_v36 = vsel %vm3793_vm8, %v3765_v29, %v3351_v0  ;;  %v3865_v0 = vsel %vm3859_vm10, %v3832_v28, %v12442_v61  ;;  %v3801_v48 = vsel %vm3793_vm8, %v3768_v50, %v3357_v25  ;;  %v12446_v28 = vld [vmem:[#allocation95_spill] sm:$0xff]  ;;  %v12451_v61 = vld [vmem:[#allocation94_spill] sm:$0xff] }
 0x449   : > { %v3831_v11 = vsel %vm3826_vm9, %v3798_v36, %v12435_v55  ;;  %v12443_v36 = vld [vmem:[#allocation33_spill] sm:$0xff]  ;;  %v12448_v25 = vld [vmem:[#allocation47_spill] sm:$0xff] }
 0x44a   : > { %v3864_v15 = vsel %vm3859_vm10, %v3831_v11, %v12439_v38  ;;  %v12444_v11 = vld [vmem:[#allocation45_spill] sm:$0xff]  ;;  %v3834_v38 = vsel %vm3826_vm9, %v3801_v48, %v12446_v28  ;;  %v3639_v50 = vsel %vm1477_vm3, %v9683_v10, %v12448_v25 }
 0x44b   : > { %v3019_v29 = vpop.permute.xlu1 %3018  ;;  %6414 = vmatprep.mubr.msk.f32.mxu0 %vm3897_vm11, %v3864_v15  ;;  %v3025_v22 = vpop.permute.xlu0 %3024  ;;  %v12453_v48 = vld [vmem:[#allocation101_spill] sm:$0xff] }
 0x44c   : > { %v3701_v49 = vsel %vm3694_vm5, %v3668_v6, %v3019_v29  ;;  %v3704_v24 = vsel %vm3694_vm5, %v3671_v39, %v3025_v22  ;;  %6415 = vmatmul.mubr.msk.f32.gmra.mrb[52].mxu0 %vm3897_vm11, %v3865_v0  ;;  %v3642_v39 = vsel %vm1477_vm3, %v9686_v31, %v12449_v8  ;;  %v12450_v29 = vld [vmem:[#allocation100_spill] sm:$0xff] }
 0x44d   : > { %v3734_v55 = vsel %vm3727_vm6, %v3701_v49, %v12443_v36  ;;  %v3737_v30 = vsel %vm3727_vm6, %v3704_v24, %v12445_v44  ;;  %v12452_v49 = vld [vmem:[#allocation49_spill] sm:$0xff]  ;;  %v3673_v36 = vsel %vm508_vm2, %v3642_v39, %v12453_v48  ;;  %v12462_v48 = vld [vmem:[#allocation108_spill] sm:$0xff] }
 0x44e   : > { %v3767_v12 = vsel %vm3760_vm7, %v3734_v55, %v12444_v11  ;;  %v3770_v22 = vsel %vm3760_vm7, %v3737_v30, %v12450_v29  ;;  %v3670_v24 = vsel %vm508_vm2, %v3639_v50, %v12452_v49  ;;  %v12454_v11 = vld [vmem:[#allocation96_spill] sm:$0xff]  ;;  %v12461_v49 = vld [vmem:[#allocation106_spill] sm:$0xff] }
 0x44f   : > { %v3355_v32 = vpop.permute.xlu1 %3354  ;;  %v3361_v56 = vpop.permute.xlu0 %3360 }
 0x450   : > { %v3800_v15 = vsel %vm3793_vm8, %v3767_v12, %v3355_v32  ;;  %v3867_v12 = vsel %vm3859_vm10, %v3834_v38, %v12454_v11  ;;  %v3803_v30 = vsel %vm3793_vm8, %v3770_v22, %v3361_v56  ;;  %v12455_v32 = vld [vmem:[#allocation53_spill] sm:$0xff]  ;;  %v12458_v38 = vld [vmem:[#allocation103_spill] sm:$0xff] }
 0x451   : > { %v3833_v6 = vsel %vm3826_vm9, %v3800_v15, %v12447_v51  ;;  %v12456_v15 = vld [vmem:[#allocation97_spill] sm:$0xff]  ;;  %v3836_v39 = vsel %vm3826_vm9, %v3803_v30, %v12458_v38  ;;  %v12464_v11 = vld [vmem:[#allocation63_spill] sm:$0xff] }
 0x452   : > { %v3866_v0 = vsel %vm3859_vm10, %v3833_v6, %v12451_v61  ;;  %v12457_v6 = vld [vmem:[#allocation67_spill] sm:$0xff]  ;;  %v12460_v56 = vld [vmem:[#allocation57_spill] sm:$0xff] }
 0x453   : > { %v3023_v55 = vpop.permute.xlu1 %3022  ;;  %6417 = vmatprep.mubr.msk.f32.mxu0 %vm3897_vm11, %v3866_v0  ;;  %v3029_v10 = vpop.permute.xlu0 %3028  ;;  %v12459_v61 = vld [vmem:[#allocation99_spill] sm:$0xff]  ;;  %v3641_v22 = vsel %vm1477_vm3, %v9709_v41, %v12460_v56 }
 0x454   : > { %v3703_v31 = vsel %vm3694_vm5, %v3670_v24, %v3023_v55  ;;  %v3706_v44 = vsel %vm3694_vm5, %v3673_v36, %v3029_v10  ;;  %6418 = vmatmul.mubr.msk.f32.gmra.mrb[54].mxu0 %vm3897_vm11, %v3867_v12  ;;  %v3644_v24 = vsel %vm1477_vm3, %v9712_v58, %v12461_v49  ;;  %v12463_v55 = vld [vmem:[#allocation102_spill] sm:$0xff]  ;;  %v3672_v12 = vsel %vm508_vm2, %v3641_v22, %v12464_v11  ;;  %v12474_v11 = vld [vmem:[#allocation116_spill] sm:$0xff] }
 0x455   : > { %v3736_v28 = vsel %vm3727_vm6, %v3703_v31, %v12455_v32  ;;  %v3739_v25 = vsel %vm3727_vm6, %v3706_v44, %v12457_v6  ;;  %v12465_v31 = vld [vmem:[#allocation109_spill] sm:$0xff]  ;;  %v12466_v32 = vld [vmem:[#allocation104_spill] sm:$0xff] }
 0x456   : > { %v3769_v51 = vsel %vm3760_vm7, %v3736_v28, %v12456_v15  ;;  %v3772_v36 = vsel %vm3760_vm7, %v3739_v25, %v12462_v48  ;;  %v3675_v44 = vsel %vm508_vm2, %v3644_v24, %v12465_v31  ;;  %v3869_v28 = vsel %vm3859_vm10, %v3836_v39, %v12466_v32  ;;  %v12467_v6 = vld [vmem:[#allocation61_spill] sm:$0xff]  ;;  %v12470_v39 = vld [vmem:[#allocation111_spill] sm:$0xff]  ;;  %v12475_v31 = vld [vmem:[#allocation110_spill] sm:$0xff] }
 0x457   : > { %v3359_v50 = vpop.permute.xlu1 %3358  ;;  %v3365_v8 = vpop.permute.xlu0 %3364  ;;  %v12471_v24 = vld [vmem:[#allocation107_spill] sm:$0xff]  ;;  %v12477_v32 = vld [vmem:[#allocation117_spill] sm:$0xff] }
 0x458   : > { %v3802_v29 = vsel %vm3793_vm8, %v3769_v51, %v3359_v50  ;;  %v3805_v51 = vsel %vm3793_vm8, %v3772_v36, %v3365_v8  ;;  %v12468_v50 = vld [vmem:[#allocation105_spill] sm:$0xff] }
 0x459   : > { %v3835_v0 = vsel %vm3826_vm9, %v3802_v29, %v12459_v61  ;;  %v12469_v29 = vld [vmem:[#allocation75_spill] sm:$0xff]  ;;  %v3838_v22 = vsel %vm3826_vm9, %v3805_v51, %v12470_v39  ;;  %v12472_v8 = vld [vmem:[#allocation65_spill] sm:$0xff] }
 0x45a   : > { %v3868_v10 = vsel %vm3859_vm10, %v3835_v0, %v12463_v55  ;;  %v3643_v36 = vsel %vm1477_vm3, %v9744_v23, %v12472_v8  ;;  %v12473_v55 = vld [vmem:[#allocation114_spill] sm:$0xff] }
 0x45b   : > { %v3027_v30 = vpop.permute.xlu1 %3026  ;;  %6420 = vmatprep.mubr.msk.f32.mxu0 %vm3897_vm11, %v3868_v10  ;;  %v3033_v41 = vpop.permute.xlu0 %3032  ;;  %v3646_v10 = vsel %vm1477_vm3, %v9747_v5, %v12473_v55 }
 0x45c   : > { %v3705_v58 = vsel %vm3694_vm5, %v3672_v12, %v3027_v30  ;;  %v3708_v15 = vsel %vm3694_vm5, %v3675_v44, %v3033_v41  ;;  %6421 = vmatmul.mubr.msk.f32.gmra.mrb[56].mxu0 %vm3897_vm11, %v3869_v28  ;;  %v12476_v30 = vld [vmem:[#allocation71_spill] sm:$0xff]  ;;  %v3677_v28 = vsel %vm508_vm2, %v3646_v10, %v12477_v32 }
 0x45d   : > { %v3738_v25 = vsel %vm3727_vm6, %v3705_v58, %v12467_v6  ;;  %v3741_v61 = vsel %vm3727_vm6, %v3708_v15, %v12469_v29  ;;  %v3674_v41 = vsel %vm508_vm2, %v3643_v36, %v12476_v30  ;;  %v12478_v15 = vld [vmem:[#allocation112_spill] sm:$0xff]  ;;  %v12480_v29 = vld [vmem:[#allocation113_spill] sm:$0xff]  ;;  %v12483_v36 = vld [vmem:[#allocation115_spill] sm:$0xff] }
 0x45e   : > { %v3771_v38 = vsel %vm3760_vm7, %v3738_v25, %v12468_v50  ;;  %v3774_v12 = vsel %vm3760_vm7, %v3741_v61, %v12474_v11  ;;  %v3871_v51 = vsel %vm3859_vm10, %v3838_v22, %v12478_v15  ;;  %v12479_v50 = vld [vmem:[#allocation69_spill] sm:$0xff]  ;;  %v12482_v22 = vld [vmem:[#allocation120_spill] sm:$0xff]  ;;  %v12487_v30 = vld [vmem:[#allocation119_spill] sm:$0xff] }
 0x45f   : > { %v3363_v0 = vpop.permute.xlu1 %3362  ;;  %v3369_v56 = vpop.permute.xlu0 %3368  ;;  %v12485_v11 = vld [vmem:[#allocation124_spill] sm:$0xff]  ;;  %v12488_v32 = vld [vmem:[#allocation79_spill] sm:$0xff] }
 0x460   : > { %v3804_v49 = vsel %vm3793_vm8, %v3771_v38, %v3363_v0  ;;  %v3807_v25 = vsel %vm3793_vm8, %v3774_v12, %v3369_v56  ;;  %v12481_v0 = vld [vmem:[#allocation81_spill] sm:$0xff]  ;;  %v3648_v12 = vsel %vm1477_vm3, %v9776_v16, %v12485_v11  ;;  %v12497_v11 = vld [vmem:[#allocation60_spill] sm:$0xff] }
 0x461   : > { %v3837_v48 = vsel %vm3826_vm9, %v3804_v49, %v12471_v24  ;;  %v12484_v56 = vld [vmem:[#allocation73_spill] sm:$0xff] }
 0x462   : > { %v3870_v44 = vsel %vm3859_vm10, %v3837_v48, %v12475_v31  ;;  %v3840_v48 = vsel %vm3826_vm9, %v3807_v25, %v12482_v22  ;;  %v3645_v10 = vsel %vm1477_vm3, %v9768_v26, %v12484_v56  ;;  %v12486_v31 = vld [vmem:[#allocation127_spill] sm:$0xff] }
 0x463   : > { %v3031_v58 = vpop.permute.xlu1 %3030  ;;  %6423 = vmatprep.mubr.msk.f32.mxu0 %vm3897_vm11, %v3870_v44  ;;  %v3037_v23 = vpop.permute.xlu0 %3036 }
 0x464   : > { %v3707_v5 = vsel %vm3694_vm5, %v3674_v41, %v3031_v58  ;;  %v3710_v6 = vsel %vm3694_vm5, %v3677_v28, %v3037_v23  ;;  %6424 = vmatmul.mubr.msk.f32.gmra.mrb[58].mxu0 %vm3897_vm11, %v3871_v51  ;;  %v3676_v28 = vsel %vm508_vm2, %v3645_v10, %v12488_v32  ;;  %v12489_v58 = vld [vmem:[#allocation50_spill] sm:$0xff] }
 0x465   : > { %v3740_v38 = vsel %vm3727_vm6, %v3707_v5, %v12479_v50  ;;  %v3743_v39 = vsel %vm3727_vm6, %v3710_v6, %v12481_v0  ;;  %v3679_v23 = vsel %vm508_vm2, %v3648_v12, %v12489_v58  ;;  %v12490_v51 = vld [vmem:[#allocation122_spill] sm:$0xff]  ;;  %v12491_v50 = vld [vmem:[#allocation77_spill] sm:$0xff]  ;;  %v3650_v12 = vsel %vm1477_vm3, %v9803_v4, %v12497_v11  ;;  %v12510_v11 = vld [vmem:[#allocation140_spill] sm:$0xff] }
 0x466   : > { %v3773_v61 = vsel %vm3760_vm7, %v3740_v38, %v12480_v29  ;;  %v3776_v44 = vsel %vm3760_vm7, %v3743_v39, %v12486_v31  ;;  %v3873_v5 = vsel %vm3859_vm10, %v3840_v48, %v12490_v51  ;;  %v12492_v29 = vld [vmem:[#allocation123_spill] sm:$0xff]  ;;  %v12493_v0 = vld [vmem:[#allocation10_spill] sm:$0xff]  ;;  %v12494_v48 = vld [vmem:[#allocation129_spill] sm:$0xff] }
 0x467   : > { %v3367_v49 = vpop.permute.xlu1 %3366  ;;  %v3373_v24 = vpop.permute.xlu0 %3372  ;;  %v12498_v31 = vld [vmem:[#allocation133_spill] sm:$0xff]  ;;  %v12500_v32 = vld [vmem:[#allocation6_spill] sm:$0xff] }
 0x468   : > { %v3806_v8 = vsel %vm3793_vm8, %v3773_v61, %v3367_v49  ;;  %v3809_v25 = vsel %vm3793_vm8, %v3776_v44, %v3373_v24  ;;  %v12496_v24 = vld [vmem:[#allocation8_spill] sm:$0xff]  ;;  %v12501_v58 = vld [vmem:[#allocation58_spill] sm:$0xff] }
 0x469   : > { %v3839_v55 = vsel %vm3826_vm9, %v3806_v8, %v12483_v36  ;;  %v3842_v8 = vsel %vm3826_vm9, %v3809_v25, %v12494_v48  ;;  %v3647_v10 = vsel %vm1477_vm3, %v9800_v53, %v12496_v24  ;;  %v12509_v24 = vld [vmem:[#allocation138_spill] sm:$0xff] }
 0x46a   : > { %v3872_v41 = vsel %vm3859_vm10, %v3839_v55, %v12487_v30  ;;  %v12495_v55 = vld [vmem:[#allocation126_spill] sm:$0xff]  ;;  %v12499_v30 = vld [vmem:[#allocation128_spill] sm:$0xff] }
 0x46b   : > { %v3035_v15 = vpop.permute.xlu1 %3034  ;;  %6426 = vmatprep.mubr.msk.f32.mxu0 %vm3897_vm11, %v3872_v41  ;;  %v3041_v26 = vpop.permute.xlu0 %3040 }
 0x46c   : > { %v3709_v16 = vsel %vm3694_vm5, %v3676_v28, %v3035_v15  ;;  %v3712_v6 = vsel %vm3694_vm5, %v3679_v23, %v3041_v26  ;;  %6427 = vmatmul.mubr.msk.f32.gmra.mrb[60].mxu0 %vm3897_vm11, %v3873_v5  ;;  %v3678_v28 = vsel %vm508_vm2, %v3647_v10, %v12500_v32  ;;  %v3681_v23 = vsel %vm508_vm2, %v3650_v12, %v12501_v58  ;;  %v12502_v26 = vld [vmem:[#allocation130_spill] sm:$0xff]  ;;  %v12513_v32 = vld [vmem:[#allocation141_spill] sm:$0xff] }
 0x46d   : > { %v3742_v38 = vsel %vm3727_vm6, %v3709_v16, %v12491_v50  ;;  %v3745_v39 = vsel %vm3727_vm6, %v3712_v6, %v12493_v0  ;;  %v3875_v51 = vsel %vm3859_vm10, %v3842_v8, %v12502_v26  ;;  %v12503_v6 = vld [vmem:[#allocation12_spill] sm:$0xff]  ;;  %v12504_v50 = vld [vmem:[#allocation131_spill] sm:$0xff]  ;;  %v3652_v10 = vsel %vm1477_vm3, %v9837_v37, %v12509_v24  ;;  %v12522_v24 = vld [vmem:[#allocation22_spill] sm:$0xff] }
 0x46e   : > { %v3775_v61 = vsel %vm3760_vm7, %v3742_v38, %v12492_v29  ;;  %v3778_v44 = vsel %vm3760_vm7, %v3745_v39, %v12498_v31  ;;  %v12505_v29 = vld [vmem:[#allocation18_spill] sm:$0xff] }
 0x46f   : > { %v3371_v49 = vpop.permute.xlu1 %3370  ;;  %v3377_v22 = vpop.permute.xlu0 %3376  ;;  %v12511_v31 = vld [vmem:[#allocation134_spill] sm:$0xff] }
 0x470   : > { %v3808_v36 = vsel %vm3793_vm8, %v3775_v61, %v3371_v49  ;;  %v3811_v16 = vsel %vm3793_vm8, %v3778_v44, %v3377_v22  ;;  %v12506_v49 = vld [vmem:[#allocation135_spill] sm:$0xff]  ;;  %v12508_v22 = vld [vmem:[#allocation16_spill] sm:$0xff] }
 0x471   : > { %v3841_v56 = vsel %vm3826_vm9, %v3808_v36, %v12495_v55  ;;  %v3844_v48 = vsel %vm3826_vm9, %v3811_v16, %v12506_v49  ;;  %v12507_v36 = vld [vmem:[#allocation132_spill] sm:$0xff]  ;;  %v12519_v49 = vld [vmem:[#allocation139_spill] sm:$0xff] }
 0x472   : > { %v3874_v41 = vsel %vm3859_vm10, %v3841_v56, %v12499_v30  ;;  %v3649_v56 = vsel %vm1477_vm3, %v9832_v3, %v12508_v22  ;;  %v12512_v30 = vld [vmem:[#allocation14_spill] sm:$0xff] }
 0x473   : > { %v3039_v15 = vpop.permute.xlu1 %3038  ;;  %6429 = vmatprep.mubr.msk.f32.mxu0 %vm3897_vm11, %v3874_v41  ;;  %v3045_v53 = vpop.permute.xlu0 %3044  ;;  %v3680_v41 = vsel %vm508_vm2, %v3649_v56, %v12512_v30  ;;  %v12521_v22 = vld [vmem:[#allocation142_spill] sm:$0xff] }
 0x474   : > { %v3711_v4 = vsel %vm3694_vm5, %v3678_v28, %v3039_v15  ;;  %v3714_v5 = vsel %vm3694_vm5, %v3681_v23, %v3045_v53  ;;  %6430 = vmatmul.mubr.msk.f32.gmra.mrb[62].mxu0 %vm3897_vm11, %v3875_v51  ;;  %v3683_v28 = vsel %vm508_vm2, %v3652_v10, %v12513_v32  ;;  %v12514_v23 = vld [vmem:[#allocation136_spill] sm:$0xff]  ;;  %v12525_v32 = vld [vmem:[#allocation147_spill] sm:$0xff] }
 0x475   : > { %v3744_v25 = vsel %vm3727_vm6, %v3711_v4, %v12503_v6  ;;  %v3747_v61 = vsel %vm3727_vm6, %v3714_v5, %v12505_v29  ;;  %v3877_v15 = vsel %vm3859_vm10, %v3844_v48, %v12514_v23  ;;  %v12515_v51 = vld [vmem:[#allocation20_spill] sm:$0xff]  ;;  %v12516_v5 = vld [vmem:[#allocation137_spill] sm:$0xff]  ;;  %v12517_v6 = vld [vmem:[#allocation26_spill] sm:$0xff] }
 0x476   : > { %v3777_v38 = vsel %vm3760_vm7, %v3744_v25, %v12504_v50  ;;  %v3780_v12 = vsel %vm3760_vm7, %v3747_v61, %v12510_v11  ;;  %v12518_v29 = vld [vmem:[#allocation143_spill] sm:$0xff] }
 0x477   : > { %v3375_v0 = vpop.permute.xlu1 %3374  ;;  %v3381_v39 = vpop.permute.xlu0 %3380 }
 0x478   : > { %v3810_v8 = vsel %vm3793_vm8, %v3777_v38, %v3375_v0  ;;  %v3813_v26 = vsel %vm3793_vm8, %v3780_v12, %v3381_v39  ;;  %v12520_v39 = vld [vmem:[#allocation24_spill] sm:$0xff] }
 0x479   : > { %v3843_v55 = vsel %vm3826_vm9, %v3810_v8, %v12507_v36  ;;  %v3846_v61 = vsel %vm3826_vm9, %v3813_v26, %v12518_v29  ;;  %v3651_v8 = vsel %vm1477_vm3, %v9862_v27, %v12520_v39  ;;  %v3654_v36 = vsel %vm1477_vm3, %v9870_v40, %v9556_v45  ;;  %v12528_v26 = vld [vmem:[#allocation68_spill] sm:$0xff] }
 0x47a   : > { %v3876_v44 = vsel %vm3859_vm10, %v3843_v55, %v12511_v31  ;;  %v3682_v10 = vsel %vm508_vm2, %v3651_v8, %v12522_v24  ;;  %v3685_v11 = vsel %vm508_vm2, %v3654_v36, %v9580_v19  ;;  %v3879_v31 = vsel %vm3859_vm10, %v3846_v61, %v9541_v60  ;;  %v12526_v60 = vld [vmem:[#allocation146_spill] sm:$0xff]  ;;  %v12533_v39 = vld [vmem:[#allocation144_spill] sm:$0xff] }
 0x47b   : > { %v3043_v58 = vpop.permute.xlu1 %3042  ;;  %6432 = vmatprep.mubr.msk.f32.mxu0 %vm3897_vm11, %v3876_v44  ;;  %v3049_v3 = vpop.permute.xlu0 %3048  ;;  %v12523_v44 = vld [vmem:[#allocation28_spill] sm:$0xff]  ;;  %v12534_v36 = vld [vmem:[#allocation70_spill] sm:$0xff] }
 0x47c   : > { %v3713_v37 = vsel %vm3694_vm5, %v3680_v41, %v3043_v58  ;;  %v3716_v53 = vsel %vm3694_vm5, %v3683_v28, %v3049_v3  ;;  %6433 = vmatmul.mubr.msk.f32.gmra.mrb[64].mxu0 %vm3897_vm11, %v3877_v15  ;;  %v12524_v41 = vld [vmem:[#allocation66_spill] sm:$0xff] }
 0x47d   : > { %v3746_v4 = vsel %vm3727_vm6, %v3713_v37, %v12515_v51  ;;  %v3749_v25 = vsel %vm3727_vm6, %v3716_v53, %v12517_v6  ;;  %v12527_v37 = vld [vmem:[#allocation30_spill] sm:$0xff]  ;;  %v3653_v51 = vsel %vm1477_vm3, %v9894_v13, %v12528_v26  ;;  %v12530_v6 = vld [vmem:[#allocation145_spill] sm:$0xff] }
 0x47e   : > { %v3779_v16 = vsel %vm3760_vm7, %v3746_v4, %v12516_v5  ;;  %v3782_v55 = vsel %vm3760_vm7, %v3749_v25, %v9565_v33  ;;  %v3656_v4 = vsel %vm1477_vm3, %v9897_v57, %v9621_v18  ;;  %v12529_v5 = vld [vmem:[#allocation150_spill] sm:$0xff] }
 0x47f   : > { %v3379_v50 = vpop.permute.xlu1 %3378  ;;  %v3385_v38 = vpop.permute.xlu0 %3384  ;;  %v3687_v29 = vsel %vm508_vm2, %v3656_v4, %v9647_v34 }
 0x480   : > { %v3812_v0 = vsel %vm3793_vm8, %v3779_v16, %v3379_v50  ;;  %v3815_v40 = vsel %vm3793_vm8, %v3782_v55, %v3385_v38  ;;  %v12531_v50 = vld [vmem:[#allocation32_spill] sm:$0xff] }
 0x481   : > { %v3845_v48 = vsel %vm3826_vm9, %v3812_v0, %v12519_v49  ;;  %v3848_v23 = vsel %vm3826_vm9, %v3815_v40, %v12526_v60  ;;  %v3684_v38 = vsel %vm508_vm2, %v3653_v51, %v12531_v50  ;;  %v12532_v0 = vld [vmem:[#allocation72_spill] sm:$0xff]  ;;  %v12538_v40 = vld [vmem:[#allocation149_spill] sm:$0xff] }
 0x482   : > { %v3878_v56 = vsel %vm3859_vm10, %v3845_v48, %v12521_v22  ;;  %v3881_v49 = vsel %vm3859_vm10, %v3848_v23, %v12532_v0  ;;  %v12542_v51 = vld [vmem:[#allocation153_spill] sm:$0xff] }
 0x483   : > { %v3047_v12 = vpop.permute.xlu1 %3046  ;;  %6435 = vmatprep.mubr.msk.f32.mxu0 %vm3897_vm11, %v3878_v56  ;;  %v3053_v27 = vpop.permute.xlu0 %3052  ;;  %v3657_v4 = vsel %vm1477_vm3, %v9951_v47, %v12542_v51 }
 0x484   : > { %v3715_v45 = vsel %vm3694_vm5, %v3682_v10, %v3047_v12  ;;  %v3718_v33 = vsel %vm3694_vm5, %v3685_v11, %v3053_v27  ;;  %6436 = vmatmul.mubr.msk.f32.gmra.mrb[66].mxu0 %vm3897_vm11, %v3879_v31  ;;  %v12535_v11 = vld [vmem:[#allocation76_spill] sm:$0xff] }
 0x485   : > { %v3748_v30 = vsel %vm3727_vm6, %v3715_v45, %v12523_v44  ;;  %v3751_v28 = vsel %vm3727_vm6, %v3718_v33, %v12525_v32  ;;  %v12536_v27 = vld [vmem:[#allocation148_spill] sm:$0xff] }
 0x486   : > { %v3781_v19 = vsel %vm3760_vm7, %v3748_v30, %v12524_v41  ;;  %v3784_v16 = vsel %vm3760_vm7, %v3751_v28, %v12529_v5  ;;  %v3655_v31 = vsel %vm1477_vm3, %v9923_v2, %v12536_v27  ;;  %v12537_v33 = vld [vmem:[#allocation152_spill] sm:$0xff]  ;;  %v12539_v41 = vld [vmem:[#allocation154_spill] sm:$0xff]  ;;  %v12540_v28 = vld [vmem:[#allocation151_spill] sm:$0xff] }
 0x487   : > { %v3383_v58 = vpop.permute.xlu1 %3382  ;;  %v3389_v3 = vpop.permute.xlu0 %3388  ;;  %v3686_v44 = vsel %vm508_vm2, %v3655_v31, %v12538_v40 }
 0x488   : > { %v3814_v15 = vsel %vm3793_vm8, %v3781_v19, %v3383_v58  ;;  %v3817_v48 = vsel %vm3793_vm8, %v3784_v16, %v3389_v3  ;;  %v12541_v3 = vld [vmem:[#allocation155_spill] sm:$0xff]  ;;  %v12543_v16 = vld [vmem:[#allocation158_spill] sm:$0xff] }
 0x489   : > { %v3847_v53 = vsel %vm3826_vm9, %v3814_v15, %v12527_v37  ;;  %v3850_v24 = vsel %vm3826_vm9, %v3817_v48, %v9664_v54  ;;  %v12548_v48 = vld [vmem:[#allocation164_spill] sm:$0xff] }
 0x48a   : > { %v3880_v25 = vsel %vm3859_vm10, %v3847_v53, %v12530_v6  ;;  %v3883_v19 = vsel %vm3859_vm10, %v3850_v24, %v12539_v41  ;;  %v12544_v6 = vld [vmem:[#allocation156_spill] sm:$0xff]  ;;  %v12551_v24 = vld [vmem:[#allocation118_spill] sm:$0xff]  ;;  %v12555_v41 = vld [vmem:[#allocation121_spill] sm:$0xff] }
 0x48b   : > { %v3051_v61 = vpop.permute.xlu1 %3050  ;;  %6438 = vmatprep.mubr.msk.f32.mxu0 %vm3897_vm11, %v3880_v25  ;;  %v3057_v13 = vpop.permute.xlu0 %3056  ;;  %v3688_v25 = vsel %vm508_vm2, %v3657_v4, %v12544_v6 }
 0x48c   : > { %v3717_v18 = vsel %vm3694_vm5, %v3684_v38, %v3051_v61  ;;  %v3720_v57 = vsel %vm3694_vm5, %v3687_v29, %v3057_v13  ;;  %6439 = vmatmul.mubr.msk.f32.gmra.mrb[68].mxu0 %vm3897_vm11, %v3881_v49  ;;  %v12545_v29 = vld [vmem:[#allocation157_spill] sm:$0xff]  ;;  %v12546_v13 = vld [vmem:[#allocation159_spill] sm:$0xff] }
 0x48d   : > { %v3750_v8 = vsel %vm3727_vm6, %v3717_v18, %v12533_v39  ;;  %v3753_v55 = vsel %vm3727_vm6, %v3720_v57, %v9672_v52  ;;  %v12547_v49 = vld [vmem:[#allocation165_spill] sm:$0xff] }
 0x48e   : > { %v3783_v34 = vsel %vm3760_vm7, %v3750_v8, %v12534_v36  ;;  %v3786_v45 = vsel %vm3760_vm7, %v3753_v55, %v9722_v9  ;;  %v12549_v8 = vld [vmem:[#allocation161_spill] sm:$0xff]  ;;  %v12550_v55 = vld [vmem:[#allocation163_spill] sm:$0xff] }
 0x48f   : > { %v3387_v22 = vpop.permute.xlu1 %3386  ;;  %v3393_v56 = vpop.permute.xlu0 %3392 }
 0x490   : > { %v3816_v10 = vsel %vm3793_vm8, %v3783_v34, %v3387_v22  ;;  %v3819_v9 = vsel %vm3793_vm8, %v3786_v45, %v3393_v56  ;;  %v12553_v45 = vld [vmem:[#allocation162_spill] sm:$0xff] }
 0x491   : > { %v3849_v12 = vsel %vm3826_vm9, %v3816_v10, %v12535_v11  ;;  %v3852_v53 = vsel %vm3826_vm9, %v3819_v9, %v9758_v7  ;;  %v12552_v11 = vld [vmem:[#allocation160_spill] sm:$0xff] }
 0x492   : > { %v3882_v52 = vsel %vm3859_vm10, %v3849_v12, %v12537_v33  ;;  %v12554_v33 = vld [vmem:[#allocation166_spill] sm:$0xff] }
 0x493   : > { %v3055_v30 = vpop.permute.xlu1 %3054  ;;  %6441 = vmatprep.mubr.msk.f32.mxu0 %vm3897_vm11, %v3882_v52  ;;  %v3061_v54 = vpop.permute.xlu0 %3060 }
 0x494   : > { %v3719_v32 = vsel %vm3694_vm5, %v3686_v44, %v3055_v30  ;;  %v3722_v2 = vsel %vm3694_vm5, %v9750_v1, %v3061_v54  ;;  %6442 = vmatmul.mubr.msk.f32.gmra.mrb[70].mxu0 %vm3897_vm11, %v3883_v19 }
 0x495   : > { %v3752_v58 = vsel %vm3727_vm6, %v3719_v32, %v12540_v28  ;;  %v3755_v23 = vsel %vm3727_vm6, %v3722_v2, %v9770_v46  ;;  %v12556_v2 = vld [vmem:[#allocation56_spill] sm:$0xff] }
 0x496   : > { %v3785_v60 = vsel %vm3760_vm7, %v3752_v58, %v12541_v3  ;;  %v3788_v5 = vsel %vm3760_vm7, %v3755_v23, %v9823_v20  ;;  %v12557_v3 = vld [vmem:[#allocation167_spill] sm:$0xff] }
 0x497   : > { %v3391_v15 = vpop.permute.xlu1 %3390  ;;  %v3397_v37 = vpop.permute.xlu0 %3396 }
 0x498   : > { %v3818_v1 = vsel %vm3793_vm8, %v3785_v60, %v3391_v15  ;;  %v3821_v20 = vsel %vm3793_vm8, %v3788_v5, %v3397_v37  ;;  %v12559_v15 = vld [vmem:[#allocation54_spill] sm:$0xff] }
 0x499   : > { %v3851_v26 = vsel %vm3826_vm9, %v3818_v1, %v9720_v14  ;;  %v3885_v14 = vsel %vm3859_vm10, %v3852_v53, %v9790_v35  ;;  %v3854_v39 = vsel %vm3826_vm9, %v3821_v20, %v12548_v48  ;;  %v6595_v20 = vld [vmem:[%s6738_s15 + $0x40] sm:$0xff]  ;;  %v6604_v48 = vld [vmem:[%s6738_s15 + $0xc8] sm:$0xff] }
 0x49a   : > { %v3884_v46 = vsel %vm3859_vm10, %v3851_v26, %v12543_v16  ;;  %v3887_v10 = vsel %vm3859_vm10, %v3854_v39, %v12551_v24  ;;  %v12560_v26 = vld [vmem:[#allocation64_spill] sm:$0xff]  ;;  %v6605_v39 = vld [vmem:[%s6738_s15 + $0xe0] sm:$0xff] }
 0x49b   : > { %v3059_v50 = vpop.permute.xlu1 %3058  ;;  %6444 = vmatprep.mubr.msk.f32.mxu0 %vm3897_vm11, %v3884_v46  ;;  %v3065_v7 = vpop.permute.xlu0 %3064  ;;  %v12561_v46 = vld [vmem:[#allocation62_spill] sm:$0xff] }
 0x49c   : > { %v3721_v38 = vsel %vm3694_vm5, %v3688_v25, %v3059_v50  ;;  %v3724_v47 = vsel %vm3694_vm5, %v9840_v63, %v3065_v7  ;;  %6445 = vmatmul.mubr.msk.f32.gmra.mrb[72].mxu0 %vm3897_vm11, %v3885_v14  ;;  %v4511_v50 = vld [vmem:[%s11704_s7] sm:$0xf]  ;;  %v6592_v14 = vld [vmem:[%s6738_s15 + $0x8] sm:$0xff] }
 0x49d   : > { %v3754_v61 = vsel %vm3727_vm6, %v3721_v38, %v12545_v29  ;;  %v3757_v18 = vsel %vm3727_vm6, %v3724_v47, %v12547_v49  ;;  %6456 = vmatprep.subr.msk.mxu1 %vm506_vm0, %v4511_v50  ;;  %v5092_v7 = vld [vmem:[%s11707_s10] sm:$0xf]  ;;  %v6594_v47 = vld [vmem:[%s6738_s15 + $0x28] sm:$0xff] }
 0x49e   : > { %v3787_v0 = vsel %vm3760_vm7, %v3754_v61, %v12546_v13  ;;  %v3790_v34 = vsel %vm3760_vm7, %v3757_v18, %v9914_v43  ;;  %6457 = vmatpush3.msk.msra.mxu1 %vm506_vm0, %v4511_v50  ;;  %6506 = vmatprep.subr.msk.mxu0 %vm506_vm0, %v5092_v7  ;;  %v6593_v38 = vld [vmem:[%s6738_s15 + $0x20] sm:$0xff]  ;;  %v6596_v29 = vld [vmem:[%s6738_s15 + $0x48] sm:$0xff] }
 0x49f   : > { %v3395_v57 = vpop.permute.xlu1 %3394  ;;  %v3401_v35 = vpop.permute.xlu0 %3400  ;;  %6507 = vmatpush3.msk.msra.mxu0 %vm506_vm0, %v5092_v7  ;;  %v6597_v61 = vld [vmem:[%s6738_s15 + $0x60] sm:$0xff]  ;;  %v6598_v13 = vld [vmem:[%s6738_s15 + $0x68] sm:$0xff] }
 0x4a0   : > { %v3820_v63 = vsel %vm3793_vm8, %v3787_v0, %v3395_v57  ;;  %v3823_v31 = vsel %vm3793_vm8, %v3790_v34, %v3401_v35  ;;  %v6599_v0 = vld [vmem:[%s6738_s15 + $0x80] sm:$0xff]  ;;  %v6600_v49 = vld [vmem:[%s6738_s15 + $0x88] sm:$0xff] }
 0x4a1   : > { %v3853_v36 = vsel %vm3826_vm9, %v3820_v63, %v12549_v8  ;;  %v3856_v44 = vsel %vm3826_vm9, %v3823_v31, %v9938_v42  ;;  %v6601_v18 = vld [vmem:[%s6738_s15 + $0xa0] sm:$0xff]  ;;  %v6602_v57 = vld [vmem:[%s6738_s15 + $0xa8] sm:$0xff] }
 0x4a2   : > { %v3886_v22 = vsel %vm3859_vm10, %v3853_v36, %v12550_v55  ;;  %v3889_v58 = vsel %vm3859_vm10, %v3856_v44, %v9963_v17  ;;  %v6603_v35 = vld [vmem:[%s6738_s15 + $0xc0] sm:$0xff]  ;;  %v6606_v63 = vld [vmem:[%s6738_s15 + $0xe8] sm:$0xff] }
 0x4a3   : > { %v3063_v56 = vpop.permute.xlu1 %3062  ;;  %6447 = vmatprep.mubr.msk.f32.mxu0 %vm3897_vm11, %v3886_v22  ;;  %v3069_v27 = vpop.permute.xlu0 %3068  ;;  %v6607_v8 = vld [vmem:[%s6738_s15 + $0x100] sm:$0xff]  ;;  %v6608_v36 = vld [vmem:[%s6738_s15 + $0x108] sm:$0xff] }
 0x4a4   : > { %v3723_v12 = vsel %vm3694_vm5, %v12552_v11, %v3063_v56  ;;  %6448 = vmatmul.mubr.msk.f32.gmra.mrb[74].mxu0 %vm3897_vm11, %v3887_v10  ;;  %v3726_v54 = vsel %vm3694_vm5, %v9926_v21, %v3069_v27  ;;  %v12558_v21 = vld [vmem:[#allocation125_spill] sm:$0xff]  ;;  %v6609_v34 = vld [vmem:[%s6738_s15 + $0x120] sm:$0xff]  ;;  %v6610_v55 = vld [vmem:[%s6738_s15 + $0x128] sm:$0xff] }
 0x4a5   : > { %v3756_v43 = vsel %vm3727_vm6, %v3723_v12, %v12553_v45  ;;  %v3759_v42 = vsel %vm3727_vm6, %v3726_v54, %v9946_v59  ;;  %v6611_v22 = vld [vmem:[%s6738_s15 + $0x140] sm:$0xff]  ;;  %v6612_v56 = vld [vmem:[%s6738_s15 + $0x148] sm:$0xff] }
 0x4a6   : > { %v3789_v52 = vsel %vm3760_vm7, %v3756_v43, %v12554_v33  ;;  %v3792_v17 = vsel %vm3760_vm7, %v3759_v42, %v12560_v26  ;;  %v6613_v24 = vld [vmem:[%s6738_s15 + $0x160] sm:$0xff]  ;;  %v6614_v10 = vld [vmem:[%s6738_s15 + $0x168] sm:$0xff] }
 0x4a7   : > { %v3399_v40 = vpop.permute.xlu1 %3398  ;;  %v3403_v32 = vpop.permute.xlu0 %3402  ;;  %v6615_v11 = vld [vmem:[%s6738_s15 + $0x180] sm:$0xff]  ;;  %v6616_v12 = vld [vmem:[%s6738_s15 + $0x188] sm:$0xff] }
 0x4a8   : > { %v3822_v30 = vsel %vm3793_vm8, %v3789_v52, %v3399_v40  ;;  %v6617_v27 = vld [vmem:[%s6738_s15 + $0x1a0] sm:$0xff]  ;;  %v6618_v31 = vld [vmem:[%s6738_s15 + $0x1a8] sm:$0xff] }
 0x4a9   : > { %v3855_v19 = vsel %vm3826_vm9, %v3822_v30, %v12555_v41  ;;  %v6619_v45 = vld [vmem:[%s6738_s15 + $0x1c0] sm:$0xff]  ;;  %v6620_v33 = vld [vmem:[%s6738_s15 + $0x1c8] sm:$0xff] }
 0x4aa   : > { %v3888_v9 = vsel %vm3859_vm10, %v3855_v19, %v12556_v2  ;;  %v6621_v30 = vld [vmem:[%s6738_s15 + $0x1e0] sm:$0xff] }
 0x4ab   : > { %v3067_v28 = vpop.permute.xlu1 %3066  ;;  %6450 = vmatprep.mubr.msk.f32.mxu0 %vm3897_vm11, %v3888_v9  ;;  %v3597_v51 = vpop.permute.xlu0 %3596  ;;  %v6622_v9 = vld [vmem:[%s6738_s15 + $0x1e8] sm:$0xff] }
 0x4ac   : > { %v3725_v60 = vsel %vm3694_vm5, %v12557_v3, %v3067_v28  ;;  %6451 = vmatmul.mubr.msk.f32.gmra.mrb[76].mxu0 %vm3897_vm11, %v3889_v58 }
 0x4ad   : > { %v3758_v23 = vsel %vm3727_vm6, %v3725_v60, %v12558_v21 }
 0x4ae   : > { %v3791_v37 = vsel %vm3760_vm7, %v3758_v23, %v12559_v15 }
 0x4af   : > { %v3824_v53 = vsel %vm3793_vm8, %v3791_v37, %v3403_v32  ;;  %v3405_v1 = vpop.permute.xlu1 %3404 }
 0x4b0   : > { %v3857_v59 = vsel %vm3826_vm9, %v3824_v53, %v9971_v62  ;;  %v3825_v4 = vsel %vm3793_vm8, %v3792_v17, %v3405_v1  ;;  %v6591_v62 = vld [vmem:[%s6738_s15] sm:$0xff] }
 0x4b1   : > { %v3890_v5 = vsel %vm3859_vm10, %v3857_v59, %v3597_v51  ;;  %v3858_v6 = vsel %vm3826_vm9, %v3825_v4, %v12561_v46 }
 0x4b2   : > { %6453 = vmatprep.mubr.msk.f32.mxu0 %vm3897_vm11, %v3890_v5 }
 0x4b3   : > { %v3599_v16 = vpop.permute.xlu1 %3598 }
 0x4b4   : > { %v3891_v25 = vsel %vm3859_vm10, %v3858_v6, %v3599_v16 }
 0x4b5   : > { %6454 = vmatmul.mubr.msk.f32.gmra.mrb[78].mxu0 %vm3897_vm11, %v3891_v25 }
 0x4b6   : > { %6508 = vmatprep.mubr.msk.f32.mxu0 %vm508_vm2, %v6591_v62 }
 0x4b9   : > { %6509 = vmatmul.mubr.msk.f32.vlgmr.msra.gmra.mrb[80].mxu0 %vm508_vm2, %v6592_v14 }
 0x4ba   : > { %6511 = vmatprep.mubr.msk.f32.mxu0 %vm508_vm2, %v6593_v38 }
 0x4bd   : > { %6512 = vmatmul.mubr.msk.f32.gmra.mrb[82].mxu0 %vm508_vm2, %v6594_v47 }
 0x4be   : > { %6514 = vmatprep.mubr.msk.f32.mxu0 %vm508_vm2, %v6595_v20 }
 0x4c1   : > { %6515 = vmatmul.mubr.msk.f32.gmra.mrb[84].mxu0 %vm508_vm2, %v6596_v29 }
 0x4c2   : > { %6517 = vmatprep.mubr.msk.f32.mxu0 %vm508_vm2, %v6597_v61 }
 0x4c5   : > { %6518 = vmatmul.mubr.msk.f32.gmra.mrb[86].mxu0 %vm508_vm2, %v6598_v13 }
 0x4c6   : > { %6520 = vmatprep.mubr.msk.f32.mxu0 %vm508_vm2, %v6599_v0 }
 0x4c9   : > { %6521 = vmatmul.mubr.msk.f32.gmra.mrb[88].mxu0 %vm508_vm2, %v6600_v49 }
 0x4ca   : > { %6523 = vmatprep.mubr.msk.f32.mxu0 %vm508_vm2, %v6601_v18 }
 0x4cd   : > { %6524 = vmatmul.mubr.msk.f32.gmra.mrb[90].mxu0 %vm508_vm2, %v6602_v57 }
 0x4ce   : > { %6526 = vmatprep.mubr.msk.f32.mxu0 %vm508_vm2, %v6603_v35 }
 0x4d1   : > { %6527 = vmatmul.mubr.msk.f32.gmra.mrb[92].mxu0 %vm508_vm2, %v6604_v48 }
 0x4d2   : > { %6529 = vmatprep.mubr.msk.f32.mxu0 %vm508_vm2, %v6605_v39 }
 0x4d5   : > { %6530 = vmatmul.mubr.msk.f32.gmra.mrb[94].mxu0 %vm508_vm2, %v6606_v63 }
 0x4d6   : > { %6532 = vmatprep.mubr.msk.f32.mxu0 %vm508_vm2, %v6607_v8 }
 0x4d9   : > { %6533 = vmatmul.mubr.msk.f32.gmra.mrb[96].mxu0 %vm508_vm2, %v6608_v36 }
 0x4da   : > { %6535 = vmatprep.mubr.msk.f32.mxu0 %vm508_vm2, %v6609_v34 }
 0x4dd   : > { %6536 = vmatmul.mubr.msk.f32.gmra.mrb[98].mxu0 %vm508_vm2, %v6610_v55 }
 0x4de   : > { %6538 = vmatprep.mubr.msk.f32.mxu0 %vm508_vm2, %v6611_v22 }
 0x4e1   : > { %6539 = vmatmul.mubr.msk.f32.gmra.mrb[100].mxu0 %vm508_vm2, %v6612_v56 }
 0x4e2   : > { %6541 = vmatprep.mubr.msk.f32.mxu0 %vm508_vm2, %v6613_v24 }
 0x4e5   : > { %6542 = vmatmul.mubr.msk.f32.gmra.mrb[102].mxu0 %vm508_vm2, %v6614_v10 }
 0x4e6   : > { %6544 = vmatprep.mubr.msk.f32.mxu0 %vm508_vm2, %v6615_v11 }
 0x4e9   : > { %6545 = vmatmul.mubr.msk.f32.gmra.mrb[104].mxu0 %vm508_vm2, %v6616_v12 }
 0x4ea   : > { %6547 = vmatprep.mubr.msk.f32.mxu0 %vm508_vm2, %v6617_v27 }
 0x4ed   : > { %6548 = vmatmul.mubr.msk.f32.gmra.mrb[106].mxu0 %vm508_vm2, %v6618_v31 }
 0x4ee   : > { %6550 = vmatprep.mubr.msk.f32.mxu0 %vm508_vm2, %v6619_v45 }
 0x4f1   : > { %6551 = vmatmul.mubr.msk.f32.gmra.mrb[108].mxu0 %vm508_vm2, %v6620_v33 }
 0x4f2   : > { %6553 = vmatprep.mubr.msk.f32.mxu0 %vm508_vm2, %v6621_v30 }
 0x4f5   : > { %6554 = vmatmul.mubr.msk.f32.gmra.mrb[110].mxu0 %vm508_vm2, %v6622_v9 }
 0x50f   : > { %v10550_v43 = vpop.f32.mrb[48].mxu0 }
 0x510   : > { %v4225_v52 = vsel %vm1477_vm3, %v10550_v43, 0.0  ;;  %v4294_v40 = vmul.f32 %v10550_v43, %v10550_v43  ;;  %v10558_v44 = vpop.f32.mrb[49].mxu0 }
 0x511   : > { %v4224_v54 = vsel %vm1477_vm3, %v10558_v44, 0.0  ;;  %v4293_v41 = vmul.f32 %v10558_v44, %v10558_v44 }
 0x512   : > { %v4326_v19 = vsel %vm1477_vm3, %v4294_v40, 0.0  ;;  %v4226_v32 = vadd.f32 %v4225_v52, %v4224_v54 }
 0x513   : > { %v4325_v2 = vsel %vm1477_vm3, %v4293_v41, 0.0 }
 0x514   : > { %v4327_v28 = vadd.f32 %v4326_v19, %v4325_v2 }
 0x517   : > { %v10570_v58 = vpop.f32.mrb[50].mxu0 }
 0x518   : > { %v10572_v42 = vpop.f32.mrb[51].mxu0  ;;  %v4296_v3 = vmul.f32 %v10570_v58, %v10570_v58  ;;  %v4229_v15 = vsel %vm1477_vm3, %v10570_v58, 0.0 }
 0x519   : > { %v4227_v60 = vsel %vm1477_vm3, %v10572_v42, 0.0  ;;  %v4295_v21 = vmul.f32 %v10572_v42, %v10572_v42 }
 0x51a   : > { %v4228_v23 = vadd.f32 %v4227_v60, %v4226_v32  ;;  %v4330_v26 = vsel %vm1477_vm3, %v4296_v3, 0.0 }
 0x51b   : > { %v4328_v37 = vsel %vm1477_vm3, %v4295_v21, 0.0 }
 0x51c   : > { %v4329_v53 = vadd.f32 %v4328_v37, %v4327_v28  ;;  %v4230_v1 = vadd.f32 %v4229_v15, %v4228_v23 }
 0x51e   : > { %v4331_v17 = vadd.f32 %v4330_v26, %v4329_v53 }
 0x51f   : > { %v10584_v59 = vpop.f32.mrb[52].mxu0 }
 0x520   : > { %v10586_v51 = vpop.f32.mrb[53].mxu0  ;;  %v4298_v4 = vmul.f32 %v10584_v59, %v10584_v59  ;;  %v4233_v6 = vsel %vm1477_vm3, %v10584_v59, 0.0 }
 0x521   : > { %v4231_v5 = vsel %vm1477_vm3, %v10586_v51, 0.0  ;;  %v4297_v16 = vmul.f32 %v10586_v51, %v10586_v51 }
 0x522   : > { %v4232_v46 = vadd.f32 %v4231_v5, %v4230_v1  ;;  %v4334_v7 = vsel %vm1477_vm3, %v4298_v4, 0.0 }
 0x523   : > { %v4332_v25 = vsel %vm1477_vm3, %v4297_v16, 0.0 }
 0x524   : > { %v4333_v62 = vadd.f32 %v4332_v25, %v4331_v17  ;;  %v4234_v50 = vadd.f32 %v4233_v6, %v4232_v46 }
 0x526   : > { %v4335_v14 = vadd.f32 %v4334_v7, %v4333_v62 }
 0x527   : > { %v10598_v38 = vpop.f32.mrb[54].mxu0 }
 0x528   : > { %v10600_v47 = vpop.f32.mrb[55].mxu0  ;;  %v4300_v20 = vmul.f32 %v10598_v38, %v10598_v38  ;;  %v4237_v0 = vsel %vm1477_vm3, %v10598_v38, 0.0 }
 0x529   : > { %v4235_v29 = vsel %vm1477_vm3, %v10600_v47, 0.0  ;;  %v4299_v61 = vmul.f32 %v10600_v47, %v10600_v47 }
 0x52a   : > { %v4236_v13 = vadd.f32 %v4235_v29, %v4234_v50  ;;  %v4338_v35 = vsel %vm1477_vm3, %v4300_v20, 0.0 }
 0x52b   : > { %v4336_v49 = vsel %vm1477_vm3, %v4299_v61, 0.0 }
 0x52c   : > { %v4337_v18 = vadd.f32 %v4336_v49, %v4335_v14  ;;  %v4238_v57 = vadd.f32 %v4237_v0, %v4236_v13 }
 0x52e   : > { %v4339_v48 = vadd.f32 %v4338_v35, %v4337_v18 }
 0x52f   : > { %v10612_v39 = vpop.f32.mrb[56].mxu0 }
 0x530   : > { %v10614_v63 = vpop.f32.mrb[57].mxu0  ;;  %v4302_v8 = vmul.f32 %v10612_v39, %v10612_v39  ;;  %v4241_v22 = vsel %vm1477_vm3, %v10612_v39, 0.0 }
 0x531   : > { %v4239_v36 = vsel %vm1477_vm3, %v10614_v63, 0.0  ;;  %v4301_v34 = vmul.f32 %v10614_v63, %v10614_v63 }
 0x532   : > { %v4240_v55 = vadd.f32 %v4239_v36, %v4238_v57  ;;  %v4342_v11 = vsel %vm1477_vm3, %v4302_v8, 0.0 }
 0x533   : > { %v4340_v56 = vsel %vm1477_vm3, %v4301_v34, 0.0 }
 0x534   : > { %v4341_v24 = vadd.f32 %v4340_v56, %v4339_v48  ;;  %v4242_v10 = vadd.f32 %v4241_v22, %v4240_v55 }
 0x536   : > { %v4343_v12 = vadd.f32 %v4342_v11, %v4341_v24 }
 0x537   : > { %v10626_v27 = vpop.f32.mrb[58].mxu0 }
 0x538   : > { %v10628_v31 = vpop.f32.mrb[59].mxu0  ;;  %v4304_v45 = vmul.f32 %v10626_v27, %v10626_v27  ;;  %v4245_v30 = vsel %vm1477_vm3, %v10626_v27, 0.0 }
 0x539   : > { %v4243_v33 = vsel %vm1477_vm3, %v10628_v31, 0.0  ;;  %v4303_v52 = vmul.f32 %v10628_v31, %v10628_v31 }
 0x53a   : > { %v4244_v40 = vadd.f32 %v4243_v33, %v4242_v10  ;;  %v4346_v32 = vsel %vm1477_vm3, %v4304_v45, 0.0 }
 0x53b   : > { %v4344_v54 = vsel %vm1477_vm3, %v4303_v52, 0.0 }
 0x53c   : > { %v4345_v41 = vadd.f32 %v4344_v54, %v4343_v12  ;;  %v4246_v19 = vadd.f32 %v4245_v30, %v4244_v40 }
 0x53e   : > { %v4347_v2 = vadd.f32 %v4346_v32, %v4345_v41 }
 0x53f   : > { %v10640_v9 = vpop.f32.mrb[60].mxu0 }
 0x540   : > { %v10642_v28 = vpop.f32.mrb[61].mxu0  ;;  %v4306_v3 = vmul.f32 %v10640_v9, %v10640_v9  ;;  %v4249_v15 = vsel %vm1477_vm3, %v10640_v9, 0.0 }
 0x541   : > { %v4247_v60 = vsel %vm1477_vm3, %v10642_v28, 0.0  ;;  %v4305_v21 = vmul.f32 %v10642_v28, %v10642_v28 }
 0x542   : > { %v4248_v23 = vadd.f32 %v4247_v60, %v4246_v19  ;;  %v4350_v26 = vsel %vm1477_vm3, %v4306_v3, 0.0 }
 0x543   : > { %v4348_v37 = vsel %vm1477_vm3, %v4305_v21, 0.0 }
 0x544   : > { %v4349_v53 = vadd.f32 %v4348_v37, %v4347_v2  ;;  %v4250_v1 = vadd.f32 %v4249_v15, %v4248_v23 }
 0x546   : > { %v4351_v17 = vadd.f32 %v4350_v26, %v4349_v53 }
 0x547   : > { %v10654_v4 = vpop.f32.mrb[62].mxu0 }
 0x548   : > { %v10656_v5 = vpop.f32.mrb[63].mxu0  ;;  %v4308_v16 = vmul.f32 %v10654_v4, %v10654_v4  ;;  %v4253_v62 = vsel %vm1477_vm3, %v10654_v4, 0.0 }
 0x549   : > { %v4251_v46 = vsel %vm1477_vm3, %v10656_v5, 0.0  ;;  %v4307_v6 = vmul.f32 %v10656_v5, %v10656_v5 }
 0x54a   : > { %v4252_v25 = vadd.f32 %v4251_v46, %v4250_v1  ;;  %v4354_v20 = vsel %vm1477_vm3, %v4308_v16, 0.0 }
 0x54b   : > { %v4352_v50 = vsel %vm1477_vm3, %v4307_v6, 0.0 }
 0x54c   : > { %v4353_v7 = vadd.f32 %v4352_v50, %v4351_v17  ;;  %v4254_v14 = vadd.f32 %v4253_v62, %v4252_v25 }
 0x54e   : > { %v4355_v29 = vadd.f32 %v4354_v20, %v4353_v7 }
 0x54f   : > { %v10668_v61 = vpop.f32.mrb[64].mxu0 }
 0x550   : > { %v10670_v13 = vpop.f32.mrb[65].mxu0  ;;  %v4310_v0 = vmul.f32 %v10668_v61, %v10668_v61  ;;  %v4257_v35 = vsel %vm1477_vm3, %v10668_v61, 0.0 }
 0x551   : > { %v4255_v49 = vsel %vm1477_vm3, %v10670_v13, 0.0  ;;  %v4309_v18 = vmul.f32 %v10670_v13, %v10670_v13 }
 0x552   : > { %v4256_v57 = vadd.f32 %v4255_v49, %v4254_v14  ;;  %v4358_v34 = vsel %vm1477_vm3, %v4310_v0, 0.0 }
 0x553   : > { %v4356_v48 = vsel %vm1477_vm3, %v4309_v18, 0.0 }
 0x554   : > { %v4357_v8 = vadd.f32 %v4356_v48, %v4355_v29  ;;  %v4258_v36 = vadd.f32 %v4257_v35, %v4256_v57 }
 0x556   : > { %v4359_v55 = vadd.f32 %v4358_v34, %v4357_v8 }
 0x557   : > { %v10682_v22 = vpop.f32.mrb[66].mxu0 }
 0x558   : > { %v10684_v56 = vpop.f32.mrb[67].mxu0  ;;  %v4312_v24 = vmul.f32 %v10682_v22, %v10682_v22  ;;  %v4261_v45 = vsel %vm1477_vm3, %v10682_v22, 0.0 }
 0x559   : > { %v4259_v10 = vsel %vm1477_vm3, %v10684_v56, 0.0  ;;  %v4311_v11 = vmul.f32 %v10684_v56, %v10684_v56 }
 0x55a   : > { %v4260_v12 = vadd.f32 %v4259_v10, %v4258_v36  ;;  %v4362_v30 = vsel %vm1477_vm3, %v4312_v24, 0.0 }
 0x55b   : > { %v4360_v33 = vsel %vm1477_vm3, %v4311_v11, 0.0 }
 0x55c   : > { %v4361_v52 = vadd.f32 %v4360_v33, %v4359_v55  ;;  %v4262_v40 = vadd.f32 %v4261_v45, %v4260_v12 }
 0x55e   : > { %v4363_v54 = vadd.f32 %v4362_v30, %v4361_v52 }
 0x55f   : > { %v10696_v41 = vpop.f32.mrb[68].mxu0 }
 0x560   : > { %v10698_v19 = vpop.f32.mrb[69].mxu0  ;;  %v4314_v32 = vmul.f32 %v10696_v41, %v10696_v41  ;;  %v4265_v21 = vsel %vm1477_vm3, %v10696_v41, 0.0 }
 0x561   : > { %v4263_v2 = vsel %vm1477_vm3, %v10698_v19, 0.0  ;;  %v4313_v3 = vmul.f32 %v10698_v19, %v10698_v19 }
 0x562   : > { %v4264_v60 = vadd.f32 %v4263_v2, %v4262_v40  ;;  %v4366_v53 = vsel %vm1477_vm3, %v4314_v32, 0.0 }
 0x563   : > { %v4364_v23 = vsel %vm1477_vm3, %v4313_v3, 0.0 }
 0x564   : > { %v4365_v15 = vadd.f32 %v4364_v23, %v4363_v54  ;;  %v4266_v37 = vadd.f32 %v4265_v21, %v4264_v60 }
 0x566   : > { %v4367_v1 = vadd.f32 %v4366_v53, %v4365_v15 }
 0x567   : > { %v10710_v26 = vpop.f32.mrb[70].mxu0 }
 0x568   : > { %v10712_v17 = vpop.f32.mrb[71].mxu0  ;;  %v4316_v16 = vmul.f32 %v10710_v26, %v10710_v26  ;;  %v4269_v62 = vsel %vm1477_vm3, %v10710_v26, 0.0 }
 0x569   : > { %v4267_v46 = vsel %vm1477_vm3, %v10712_v17, 0.0  ;;  %v4315_v6 = vmul.f32 %v10712_v17, %v10712_v17 }
 0x56a   : > { %v4268_v25 = vadd.f32 %v4267_v46, %v4266_v37  ;;  %v4370_v20 = vsel %vm1477_vm3, %v4316_v16, 0.0 }
 0x56b   : > { %v4368_v50 = vsel %vm1477_vm3, %v4315_v6, 0.0 }
 0x56c   : > { %v4369_v7 = vadd.f32 %v4368_v50, %v4367_v1  ;;  %v4270_v14 = vadd.f32 %v4269_v62, %v4268_v25 }
 0x56e   : > { %v4371_v29 = vadd.f32 %v4370_v20, %v4369_v7 }
 0x56f   : > { %v10724_v0 = vpop.f32.mrb[72].mxu0 }
 0x570   : > { %v10726_v49 = vpop.f32.mrb[73].mxu0  ;;  %v4318_v18 = vmul.f32 %v10724_v0, %v10724_v0  ;;  %v4273_v8 = vsel %vm1477_vm3, %v10724_v0, 0.0 }
 0x571   : > { %v4271_v57 = vsel %vm1477_vm3, %v10726_v49, 0.0  ;;  %v4317_v35 = vmul.f32 %v10726_v49, %v10726_v49 }
 0x572   : > { %v4272_v48 = vadd.f32 %v4271_v57, %v4270_v14  ;;  %v4374_v24 = vsel %vm1477_vm3, %v4318_v18, 0.0 }
 0x573   : > { %v4372_v36 = vsel %vm1477_vm3, %v4317_v35, 0.0 }
 0x574   : > { %v4373_v34 = vadd.f32 %v4372_v36, %v4371_v29  ;;  %v4274_v55 = vadd.f32 %v4273_v8, %v4272_v48 }
 0x576   : > { %v4375_v10 = vadd.f32 %v4374_v24, %v4373_v34 }
 0x577   : > { %v10738_v11 = vpop.f32.mrb[74].mxu0 }
 0x578   : > { %v10740_v12 = vpop.f32.mrb[75].mxu0  ;;  %v4320_v45 = vmul.f32 %v10738_v11, %v10738_v11  ;;  %v4277_v30 = vsel %vm1477_vm3, %v10738_v11, 0.0 }
 0x579   : > { %v4275_v33 = vsel %vm1477_vm3, %v10740_v12, 0.0  ;;  %v4319_v52 = vmul.f32 %v10740_v12, %v10740_v12 }
 0x57a   : > { %v4276_v40 = vadd.f32 %v4275_v33, %v4274_v55  ;;  %v4378_v3 = vsel %vm1477_vm3, %v4320_v45, 0.0 }
 0x57b   : > { %v4376_v54 = vsel %vm1477_vm3, %v4319_v52, 0.0 }
 0x57c   : > { %v4377_v32 = vadd.f32 %v4376_v54, %v4375_v10  ;;  %v4278_v2 = vadd.f32 %v4277_v30, %v4276_v40 }
 0x57e   : > { %v4379_v60 = vadd.f32 %v4378_v3, %v4377_v32 }
 0x57f   : > { %v10752_v21 = vpop.f32.mrb[76].mxu0 }
 0x580   : > { %v10754_v23 = vpop.f32.mrb[77].mxu0  ;;  %v4322_v15 = vmul.f32 %v10752_v21, %v10752_v21  ;;  %v4281_v16 = vsel %vm1477_vm3, %v10752_v21, 0.0 }
 0x581   : > { %v4279_v37 = vsel %vm1477_vm3, %v10754_v23, 0.0  ;;  %v4321_v53 = vmul.f32 %v10754_v23, %v10754_v23 }
 0x582   : > { %v4280_v1 = vadd.f32 %v4279_v37, %v4278_v2  ;;  %v4382_v62 = vsel %vm1477_vm3, %v4322_v15, 0.0 }
 0x583   : > { %v4380_v46 = vsel %vm1477_vm3, %v4321_v53, 0.0 }
 0x584   : > { %v4381_v6 = vadd.f32 %v4380_v46, %v4379_v60  ;;  %v4282_v25 = vadd.f32 %v4281_v16, %v4280_v1 }
 0x586   : > { %v4383_v50 = vadd.f32 %v4382_v62, %v4381_v6 }
 0x588   : > { %v10766_v7 = vpop.f32.mrb[78].mxu0 }
 0x589   : > { %v4213_v14 = vpop.f32.mrb[79].mxu0  ;;  %v4324_v20 = vmul.f32 %v10766_v7, %v10766_v7  ;;  %v4285_v35 = vsel %vm1477_vm3, %v10766_v7, 0.0 }
 0x58a   : > { %v4283_v29 = vsel %vm1477_vm3, %v4213_v14, 0.0  ;;  %v4323_v18 = vmul.f32 %v4213_v14, %v4213_v14 }
 0x58b   : > { %v4284_v57 = vadd.f32 %v4283_v29, %v4282_v25  ;;  %v4386_v34 = vsel %vm1477_vm3, %v4324_v20, 0.0 }
 0x58c   : > { %v4384_v48 = vsel %vm1477_vm3, %v4323_v18, 0.0  ;;  %v10775_v6 = vpop.f32.mrb[80].mxu0  ;;  %v4222_v18 = vld [vmem:[%s11702_s5] sm:$0x1] }
 0x58d   : > { %v4286_v8 = vadd.f32 %v4285_v35, %v4284_v57  ;;  %v4385_v36 = vadd.f32 %v4384_v48, %v4383_v50  ;;  %v5322_v25 = vsel %vm3727_vm6, %v10775_v6, 0.0  ;;  %v5391_v62 = vmul.f32 %v10775_v6, %v10775_v6  ;;  %v10781_v50 = vpop.f32.mrb[81].mxu0 }
 0x58e   : > { %v5321_v20 = vsel %vm3727_vm6, %v10781_v50, 0.0  ;;  %v5390_v29 = vmul.f32 %v10781_v50, %v10781_v50 }
 0x58f   : > { %v4287_v55 = vrot.slane %v4286_v8, 4  ;;  %v4387_v24 = vadd.f32 %v4386_v34, %v4385_v36  ;;  %v5423_v57 = vsel %vm3727_vm6, %v5391_v62, 0.0  ;;  %v5323_v35 = vadd.f32 %v5322_v25, %v5321_v20 }
 0x590   : > { %v5422_v48 = vsel %vm3727_vm6, %v5390_v29, 0.0 }
 0x591   : > { %v4288_v10 = vadd.f32 %v4287_v55, %v4286_v8  ;;  %v4388_v45 = vrot.slane %v4387_v24, 4  ;;  %v10792_v8 = vpop.f32.mrb[82].mxu0  ;;  %v5424_v34 = vadd.f32 %v5423_v57, %v5422_v48 }
 0x592   : > { %v10794_v55 = vpop.f32.mrb[83].mxu0 }
 0x593   : > { %v4289_v33 = vrot.slane %v4288_v10, 2  ;;  %v4389_v52 = vadd.f32 %v4388_v45, %v4387_v24  ;;  %v5324_v45 = vsel %vm3727_vm6, %v10794_v55, 0.0 }
 0x595   : > { %v4290_v40 = vadd.f32 %v4289_v33, %v4288_v10  ;;  %v4390_v30 = vrot.slane %v4389_v52, 2  ;;  %v5326_v10 = vsel %vm3727_vm6, %v10792_v8, 0.0  ;;  %v5392_v33 = vmul.f32 %v10794_v55, %v10794_v55 }
 0x597   : > { %v4291_v54 = vrot.slane %v4290_v40, 1  ;;  %v4391_v32 = vadd.f32 %v4390_v30, %v4389_v52  ;;  %v4223_v52 = vld [vmem:[%s11703_s6] sm:$0x1] }
 0x599   : > { %v4292_v2 = vadd.f32 %v4291_v54, %v4290_v40  ;;  %v4392_v3 = vrot.slane %v4391_v32, 1  ;;  %v5325_v40 = vadd.f32 %v5324_v45, %v5323_v35  ;;  %v12562_v54 = vld [vmem:[#allocation90_spill] sm:$0xff] }
 0x59b   : > { %v4393_v60 = vadd.f32 %v4392_v3, %v4391_v32  ;;  %v4395_v15 = vmul.f32 0.00390625, %v4292_v2  ;;  %v5425_v2 = vsel %vm3727_vm6, %v5392_v33, 0.0  ;;  %v10807_v3 = vpop.f32.mrb[84].mxu0 }
 0x59d   : > { %v4396_v37 = vmul.f32 0.00390625, %v4393_v60  ;;  %v4397_v53 = vmul.f32 %v4395_v15, %v4395_v15  ;;  %v10809_v60 = vadd.f32 %v5425_v2, %v5424_v34 }
 0x59f   : > { %v4398_v1 = vsub.f32 %v4396_v37, %v4397_v53  ;;  %v10811_v37 = vpop.f32.mrb[85].mxu0  ;;  %v10813_v53 = vadd.f32 %v5326_v10, %v5325_v40 }
 0x5a1   : > { %v4399_v16 = vmax.f32 %v4398_v1, 0.0 }
 0x5a3   : > { %v4400_v46 = vadd.f32 1e-05, %v4399_v16 }
 0x5a5   : > { %6585 = vrsqrt.f32 %v4400_v46 }
 0x5af   : > { %v6586_v36 = vpop.eup %6585 }
 0x5b0   : > { %v4402_v24 = vmul.f32 %v6586_v36, %v4222_v18 }
 0x5b2   : > { %v4403_v30 = vmul.f32 %v4402_v24, %v4395_v15  ;;  %v4408_v32 = vrot.slane %v4402_v24, %v12562_v54 }
 0x5b4   : > { %v4404_v1 = vsub.f32 %v4223_v52, %v4403_v30  ;;  %v4439_v16 = vmul.f32 %v4408_v32, %v4213_v14  ;;  %v4409_v46 = vmul.f32 %v4408_v32, %v10558_v44  ;;  %v4410_v25 = vmul.f32 %v10550_v43, %v4408_v32  ;;  %v10827_v44 = vpop.f32.mrb[86].mxu0 }
 0x5b5   : > { %v4411_v15 = vmul.f32 %v4408_v32, %v10572_v42  ;;  %v4412_v62 = vmul.f32 %v10570_v58, %v4408_v32  ;;  %v4413_v20 = vmul.f32 %v4408_v32, %v10586_v51  ;;  %v4414_v29 = vmul.f32 %v10584_v59, %v4408_v32  ;;  %v10833_v59 = vpop.f32.mrb[87].mxu0 }
 0x5b6   : > { %v10822_v18 = vrot.slane %v4404_v1, %v12562_v54  ;;  %v4415_v57 = vmul.f32 %v4408_v32, %v10600_v47  ;;  %v4416_v35 = vmul.f32 %v10598_v38, %v4408_v32  ;;  %v4417_v14 = vmul.f32 %v4408_v32, %v10614_v63  ;;  %v10848_v10 = vpop.f32.mrb[88].mxu0 }
 0x5b7   : > { %v4418_v43 = vmul.f32 %v10612_v39, %v4408_v32  ;;  %v4419_v42 = vmul.f32 %v4408_v32, %v10628_v31  ;;  %v4420_v58 = vmul.f32 %v10626_v27, %v4408_v32  ;;  %v4421_v51 = vmul.f32 %v4408_v32, %v10642_v28 }
 0x5b8   : > { %v10836_v48 = vadd.f32 %v10822_v18, %v4439_v16  ;;  %v4422_v47 = vmul.f32 %v10640_v9, %v4408_v32  ;;  %v4423_v38 = vmul.f32 %v4408_v32, %v10656_v5  ;;  %v4424_v63 = vmul.f32 %v10654_v4, %v4408_v32 }
 0x5b9   : > { %v4425_v36 = vmul.f32 %v4408_v32, %v10670_v13  ;;  %v4426_v39 = vmul.f32 %v10668_v61, %v4408_v32  ;;  %v4427_v31 = vmul.f32 %v4408_v32, %v10684_v56  ;;  %v4428_v27 = vmul.f32 %v10682_v22, %v4408_v32  ;;  %v10854_v13 = vpop.f32.mrb[89].mxu0 }
 0x5ba   : > { %v4429_v28 = vmul.f32 %v4408_v32, %v10698_v19  ;;  %v4430_v34 = vmul.f32 %v10696_v41, %v4408_v32  ;;  %v4431_v24 = vmul.f32 %v4408_v32, %v10712_v17  ;;  %v4432_v9 = vmul.f32 %v10710_v26, %v4408_v32 }
 0x5bb   : > { %v4433_v4 = vmul.f32 %v4408_v32, %v10726_v49  ;;  %v4434_v5 = vmul.f32 %v10724_v0, %v4408_v32  ;;  %v4435_v61 = vmul.f32 %v4408_v32, %v10740_v12  ;;  %v4436_v22 = vmul.f32 %v10738_v11, %v4408_v32 }
 0x5bc   : > { %v4437_v56 = vmul.f32 %v4408_v32, %v10754_v23  ;;  %v4438_v41 = vmul.f32 %v10752_v21, %v4408_v32  ;;  %v4440_v19 = vmul.f32 %v10766_v7, %v4408_v32  ;;  %v4447_v17 = vadd.f32 %v10822_v18, %v4409_v46  ;;  %v10872_v21 = vpop.f32.mrb[90].mxu0 }
 0x5bd   : > { %v4448_v26 = vadd.f32 %v10822_v18, %v4410_v25  ;;  %v4449_v49 = vadd.f32 %v10822_v18, %v4411_v15  ;;  %v4450_v0 = vadd.f32 %v10822_v18, %v4412_v62  ;;  %v4451_v12 = vadd.f32 %v10822_v18, %v4413_v20  ;;  %v10886_v30 = vpop.f32.mrb[91].mxu0 }
 0x5be   : > { %v4452_v45 = vadd.f32 %v10822_v18, %v4414_v29  ;;  %v10867_v11 = vadd.f32 %v10822_v18, %v4415_v57  ;;  %v10870_v23 = vadd.f32 %v10822_v18, %v4416_v35  ;;  %v10875_v7 = vadd.f32 %v10822_v18, %v4417_v14  ;;  %v10924_v14 = vpop.f32.mrb[92].mxu0 }
 0x5bf   : > { %v10878_v33 = vadd.f32 %v10822_v18, %v4418_v43  ;;  %v10881_v52 = vadd.f32 %v10822_v18, %v4419_v42  ;;  %v10884_v40 = vadd.f32 %v10822_v18, %v4420_v58  ;;  %v10889_v32 = vadd.f32 %v10822_v18, %v4421_v51 }
 0x5c0   : > { %v10892_v2 = vadd.f32 %v10822_v18, %v4422_v47  ;;  %v10895_v1 = vadd.f32 %v10822_v18, %v4423_v38  ;;  %v10898_v16 = vadd.f32 %v10822_v18, %v4424_v63  ;;  %v10901_v46 = vadd.f32 %v10822_v18, %v4425_v36  ;;  %v10938_v47 = vpop.f32.mrb[93].mxu0 }
 0x5c1   : > { %v10904_v25 = vadd.f32 %v10822_v18, %v4426_v39  ;;  %v10907_v15 = vadd.f32 %v10822_v18, %v4427_v31  ;;  %v10910_v62 = vadd.f32 %v10822_v18, %v4428_v27  ;;  %v10913_v20 = vadd.f32 %v10822_v18, %v4429_v28 }
 0x5c2   : > { %v10916_v29 = vadd.f32 %v10822_v18, %v4430_v34  ;;  %v10919_v57 = vadd.f32 %v10822_v18, %v4431_v24  ;;  %v10922_v35 = vadd.f32 %v10822_v18, %v4432_v9  ;;  %v10927_v43 = vadd.f32 %v10822_v18, %v4433_v4  ;;  %v10952_v34 = vpop.f32.mrb[94].mxu0 }
 0x5c3   : > { %v10930_v42 = vadd.f32 %v10822_v18, %v4434_v5  ;;  %v10933_v58 = vadd.f32 %v10822_v18, %v4435_v61  ;;  %v10936_v51 = vadd.f32 %v10822_v18, %v4436_v22  ;;  %v10941_v38 = vadd.f32 %v10822_v18, %v4437_v56  ;;  %v10955_v24 = vpop.f32.mrb[95].mxu0 }
 0x5c4   : > { %v10944_v63 = vadd.f32 %v10822_v18, %v4438_v41  ;;  %v10947_v36 = vadd.f32 %v10822_v18, %v4440_v19  ;;  %v4479_v39 = vmax.f32 %v4447_v17, 0.0  ;;  %v4480_v31 = vmax.f32 %v4448_v26, 0.0  ;;  %v10959_v5 = vpop.f32.mrb[96].mxu0 }
 0x5c5   : > { %v4481_v27 = vmax.f32 %v4449_v49, 0.0  ;;  %v5393_v28 = vmul.f32 %v10792_v8, %v10792_v8  ;;  %v4482_v9 = vmax.f32 %v4450_v0, 0.0  ;;  %v4483_v4 = vmax.f32 %v4451_v12, 0.0  ;;  %v10964_v22 = vpop.f32.mrb[97].mxu0 }
 0x5c6   : > { %6458 = vmatprep.mubr.msk.f32.mxu1 %vm1477_vm3, %v4479_v39  ;;  %v5395_v61 = vmul.f32 %v10807_v3, %v10807_v3  ;;  %v5330_v56 = vsel %vm3727_vm6, %v10807_v3, 0.0  ;;  %v5328_v41 = vsel %vm3727_vm6, %v10811_v37, 0.0  ;;  %v4484_v19 = vmax.f32 %v4452_v45, 0.0 }
 0x5c7   : > { %6459 = vmatmul.mubr.msk.f32.vlgmr.msra.gmra.mrb[80].mxu1 %vm1477_vm3, %v4480_v31  ;;  %v5427_v18 = vsel %vm3727_vm6, %v5393_v28, 0.0  ;;  %v5329_v17 = vadd.f32 %v5328_v41, %v10813_v53  ;;  %v5394_v26 = vmul.f32 %v10811_v37, %v10811_v37  ;;  %v4485_v0 = vmax.f32 %v10867_v11, 0.0  ;;  %v10980_v31 = vpop.f32.mrb[98].mxu0 }
 0x5c8   : > { %6461 = vmatprep.mubr.msk.f32.mxu1 %vm1477_vm3, %v4481_v27  ;;  %v5428_v49 = vadd.f32 %v5427_v18, %v10809_v60  ;;  %v5332_v12 = vsel %vm3727_vm6, %v10833_v59, 0.0  ;;  %v5396_v39 = vmul.f32 %v10833_v59, %v10833_v59  ;;  %v5431_v45 = vsel %vm3727_vm6, %v5395_v61, 0.0  ;;  %v10987_v28 = vpop.f32.mrb[99].mxu0 }
 0x5c9   : > { %v5429_v53 = vsel %vm3727_vm6, %v5394_v26, 0.0  ;;  %v5397_v27 = vmul.f32 %v10827_v44, %v10827_v44  ;;  %v5331_v60 = vadd.f32 %v5330_v56, %v5329_v17  ;;  %v5398_v61 = vmul.f32 %v10854_v13, %v10854_v13  ;;  %v10999_v17 = vpop.f32.mrb[100].mxu0 }
 0x5ca   : > { %v5430_v11 = vadd.f32 %v5429_v53, %v5428_v49  ;;  %v5433_v41 = vsel %vm3727_vm6, %v5396_v39, 0.0  ;;  %v5336_v56 = vsel %vm3727_vm6, %v10854_v13, 0.0 }
 0x5cb   : > { %6462 = vmatmul.mubr.msk.f32.gmra.mrb[82].mxu1 %vm1477_vm3, %v4482_v9  ;;  %v5334_v9 = vsel %vm3727_vm6, %v10827_v44, 0.0  ;;  %v5333_v18 = vadd.f32 %v5332_v12, %v5331_v60  ;;  %v5435_v49 = vsel %vm3727_vm6, %v5397_v27, 0.0  ;;  %v11005_v12 = vpop.f32.mrb[101].mxu0  ;;  %v5437_v60 = vsel %vm3727_vm6, %v5398_v61, 0.0 }
 0x5cc   : > { %6464 = vmatprep.mubr.msk.f32.mxu1 %vm1477_vm3, %v4483_v4  ;;  %v4486_v4 = vmax.f32 %v10870_v23, 0.0  ;;  %v5432_v26 = vadd.f32 %v5431_v45, %v5430_v11  ;;  %v5399_v23 = vmul.f32 %v10848_v10, %v10848_v10  ;;  %v4488_v45 = vmax.f32 %v10878_v33, 0.0 }
 0x5cd   : > { %v5400_v27 = vmul.f32 %v10886_v30, %v10886_v30  ;;  %v4489_v11 = vmax.f32 %v10881_v52, 0.0  ;;  %v5401_v33 = vmul.f32 %v10872_v21, %v10872_v21  ;;  %v5342_v52 = vsel %vm3727_vm6, %v10872_v21, 0.0 }
 0x5ce   : > { %v5434_v39 = vadd.f32 %v5433_v41, %v5432_v26  ;;  %v5439_v41 = vsel %vm3727_vm6, %v5399_v23, 0.0  ;;  %v5402_v23 = vmul.f32 %v10938_v47, %v10938_v47 }
 0x5cf   : > { %6465 = vmatmul.mubr.msk.f32.gmra.mrb[84].mxu1 %vm1477_vm3, %v4484_v19  ;;  %v4487_v19 = vmax.f32 %v10875_v7, 0.0  ;;  %v5338_v7 = vsel %vm3727_vm6, %v10848_v10, 0.0 }
 0x5d0   : > { %6467 = vmatprep.mubr.msk.f32.mxu1 %vm1477_vm3, %v4485_v0  ;;  %v5335_v0 = vadd.f32 %v5334_v9, %v5333_v18  ;;  %v5340_v9 = vsel %vm3727_vm6, %v10886_v30, 0.0  ;;  %v11017_v18 = vpop.f32.mrb[102].mxu0 }
 0x5d1   : > { %v11023_v61 = vpop.f32.mrb[103].mxu0 }
 0x5d2   : > { %v5337_v53 = vadd.f32 %v5336_v56, %v5335_v0  ;;  %v4490_v56 = vmax.f32 %v10884_v40, 0.0  ;;  %v5441_v0 = vsel %vm3727_vm6, %v5400_v27, 0.0  ;;  %v5403_v40 = vmul.f32 %v10924_v14, %v10924_v14 }
 0x5d3   : > { %6468 = vmatmul.mubr.msk.f32.gmra.mrb[86].mxu1 %vm1477_vm3, %v4486_v4  ;;  %v5436_v4 = vadd.f32 %v5435_v49, %v5434_v39  ;;  %v4491_v39 = vmax.f32 %v10889_v32, 0.0  ;;  %v5346_v32 = vsel %vm3727_vm6, %v10924_v14, 0.0 }
 0x5d4   : > { %6470 = vmatprep.mubr.msk.f32.mxu1 %vm1477_vm3, %v4487_v19  ;;  %v5339_v19 = vadd.f32 %v5338_v7, %v5337_v53  ;;  %v5344_v7 = vsel %vm3727_vm6, %v10938_v47, 0.0  ;;  %v11035_v53 = vpop.f32.mrb[104].mxu0 }
 0x5d5   : > { %v5438_v26 = vadd.f32 %v5437_v60, %v5436_v4  ;;  %v5443_v60 = vsel %vm3727_vm6, %v5401_v33, 0.0  ;;  %v11041_v27 = vpop.f32.mrb[105].mxu0  ;;  %v5404_v33 = vmul.f32 %v10955_v24, %v10955_v24 }
 0x5d6   : > { %v5341_v49 = vadd.f32 %v5340_v9, %v5339_v19  ;;  %v4492_v9 = vmax.f32 %v10892_v2, 0.0  ;;  %v5445_v19 = vsel %vm3727_vm6, %v5402_v23, 0.0  ;;  %v5405_v2 = vmul.f32 %v10952_v34, %v10952_v34 }
 0x5d7   : > { %6471 = vmatmul.mubr.msk.f32.gmra.mrb[88].mxu1 %vm1477_vm3, %v4488_v45  ;;  %v5440_v45 = vadd.f32 %v5439_v41, %v5438_v26  ;;  %v4493_v26 = vmax.f32 %v10895_v1, 0.0  ;;  %v5350_v1 = vsel %vm3727_vm6, %v10952_v34, 0.0 }
 0x5d8   : > { %6473 = vmatprep.mubr.msk.f32.mxu1 %vm1477_vm3, %v4489_v11  ;;  %v5343_v11 = vadd.f32 %v5342_v52, %v5341_v49  ;;  %v5348_v52 = vsel %vm3727_vm6, %v10955_v24, 0.0  ;;  %v11053_v49 = vpop.f32.mrb[106].mxu0 }
 0x5d9   : > { %v5442_v4 = vadd.f32 %v5441_v0, %v5440_v45  ;;  %v5447_v0 = vsel %vm3727_vm6, %v5403_v40, 0.0  ;;  %v11059_v23 = vpop.f32.mrb[107].mxu0  ;;  %v5406_v40 = vmul.f32 %v10964_v22, %v10964_v22 }
 0x5da   : > { %v5345_v41 = vadd.f32 %v5344_v7, %v5343_v11  ;;  %v4494_v7 = vmax.f32 %v10898_v16, 0.0  ;;  %v5449_v11 = vsel %vm3727_vm6, %v5404_v33, 0.0  ;;  %v5407_v16 = vmul.f32 %v10959_v5, %v10959_v5 }
 0x5db   : > { %6474 = vmatmul.mubr.msk.f32.gmra.mrb[90].mxu1 %vm1477_vm3, %v4490_v56  ;;  %v5444_v56 = vadd.f32 %v5443_v60, %v5442_v4  ;;  %v4495_v4 = vmax.f32 %v10901_v46, 0.0  ;;  %v5354_v46 = vsel %vm3727_vm6, %v10959_v5, 0.0 }
 0x5dc   : > { %6476 = vmatprep.mubr.msk.f32.mxu1 %vm1477_vm3, %v4491_v39  ;;  %v5347_v39 = vadd.f32 %v5346_v32, %v5345_v41  ;;  %v5352_v32 = vsel %vm3727_vm6, %v10964_v22, 0.0  ;;  %v11071_v41 = vpop.f32.mrb[108].mxu0 }
 0x5dd   : > { %v5446_v45 = vadd.f32 %v5445_v19, %v5444_v56  ;;  %v5451_v19 = vsel %vm3727_vm6, %v5405_v2, 0.0  ;;  %v11077_v33 = vpop.f32.mrb[109].mxu0  ;;  %v5408_v2 = vmul.f32 %v10987_v28, %v10987_v28 }
 0x5de   : > { %v5349_v60 = vadd.f32 %v5348_v52, %v5347_v39  ;;  %v4496_v52 = vmax.f32 %v10904_v25, 0.0  ;;  %v5453_v39 = vsel %vm3727_vm6, %v5406_v40, 0.0  ;;  %v5409_v25 = vmul.f32 %v10980_v31, %v10980_v31 }
 0x5df   : > { %6477 = vmatmul.mubr.msk.f32.gmra.mrb[92].mxu1 %vm1477_vm3, %v4492_v9  ;;  %v5448_v9 = vadd.f32 %v5447_v0, %v5446_v45  ;;  %v4497_v45 = vmax.f32 %v10907_v15, 0.0  ;;  %v5358_v15 = vsel %vm3727_vm6, %v10980_v31, 0.0 }
 0x5e0   : > { %6479 = vmatprep.mubr.msk.f32.mxu1 %vm1477_vm3, %v4493_v26  ;;  %v5351_v26 = vadd.f32 %v5350_v1, %v5349_v60  ;;  %v5356_v1 = vsel %vm3727_vm6, %v10987_v28, 0.0  ;;  %v11089_v60 = vpop.f32.mrb[110].mxu0 }
 0x5e1   : > { %v5450_v56 = vadd.f32 %v5449_v11, %v5448_v9  ;;  %v5455_v11 = vsel %vm3727_vm6, %v5407_v16, 0.0  ;;  %v11095_v40 = vpop.f32.mrb[111].mxu0  ;;  %v5410_v16 = vmul.f32 %v11005_v12, %v11005_v12 }
 0x5e2   : > { %v5353_v0 = vadd.f32 %v5352_v32, %v5351_v26  ;;  %v4498_v32 = vmax.f32 %v10910_v62, 0.0  ;;  %v5457_v26 = vsel %vm3727_vm6, %v5408_v2, 0.0 }
 0x5e3   : > { %6480 = vmatmul.mubr.msk.f32.gmra.mrb[94].mxu1 %vm1477_vm3, %v4494_v7  ;;  %v5452_v7 = vadd.f32 %v5451_v19, %v5450_v56  ;;  %v4499_v56 = vmax.f32 %v10913_v20, 0.0  ;;  %v4500_v20 = vmax.f32 %v10916_v29, 0.0 }
 0x5e4   : > { %6482 = vmatprep.mubr.msk.f32.mxu1 %vm1477_vm3, %v4495_v4  ;;  %v5355_v4 = vadd.f32 %v5354_v46, %v5353_v0  ;;  %v5360_v46 = vsel %vm3727_vm6, %v11005_v12, 0.0  ;;  %v5459_v0 = vsel %vm3727_vm6, %v5409_v25, 0.0  ;;  %v4501_v25 = vmax.f32 %v10919_v57, 0.0 }
 0x5e5   : > { %v5454_v9 = vadd.f32 %v5453_v39, %v5452_v7  ;;  %v5411_v39 = vmul.f32 %v10999_v17, %v10999_v17  ;;  %v4502_v57 = vmax.f32 %v10922_v35, 0.0 }
 0x5e6   : > { %v5357_v19 = vadd.f32 %v5356_v1, %v5355_v4  ;;  %v5461_v1 = vsel %vm3727_vm6, %v5410_v16, 0.0 }
 0x5e7   : > { %6483 = vmatmul.mubr.msk.f32.gmra.mrb[96].mxu1 %vm1477_vm3, %v4496_v52  ;;  %v5456_v52 = vadd.f32 %v5455_v11, %v5454_v9  ;;  %v5412_v11 = vmul.f32 %v11023_v61, %v11023_v61  ;;  %v5364_v9 = vsel %vm3727_vm6, %v11023_v61, 0.0 }
 0x5e8   : > { %6485 = vmatprep.mubr.msk.f32.mxu1 %vm1477_vm3, %v4497_v45  ;;  %v5359_v62 = vadd.f32 %v5358_v15, %v5357_v19  ;;  %v5362_v45 = vsel %vm3727_vm6, %v10999_v17, 0.0  ;;  %v5463_v15 = vsel %vm3727_vm6, %v5411_v39, 0.0  ;;  %v5368_v39 = vsel %vm3727_vm6, %v11041_v27, 0.0 }
 0x5e9   : > { %v5458_v2 = vadd.f32 %v5457_v26, %v5456_v52  ;;  %v5366_v26 = vsel %vm3727_vm6, %v11017_v18, 0.0  ;;  %v5414_v52 = vmul.f32 %v11041_v27, %v11041_v27 }
 0x5ea   : > { %v5361_v7 = vadd.f32 %v5360_v46, %v5359_v62  ;;  %v4503_v46 = vmax.f32 %v10927_v43, 0.0  ;;  %v4504_v43 = vmax.f32 %v10930_v42, 0.0 }
 0x5eb   : > { %6486 = vmatmul.mubr.msk.f32.gmra.mrb[98].mxu1 %vm1477_vm3, %v4498_v32  ;;  %v5460_v4 = vadd.f32 %v5459_v0, %v5458_v2  ;;  %v5413_v32 = vmul.f32 %v11017_v18, %v11017_v18  ;;  %v5415_v2 = vmul.f32 %v11035_v53, %v11035_v53 }
 0x5ec   : > { %6488 = vmatprep.mubr.msk.f32.mxu1 %vm1477_vm3, %v4499_v56  ;;  %v5363_v29 = vadd.f32 %v5362_v45, %v5361_v7  ;;  %v5465_v56 = vsel %vm3727_vm6, %v5412_v11, 0.0  ;;  %v5416_v11 = vmul.f32 %v11059_v23, %v11059_v23 }
 0x5ed   : > { %v5462_v19 = vadd.f32 %v5461_v1, %v5460_v4  ;;  %v5467_v62 = vsel %vm3727_vm6, %v5413_v32, 0.0  ;;  %v5469_v1 = vsel %vm3727_vm6, %v5414_v52, 0.0  ;;  %v5417_v32 = vmul.f32 %v11053_v49, %v11053_v49 }
 0x5ee   : > { %v5365_v16 = vadd.f32 %v5364_v9, %v5363_v29  ;;  %v5372_v9 = vsel %vm3727_vm6, %v11059_v23, 0.0 }
 0x5ef   : > { %6489 = vmatmul.mubr.msk.f32.gmra.mrb[100].mxu1 %vm1477_vm3, %v4500_v20  ;;  %v5464_v0 = vadd.f32 %v5463_v15, %v5462_v19  ;;  %v5370_v20 = vsel %vm3727_vm6, %v11035_v53, 0.0  ;;  %v5471_v15 = vsel %vm3727_vm6, %v5415_v2, 0.0  ;;  %v5374_v19 = vsel %vm3727_vm6, %v11053_v49, 0.0 }
 0x5f0   : > { %6491 = vmatprep.mubr.msk.f32.mxu1 %vm1477_vm3, %v4501_v25  ;;  %v5367_v35 = vadd.f32 %v5366_v26, %v5365_v16  ;;  %v4505_v25 = vmax.f32 %v10933_v58, 0.0  ;;  %v4506_v58 = vmax.f32 %v10936_v51, 0.0  ;;  %v5418_v16 = vmul.f32 %v11077_v33, %v11077_v33 }
 0x5f1   : > { %v5466_v45 = vadd.f32 %v5465_v56, %v5464_v0  ;;  %v4507_v56 = vmax.f32 %v10941_v38, 0.0  ;;  %v5475_v0 = vsel %vm3727_vm6, %v5417_v32, 0.0  ;;  %v5378_v2 = vsel %vm3727_vm6, %v11071_v41, 0.0 }
 0x5f2   : > { %v5369_v7 = vadd.f32 %v5368_v39, %v5367_v35  ;;  %v5419_v39 = vmul.f32 %v11071_v41, %v11071_v41  ;;  %v4508_v38 = vmax.f32 %v10944_v63, 0.0 }
 0x5f3   : > { %6492 = vmatmul.mubr.msk.f32.gmra.mrb[102].mxu1 %vm1477_vm3, %v4502_v57  ;;  %v5468_v4 = vadd.f32 %v5467_v62, %v5466_v45  ;;  %v5473_v57 = vsel %vm3727_vm6, %v5416_v11, 0.0  ;;  %v5477_v45 = vsel %vm3727_vm6, %v5418_v16, 0.0 }
 0x5f4   : > { %6494 = vmatprep.mubr.msk.f32.mxu1 %vm1477_vm3, %v4503_v46  ;;  %v5371_v42 = vadd.f32 %v5370_v20, %v5369_v7  ;;  %v5376_v46 = vsel %vm3727_vm6, %v11077_v33, 0.0  ;;  %v5420_v20 = vmul.f32 %v11095_v40, %v11095_v40  ;;  %v5479_v11 = vsel %vm3727_vm6, %v5419_v39, 0.0 }
 0x5f5   : > { %v5470_v29 = vadd.f32 %v5469_v1, %v5468_v4  ;;  %v5380_v1 = vsel %vm3727_vm6, %v11095_v40, 0.0 }
 0x5f6   : > { %v5373_v26 = vadd.f32 %v5372_v9, %v5371_v42  ;;  %v5382_v9 = vsel %vm3727_vm6, %v11089_v60, 0.0  ;;  %v5481_v32 = vsel %vm3727_vm6, %v5420_v20, 0.0 }
 0x5f7   : > { %6495 = vmatmul.mubr.msk.f32.gmra.mrb[104].mxu1 %vm1477_vm3, %v4504_v43  ;;  %v5472_v52 = vadd.f32 %v5471_v15, %v5470_v29  ;;  %v4509_v43 = vmax.f32 %v10836_v48, 0.0  ;;  %v4510_v48 = vmax.f32 %v10947_v36, 0.0 }
 0x5f8   : > { %6497 = vmatprep.mubr.msk.f32.mxu1 %vm1477_vm3, %v4505_v25  ;;  %v5375_v51 = vadd.f32 %v5374_v19, %v5373_v26  ;;  %v5421_v25 = vmul.f32 %v11089_v60, %v11089_v60 }
 0x5f9   : > { %v5474_v62 = vadd.f32 %v5473_v57, %v5472_v52 }
 0x5fa   : > { %v5377_v35 = vadd.f32 %v5376_v46, %v5375_v51  ;;  %v5483_v29 = vsel %vm3727_vm6, %v5421_v25, 0.0 }
 0x5fb   : > { %6498 = vmatmul.mubr.msk.f32.gmra.mrb[106].mxu1 %vm1477_vm3, %v4506_v58  ;;  %v5476_v7 = vadd.f32 %v5475_v0, %v5474_v62 }
 0x5fc   : > { %6500 = vmatprep.mubr.msk.f32.mxu1 %vm1477_vm3, %v4507_v56  ;;  %v5379_v63 = vadd.f32 %v5378_v2, %v5377_v35 }
 0x5fd   : > { %v5478_v4 = vadd.f32 %v5477_v45, %v5476_v7 }
 0x5fe   : > { %v5381_v15 = vadd.f32 %v5380_v1, %v5379_v63 }
 0x5ff   : > { %6501 = vmatmul.mubr.msk.f32.gmra.mrb[108].mxu1 %vm1477_vm3, %v4508_v38  ;;  %v5480_v42 = vadd.f32 %v5479_v11, %v5478_v4  ;;  %v5319_v11 = vld [vmem:[%s11708_s11] sm:$0x1] }
 0x600   : > { %6503 = vmatprep.mubr.msk.f32.mxu1 %vm1477_vm3, %v4509_v43  ;;  %v5383_v19 = vadd.f32 %v5382_v9, %v5381_v15  ;;  %v5320_v4 = vld [vmem:[%s11709_s12] sm:$0x1] }
 0x601   : > { %v5482_v58 = vadd.f32 %v5481_v32, %v5480_v42 }
 0x602   : > { %v5384_v26 = vrot.slane %v5383_v19, 4 }
 0x603   : > { %6504 = vmatmul.mubr.msk.f32.gmra.mrb[110].mxu1 %vm1477_vm3, %v4510_v48  ;;  %v5484_v57 = vadd.f32 %v5483_v29, %v5482_v58 }
 0x604   : > { %v5385_v16 = vadd.f32 %v5384_v26, %v5383_v19 }
 0x605   : > { %v5485_v56 = vrot.slane %v5484_v57, 4 }
 0x606   : > { %v5386_v52 = vrot.slane %v5385_v16, 2 }
 0x607   : > { %v5486_v46 = vadd.f32 %v5485_v56, %v5484_v57 }
 0x608   : > { %v5387_v0 = vadd.f32 %v5386_v52, %v5385_v16 }
 0x609   : > { %v5487_v39 = vrot.slane %v5486_v46, 2 }
 0x60a   : > { %v5388_v51 = vrot.slane %v5387_v0, 1 }
 0x60b   : > { %v5488_v36 = vadd.f32 %v5487_v39, %v5486_v46 }
 0x60c   : > { %v5389_v62 = vadd.f32 %v5388_v51, %v5387_v0 }
 0x60d   : > { %v5489_v2 = vrot.slane %v5488_v36, 1 }
 0x60e   : > { %v5491_v38 = vmul.f32 0.00390625, %v5389_v62 }
 0x60f   : > { %v5490_v35 = vadd.f32 %v5489_v2, %v5488_v36 }
 0x610   : > { %v5493_v45 = vmul.f32 %v5491_v38, %v5491_v38 }
 0x611   : > { %v5492_v20 = vmul.f32 0.00390625, %v5490_v35 }
 0x613   : > { %v5494_v43 = vsub.f32 %v5492_v20, %v5493_v45 }
 0x615   : > { %v5495_v7 = vmax.f32 %v5494_v43, 0.0 }
 0x617   : > { %v5496_v1 = vadd.f32 1e-05, %v5495_v7 }
 0x619   : > { %6587 = vrsqrt.f32 %v5496_v1 }
 0x623   : > { %v6588_v25 = vpop.eup %6587 }
 0x624   : > { %v5498_v63 = vmul.f32 %v6588_v25, %v5319_v11 }
 0x626   : > { %v5499_v9 = vmul.f32 %v5498_v63, %v5491_v38  ;;  %v5504_v48 = vrot.slane %v5498_v63, %v12562_v54 }
 0x628   : > { %v5500_v15 = vsub.f32 %v5320_v4, %v5499_v9  ;;  %v5505_v32 = vmul.f32 %v5504_v48, %v10781_v50  ;;  %v5506_v42 = vmul.f32 %v10775_v6, %v5504_v48  ;;  %v5507_v29 = vmul.f32 %v5504_v48, %v10794_v55 }
 0x629   : > { %v5508_v19 = vmul.f32 %v10792_v8, %v5504_v48  ;;  %v5509_v58 = vmul.f32 %v5504_v48, %v10811_v37  ;;  %v5510_v26 = vmul.f32 %v10807_v3, %v5504_v48  ;;  %v5511_v57 = vmul.f32 %v5504_v48, %v10833_v59 }
 0x62a   : > { %v5512_v16 = vmul.f32 %v10827_v44, %v5504_v48  ;;  %v5513_v56 = vmul.f32 %v5504_v48, %v10854_v13  ;;  %v5514_v52 = vmul.f32 %v10848_v10, %v5504_v48  ;;  %v5515_v50 = vmul.f32 %v5504_v48, %v10886_v30 }
 0x62b   : > { %v5516_v6 = vmul.f32 %v10872_v21, %v5504_v48  ;;  %v5517_v55 = vmul.f32 %v5504_v48, %v10938_v47  ;;  %v5518_v8 = vmul.f32 %v10924_v14, %v5504_v48  ;;  %v5519_v37 = vmul.f32 %v5504_v48, %v10955_v24 }
 0x62c   : > { %v5520_v3 = vmul.f32 %v10952_v34, %v5504_v48  ;;  %v5521_v59 = vmul.f32 %v5504_v48, %v10964_v22  ;;  %v5522_v44 = vmul.f32 %v10959_v5, %v5504_v48  ;;  %v5523_v13 = vmul.f32 %v5504_v48, %v10987_v28 }
 0x62d   : > { %v5524_v10 = vmul.f32 %v10980_v31, %v5504_v48  ;;  %v5525_v30 = vmul.f32 %v5504_v48, %v11005_v12  ;;  %v5526_v21 = vmul.f32 %v10999_v17, %v5504_v48  ;;  %v5527_v47 = vmul.f32 %v5504_v48, %v11023_v61 }
 0x62e   : > { %v5528_v14 = vmul.f32 %v11017_v18, %v5504_v48  ;;  %v5529_v24 = vmul.f32 %v5504_v48, %v11041_v27  ;;  %v5530_v34 = vmul.f32 %v11035_v53, %v5504_v48  ;;  %v5531_v22 = vmul.f32 %v5504_v48, %v11059_v23 }
 0x62f   : > { %v5532_v5 = vmul.f32 %v11053_v49, %v5504_v48  ;;  %v5533_v28 = vmul.f32 %v5504_v48, %v11077_v33  ;;  %v5534_v31 = vmul.f32 %v11071_v41, %v5504_v48  ;;  %v5535_v12 = vmul.f32 %v5504_v48, %v11095_v40 }
 0x630   : > { %v5536_v17 = vmul.f32 %v11089_v60, %v5504_v48  ;;  %v5541_v61 = vrot.slane %v5500_v15, %v12562_v54 }
 0x632   : > { %v11228_v46 = vadd.f32 %v5541_v61, %v5505_v32  ;;  %v11230_v18 = vadd.f32 %v5541_v61, %v5506_v42  ;;  %v11232_v27 = vadd.f32 %v5541_v61, %v5507_v29  ;;  %v11234_v53 = vadd.f32 %v5541_v61, %v5508_v19 }
 0x633   : > { %v11236_v23 = vadd.f32 %v5541_v61, %v5509_v58  ;;  %v11238_v49 = vadd.f32 %v5541_v61, %v5510_v26  ;;  %v11240_v33 = vadd.f32 %v5541_v61, %v5511_v57  ;;  %v11242_v41 = vadd.f32 %v5541_v61, %v5512_v16 }
 0x634   : > { %v11244_v40 = vadd.f32 %v5541_v61, %v5513_v56  ;;  %v11246_v60 = vadd.f32 %v5541_v61, %v5514_v52  ;;  %v11248_v0 = vadd.f32 %v5541_v61, %v5515_v50  ;;  %v11250_v39 = vadd.f32 %v5541_v61, %v5516_v6 }
 0x635   : > { %12563 = vst [vmem:[#allocation83_spill] sm:$0xff] %v11242_v41  ;;  %v11252_v51 = vadd.f32 %v5541_v61, %v5517_v55  ;;  %v11254_v36 = vadd.f32 %v5541_v61, %v5518_v8  ;;  %v11256_v62 = vadd.f32 %v5541_v61, %v5519_v37  ;;  %v11258_v2 = vadd.f32 %v5541_v61, %v5520_v3 }
 0x636   : > { %12564 = vst [vmem:[#allocation84_spill] sm:$0xff] %v11244_v40  ;;  %12565 = vst [vmem:[#allocation42_spill] sm:$0xff] %v11246_v60  ;;  %v11260_v38 = vadd.f32 %v5541_v61, %v5521_v59  ;;  %v11262_v35 = vadd.f32 %v5541_v61, %v5522_v44  ;;  %v11264_v45 = vadd.f32 %v5541_v61, %v5523_v13 }
 0x637   : > { %12566 = vst [vmem:[#allocation34_spill] sm:$0xff] %v11248_v0  ;;  %12567 = vst [vmem:[#allocation85_spill] sm:$0xff] %v11250_v39  ;;  %v11266_v20 = vadd.f32 %v5541_v61, %v5524_v10  ;;  %v11268_v43 = vadd.f32 %v5541_v61, %v5525_v30  ;;  %v11270_v7 = vadd.f32 %v5541_v61, %v5526_v21 }
 0x638   : > { %12568 = vst [vmem:[#allocation87_spill] sm:$0xff] %v11252_v51  ;;  %12569 = vst [vmem:[#allocation78_spill] sm:$0xff] %v11254_v36  ;;  %v11272_v1 = vadd.f32 %v5541_v61, %v5527_v47  ;;  %v11274_v11 = vadd.f32 %v5541_v61, %v5528_v14  ;;  %v11276_v25 = vadd.f32 %v5541_v61, %v5529_v24 }
 0x639   : > { %12570 = vst [vmem:[#allocation36_spill] sm:$0xff] %v11256_v62  ;;  %12571 = vst [vmem:[#allocation3_spill] sm:$0xff] %v11258_v2  ;;  %v11278_v63 = vadd.f32 %v5541_v61, %v5530_v34  ;;  %v11280_v4 = vadd.f32 %v5541_v61, %v5531_v22  ;;  %v11282_v9 = vadd.f32 %v5541_v61, %v5532_v5 }
 0x63a   : > { %12572 = vst [vmem:[#allocation88_spill] sm:$0xff] %v11260_v38  ;;  %12573 = vst [vmem:[#allocation4_spill] sm:$0xff] %v11262_v35  ;;  %v11284_v48 = vadd.f32 %v5541_v61, %v5533_v28  ;;  %v11286_v15 = vadd.f32 %v5541_v61, %v5534_v31  ;;  %v11288_v32 = vadd.f32 %v5541_v61, %v5535_v12 }
 0x63b   : > { %12574 = vst [vmem:[#allocation48_spill] sm:$0xff] %v11264_v45  ;;  %12575 = vst [vmem:[#allocation74_spill] sm:$0xff] %v11266_v20  ;;  %v11290_v42 = vadd.f32 %v5541_v61, %v5536_v17 }
 0x63c   : > { %12576 = vst [vmem:[#allocation86_spill] sm:$0xff] %v11268_v43  ;;  %12577 = vst [vmem:[#allocation9_spill] sm:$0xff] %v11270_v7 }
 0x63d   : > { %12578 = vst [vmem:[#allocation15_spill] sm:$0xff] %v11272_v1  ;;  %12579 = vst [vmem:[#allocation40_spill] sm:$0xff] %v11274_v11 }
 0x63e   : > { %12580 = vst [vmem:[#allocation89_spill] sm:$0xff] %v11276_v25  ;;  %12581 = vst [vmem:[#allocation13_spill] sm:$0xff] %v11278_v63 }
 0x63f   : > { %12582 = vst [vmem:[#allocation91_spill] sm:$0xff] %v11280_v4  ;;  %12583 = vst [vmem:[#allocation2_spill] sm:$0xff] %v11282_v9 }
 0x640   : > { %12584 = vst [vmem:[#allocation82_spill] sm:$0xff] %v11284_v48  ;;  %12585 = vst [vmem:[#allocation5_spill] sm:$0xff] %v11286_v15 }
 0x641   : > { %12586 = vst [vmem:[#allocation46_spill] sm:$0xff] %v11288_v32  ;;  %12587 = vst [vmem:[#allocation17_spill] sm:$0xff] %v11290_v42 }
 0x69a   : > { %v11292_v29 = vpop.f32.mrb[80].mxu1 }
 0x69b   : > { %v4839_v19 = vsel %vm3727_vm6, %v11292_v29, 0.0  ;;  %v4908_v58 = vmul.f32 %v11292_v29, %v11292_v29  ;;  %v11298_v26 = vpop.f32.mrb[81].mxu1 }
 0x69c   : > { %v4838_v57 = vsel %vm3727_vm6, %v11298_v26, 0.0  ;;  %v4907_v16 = vmul.f32 %v11298_v26, %v11298_v26 }
 0x69d   : > { %v4940_v56 = vsel %vm3727_vm6, %v4908_v58, 0.0  ;;  %v4840_v52 = vadd.f32 %v4839_v19, %v4838_v57 }
 0x69e   : > { %v4939_v50 = vsel %vm3727_vm6, %v4907_v16, 0.0  ;;  %v11306_v6 = vpop.f32.mrb[82].mxu1 }
 0x69f   : > { %v4941_v55 = vadd.f32 %v4940_v56, %v4939_v50  ;;  %v11308_v8 = vpop.f32.mrb[83].mxu1  ;;  %v4910_v37 = vmul.f32 %v11306_v6, %v11306_v6  ;;  %v4843_v13 = vsel %vm3727_vm6, %v11306_v6, 0.0 }
 0x6a0   : > { %v4841_v3 = vsel %vm3727_vm6, %v11308_v8, 0.0  ;;  %v4909_v59 = vmul.f32 %v11308_v8, %v11308_v8 }
 0x6a1   : > { %v4842_v44 = vadd.f32 %v4841_v3, %v4840_v52  ;;  %v4944_v24 = vsel %vm3727_vm6, %v4910_v37, 0.0 }
 0x6a2   : > { %v4942_v10 = vsel %vm3727_vm6, %v4909_v59, 0.0  ;;  %v11319_v30 = vpop.f32.mrb[84].mxu1 }
 0x6a3   : > { %v4943_v21 = vadd.f32 %v4942_v10, %v4941_v55  ;;  %v11321_v47 = vpop.f32.mrb[85].mxu1  ;;  %v4844_v14 = vadd.f32 %v4843_v13, %v4842_v44  ;;  %v4912_v34 = vmul.f32 %v11319_v30, %v11319_v30  ;;  %v4847_v12 = vsel %vm3727_vm6, %v11319_v30, 0.0 }
 0x6a4   : > { %v4845_v22 = vsel %vm3727_vm6, %v11321_v47, 0.0  ;;  %v4911_v5 = vmul.f32 %v11321_v47, %v11321_v47 }
 0x6a5   : > { %v4846_v28 = vadd.f32 %v4845_v22, %v4844_v14  ;;  %v4945_v31 = vadd.f32 %v4944_v24, %v4943_v21  ;;  %v4948_v16 = vsel %vm3727_vm6, %v4912_v34, 0.0 }
 0x6a6   : > { %v4946_v17 = vsel %vm3727_vm6, %v4911_v5, 0.0  ;;  %v11333_v61 = vpop.f32.mrb[86].mxu1 }
 0x6a7   : > { %v4947_v19 = vadd.f32 %v4946_v17, %v4945_v31  ;;  %v11335_v58 = vpop.f32.mrb[87].mxu1  ;;  %v4848_v57 = vadd.f32 %v4847_v12, %v4846_v28  ;;  %v4914_v56 = vmul.f32 %v11333_v61, %v11333_v61  ;;  %v4851_v3 = vsel %vm3727_vm6, %v11333_v61, 0.0 }
 0x6a8   : > { %v4849_v52 = vsel %vm3727_vm6, %v11335_v58, 0.0  ;;  %v4913_v50 = vmul.f32 %v11335_v58, %v11335_v58 }
 0x6a9   : > { %v4850_v55 = vadd.f32 %v4849_v52, %v4848_v57  ;;  %v4949_v37 = vadd.f32 %v4948_v16, %v4947_v19  ;;  %v4952_v14 = vsel %vm3727_vm6, %v4914_v56, 0.0 }
 0x6aa   : > { %v4950_v59 = vsel %vm3727_vm6, %v4913_v50, 0.0  ;;  %v11347_v44 = vpop.f32.mrb[88].mxu1 }
 0x6ab   : > { %v4951_v13 = vadd.f32 %v4950_v59, %v4949_v37  ;;  %v11349_v10 = vpop.f32.mrb[89].mxu1  ;;  %v4852_v21 = vadd.f32 %v4851_v3, %v4850_v55  ;;  %v4916_v24 = vmul.f32 %v11347_v44, %v11347_v44  ;;  %v4855_v31 = vsel %vm3727_vm6, %v11347_v44, 0.0 }
 0x6ac   : > { %v4853_v34 = vsel %vm3727_vm6, %v11349_v10, 0.0  ;;  %v4915_v22 = vmul.f32 %v11349_v10, %v11349_v10 }
 0x6ad   : > { %v4854_v5 = vadd.f32 %v4853_v34, %v4852_v21  ;;  %v4953_v28 = vadd.f32 %v4952_v14, %v4951_v13  ;;  %v4956_v56 = vsel %vm3727_vm6, %v4916_v24, 0.0 }
 0x6ae   : > { %v4954_v12 = vsel %vm3727_vm6, %v4915_v22, 0.0  ;;  %v11361_v17 = vpop.f32.mrb[90].mxu1 }
 0x6af   : > { %v4955_v19 = vadd.f32 %v4954_v12, %v4953_v28  ;;  %v11363_v57 = vpop.f32.mrb[91].mxu1  ;;  %v4856_v16 = vadd.f32 %v4855_v31, %v4854_v5  ;;  %v4918_v52 = vmul.f32 %v11361_v17, %v11361_v17  ;;  %v4859_v59 = vsel %vm3727_vm6, %v11361_v17, 0.0 }
 0x6b0   : > { %v4857_v50 = vsel %vm3727_vm6, %v11363_v57, 0.0  ;;  %v4917_v55 = vmul.f32 %v11363_v57, %v11363_v57 }
 0x6b1   : > { %v4858_v37 = vadd.f32 %v4857_v50, %v4856_v16  ;;  %v4957_v3 = vadd.f32 %v4956_v56, %v4955_v19  ;;  %v4960_v22 = vsel %vm3727_vm6, %v4918_v52, 0.0 }
 0x6b2   : > { %v4958_v13 = vsel %vm3727_vm6, %v4917_v55, 0.0  ;;  %v11375_v21 = vpop.f32.mrb[92].mxu1 }
 0x6b3   : > { %v4959_v14 = vadd.f32 %v4958_v13, %v4957_v3  ;;  %v11377_v24 = vpop.f32.mrb[93].mxu1  ;;  %v4860_v34 = vadd.f32 %v4859_v59, %v4858_v37  ;;  %v4920_v5 = vmul.f32 %v11375_v21, %v11375_v21  ;;  %v4863_v16 = vsel %vm3727_vm6, %v11375_v21, 0.0 }
 0x6b4   : > { %v4861_v28 = vsel %vm3727_vm6, %v11377_v24, 0.0  ;;  %v4919_v31 = vmul.f32 %v11377_v24, %v11377_v24 }
 0x6b5   : > { %v4862_v12 = vadd.f32 %v4861_v28, %v4860_v34  ;;  %v4961_v19 = vadd.f32 %v4960_v22, %v4959_v14  ;;  %v4964_v3 = vsel %vm3727_vm6, %v4920_v5, 0.0 }
 0x6b6   : > { %v4962_v56 = vsel %vm3727_vm6, %v4919_v31, 0.0  ;;  %v11389_v50 = vpop.f32.mrb[94].mxu1 }
 0x6b7   : > { %v4963_v55 = vadd.f32 %v4962_v56, %v4961_v19  ;;  %v11391_v52 = vpop.f32.mrb[95].mxu1  ;;  %v4864_v37 = vadd.f32 %v4863_v16, %v4862_v12  ;;  %v4922_v59 = vmul.f32 %v11389_v50, %v11389_v50  ;;  %v4867_v28 = vsel %vm3727_vm6, %v11389_v50, 0.0 }
 0x6b8   : > { %v4865_v13 = vsel %vm3727_vm6, %v11391_v52, 0.0  ;;  %v4921_v14 = vmul.f32 %v11391_v52, %v11391_v52 }
 0x6b9   : > { %v4866_v34 = vadd.f32 %v4865_v13, %v4864_v37  ;;  %v4965_v22 = vadd.f32 %v4964_v3, %v4963_v55  ;;  %v4968_v56 = vsel %vm3727_vm6, %v4922_v59, 0.0 }
 0x6ba   : > { %v4966_v31 = vsel %vm3727_vm6, %v4921_v14, 0.0  ;;  %v11403_v19 = vpop.f32.mrb[96].mxu1 }
 0x6bb   : > { %v4967_v12 = vadd.f32 %v4966_v31, %v4965_v22  ;;  %v11405_v5 = vpop.f32.mrb[97].mxu1  ;;  %v4868_v16 = vadd.f32 %v4867_v28, %v4866_v34  ;;  %v4924_v42 = vmul.f32 %v11403_v19, %v11403_v19  ;;  %v4871_v14 = vsel %vm3727_vm6, %v11403_v19, 0.0 }
 0x6bc   : > { %v4869_v37 = vsel %vm3727_vm6, %v11405_v5, 0.0  ;;  %v4923_v55 = vmul.f32 %v11405_v5, %v11405_v5 }
 0x6bd   : > { %v4870_v3 = vadd.f32 %v4869_v37, %v4868_v16  ;;  %v4969_v13 = vadd.f32 %v4968_v56, %v4967_v12  ;;  %v4972_v32 = vsel %vm3727_vm6, %v4924_v42, 0.0 }
 0x6be   : > { %v4970_v22 = vsel %vm3727_vm6, %v4923_v55, 0.0  ;;  %v11417_v31 = vpop.f32.mrb[98].mxu1 }
 0x6bf   : > { %v4971_v34 = vadd.f32 %v4970_v22, %v4969_v13  ;;  %v11419_v59 = vpop.f32.mrb[99].mxu1  ;;  %v4872_v28 = vadd.f32 %v4871_v14, %v4870_v3  ;;  %v4926_v15 = vmul.f32 %v11417_v31, %v11417_v31  ;;  %v4875_v55 = vsel %vm3727_vm6, %v11417_v31, 0.0 }
 0x6c0   : > { %v4873_v16 = vsel %vm3727_vm6, %v11419_v59, 0.0  ;;  %v4925_v12 = vmul.f32 %v11419_v59, %v11419_v59 }
 0x6c1   : > { %v4874_v56 = vadd.f32 %v4873_v16, %v4872_v28  ;;  %v4973_v37 = vadd.f32 %v4972_v32, %v4971_v34  ;;  %v4976_v48 = vsel %vm3727_vm6, %v4926_v15, 0.0 }
 0x6c2   : > { %v4974_v13 = vsel %vm3727_vm6, %v4925_v12, 0.0  ;;  %v11431_v22 = vpop.f32.mrb[100].mxu1 }
 0x6c3   : > { %v4975_v3 = vadd.f32 %v4974_v13, %v4973_v37  ;;  %v11433_v42 = vpop.f32.mrb[101].mxu1  ;;  %v4876_v14 = vadd.f32 %v4875_v55, %v4874_v56  ;;  %v4928_v9 = vmul.f32 %v11431_v22, %v11431_v22  ;;  %v4879_v12 = vsel %vm3727_vm6, %v11431_v22, 0.0 }
 0x6c4   : > { %v4877_v28 = vsel %vm3727_vm6, %v11433_v42, 0.0  ;;  %v4927_v32 = vmul.f32 %v11433_v42, %v11433_v42 }
 0x6c5   : > { %v4878_v34 = vadd.f32 %v4877_v28, %v4876_v14  ;;  %v4977_v16 = vadd.f32 %v4976_v48, %v4975_v3  ;;  %v4980_v4 = vsel %vm3727_vm6, %v4928_v9, 0.0 }
 0x6c6   : > { %v4978_v37 = vsel %vm3727_vm6, %v4927_v32, 0.0  ;;  %v11445_v13 = vpop.f32.mrb[102].mxu1 }
 0x6c7   : > { %v4979_v56 = vadd.f32 %v4978_v37, %v4977_v16  ;;  %v11447_v15 = vpop.f32.mrb[103].mxu1  ;;  %v4880_v55 = vadd.f32 %v4879_v12, %v4878_v34  ;;  %v4930_v63 = vmul.f32 %v11445_v13, %v11445_v13  ;;  %v4883_v32 = vsel %vm3727_vm6, %v11445_v13, 0.0 }
 0x6c8   : > { %v4881_v14 = vsel %vm3727_vm6, %v11447_v15, 0.0  ;;  %v4929_v48 = vmul.f32 %v11447_v15, %v11447_v15 }
 0x6c9   : > { %v4882_v3 = vadd.f32 %v4881_v14, %v4880_v55  ;;  %v4981_v28 = vadd.f32 %v4980_v4, %v4979_v56  ;;  %v4984_v25 = vsel %vm3727_vm6, %v4930_v63, 0.0 }
 0x6ca   : > { %v4982_v16 = vsel %vm3727_vm6, %v4929_v48, 0.0  ;;  %v11459_v37 = vpop.f32.mrb[104].mxu1 }
 0x6cb   : > { %v4983_v34 = vadd.f32 %v4982_v16, %v4981_v28  ;;  %v11461_v9 = vpop.f32.mrb[105].mxu1  ;;  %v4884_v12 = vadd.f32 %v4883_v32, %v4882_v3  ;;  %v4932_v11 = vmul.f32 %v11459_v37, %v11459_v37  ;;  %v4887_v48 = vsel %vm3727_vm6, %v11459_v37, 0.0 }
 0x6cc   : > { %v4885_v55 = vsel %vm3727_vm6, %v11461_v9, 0.0  ;;  %v4931_v4 = vmul.f32 %v11461_v9, %v11461_v9 }
 0x6cd   : > { %v4886_v56 = vadd.f32 %v4885_v55, %v4884_v12  ;;  %v4985_v14 = vadd.f32 %v4984_v25, %v4983_v34  ;;  %v4988_v1 = vsel %vm3727_vm6, %v4932_v11, 0.0 }
 0x6ce   : > { %v4986_v28 = vsel %vm3727_vm6, %v4931_v4, 0.0  ;;  %v11473_v16 = vpop.f32.mrb[106].mxu1 }
 0x6cf   : > { %v4987_v3 = vadd.f32 %v4986_v28, %v4985_v14  ;;  %v11475_v63 = vpop.f32.mrb[107].mxu1  ;;  %v4888_v32 = vadd.f32 %v4887_v48, %v4886_v56  ;;  %v4934_v7 = vmul.f32 %v11473_v16, %v11473_v16  ;;  %v4891_v4 = vsel %vm3727_vm6, %v11473_v16, 0.0 }
 0x6d0   : > { %v4889_v12 = vsel %vm3727_vm6, %v11475_v63, 0.0  ;;  %v4933_v25 = vmul.f32 %v11475_v63, %v11475_v63 }
 0x6d1   : > { %v4890_v34 = vadd.f32 %v4889_v12, %v4888_v32  ;;  %v4989_v55 = vadd.f32 %v4988_v1, %v4987_v3  ;;  %v4992_v43 = vsel %vm3727_vm6, %v4934_v7, 0.0 }
 0x6d2   : > { %v4990_v14 = vsel %vm3727_vm6, %v4933_v25, 0.0  ;;  %v11487_v28 = vpop.f32.mrb[108].mxu1 }
 0x6d3   : > { %v4991_v56 = vadd.f32 %v4990_v14, %v4989_v55  ;;  %v11489_v11 = vpop.f32.mrb[109].mxu1  ;;  %v4892_v48 = vadd.f32 %v4891_v4, %v4890_v34  ;;  %v4936_v20 = vmul.f32 %v11487_v28, %v11487_v28  ;;  %v4895_v25 = vsel %vm3727_vm6, %v11487_v28, 0.0 }
 0x6d4   : > { %v4893_v32 = vsel %vm3727_vm6, %v11489_v11, 0.0  ;;  %v4935_v1 = vmul.f32 %v11489_v11, %v11489_v11 }
 0x6d5   : > { %v4894_v3 = vadd.f32 %v4893_v32, %v4892_v48  ;;  %v4993_v12 = vadd.f32 %v4992_v43, %v4991_v56  ;;  %v4996_v45 = vsel %vm3727_vm6, %v4936_v20, 0.0 }
 0x6d6   : > { %v4994_v55 = vsel %vm3727_vm6, %v4935_v1, 0.0  ;;  %v11501_v14 = vpop.f32.mrb[110].mxu1 }
 0x6d7   : > { %v4995_v34 = vadd.f32 %v4994_v55, %v4993_v12  ;;  %v11503_v7 = vpop.f32.mrb[111].mxu1  ;;  %v4896_v4 = vadd.f32 %v4895_v25, %v4894_v3  ;;  %v4938_v35 = vmul.f32 %v11501_v14, %v11501_v14  ;;  %v4899_v1 = vsel %vm3727_vm6, %v11501_v14, 0.0 }
 0x6d8   : > { %v4897_v48 = vsel %vm3727_vm6, %v11503_v7, 0.0  ;;  %v4937_v43 = vmul.f32 %v11503_v7, %v11503_v7 }
 0x6d9   : > { %v4898_v56 = vadd.f32 %v4897_v48, %v4896_v4  ;;  %v4997_v32 = vadd.f32 %v4996_v45, %v4995_v34  ;;  %v5000_v20 = vsel %vm3727_vm6, %v4938_v35, 0.0  ;;  %v4836_v35 = vld [vmem:[%s11705_s8] sm:$0x1] }
 0x6da   : > { %v4998_v12 = vsel %vm3727_vm6, %v4937_v43, 0.0 }
 0x6db   : > { %v4900_v55 = vadd.f32 %v4899_v1, %v4898_v56  ;;  %v4999_v3 = vadd.f32 %v4998_v12, %v4997_v32 }
 0x6dd   : > { %v4901_v25 = vrot.slane %v4900_v55, 4  ;;  %v5001_v38 = vadd.f32 %v5000_v20, %v4999_v3 }
 0x6df   : > { %v4902_v2 = vadd.f32 %v4901_v25, %v4900_v55  ;;  %v5002_v62 = vrot.slane %v5001_v38, 4 }
 0x6e1   : > { %v4903_v36 = vrot.slane %v4902_v2, 2  ;;  %v5003_v51 = vadd.f32 %v5002_v62, %v5001_v38 }
 0x6e3   : > { %v4904_v39 = vadd.f32 %v4903_v36, %v4902_v2  ;;  %v5004_v0 = vrot.slane %v5003_v51, 2 }
 0x6e5   : > { %v4905_v60 = vrot.slane %v4904_v39, 1  ;;  %v5005_v4 = vadd.f32 %v5004_v0, %v5003_v51  ;;  %v4837_v0 = vld [vmem:[%s11706_s9] sm:$0x1] }
 0x6e7   : > { %v4906_v45 = vadd.f32 %v4905_v60, %v4904_v39  ;;  %v5006_v34 = vrot.slane %v5005_v4, 1 }
 0x6e9   : > { %v5007_v48 = vadd.f32 %v5006_v34, %v5005_v4  ;;  %v5008_v40 = vmul.f32 0.00390625, %v4906_v45 }
 0x6eb   : > { %v5009_v41 = vmul.f32 0.00390625, %v5007_v48  ;;  %v5010_v43 = vmul.f32 %v5008_v40, %v5008_v40 }
 0x6ed   : > { %v5011_v56 = vsub.f32 %v5009_v41, %v5010_v43 }
 0x6ef   : > { %v5012_v32 = vmax.f32 %v5011_v56, 0.0 }
 0x6f1   : > { %v5013_v1 = vadd.f32 1e-05, %v5012_v32 }
 0x6f3   : > { %6589 = vrsqrt.f32 %v5013_v1 }
 0x6fd   : > { %v6590_v12 = vpop.eup %6589 }
 0x6fe   : > { %v5015_v62 = vmul.f32 %v6590_v12, %v4836_v35 }
 0x700   : > { %v5016_v60 = vmul.f32 %v5015_v62, %v5008_v40  ;;  %v5021_v39 = vrot.slane %v5015_v62, %v12562_v54 }
 0x702   : > { %v5017_v51 = vsub.f32 %v4837_v0, %v5016_v60  ;;  %v5022_v36 = vmul.f32 %v5021_v39, %v11298_v26  ;;  %v5023_v41 = vmul.f32 %v11292_v29, %v5021_v39  ;;  %v5024_v2 = vmul.f32 %v5021_v39, %v11308_v8 }
 0x703   : > { %v5025_v38 = vmul.f32 %v11306_v6, %v5021_v39  ;;  %v5026_v55 = vmul.f32 %v5021_v39, %v11321_v47  ;;  %v5027_v3 = vmul.f32 %v11319_v30, %v5021_v39  ;;  %v5028_v20 = vmul.f32 %v5021_v39, %v11335_v58 }
 0x704   : > { %v5029_v25 = vmul.f32 %v11333_v61, %v5021_v39  ;;  %v5030_v40 = vmul.f32 %v5021_v39, %v11349_v10  ;;  %v5031_v4 = vmul.f32 %v11347_v44, %v5021_v39  ;;  %v5032_v26 = vmul.f32 %v5021_v39, %v11363_v57 }
 0x705   : > { %v5033_v29 = vmul.f32 %v11361_v17, %v5021_v39  ;;  %v5034_v8 = vmul.f32 %v5021_v39, %v11377_v24  ;;  %v5035_v6 = vmul.f32 %v11375_v21, %v5021_v39  ;;  %v5036_v47 = vmul.f32 %v5021_v39, %v11391_v52 }
 0x706   : > { %v5037_v30 = vmul.f32 %v11389_v50, %v5021_v39  ;;  %v5038_v58 = vmul.f32 %v5021_v39, %v11405_v5  ;;  %v5039_v61 = vmul.f32 %v11403_v19, %v5021_v39  ;;  %v5040_v10 = vmul.f32 %v5021_v39, %v11419_v59 }
 0x707   : > { %v5041_v44 = vmul.f32 %v11417_v31, %v5021_v39  ;;  %v5042_v57 = vmul.f32 %v5021_v39, %v11433_v42  ;;  %v5043_v17 = vmul.f32 %v11431_v22, %v5021_v39  ;;  %v5044_v24 = vmul.f32 %v5021_v39, %v11447_v15 }
 0x708   : > { %v5045_v21 = vmul.f32 %v11445_v13, %v5021_v39  ;;  %v5046_v52 = vmul.f32 %v5021_v39, %v11461_v9  ;;  %v5047_v50 = vmul.f32 %v11459_v37, %v5021_v39  ;;  %v5048_v5 = vmul.f32 %v5021_v39, %v11475_v63 }
 0x709   : > { %v5049_v19 = vmul.f32 %v11473_v16, %v5021_v39  ;;  %v5050_v59 = vmul.f32 %v5021_v39, %v11489_v11  ;;  %v5051_v31 = vmul.f32 %v11487_v28, %v5021_v39  ;;  %v5052_v42 = vmul.f32 %v5021_v39, %v11503_v7 }
 0x70a   : > { %v5053_v22 = vmul.f32 %v11501_v14, %v5021_v39  ;;  %v5058_v15 = vrot.slane %v5017_v51, %v12562_v54 }
 0x70c   : > { %v5060_v45 = vadd.f32 %v5058_v15, %v5022_v36  ;;  %v5061_v13 = vadd.f32 %v5058_v15, %v5023_v41  ;;  %v5062_v34 = vadd.f32 %v5058_v15, %v5024_v2  ;;  %v5063_v9 = vadd.f32 %v5058_v15, %v5025_v38 }
 0x70d   : > { %v5064_v48 = vadd.f32 %v5058_v15, %v5026_v55  ;;  %v5065_v37 = vadd.f32 %v5058_v15, %v5027_v3  ;;  %v5066_v43 = vadd.f32 %v5058_v15, %v5028_v20  ;;  %v5067_v63 = vadd.f32 %v5058_v15, %v5029_v25 }
 0x70e   : > { %v5068_v56 = vadd.f32 %v5058_v15, %v5030_v40  ;;  %v5069_v16 = vadd.f32 %v5058_v15, %v5031_v4  ;;  %v5070_v32 = vadd.f32 %v5058_v15, %v5032_v26  ;;  %v5071_v11 = vadd.f32 %v5058_v15, %v5033_v29 }
 0x70f   : > { %v5072_v1 = vadd.f32 %v5058_v15, %v5034_v8  ;;  %v5073_v28 = vadd.f32 %v5058_v15, %v5035_v6  ;;  %v5074_v35 = vadd.f32 %v5058_v15, %v5036_v47  ;;  %v5075_v7 = vadd.f32 %v5058_v15, %v5037_v30  ;;  %v12588_v30 = vld [vmem:[#allocation83_spill] sm:$0xff] }
 0x710   : > { %v5076_v12 = vadd.f32 %v5058_v15, %v5038_v58  ;;  %v5077_v14 = vadd.f32 %v5058_v15, %v5039_v61  ;;  %v5078_v62 = vadd.f32 %v5058_v15, %v5040_v10  ;;  %v5079_v54 = vadd.f32 %v5058_v15, %v5041_v44  ;;  %v12589_v61 = vld [vmem:[#allocation84_spill] sm:$0xff]  ;;  %v12590_v44 = vld [vmem:[#allocation42_spill] sm:$0xff] }
 0x711   : > { %v5080_v0 = vadd.f32 %v5058_v15, %v5042_v57  ;;  %v5081_v60 = vadd.f32 %v5058_v15, %v5043_v17  ;;  %v5082_v39 = vadd.f32 %v5058_v15, %v5044_v24  ;;  %v5083_v51 = vadd.f32 %v5058_v15, %v5045_v21  ;;  %v12592_v24 = vld [vmem:[#allocation85_spill] sm:$0xff]  ;;  %v12593_v21 = vld [vmem:[#allocation87_spill] sm:$0xff] }
 0x712   : > { %v5084_v36 = vadd.f32 %v5058_v15, %v5046_v52  ;;  %v5085_v41 = vadd.f32 %v5058_v15, %v5047_v50  ;;  %v5086_v2 = vadd.f32 %v5058_v15, %v5048_v5  ;;  %v5087_v38 = vadd.f32 %v5058_v15, %v5049_v19  ;;  %v12594_v52 = vld [vmem:[#allocation78_spill] sm:$0xff]  ;;  %v12595_v50 = vld [vmem:[#allocation36_spill] sm:$0xff]  ;;  %v12596_v5 = vld [vmem:[#allocation3_spill] sm:$0xff] }
 0x713   : > { %v5088_v55 = vadd.f32 %v5058_v15, %v5050_v59  ;;  %v5089_v3 = vadd.f32 %v5058_v15, %v5051_v31  ;;  %v5090_v20 = vadd.f32 %v5058_v15, %v5052_v42  ;;  %v5091_v25 = vadd.f32 %v5058_v15, %v5053_v22  ;;  %v12598_v59 = vld [vmem:[#allocation4_spill] sm:$0xff]  ;;  %v12600_v15 = vld [vmem:[#allocation74_spill] sm:$0xff] }
 0x714   : > { %v5575_v40 = vadd.f32 %v11228_v46, %v5060_v45  ;;  %v5576_v4 = vadd.f32 %v11230_v18, %v5061_v13  ;;  %v5577_v26 = vadd.f32 %v11232_v27, %v5062_v34  ;;  %v5578_v29 = vadd.f32 %v11234_v53, %v5063_v9  ;;  %v12591_v46 = vld [vmem:[#allocation34_spill] sm:$0xff]  ;;  %v12599_v42 = vld [vmem:[#allocation48_spill] sm:$0xff]  ;;  %v12602_v9 = vld [vmem:[#allocation9_spill] sm:$0xff] }
 0x715   : > { %v5579_v8 = vadd.f32 %v11236_v23, %v5064_v48  ;;  %v5580_v6 = vadd.f32 %v11238_v49, %v5065_v37  ;;  %v5581_v47 = vadd.f32 %v11240_v33, %v5066_v43  ;;  %v5582_v58 = vadd.f32 %v12588_v30, %v5067_v63  ;;  %v12597_v33 = vld [vmem:[#allocation88_spill] sm:$0xff]  ;;  %v12601_v13 = vld [vmem:[#allocation86_spill] sm:$0xff]  ;;  %v12603_v37 = vld [vmem:[#allocation15_spill] sm:$0xff] }
 0x716   : > { %v5583_v10 = vadd.f32 %v12589_v61, %v5068_v56  ;;  %v5584_v57 = vadd.f32 %v12590_v44, %v5069_v16  ;;  %v5585_v17 = vadd.f32 %v12591_v46, %v5070_v32  ;;  %v5586_v18 = vadd.f32 %v12592_v24, %v5071_v11  ;;  %v12604_v63 = vld [vmem:[#allocation40_spill] sm:$0xff]  ;;  %v12605_v16 = vld [vmem:[#allocation89_spill] sm:$0xff] }
 0x717   : > { %v5587_v27 = vadd.f32 %v12593_v21, %v5072_v1  ;;  %v5588_v53 = vadd.f32 %v12594_v52, %v5073_v28  ;;  %v5589_v23 = vadd.f32 %v12595_v50, %v5074_v35  ;;  %v5590_v49 = vadd.f32 %v12596_v5, %v5075_v7  ;;  %v12606_v11 = vld [vmem:[#allocation13_spill] sm:$0xff]  ;;  %v12607_v28 = vld [vmem:[#allocation91_spill] sm:$0xff]  ;;  %v12608_v7 = vld [vmem:[#allocation2_spill] sm:$0xff] }
 0x718   : > { %v5591_v19 = vadd.f32 %v12597_v33, %v5076_v12  ;;  %v5592_v31 = vadd.f32 %v12598_v59, %v5077_v14  ;;  %v5593_v22 = vadd.f32 %v12599_v42, %v5078_v62  ;;  %v5594_v45 = vadd.f32 %v12600_v15, %v5079_v54  ;;  %v12609_v14 = vld [vmem:[#allocation82_spill] sm:$0xff]  ;;  %v12610_v54 = vld [vmem:[#allocation5_spill] sm:$0xff] }
 0x719   : > { %v11578_v34 = vadd.f32 %v12601_v13, %v5080_v0  ;;  %v11581_v48 = vadd.f32 %v12602_v9, %v5081_v60  ;;  %v11584_v43 = vadd.f32 %v12603_v37, %v5082_v39  ;;  %v11587_v56 = vadd.f32 %v12604_v63, %v5083_v51  ;;  %v12611_v60 = vld [vmem:[#allocation46_spill] sm:$0xff]  ;;  %v12612_v51 = vld [vmem:[#allocation17_spill] sm:$0xff] }
 0x71a   : > { %v11590_v32 = vadd.f32 %v12605_v16, %v5084_v36  ;;  %v11593_v1 = vadd.f32 %v12606_v11, %v5085_v41  ;;  %v11596_v35 = vadd.f32 %v12607_v28, %v5086_v2  ;;  %v11599_v12 = vadd.f32 %v12608_v7, %v5087_v38 }
 0x71b   : > { %v11607_v62 = vadd.f32 %v12609_v14, %v5088_v55  ;;  %v11610_v0 = vadd.f32 %v12610_v54, %v5089_v3  ;;  %v11613_v39 = vadd.f32 %v12611_v60, %v5090_v20  ;;  %v11616_v36 = vadd.f32 %v12612_v51, %v5091_v25 }
 0x71c   : > { %v5607_v41 = vmax.f32 %v5575_v40, 0.0  ;;  %v5608_v2 = vmax.f32 %v5576_v4, 0.0  ;;  %v5609_v38 = vmax.f32 %v5577_v26, 0.0  ;;  %v5610_v30 = vmax.f32 %v5578_v29, 0.0 }
 0x71d   : > { %v5611_v61 = vmax.f32 %v5579_v8, 0.0  ;;  %v5612_v55 = vmax.f32 %v5580_v6, 0.0  ;;  %v5613_v44 = vmax.f32 %v5581_v47, 0.0  ;;  %v5614_v3 = vmax.f32 %v5582_v58, 0.0 }
 0x71e   : > { %v5615_v46 = vmax.f32 %v5583_v10, 0.0  ;;  %v5616_v20 = vmax.f32 %v5584_v57, 0.0  ;;  %v5617_v24 = vmax.f32 %v5585_v17, 0.0  ;;  %v5618_v21 = vmax.f32 %v5586_v18, 0.0  ;;  %5639 = vst.msk [vmem:[%s11604_s29] sm:$0xff] %vm3727_vm6, %v5607_v41  ;;  %5640 = vst.msk [vmem:[%s11604_s29 + $0x8] sm:$0xff] %vm3727_vm6, %v5608_v2 }
 0x71f   : > { %5641 = vst.msk [vmem:[%s11604_s29 + $0x10] sm:$0xff] %vm3727_vm6, %v5609_v38  ;;  %5642 = vst.msk [vmem:[%s11604_s29 + $0x18] sm:$0xff] %vm3727_vm6, %v5610_v30  ;;  %v5619_v25 = vmax.f32 %v5587_v27, 0.0  ;;  %v5620_v40 = vmax.f32 %v5588_v53, 0.0  ;;  %v5621_v4 = vmax.f32 %v5589_v23, 0.0  ;;  %v5622_v26 = vmax.f32 %v5590_v49, 0.0 }
 0x720   : > { %5643 = vst.msk [vmem:[%s11604_s29 + $0x20] sm:$0xff] %vm3727_vm6, %v5611_v61  ;;  %5644 = vst.msk [vmem:[%s11604_s29 + $0x28] sm:$0xff] %vm3727_vm6, %v5612_v55  ;;  %v5623_v29 = vmax.f32 %v5591_v19, 0.0  ;;  %v5624_v8 = vmax.f32 %v5592_v31, 0.0  ;;  %v5625_v6 = vmax.f32 %v5593_v22, 0.0  ;;  %v5626_v47 = vmax.f32 %v5594_v45, 0.0 }
 0x721   : > { %5645 = vst.msk [vmem:[%s11604_s29 + $0x30] sm:$0xff] %vm3727_vm6, %v5613_v44  ;;  %5646 = vst.msk [vmem:[%s11604_s29 + $0x38] sm:$0xff] %vm3727_vm6, %v5614_v3  ;;  %v5627_v58 = vmax.f32 %v11578_v34, 0.0  ;;  %v5628_v10 = vmax.f32 %v11581_v48, 0.0  ;;  %v5629_v57 = vmax.f32 %v11584_v43, 0.0  ;;  %v5630_v17 = vmax.f32 %v11587_v56, 0.0 }
 0x722   : > { %5647 = vst.msk [vmem:[%s11604_s29 + $0x40] sm:$0xff] %vm3727_vm6, %v5615_v46  ;;  %5648 = vst.msk [vmem:[%s11604_s29 + $0x48] sm:$0xff] %vm3727_vm6, %v5616_v20  ;;  %v5631_v18 = vmax.f32 %v11590_v32, 0.0  ;;  %v5632_v27 = vmax.f32 %v11593_v1, 0.0  ;;  %v5633_v52 = vmax.f32 %v11596_v35, 0.0  ;;  %v5634_v53 = vmax.f32 %v11599_v12, 0.0 }
 0x723   : > { %5649 = vst.msk [vmem:[%s11604_s29 + $0x50] sm:$0xff] %vm3727_vm6, %v5617_v24  ;;  %5650 = vst.msk [vmem:[%s11604_s29 + $0x58] sm:$0xff] %vm3727_vm6, %v5618_v21  ;;  %v5635_v50 = vmax.f32 %v11607_v62, 0.0  ;;  %v5636_v23 = vmax.f32 %v11610_v0, 0.0  ;;  %v5637_v5 = vmax.f32 %v11613_v39, 0.0  ;;  %v5638_v49 = vmax.f32 %v11616_v36, 0.0 }
 0x724   : > { %5651 = vst.msk [vmem:[%s11604_s29 + $0x60] sm:$0xff] %vm3727_vm6, %v5619_v25  ;;  %5652 = vst.msk [vmem:[%s11604_s29 + $0x68] sm:$0xff] %vm3727_vm6, %v5620_v40 }
 0x725   : > { %5653 = vst.msk [vmem:[%s11604_s29 + $0x70] sm:$0xff] %vm3727_vm6, %v5621_v4  ;;  %5654 = vst.msk [vmem:[%s11604_s29 + $0x78] sm:$0xff] %vm3727_vm6, %v5622_v26 }
 0x726   : > { %5655 = vst.msk [vmem:[%s11604_s29 + $0x80] sm:$0xff] %vm3727_vm6, %v5623_v29  ;;  %5656 = vst.msk [vmem:[%s11604_s29 + $0x88] sm:$0xff] %vm3727_vm6, %v5624_v8 }
 0x727   : > { %5657 = vst.msk [vmem:[%s11604_s29 + $0x90] sm:$0xff] %vm3727_vm6, %v5625_v6  ;;  %5658 = vst.msk [vmem:[%s11604_s29 + $0x98] sm:$0xff] %vm3727_vm6, %v5626_v47 }
 0x728   : > { %5659 = vst.msk [vmem:[%s11604_s29 + $0xa0] sm:$0xff] %vm3727_vm6, %v5627_v58  ;;  %5660 = vst.msk [vmem:[%s11604_s29 + $0xa8] sm:$0xff] %vm3727_vm6, %v5628_v10 }
 0x729   : > { %5661 = vst.msk [vmem:[%s11604_s29 + $0xb0] sm:$0xff] %vm3727_vm6, %v5629_v57  ;;  %5662 = vst.msk [vmem:[%s11604_s29 + $0xb8] sm:$0xff] %vm3727_vm6, %v5630_v17 }
 0x72a   : > { %5663 = vst.msk [vmem:[%s11604_s29 + $0xc0] sm:$0xff] %vm3727_vm6, %v5631_v18  ;;  %5664 = vst.msk [vmem:[%s11604_s29 + $0xc8] sm:$0xff] %vm3727_vm6, %v5632_v27 }
 0x72b   : > { %5665 = vst.msk [vmem:[%s11604_s29 + $0xd0] sm:$0xff] %vm3727_vm6, %v5633_v52  ;;  %5666 = vst.msk [vmem:[%s11604_s29 + $0xd8] sm:$0xff] %vm3727_vm6, %v5634_v53 }
 0x72c   : > { %5667 = vst.msk [vmem:[%s11604_s29 + $0xe0] sm:$0xff] %vm3727_vm6, %v5635_v50  ;;  %5668 = vst.msk [vmem:[%s11604_s29 + $0xe8] sm:$0xff] %vm3727_vm6, %v5636_v23 }
 0x72d   : > { %5669 = vst.msk [vmem:[%s11604_s29 + $0xf0] sm:$0xff] %vm3727_vm6, %v5637_v5  ;;  %5670 = vst.msk [vmem:[%s11604_s29 + $0xf8] sm:$0xff] %vm3727_vm6, %v5638_v49 }
 0x72e PF: > { %s23_s25 = sadd.s32 1, %s6629_s25  }
 0x72f   : > { %p20_p4 = scmp.ge.s32.totalorder %s23_s25, 4  }
 0x731   :  { %22 = sbr.rel (!%p20_p4) target bundleno = 1 (0x1), region = 102 }

</bundles_post_ra>
